<compile_context>
chip_gen: v7x
topology: tpu7x:2x2x1
jax: 0.10.0
libtpu: 0.0.40
codegen_flags: <defaults>
</compile_context>

<pallas_src>
import functools

import jax
import jax.numpy as jnp
from jax import lax
from jax.experimental import pallas as pl
from jax.experimental.pallas import tpu as pltpu


LANE = 128


def _round_up(x, m):
    return (x + m - 1) // m * m


def _swish(t):
    return t * (1.0 / (1.0 + jnp.exp(-t)))


def _gn_swish_conv3x3(act, gfwd, gbwd, gn_w, gn_b, cw_ref, c_b, a_ref,
                      m_left, m_right, *, H, W, cpg):
    """GroupNorm -> Swish -> 3x3 conv (padding=1) on one (H*W, Cin_pad) tile.

    act    : (H*W, Cin_pad) f32 (padded channels are exactly zero)
    gfwd   : (Cin_pad, G) one-hot channel->group (zero rows for pad channels)
    gbwd   : (G, Cin_pad) one-hot group->channel
    gn_w/b : (1, Cin_pad) f32
    cw_ref : ref (3, 3*Cin_pad, Cout_pad) bf16 conv taps, K-merged over dw
    c_b    : (1, Cout_pad) f32
    a_ref  : VMEM scratch (H*W + 2*PADR, 3*Cin_pad) bf16
             column blocks: [0:Cin]=dw-1, [Cin:2Cin]=dw 0, [2Cin:3Cin]=dw+1
    m_left/m_right: (H*W, 1) bool column-validity masks for dw = -1 / +1
    """
    HW = H * W
    cin = act.shape[-1]
    PADR = (a_ref.shape[0] - HW) // 2
    n = float(HW * cpg)   # real elements per group (padded channels excluded)

    # ---- GroupNorm (two-pass, centered variance), all in f32 ----
    ch_sum = jnp.sum(act, axis=0, keepdims=True)                         # (1, Cin)
    g_mean = jnp.dot(ch_sum, gfwd, preferred_element_type=jnp.float32) / n
    mean = jnp.dot(g_mean, gbwd, preferred_element_type=jnp.float32)     # (1, Cin)
    d = act - mean
    ch_var = jnp.sum(d * d, axis=0, keepdims=True)
    g_var = jnp.dot(ch_var, gfwd, preferred_element_type=jnp.float32) / n
    var = jnp.dot(g_var, gbwd, preferred_element_type=jnp.float32)
    y = d * lax.rsqrt(var + 1e-5) * gn_w + gn_b

    # ---- Swish (f32; exp goes to the EUP), single cast to bf16 ----
    a_bf = _swish(y).astype(jnp.bfloat16)

    # ---- zero only the halo rows (scratch may be per-core: re-zero each step) ----
    a_ref[:PADR, :] = jnp.zeros((PADR, 3 * cin), jnp.bfloat16)
    a_ref[PADR + HW:, :] = jnp.zeros((PADR, 3 * cin), jnp.bfloat16)

    # ---- build the K-merged staging buffer ----
    # center (dw = 0) column block
    a_ref[PADR:PADR + HW, cin:2 * cin] = a_bf
    # dw = -1 / +1 blocks: 1-row shifted reads of the center + boundary mask
    # (selects are mask ops, fine on bf16 across TPU generations)
    left = a_ref[PADR - 1:PADR - 1 + HW, cin:2 * cin]
    a_ref[PADR:PADR + HW, :cin] = jnp.where(m_left, left, 0)
    right = a_ref[PADR + 1:PADR + 1 + HW, cin:2 * cin]
    a_ref[PADR:PADR + HW, 2 * cin:] = jnp.where(m_right, right, 0)

    # ---- 3x3 conv, padding=1, as 3 matmuls of K = 3*Cin on the MXU ----
    # Vertical out-of-image taps read the zero halo rows; horizontal taps were
    # masked at staging time, so no selects remain in the matmul loop.
    acc = jnp.dot(a_ref[PADR - W:PADR - W + HW, :], cw_ref[0],
                  preferred_element_type=jnp.float32) + c_b
    acc = acc + jnp.dot(a_ref[PADR:PADR + HW, :], cw_ref[1],
                        preferred_element_type=jnp.float32)
    acc = acc + jnp.dot(a_ref[PADR + W:PADR + W + HW, :], cw_ref[2],
                        preferred_element_type=jnp.float32)
    return acc


def _resnet_block_kernel(x_ref, nz_ref,
                         g1f_ref, g1b_ref, gn1w_ref, gn1b_ref, c1w_ref, c1b_ref,
                         g2f_ref, g2b_ref, gn2w_ref, gn2b_ref, c2w_ref, c2b_ref,
                         rw_ref, rb_ref,
                         out_ref,
                         a1_ref, a2_ref, *, H, W, cpg1, cpg2):
    HW = H * W
    x_bf = x_ref[0]                                           # (HW, Cpad) bf16
    x = x_bf.astype(jnp.float32)                              # f32 for GN stats

    w_id = lax.broadcasted_iota(jnp.int32, (HW, 1), 0) % W
    m_left = w_id >= 1            # source column w-1 valid
    m_right = w_id < (W - 1)      # source column w+1 valid

    # stage 1: GroupNorm -> Swish -> Conv3x3
    h = _gn_swish_conv3x3(x, g1f_ref[...], g1b_ref[...], gn1w_ref[...],
                          gn1b_ref[...], c1w_ref, c1b_ref[...], a1_ref,
                          m_left, m_right, H=H, W=W, cpg=cpg1)

    # FeatureWiseAffine (use_affine_level=False): additive per-channel bias,
    # precomputed outside the kernel as one batched matmul.
    h = h + nz_ref[0]                                         # (HW,Co) + (1,Co)

    # stage 2: GroupNorm -> Swish -> Conv3x3
    h = _gn_swish_conv3x3(h, g2f_ref[...], g2b_ref[...], gn2w_ref[...],
                          gn2b_ref[...], c2w_ref, c2b_ref[...], a2_ref,
                          m_left, m_right, H=H, W=W, cpg=cpg2)

    # residual 1x1 conv (dim != dim_out); x already bf16 -> no cast needed
    res = jnp.dot(x_bf, rw_ref[...],
                  preferred_element_type=jnp.float32) + rb_ref[...]
    out_ref[0] = (h + res).astype(jnp.bfloat16)


def _group_onehots(real_c, padded_c, groups):
    """(Cpad, G) channel->group one-hot (zero rows for padded channels) and its T."""
    cpg = real_c // groups
    idx = jnp.arange(padded_c)
    gid = idx // cpg
    valid = idx < real_c
    fwd = ((gid[:, None] == jnp.arange(groups)[None, :]) &
           valid[:, None]).astype(jnp.float32)                # (Cpad, G)
    return fwd, fwd.T                                         # , (G, Cpad)


def resnet_block_forward(x_nchw, time_emb, p, *, norm_groups):
    B, C, H, W = x_nchw.shape
    HW = H * W
    Cout = p["conv1_w"].shape[-1]
    G = norm_groups
    Cp = _round_up(C, LANE)
    Cop = _round_up(Cout, LANE)
    # halo >= W rows; multiple of 16 keeps the +-W bf16 sublane-packed slices
    # aligned when W is a multiple of 16 (typical UNet spatial sizes).
    PADR = _round_up(W, 16)

    # NCHW -> (B, HW, Cp), channel-padded with zeros, bf16 activation I/O
    x2d = jnp.transpose(x_nchw, (0, 2, 3, 1)).reshape(B, HW, C)
    x2d = jnp.pad(x2d, ((0, 0), (0, 0), (0, Cp - C))).astype(jnp.bfloat16)

    # time-embedding bias: one batched XLA matmul (M=1 per-step matmuls inside
    # the kernel waste MXU and keep noise_w resident in VMEM)
    noise = time_emb.astype(jnp.float32) @ p["noise_w"] + p["noise_b"]    # (B, Cout)
    noise = jnp.pad(noise, ((0, 0), (0, Cop - Cout))).reshape(B, 1, Cop)

    g1f, g1b = _group_onehots(C, Cp, G)
    g2f, g2b = _group_onehots(Cout, Cop, G)

    def pad1d(v, n):
        return jnp.pad(v.astype(jnp.float32), (0, n - v.shape[0])).reshape(1, n)

    gn1_w, gn1_b = pad1d(p["gn1_w"], Cp), pad1d(p["gn1_b"], Cp)
    gn2_w, gn2_b = pad1d(p["gn2_w"], Cop), pad1d(p["gn2_b"], Cop)
    c1_b, c2_b = pad1d(p["conv1_b"], Cop), pad1d(p["conv2_b"], Cop)
    r_b = pad1d(p["res_b"], Cop)

    # conv weights: (kh, kw, cin, cout) -> zero-pad channels, K-merge the kw
    # (dw) taps -> (3, 3*Cin_pad, Cout_pad), bf16 (MXU-native)
    c1_w = jnp.pad(p["conv1_w"], ((0, 0), (0, 0), (0, Cp - C), (0, Cop - Cout))
                   ).reshape(3, 3 * Cp, Cop).astype(jnp.bfloat16)
    c2_w = jnp.pad(p["conv2_w"], ((0, 0), (0, 0), (0, Cop - Cout), (0, Cop - Cout))
                   ).reshape(3, 3 * Cop, Cop).astype(jnp.bfloat16)
    r_w = jnp.pad(p["res_w"],
                  ((0, Cp - C), (0, Cop - Cout))).astype(jnp.bfloat16)

    # explicit scoped-VMEM budget from the actual buffer sum (double-buffered
    # x/out blocks + weights + the two bf16 staging scratches), capped below
    # v7x's 64 MiB physical VMEM.
    est = (2 * HW * Cp * 2                                   # x blocks (bf16)
           + 2 * HW * Cop * 2                                # out blocks (bf16)
           + 2 * (3 * 3 * Cp * Cop + 3 * 3 * Cop * Cop + Cp * Cop) * 2   # weights
           + (HW + 2 * PADR) * 3 * (Cp + Cop) * 2            # staging scratch
           + 4 * (2 * Cp * G + 2 * Cop * G + 4 * Cp + 8 * Cop) * 4)      # small f32
    vmem_limit = int(min(max(1.3 * est + (4 << 20), 32 << 20), 56 << 20))

    def full(shape):
        return pl.BlockSpec(shape, lambda b, _n=len(shape): (0,) * _n)

    out2d = pl.pallas_call(
        functools.partial(_resnet_block_kernel, H=H, W=W,
                          cpg1=C // G, cpg2=Cout // G),
        out_shape=jax.ShapeDtypeStruct((B, HW, Cop), jnp.bfloat16),
        grid_spec=pltpu.PrefetchScalarGridSpec(
            num_scalar_prefetch=0,
            grid=(B,),
            in_specs=[
                pl.BlockSpec((1, HW, Cp), lambda b: (b, 0, 0)),    # x (bf16)
                pl.BlockSpec((1, 1, Cop), lambda b: (b, 0, 0)),    # time-emb bias
                full((Cp, G)), full((G, Cp)),                      # group one-hots 1
                full((1, Cp)), full((1, Cp)),                      # gn1 w, b
                full((3, 3 * Cp, Cop)), full((1, Cop)),            # conv1 w (bf16), b
                full((Cop, G)), full((G, Cop)),                    # group one-hots 2
                full((1, Cop)), full((1, Cop)),                    # gn2 w, b
                full((3, 3 * Cop, Cop)), full((1, Cop)),           # conv2 w (bf16), b
                full((Cp, Cop)), full((1, Cop)),                   # res w (bf16), b
            ],
            out_specs=pl.BlockSpec((1, HW, Cop), lambda b: (b, 0, 0)),
            scratch_shapes=[pltpu.VMEM((HW + 2 * PADR, 3 * Cp), jnp.bfloat16),
                            pltpu.VMEM((HW + 2 * PADR, 3 * Cop), jnp.bfloat16)],
        ),
        compiler_params=pltpu.CompilerParams(
            dimension_semantics=("parallel",),     # batch is independent (megacore)
            vmem_limit_bytes=vmem_limit),
    )(x2d, noise,
      g1f, g1b, gn1_w, gn1_b, c1_w, c1_b,
      g2f, g2b, gn2_w, gn2_b, c2_w, c2_b,
      r_w, r_b)

    out2d = out2d[:, :, :Cout].astype(jnp.float32)
    return out2d.reshape(B, H, W, Cout).transpose(0, 3, 1, 2)


def init_params(key, dim, dim_out, emb_dim):
    ks = jax.random.split(key, 12)
    s = 0.1
    return dict(
        gn1_w=1.0 + s * jax.random.normal(ks[0], (dim,), jnp.float32),
        gn1_b=s * jax.random.normal(ks[1], (dim,), jnp.float32),
        conv1_w=s * jax.random.normal(ks[2], (3, 3, dim, dim_out), jnp.float32),
        conv1_b=s * jax.random.normal(ks[3], (dim_out,), jnp.float32),
        noise_w=s * jax.random.normal(ks[4], (emb_dim, dim_out), jnp.float32),
        noise_b=s * jax.random.normal(ks[5], (dim_out,), jnp.float32),
        gn2_w=1.0 + s * jax.random.normal(ks[6], (dim_out,), jnp.float32),
        gn2_b=s * jax.random.normal(ks[7], (dim_out,), jnp.float32),
        conv2_w=s * jax.random.normal(ks[8], (3, 3, dim_out, dim_out), jnp.float32),
        conv2_b=s * jax.random.normal(ks[9], (dim_out,), jnp.float32),
        res_w=s * jax.random.normal(ks[10], (dim, dim_out), jnp.float32),
        res_b=s * jax.random.normal(ks[11], (dim_out,), jnp.float32),
    )


def _reference(x, temb, p, groups):
    """Pure-JAX f32 reference mirroring the PyTorch module (NCHW)."""
    def gn(t, w, b):
        B, C, H, W = t.shape
        tg = t.reshape(B, groups, C // groups, H, W)
        m = tg.mean(axis=(2, 3, 4), keepdims=True)
        v = ((tg - m) ** 2).mean(axis=(2, 3, 4), keepdims=True)
        tn = ((tg - m) / jnp.sqrt(v + 1e-5)).reshape(B, C, H, W)
        return tn * w[None, :, None, None] + b[None, :, None, None]

    def conv3(t, w_hwio, b):
        w_oihw = jnp.transpose(w_hwio, (3, 2, 0, 1))
        y = lax.conv_general_dilated(t, w_oihw, (1, 1), ((1, 1), (1, 1)),
                                     dimension_numbers=('NCHW', 'OIHW', 'NCHW'))
        return y + b[None, :, None, None]

    h = conv3(_swish(gn(x, p["gn1_w"], p["gn1_b"])), p["conv1_w"], p["conv1_b"])
    h = h + (temb @ p["noise_w"] + p["noise_b"])[:, :, None, None]
    h = conv3(_swish(gn(h, p["gn2_w"], p["gn2_b"])), p["conv2_w"], p["conv2_b"])
    res = jnp.einsum('bchw,cd->bdhw', x, p["res_w"]) + p["res_b"][None, :, None, None]
    return h + res


if __name__ == "__main__":
    B, dim, dim_out, H, W, E, groups = 2, 4, 8, 16, 16, 32, 2
    key = jax.random.PRNGKey(0)
    kx, kt, kp = jax.random.split(key, 3)
    x = jax.random.normal(kx, (B, dim, H, W), jnp.float32)
    time_emb = jax.random.normal(kt, (B, E), jnp.float32)
    params = init_params(kp, dim, dim_out, E)

    out = resnet_block_forward(x, time_emb, params, norm_groups=groups)
    out = jax.block_until_ready(out)

    ref = _reference(x, time_emb, params, groups)
    assert out.shape == (B, dim_out, H, W)
    # kernel I/O and matmuls run in bf16 (f32 accumulation / f32 GN statistics)
    # -> tolerance scaled by the reference magnitude
    err = float(jnp.max(jnp.abs(out - ref)))
    scale = float(jnp.max(jnp.abs(ref)))
    if err > 6e-2 + 2e-2 * scale:
        raise AssertionError(f"kernel/reference mismatch: max abs err = {err} "
                             f"(ref max abs = {scale})")
    print("KERNEL_OK")
</pallas_src>

<mosaic_0001>
module attributes {stable_mosaic.version = 11 : i64} {
  func.func @_resnet_block_kernel(%arg0: i32, %arg1: memref<1x256x128xbf16, #tpu.memory_space<vmem>>, %arg2: memref<1x1x128xf32, #tpu.memory_space<vmem>>, %arg3: memref<128x2xf32, #tpu.memory_space<vmem>>, %arg4: memref<2x128xf32, #tpu.memory_space<vmem>>, %arg5: memref<1x128xf32, #tpu.memory_space<vmem>>, %arg6: memref<1x128xf32, #tpu.memory_space<vmem>>, %arg7: memref<3x384x128xbf16, #tpu.memory_space<vmem>>, %arg8: memref<1x128xf32, #tpu.memory_space<vmem>>, %arg9: memref<128x2xf32, #tpu.memory_space<vmem>>, %arg10: memref<2x128xf32, #tpu.memory_space<vmem>>, %arg11: memref<1x128xf32, #tpu.memory_space<vmem>>, %arg12: memref<1x128xf32, #tpu.memory_space<vmem>>, %arg13: memref<3x384x128xbf16, #tpu.memory_space<vmem>>, %arg14: memref<1x128xf32, #tpu.memory_space<vmem>>, %arg15: memref<128x128xbf16, #tpu.memory_space<vmem>>, %arg16: memref<1x128xf32, #tpu.memory_space<vmem>>, %arg17: memref<1x256x128xbf16, #tpu.memory_space<vmem>>, %arg18: memref<288x384xbf16, #tpu.memory_space<vmem>>, %arg19: memref<288x384xbf16, #tpu.memory_space<vmem>>) attributes {dimension_semantics = [#tpu.dimension_semantics<parallel>], iteration_bounds = array<i64: 2>, scalar_prefetch = 0 : i64, scratch_operands = 2 : i64, tpu.core_type = #tpu.core_type<tc>, window_params = [{transform_indices = @transform_0, window_bounds = array<i64: 1, 256, 128>}, {transform_indices = @transform_1, window_bounds = array<i64: 1, 1, 128>}, {pipeline_mode = #tpu.pipeline_mode<synchronous>, transform_indices = @transform_2, window_bounds = array<i64: 128, 2>}, {pipeline_mode = #tpu.pipeline_mode<synchronous>, transform_indices = @transform_3, window_bounds = array<i64: 2, 128>}, {pipeline_mode = #tpu.pipeline_mode<synchronous>, transform_indices = @transform_4, window_bounds = array<i64: 1, 128>}, {pipeline_mode = #tpu.pipeline_mode<synchronous>, transform_indices = @transform_5, window_bounds = array<i64: 1, 128>}, {pipeline_mode = #tpu.pipeline_mode<synchronous>, transform_indices = @transform_6, window_bounds = array<i64: 3, 384, 128>}, {pipeline_mode = #tpu.pipeline_mode<synchronous>, transform_indices = @transform_7, window_bounds = array<i64: 1, 128>}, {pipeline_mode = #tpu.pipeline_mode<synchronous>, transform_indices = @transform_8, window_bounds = array<i64: 128, 2>}, {pipeline_mode = #tpu.pipeline_mode<synchronous>, transform_indices = @transform_9, window_bounds = array<i64: 2, 128>}, {pipeline_mode = #tpu.pipeline_mode<synchronous>, transform_indices = @transform_10, window_bounds = array<i64: 1, 128>}, {pipeline_mode = #tpu.pipeline_mode<synchronous>, transform_indices = @transform_11, window_bounds = array<i64: 1, 128>}, {pipeline_mode = #tpu.pipeline_mode<synchronous>, transform_indices = @transform_12, window_bounds = array<i64: 3, 384, 128>}, {pipeline_mode = #tpu.pipeline_mode<synchronous>, transform_indices = @transform_13, window_bounds = array<i64: 1, 128>}, {pipeline_mode = #tpu.pipeline_mode<synchronous>, transform_indices = @transform_14, window_bounds = array<i64: 128, 128>}, {pipeline_mode = #tpu.pipeline_mode<synchronous>, transform_indices = @transform_15, window_bounds = array<i64: 1, 128>}, {transform_indices = @transform_16, window_bounds = array<i64: 1, 256, 128>}]} {
    %c0 = arith.constant 0 : index
    %c0_0 = arith.constant 0 : index
    %c0_1 = arith.constant 0 : index
    %0 = vector.load %arg1[%c0, %c0_0, %c0_1] : memref<1x256x128xbf16, #tpu.memory_space<vmem>>, vector<1x256x128xbf16>
    %1 = vector.shape_cast %0 : vector<1x256x128xbf16> to vector<256x128xbf16>
    %2 = arith.extf %1 : vector<256x128xbf16> to vector<256x128xf32>
    %3 = tpu.iota {dimensions = array<i32: 0>} : vector<256x1xi32>
    %c16_i32 = arith.constant 16 : i32
    %c0_i32 = arith.constant 0 : i32
    %4 = arith.cmpi eq, %c16_i32, %c0_i32 : i32
    %c1_i32 = arith.constant 1 : i32
    %5 = arith.select %4, %c1_i32, %c16_i32 : i32
    %6 = vector.broadcast %5 : i32 to vector<256x1xi32>
    %7 = arith.remsi %3, %6 : vector<256x1xi32>
    %c0_i32_2 = arith.constant 0 : i32
    %8 = vector.broadcast %c0_i32_2 : i32 to vector<256x1xi32>
    %9 = arith.cmpi ne, %7, %8 : vector<256x1xi32>
    %c0_i32_3 = arith.constant 0 : i32
    %10 = vector.broadcast %c0_i32_3 : i32 to vector<256x1xi32>
    %11 = arith.cmpi slt, %7, %10 : vector<256x1xi32>
    %c0_i32_4 = arith.constant 0 : i32
    %12 = arith.cmpi slt, %5, %c0_i32_4 : i32
    %13 = vector.broadcast %12 : i1 to vector<256x1xi1>
    %14 = vector.broadcast %13 : vector<256x1xi1> to vector<256x1xi1>
    %15 = arith.xori %11, %14 : vector<256x1xi1>
    %16 = arith.andi %15, %9 : vector<256x1xi1>
    %17 = vector.broadcast %5 : i32 to vector<256x1xi32>
    %18 = arith.addi %7, %17 : vector<256x1xi32>
    %19 = arith.select %16, %18, %7 : vector<256x1xi1>, vector<256x1xi32>
    %c1_i32_5 = arith.constant 1 : i32
    %20 = vector.broadcast %c1_i32_5 : i32 to vector<256x1xi32>
    %21 = arith.cmpi sge, %19, %20 : vector<256x1xi32>
    %c15_i32 = arith.constant 15 : i32
    %22 = vector.broadcast %c15_i32 : i32 to vector<256x1xi32>
    %23 = arith.cmpi slt, %19, %22 : vector<256x1xi32>
    %c0_6 = arith.constant 0 : index
    %c0_7 = arith.constant 0 : index
    %24 = vector.load %arg3[%c0_6, %c0_7] : memref<128x2xf32, #tpu.memory_space<vmem>>, vector<128x2xf32>
    %c0_8 = arith.constant 0 : index
    %c0_9 = arith.constant 0 : index
    %25 = vector.load %arg4[%c0_8, %c0_9] : memref<2x128xf32, #tpu.memory_space<vmem>>, vector<2x128xf32>
    %c0_10 = arith.constant 0 : index
    %c0_11 = arith.constant 0 : index
    %26 = vector.load %arg5[%c0_10, %c0_11] : memref<1x128xf32, #tpu.memory_space<vmem>>, vector<1x128xf32>
    %c0_12 = arith.constant 0 : index
    %c0_13 = arith.constant 0 : index
    %27 = vector.load %arg6[%c0_12, %c0_13] : memref<1x128xf32, #tpu.memory_space<vmem>>, vector<1x128xf32>
    %c0_14 = arith.constant 0 : index
    %c0_15 = arith.constant 0 : index
    %28 = vector.load %arg8[%c0_14, %c0_15] : memref<1x128xf32, #tpu.memory_space<vmem>>, vector<1x128xf32>
    %cst = arith.constant dense<0.000000e+00> : vector<128xf32>
    %29 = vector.multi_reduction <add>, %2, %cst [0] : vector<256x128xf32> to vector<128xf32>
    %30 = vector.shape_cast %29 : vector<128xf32> to vector<1x128xf32>
    %cst_16 = arith.constant dense<0.000000e+00> : vector<1x2xf32>
    %31 = tpu.matmul %30, %24, %cst_16 {dimension_numbers = #tpu.dot_dimension_numbers<[1], [0], [0], [1], [0, 0, 1, 1], [], []>} : vector<1x128xf32>, vector<128x2xf32>, vector<1x2xf32> -> vector<1x2xf32>
    %cst_17 = arith.constant 5.120000e+02 : f32
    %32 = vector.broadcast %cst_17 : f32 to vector<1x2xf32>
    %33 = arith.divf %31, %32 : vector<1x2xf32>
    %cst_18 = arith.constant dense<0.000000e+00> : vector<1x128xf32>
    %34 = tpu.matmul %33, %25, %cst_18 {dimension_numbers = #tpu.dot_dimension_numbers<[1], [0], [0], [1], [0, 0, 1, 1], [], []>} : vector<1x2xf32>, vector<2x128xf32>, vector<1x128xf32> -> vector<1x128xf32>
    %35 = vector.broadcast %34 : vector<1x128xf32> to vector<256x128xf32>
    %36 = arith.subf %2, %35 : vector<256x128xf32>
    %37 = arith.mulf %36, %36 : vector<256x128xf32>
    %cst_19 = arith.constant dense<0.000000e+00> : vector<128xf32>
    %38 = vector.multi_reduction <add>, %37, %cst_19 [0] : vector<256x128xf32> to vector<128xf32>
    %39 = vector.shape_cast %38 : vector<128xf32> to vector<1x128xf32>
    %cst_20 = arith.constant dense<0.000000e+00> : vector<1x2xf32>
    %40 = tpu.matmul %39, %24, %cst_20 {dimension_numbers = #tpu.dot_dimension_numbers<[1], [0], [0], [1], [0, 0, 1, 1], [], []>} : vector<1x128xf32>, vector<128x2xf32>, vector<1x2xf32> -> vector<1x2xf32>
    %cst_21 = arith.constant 5.120000e+02 : f32
    %41 = vector.broadcast %cst_21 : f32 to vector<1x2xf32>
    %42 = arith.divf %40, %41 : vector<1x2xf32>
    %cst_22 = arith.constant dense<0.000000e+00> : vector<1x128xf32>
    %43 = tpu.matmul %42, %25, %cst_22 {dimension_numbers = #tpu.dot_dimension_numbers<[1], [0], [0], [1], [0, 0, 1, 1], [], []>} : vector<1x2xf32>, vector<2x128xf32>, vector<1x128xf32> -> vector<1x128xf32>
    %cst_23 = arith.constant 9.99999974E-6 : f32
    %44 = vector.broadcast %cst_23 : f32 to vector<1x128xf32>
    %45 = arith.addf %43, %44 : vector<1x128xf32>
    %46 = math.rsqrt %45 : vector<1x128xf32>
    %47 = vector.broadcast %46 : vector<1x128xf32> to vector<256x128xf32>
    %48 = arith.mulf %36, %47 : vector<256x128xf32>
    %49 = vector.broadcast %26 : vector<1x128xf32> to vector<256x128xf32>
    %50 = arith.mulf %48, %49 : vector<256x128xf32>
    %51 = vector.broadcast %27 : vector<1x128xf32> to vector<256x128xf32>
    %52 = arith.addf %50, %51 : vector<256x128xf32>
    %cst_24 = arith.constant 0.000000e+00 : f32
    %53 = vector.broadcast %cst_24 : f32 to vector<256x128xf32>
    %54 = arith.subf %53, %52 : vector<256x128xf32>
    %55 = math.exp %54 : vector<256x128xf32>
    %cst_25 = arith.constant 1.000000e+00 : f32
    %56 = vector.broadcast %cst_25 : f32 to vector<256x128xf32>
    %57 = arith.addf %56, %55 : vector<256x128xf32>
    %cst_26 = arith.constant 1.000000e+00 : f32
    %58 = vector.broadcast %cst_26 : f32 to vector<256x128xf32>
    %59 = arith.divf %58, %57 : vector<256x128xf32>
    %60 = arith.mulf %52, %59 : vector<256x128xf32>
    %61 = arith.truncf %60 : vector<256x128xf32> to vector<256x128xbf16>
    %cst_27 = arith.constant 0.000000e+00 : bf16
    %62 = vector.broadcast %cst_27 : bf16 to vector<16x384xbf16>
    %c0_28 = arith.constant 0 : index
    %c0_29 = arith.constant 0 : index
    %63 = vector.load %arg18[%c0_28, %c0_29] : memref<288x384xbf16, #tpu.memory_space<vmem>>, vector<16x384xbf16>
    tpu.vector_store %arg18[%c0_28, %c0_29], %62 {strides = array<i32>} : memref<288x384xbf16, #tpu.memory_space<vmem>>, vector<16x384xbf16>,
    %cst_30 = arith.constant 0.000000e+00 : bf16
    %64 = vector.broadcast %cst_30 : bf16 to vector<16x384xbf16>
    %c272 = arith.constant 272 : index
    %c0_31 = arith.constant 0 : index
    %65 = vector.load %arg18[%c272, %c0_31] : memref<288x384xbf16, #tpu.memory_space<vmem>>, vector<16x384xbf16>
    tpu.vector_store %arg18[%c272, %c0_31], %64 {strides = array<i32>} : memref<288x384xbf16, #tpu.memory_space<vmem>>, vector<16x384xbf16>,
    %c16 = arith.constant 16 : index
    %c128 = arith.constant 128 : index
    %66 = vector.load %arg18[%c16, %c128] : memref<288x384xbf16, #tpu.memory_space<vmem>>, vector<256x128xbf16>
    tpu.vector_store %arg18[%c16, %c128], %61 {strides = array<i32>} : memref<288x384xbf16, #tpu.memory_space<vmem>>, vector<256x128xbf16>,
    %c15 = arith.constant 15 : index
    %c128_32 = arith.constant 128 : index
    %67 = vector.load %arg18[%c15, %c128_32] : memref<288x384xbf16, #tpu.memory_space<vmem>>, vector<256x128xbf16>
    %c0_i32_33 = arith.constant 0 : i32
    %68 = arith.sitofp %c0_i32_33 : i32 to bf16
    %69 = vector.shape_cast %21 : vector<256x1xi1> to vector<256x1xi1>
    %70 = vector.broadcast %69 : vector<256x1xi1> to vector<256x128xi1>
    %71 = vector.broadcast %68 : bf16 to vector<256x128xbf16>
    %72 = arith.select %70, %67, %71 : vector<256x128xi1>, vector<256x128xbf16>
    %c16_34 = arith.constant 16 : index
    %c0_35 = arith.constant 0 : index
    %73 = vector.load %arg18[%c16_34, %c0_35] : memref<288x384xbf16, #tpu.memory_space<vmem>>, vector<256x128xbf16>
    tpu.vector_store %arg18[%c16_34, %c0_35], %72 {strides = array<i32>} : memref<288x384xbf16, #tpu.memory_space<vmem>>, vector<256x128xbf16>,
    %c17 = arith.constant 17 : index
    %c128_36 = arith.constant 128 : index
    %74 = vector.load %arg18[%c17, %c128_36] : memref<288x384xbf16, #tpu.memory_space<vmem>>, vector<256x128xbf16>
    %c0_i32_37 = arith.constant 0 : i32
    %75 = arith.sitofp %c0_i32_37 : i32 to bf16
    %76 = vector.shape_cast %23 : vector<256x1xi1> to vector<256x1xi1>
    %77 = vector.broadcast %76 : vector<256x1xi1> to vector<256x128xi1>
    %78 = vector.broadcast %75 : bf16 to vector<256x128xbf16>
    %79 = arith.select %77, %74, %78 : vector<256x128xi1>, vector<256x128xbf16>
    %c16_38 = arith.constant 16 : index
    %c256 = arith.constant 256 : index
    %80 = vector.load %arg18[%c16_38, %c256] : memref<288x384xbf16, #tpu.memory_space<vmem>>, vector<256x128xbf16>
    tpu.vector_store %arg18[%c16_38, %c256], %79 {strides = array<i32>} : memref<288x384xbf16, #tpu.memory_space<vmem>>, vector<256x128xbf16>,
    %c0_39 = arith.constant 0 : index
    %c0_40 = arith.constant 0 : index
    %81 = vector.load %arg18[%c0_39, %c0_40] : memref<288x384xbf16, #tpu.memory_space<vmem>>, vector<256x384xbf16>
    %c0_41 = arith.constant 0 : index
    %c0_42 = arith.constant 0 : index
    %c0_43 = arith.constant 0 : index
    %82 = vector.load %arg7[%c0_41, %c0_42, %c0_43] : memref<3x384x128xbf16, #tpu.memory_space<vmem>>, vector<1x384x128xbf16>
    %83 = vector.shape_cast %82 : vector<1x384x128xbf16> to vector<384x128xbf16>
    %cst_44 = arith.constant dense<0.000000e+00> : vector<256x128xf32>
    %84 = tpu.matmul %81, %83, %cst_44 {dimension_numbers = #tpu.dot_dimension_numbers<[1], [0], [0], [1], [0, 0, 1, 1], [], []>} : vector<256x384xbf16>, vector<384x128xbf16>, vector<256x128xf32> -> vector<256x128xf32>
    %85 = vector.broadcast %28 : vector<1x128xf32> to vector<256x128xf32>
    %86 = arith.addf %84, %85 : vector<256x128xf32>
    %c16_45 = arith.constant 16 : index
    %c0_46 = arith.constant 0 : index
    %87 = vector.load %arg18[%c16_45, %c0_46] : memref<288x384xbf16, #tpu.memory_space<vmem>>, vector<256x384xbf16>
    %c1 = arith.constant 1 : index
    %c0_47 = arith.constant 0 : index
    %c0_48 = arith.constant 0 : index
    %88 = vector.load %arg7[%c1, %c0_47, %c0_48] : memref<3x384x128xbf16, #tpu.memory_space<vmem>>, vector<1x384x128xbf16>
    %89 = vector.shape_cast %88 : vector<1x384x128xbf16> to vector<384x128xbf16>
    %cst_49 = arith.constant dense<0.000000e+00> : vector<256x128xf32>
    %90 = tpu.matmul %87, %89, %cst_49 {dimension_numbers = #tpu.dot_dimension_numbers<[1], [0], [0], [1], [0, 0, 1, 1], [], []>} : vector<256x384xbf16>, vector<384x128xbf16>, vector<256x128xf32> -> vector<256x128xf32>
    %91 = arith.addf %86, %90 : vector<256x128xf32>
    %c32 = arith.constant 32 : index
    %c0_50 = arith.constant 0 : index
    %92 = vector.load %arg18[%c32, %c0_50] : memref<288x384xbf16, #tpu.memory_space<vmem>>, vector<256x384xbf16>
    %c2 = arith.constant 2 : index
    %c0_51 = arith.constant 0 : index
    %c0_52 = arith.constant 0 : index
    %93 = vector.load %arg7[%c2, %c0_51, %c0_52] : memref<3x384x128xbf16, #tpu.memory_space<vmem>>, vector<1x384x128xbf16>
    %94 = vector.shape_cast %93 : vector<1x384x128xbf16> to vector<384x128xbf16>
    %cst_53 = arith.constant dense<0.000000e+00> : vector<256x128xf32>
    %95 = tpu.matmul %92, %94, %cst_53 {dimension_numbers = #tpu.dot_dimension_numbers<[1], [0], [0], [1], [0, 0, 1, 1], [], []>} : vector<256x384xbf16>, vector<384x128xbf16>, vector<256x128xf32> -> vector<256x128xf32>
    %96 = arith.addf %91, %95 : vector<256x128xf32>
    %c0_54 = arith.constant 0 : index
    %c0_55 = arith.constant 0 : index
    %c0_56 = arith.constant 0 : index
    %97 = vector.load %arg2[%c0_54, %c0_55, %c0_56] : memref<1x1x128xf32, #tpu.memory_space<vmem>>, vector<1x1x128xf32>
    %98 = vector.shape_cast %97 : vector<1x1x128xf32> to vector<1x128xf32>
    %99 = vector.broadcast %98 : vector<1x128xf32> to vector<256x128xf32>
    %100 = arith.addf %96, %99 : vector<256x128xf32>
    %c0_57 = arith.constant 0 : index
    %c0_58 = arith.constant 0 : index
    %101 = vector.load %arg9[%c0_57, %c0_58] : memref<128x2xf32, #tpu.memory_space<vmem>>, vector<128x2xf32>
    %c0_59 = arith.constant 0 : index
    %c0_60 = arith.constant 0 : index
    %102 = vector.load %arg10[%c0_59, %c0_60] : memref<2x128xf32, #tpu.memory_space<vmem>>, vector<2x128xf32>
    %c0_61 = arith.constant 0 : index
    %c0_62 = arith.constant 0 : index
    %103 = vector.load %arg11[%c0_61, %c0_62] : memref<1x128xf32, #tpu.memory_space<vmem>>, vector<1x128xf32>
    %c0_63 = arith.constant 0 : index
    %c0_64 = arith.constant 0 : index
    %104 = vector.load %arg12[%c0_63, %c0_64] : memref<1x128xf32, #tpu.memory_space<vmem>>, vector<1x128xf32>
    %c0_65 = arith.constant 0 : index
    %c0_66 = arith.constant 0 : index
    %105 = vector.load %arg14[%c0_65, %c0_66] : memref<1x128xf32, #tpu.memory_space<vmem>>, vector<1x128xf32>
    %cst_67 = arith.constant dense<0.000000e+00> : vector<128xf32>
    %106 = vector.multi_reduction <add>, %100, %cst_67 [0] : vector<256x128xf32> to vector<128xf32>
    %107 = vector.shape_cast %106 : vector<128xf32> to vector<1x128xf32>
    %cst_68 = arith.constant dense<0.000000e+00> : vector<1x2xf32>
    %108 = tpu.matmul %107, %101, %cst_68 {dimension_numbers = #tpu.dot_dimension_numbers<[1], [0], [0], [1], [0, 0, 1, 1], [], []>} : vector<1x128xf32>, vector<128x2xf32>, vector<1x2xf32> -> vector<1x2xf32>
    %cst_69 = arith.constant 1.024000e+03 : f32
    %109 = vector.broadcast %cst_69 : f32 to vector<1x2xf32>
    %110 = arith.divf %108, %109 : vector<1x2xf32>
    %cst_70 = arith.constant dense<0.000000e+00> : vector<1x128xf32>
    %111 = tpu.matmul %110, %102, %cst_70 {dimension_numbers = #tpu.dot_dimension_numbers<[1], [0], [0], [1], [0, 0, 1, 1], [], []>} : vector<1x2xf32>, vector<2x128xf32>, vector<1x128xf32> -> vector<1x128xf32>
    %112 = vector.broadcast %111 : vector<1x128xf32> to vector<256x128xf32>
    %113 = arith.subf %100, %112 : vector<256x128xf32>
    %114 = arith.mulf %113, %113 : vector<256x128xf32>
    %cst_71 = arith.constant dense<0.000000e+00> : vector<128xf32>
    %115 = vector.multi_reduction <add>, %114, %cst_71 [0] : vector<256x128xf32> to vector<128xf32>
    %116 = vector.shape_cast %115 : vector<128xf32> to vector<1x128xf32>
    %cst_72 = arith.constant dense<0.000000e+00> : vector<1x2xf32>
    %117 = tpu.matmul %116, %101, %cst_72 {dimension_numbers = #tpu.dot_dimension_numbers<[1], [0], [0], [1], [0, 0, 1, 1], [], []>} : vector<1x128xf32>, vector<128x2xf32>, vector<1x2xf32> -> vector<1x2xf32>
    %cst_73 = arith.constant 1.024000e+03 : f32
    %118 = vector.broadcast %cst_73 : f32 to vector<1x2xf32>
    %119 = arith.divf %117, %118 : vector<1x2xf32>
    %cst_74 = arith.constant dense<0.000000e+00> : vector<1x128xf32>
    %120 = tpu.matmul %119, %102, %cst_74 {dimension_numbers = #tpu.dot_dimension_numbers<[1], [0], [0], [1], [0, 0, 1, 1], [], []>} : vector<1x2xf32>, vector<2x128xf32>, vector<1x128xf32> -> vector<1x128xf32>
    %cst_75 = arith.constant 9.99999974E-6 : f32
    %121 = vector.broadcast %cst_75 : f32 to vector<1x128xf32>
    %122 = arith.addf %120, %121 : vector<1x128xf32>
    %123 = math.rsqrt %122 : vector<1x128xf32>
    %124 = vector.broadcast %123 : vector<1x128xf32> to vector<256x128xf32>
    %125 = arith.mulf %113, %124 : vector<256x128xf32>
    %126 = vector.broadcast %103 : vector<1x128xf32> to vector<256x128xf32>
    %127 = arith.mulf %125, %126 : vector<256x128xf32>
    %128 = vector.broadcast %104 : vector<1x128xf32> to vector<256x128xf32>
    %129 = arith.addf %127, %128 : vector<256x128xf32>
    %cst_76 = arith.constant 0.000000e+00 : f32
    %130 = vector.broadcast %cst_76 : f32 to vector<256x128xf32>
    %131 = arith.subf %130, %129 : vector<256x128xf32>
    %132 = math.exp %131 : vector<256x128xf32>
    %cst_77 = arith.constant 1.000000e+00 : f32
    %133 = vector.broadcast %cst_77 : f32 to vector<256x128xf32>
    %134 = arith.addf %133, %132 : vector<256x128xf32>
    %cst_78 = arith.constant 1.000000e+00 : f32
    %135 = vector.broadcast %cst_78 : f32 to vector<256x128xf32>
    %136 = arith.divf %135, %134 : vector<256x128xf32>
    %137 = arith.mulf %129, %136 : vector<256x128xf32>
    %138 = arith.truncf %137 : vector<256x128xf32> to vector<256x128xbf16>
    %cst_79 = arith.constant 0.000000e+00 : bf16
    %139 = vector.broadcast %cst_79 : bf16 to vector<16x384xbf16>
    %c0_80 = arith.constant 0 : index
    %c0_81 = arith.constant 0 : index
    %140 = vector.load %arg19[%c0_80, %c0_81] : memref<288x384xbf16, #tpu.memory_space<vmem>>, vector<16x384xbf16>
    tpu.vector_store %arg19[%c0_80, %c0_81], %139 {strides = array<i32>} : memref<288x384xbf16, #tpu.memory_space<vmem>>, vector<16x384xbf16>,
    %cst_82 = arith.constant 0.000000e+00 : bf16
    %141 = vector.broadcast %cst_82 : bf16 to vector<16x384xbf16>
    %c272_83 = arith.constant 272 : index
    %c0_84 = arith.constant 0 : index
    %142 = vector.load %arg19[%c272_83, %c0_84] : memref<288x384xbf16, #tpu.memory_space<vmem>>, vector<16x384xbf16>
    tpu.vector_store %arg19[%c272_83, %c0_84], %141 {strides = array<i32>} : memref<288x384xbf16, #tpu.memory_space<vmem>>, vector<16x384xbf16>,
    %c16_85 = arith.constant 16 : index
    %c128_86 = arith.constant 128 : index
    %143 = vector.load %arg19[%c16_85, %c128_86] : memref<288x384xbf16, #tpu.memory_space<vmem>>, vector<256x128xbf16>
    tpu.vector_store %arg19[%c16_85, %c128_86], %138 {strides = array<i32>} : memref<288x384xbf16, #tpu.memory_space<vmem>>, vector<256x128xbf16>,
    %c15_87 = arith.constant 15 : index
    %c128_88 = arith.constant 128 : index
    %144 = vector.load %arg19[%c15_87, %c128_88] : memref<288x384xbf16, #tpu.memory_space<vmem>>, vector<256x128xbf16>
    %c0_i32_89 = arith.constant 0 : i32
    %145 = arith.sitofp %c0_i32_89 : i32 to bf16
    %146 = vector.shape_cast %21 : vector<256x1xi1> to vector<256x1xi1>
    %147 = vector.broadcast %146 : vector<256x1xi1> to vector<256x128xi1>
    %148 = vector.broadcast %145 : bf16 to vector<256x128xbf16>
    %149 = arith.select %147, %144, %148 : vector<256x128xi1>, vector<256x128xbf16>
    %c16_90 = arith.constant 16 : index
    %c0_91 = arith.constant 0 : index
    %150 = vector.load %arg19[%c16_90, %c0_91] : memref<288x384xbf16, #tpu.memory_space<vmem>>, vector<256x128xbf16>
    tpu.vector_store %arg19[%c16_90, %c0_91], %149 {strides = array<i32>} : memref<288x384xbf16, #tpu.memory_space<vmem>>, vector<256x128xbf16>,
    %c17_92 = arith.constant 17 : index
    %c128_93 = arith.constant 128 : index
    %151 = vector.load %arg19[%c17_92, %c128_93] : memref<288x384xbf16, #tpu.memory_space<vmem>>, vector<256x128xbf16>
    %c0_i32_94 = arith.constant 0 : i32
    %152 = arith.sitofp %c0_i32_94 : i32 to bf16
    %153 = vector.shape_cast %23 : vector<256x1xi1> to vector<256x1xi1>
    %154 = vector.broadcast %153 : vector<256x1xi1> to vector<256x128xi1>
    %155 = vector.broadcast %152 : bf16 to vector<256x128xbf16>
    %156 = arith.select %154, %151, %155 : vector<256x128xi1>, vector<256x128xbf16>
    %c16_95 = arith.constant 16 : index
    %c256_96 = arith.constant 256 : index
    %157 = vector.load %arg19[%c16_95, %c256_96] : memref<288x384xbf16, #tpu.memory_space<vmem>>, vector<256x128xbf16>
    tpu.vector_store %arg19[%c16_95, %c256_96], %156 {strides = array<i32>} : memref<288x384xbf16, #tpu.memory_space<vmem>>, vector<256x128xbf16>,
    %c0_97 = arith.constant 0 : index
    %c0_98 = arith.constant 0 : index
    %158 = vector.load %arg19[%c0_97, %c0_98] : memref<288x384xbf16, #tpu.memory_space<vmem>>, vector<256x384xbf16>
    %c0_99 = arith.constant 0 : index
    %c0_100 = arith.constant 0 : index
    %c0_101 = arith.constant 0 : index
    %159 = vector.load %arg13[%c0_99, %c0_100, %c0_101] : memref<3x384x128xbf16, #tpu.memory_space<vmem>>, vector<1x384x128xbf16>
    %160 = vector.shape_cast %159 : vector<1x384x128xbf16> to vector<384x128xbf16>
    %cst_102 = arith.constant dense<0.000000e+00> : vector<256x128xf32>
    %161 = tpu.matmul %158, %160, %cst_102 {dimension_numbers = #tpu.dot_dimension_numbers<[1], [0], [0], [1], [0, 0, 1, 1], [], []>} : vector<256x384xbf16>, vector<384x128xbf16>, vector<256x128xf32> -> vector<256x128xf32>
    %162 = vector.broadcast %105 : vector<1x128xf32> to vector<256x128xf32>
    %163 = arith.addf %161, %162 : vector<256x128xf32>
    %c16_103 = arith.constant 16 : index
    %c0_104 = arith.constant 0 : index
    %164 = vector.load %arg19[%c16_103, %c0_104] : memref<288x384xbf16, #tpu.memory_space<vmem>>, vector<256x384xbf16>
    %c1_105 = arith.constant 1 : index
    %c0_106 = arith.constant 0 : index
    %c0_107 = arith.constant 0 : index
    %165 = vector.load %arg13[%c1_105, %c0_106, %c0_107] : memref<3x384x128xbf16, #tpu.memory_space<vmem>>, vector<1x384x128xbf16>
    %166 = vector.shape_cast %165 : vector<1x384x128xbf16> to vector<384x128xbf16>
    %cst_108 = arith.constant dense<0.000000e+00> : vector<256x128xf32>
    %167 = tpu.matmul %164, %166, %cst_108 {dimension_numbers = #tpu.dot_dimension_numbers<[1], [0], [0], [1], [0, 0, 1, 1], [], []>} : vector<256x384xbf16>, vector<384x128xbf16>, vector<256x128xf32> -> vector<256x128xf32>
    %168 = arith.addf %163, %167 : vector<256x128xf32>
    %c32_109 = arith.constant 32 : index
    %c0_110 = arith.constant 0 : index
    %169 = vector.load %arg19[%c32_109, %c0_110] : memref<288x384xbf16, #tpu.memory_space<vmem>>, vector<256x384xbf16>
    %c2_111 = arith.constant 2 : index
    %c0_112 = arith.constant 0 : index
    %c0_113 = arith.constant 0 : index
    %170 = vector.load %arg13[%c2_111, %c0_112, %c0_113] : memref<3x384x128xbf16, #tpu.memory_space<vmem>>, vector<1x384x128xbf16>
    %171 = vector.shape_cast %170 : vector<1x384x128xbf16> to vector<384x128xbf16>
    %cst_114 = arith.constant dense<0.000000e+00> : vector<256x128xf32>
    %172 = tpu.matmul %169, %171, %cst_114 {dimension_numbers = #tpu.dot_dimension_numbers<[1], [0], [0], [1], [0, 0, 1, 1], [], []>} : vector<256x384xbf16>, vector<384x128xbf16>, vector<256x128xf32> -> vector<256x128xf32>
    %173 = arith.addf %168, %172 : vector<256x128xf32>
    %c0_115 = arith.constant 0 : index
    %c0_116 = arith.constant 0 : index
    %174 = vector.load %arg15[%c0_115, %c0_116] : memref<128x128xbf16, #tpu.memory_space<vmem>>, vector<128x128xbf16>
    %cst_117 = arith.constant dense<0.000000e+00> : vector<256x128xf32>
    %175 = tpu.matmul %1, %174, %cst_117 {dimension_numbers = #tpu.dot_dimension_numbers<[1], [0], [0], [1], [0, 0, 1, 1], [], []>} : vector<256x128xbf16>, vector<128x128xbf16>, vector<256x128xf32> -> vector<256x128xf32>
    %c0_118 = arith.constant 0 : index
    %c0_119 = arith.constant 0 : index
    %176 = vector.load %arg16[%c0_118, %c0_119] : memref<1x128xf32, #tpu.memory_space<vmem>>, vector<1x128xf32>
    %177 = vector.broadcast %176 : vector<1x128xf32> to vector<256x128xf32>
    %178 = arith.addf %175, %177 : vector<256x128xf32>
    %179 = arith.addf %173, %178 : vector<256x128xf32>
    %180 = arith.truncf %179 : vector<256x128xf32> to vector<256x128xbf16>
    %c0_120 = arith.constant 0 : index
    %c0_121 = arith.constant 0 : index
    %c0_122 = arith.constant 0 : index
    %181 = vector.load %arg17[%c0_120, %c0_121, %c0_122] : memref<1x256x128xbf16, #tpu.memory_space<vmem>>, vector<1x256x128xbf16>
    %182 = vector.shape_cast %181 : vector<1x256x128xbf16> to vector<256x128xbf16>
    %183 = vector.shape_cast %180 : vector<256x128xbf16> to vector<1x256x128xbf16>
    tpu.vector_store %arg17[%c0_120, %c0_121, %c0_122], %183 {strides = array<i32>} : memref<1x256x128xbf16, #tpu.memory_space<vmem>>, vector<1x256x128xbf16>,
    return
  }
  func.func @transform_0(%arg0: i32) -> (i32, i32, i32) {
    %c0_i32 = arith.constant 0 : i32
    %c0_i32_0 = arith.constant 0 : i32
    %c0_i32_1 = arith.constant 0 : i32
    return %arg0, %c0_i32, %c0_i32_0 : i32, i32, i32
  }
  func.func @transform_1(%arg0: i32) -> (i32, i32, i32) {
    %c0_i32 = arith.constant 0 : i32
    %c0_i32_0 = arith.constant 0 : i32
    %c0_i32_1 = arith.constant 0 : i32
    return %arg0, %c0_i32, %c0_i32_0 : i32, i32, i32
  }
  func.func @transform_2(%arg0: i32) -> (i32, i32) {
    %c0_i32 = arith.constant 0 : i32
    %c0_i32_0 = arith.constant 0 : i32
    %c0_i32_1 = arith.constant 0 : i32
    return %c0_i32, %c0_i32_0 : i32, i32
  }
  func.func @transform_3(%arg0: i32) -> (i32, i32) {
    %c0_i32 = arith.constant 0 : i32
    %c0_i32_0 = arith.constant 0 : i32
    %c0_i32_1 = arith.constant 0 : i32
    return %c0_i32, %c0_i32_0 : i32, i32
  }
  func.func @transform_4(%arg0: i32) -> (i32, i32) {
    %c0_i32 = arith.constant 0 : i32
    %c0_i32_0 = arith.constant 0 : i32
    %c0_i32_1 = arith.constant 0 : i32
    return %c0_i32, %c0_i32_0 : i32, i32
  }
  func.func @transform_5(%arg0: i32) -> (i32, i32) {
    %c0_i32 = arith.constant 0 : i32
    %c0_i32_0 = arith.constant 0 : i32
    %c0_i32_1 = arith.constant 0 : i32
    return %c0_i32, %c0_i32_0 : i32, i32
  }
  func.func @transform_6(%arg0: i32) -> (i32, i32, i32) {
    %c0_i32 = arith.constant 0 : i32
    %c0_i32_0 = arith.constant 0 : i32
    %c0_i32_1 = arith.constant 0 : i32
    %c0_i32_2 = arith.constant 0 : i32
    return %c0_i32, %c0_i32_0, %c0_i32_1 : i32, i32, i32
  }
  func.func @transform_7(%arg0: i32) -> (i32, i32) {
    %c0_i32 = arith.constant 0 : i32
    %c0_i32_0 = arith.constant 0 : i32
    %c0_i32_1 = arith.constant 0 : i32
    return %c0_i32, %c0_i32_0 : i32, i32
  }
  func.func @transform_8(%arg0: i32) -> (i32, i32) {
    %c0_i32 = arith.constant 0 : i32
    %c0_i32_0 = arith.constant 0 : i32
    %c0_i32_1 = arith.constant 0 : i32
    return %c0_i32, %c0_i32_0 : i32, i32
  }
  func.func @transform_9(%arg0: i32) -> (i32, i32) {
    %c0_i32 = arith.constant 0 : i32
    %c0_i32_0 = arith.constant 0 : i32
    %c0_i32_1 = arith.constant 0 : i32
    return %c0_i32, %c0_i32_0 : i32, i32
  }
  func.func @transform_10(%arg0: i32) -> (i32, i32) {
    %c0_i32 = arith.constant 0 : i32
    %c0_i32_0 = arith.constant 0 : i32
    %c0_i32_1 = arith.constant 0 : i32
    return %c0_i32, %c0_i32_0 : i32, i32
  }
  func.func @transform_11(%arg0: i32) -> (i32, i32) {
    %c0_i32 = arith.constant 0 : i32
    %c0_i32_0 = arith.constant 0 : i32
    %c0_i32_1 = arith.constant 0 : i32
    return %c0_i32, %c0_i32_0 : i32, i32
  }
  func.func @transform_12(%arg0: i32) -> (i32, i32, i32) {
    %c0_i32 = arith.constant 0 : i32
    %c0_i32_0 = arith.constant 0 : i32
    %c0_i32_1 = arith.constant 0 : i32
    %c0_i32_2 = arith.constant 0 : i32
    return %c0_i32, %c0_i32_0, %c0_i32_1 : i32, i32, i32
  }
  func.func @transform_13(%arg0: i32) -> (i32, i32) {
    %c0_i32 = arith.constant 0 : i32
    %c0_i32_0 = arith.constant 0 : i32
    %c0_i32_1 = arith.constant 0 : i32
    return %c0_i32, %c0_i32_0 : i32, i32
  }
  func.func @transform_14(%arg0: i32) -> (i32, i32) {
    %c0_i32 = arith.constant 0 : i32
    %c0_i32_0 = arith.constant 0 : i32
    %c0_i32_1 = arith.constant 0 : i32
    return %c0_i32, %c0_i32_0 : i32, i32
  }
  func.func @transform_15(%arg0: i32) -> (i32, i32) {
    %c0_i32 = arith.constant 0 : i32
    %c0_i32_0 = arith.constant 0 : i32
    %c0_i32_1 = arith.constant 0 : i32
    return %c0_i32, %c0_i32_0 : i32, i32
  }
  func.func @transform_16(%arg0: i32) -> (i32, i32, i32) {
    %c0_i32 = arith.constant 0 : i32
    %c0_i32_0 = arith.constant 0 : i32
    %c0_i32_1 = arith.constant 0 : i32
    return %arg0, %c0_i32, %c0_i32_0 : i32, i32, i32
  }
}

</mosaic_0001>

<bundles_post_ra>
// kernel: tpu_custom_call.1
= control target key start
LH: loop header
LB: loop body
LE: loop exit
PB: predicated region body
PF: predicated region fallthrough
CT: control target
= control target key end

     0   :  { %s15416_s0 = inlined_call_operand.vmem [shape: bf16[2,256,128], index: 0, kind: input, shape index: {}]   ;;  %s15417_s1 = inlined_call_operand.vmem [shape: f32[2,1,128], index: 1, kind: input, shape index: {}]   ;;  %s15418_s2 = inlined_call_operand.vmem [shape: f32[128,2], index: 2, kind: input, shape index: {}]   ;;  %s15419_s3 = inlined_call_operand.vmem [shape: f32[2,128], index: 3, kind: input, shape index: {}]   ;;  %s15420_s4 = inlined_call_operand.vmem [shape: f32[1,128], index: 4, kind: input, shape index: {}]   ;;  %s15421_s5 = inlined_call_operand.vmem [shape: f32[1,128], index: 5, kind: input, shape index: {}]   ;;  %s15422_s6 = inlined_call_operand.hbm [shape: bf16[3,384,128], index: 6, kind: input, shape index: {}]   ;;  %s15423_s7 = inlined_call_operand.vmem [shape: f32[1,128], index: 7, kind: input, shape index: {}]   ;;  %s15424_s8 = inlined_call_operand.vmem [shape: f32[128,2], index: 8, kind: input, shape index: {}]   ;;  %s15425_s9 = inlined_call_operand.vmem [shape: f32[2,128], index: 9, kind: input, shape index: {}]   ;;  %s15426_s10 = inlined_call_operand.vmem [shape: f32[1,128], index: 10, kind: input, shape index: {}]   ;;  %s15427_s11 = inlined_call_operand.vmem [shape: f32[1,128], index: 11, kind: input, shape index: {}]   ;;  %s15428_s12 = inlined_call_operand.hbm [shape: bf16[3,384,128], index: 12, kind: input, shape index: {}]   ;;  %s15429_s13 = inlined_call_operand.vmem [shape: f32[1,128], index: 13, kind: input, shape index: {}]   ;;  %s15430_s14 = inlined_call_operand.hbm [shape: bf16[128,128], index: 14, kind: input, shape index: {}]   ;;  %s15431_s15 = inlined_call_operand.vmem [shape: f32[1,128], index: 15, kind: input, shape index: {}]   ;;  %s15432_s16 = inlined_call_operand.hbm [shape: bf16[2,256,128], index: 16, kind: output, shape index: {}]  }
   0x1   :  { %15550 = sst [smem:[#allocation65_spill]] %s15416_s0 }
   0x2   :  { %15551 = sst [smem:[#allocation66_spill]] %s15429_s13 }
   0x3   :  { %15552 = sst [smem:[#allocation67_spill]] %s15431_s15 }
   0x4   :  { %15553 = sst [smem:[#allocation68_spill]] %s15432_s16 }
   0x5   :  { %21 = vsyncpa [#allocation5], 0 }
   0x6   :  { %22 = vsyncpa [#allocation8], 0 }
   0x7   :  { %23 = vsyncpa [#allocation6], 0 }
   0x8   :  { %25 = vsyncpa [#allocation6 + $0x1], 0  ;;  %s11510_s21 = smov 0   ;;  %s11512_s22 = smov 0  }
   0x9   :  { %s11514_s23 = smov 0   ;;  %s11516_s24 = smov 0  }
   0xa LB: > { %15554 = sst [smem:[#allocation14_spill]] %s11398_s21  ;;  %s11531_s25 = sadd.s32 4294967295, %s11410_s24   ;;  %s11410_s24 = sphi %s11516_s24, %s15810_s24   ;;  %s11406_s23 = sphi %s11514_s23, %s15813_s23   ;;  %s11402_s22 = sphi %s11512_s22, %s15812_s22   ;;  %s11398_s21 = sphi %s11510_s21, %s15811_s21  }
   0xb   : > { %15555 = sst [smem:[#allocation15_spill]] %s11402_s22  ;;  %s8411_s26 = sadd.s32 4294967294, %s11410_s24  }
   0xc   : > { %15556 = sst [smem:[#allocation16_spill]] %s11406_s23  ;;  %s11535_s27 = sadd.s32 1, %s11410_s24  }
   0xd   : > { %15557 = sst [smem:[#allocation17_spill]] %s11410_s24  ;;  %s384_s28 = sadd.s32 1, %s11406_s23 }
   0xe   : > { %15558 = sst [smem:[#allocation18_spill]] %s11535_s27  ;;  %s381_s29 = ssub.s32 %s11410_s24, %s11535_s27 }
   0xf   : > { %p394_p0 = scmp.ne.s32.totalorder %s11406_s23, %s11402_s22  ;;  %p382_p1 = scmp.eq.s32.totalorder %s381_s29, 0 }
  0x10   : > { %p395_p2 = scmp.eq.s32.totalorder %s11531_s25, 1  ;;  %p400_p3 = scmp.ne.s32.totalorder %s11402_s22, %s11398_s21 }
  0x11   : > { %p401_p4 = scmp.eq.s32.totalorder %s8411_s26, 1  ;;  %p8412_p7 = scmp.ge.s32.totalorder %s11410_s24, 1 }
  0x12   : > { %s11546_s30 = scalar_select %p382_p1, %s11406_s23, %s384_s28  }
  0x13   : > { %p11548_p5 = por %p395_p2, %p394_p0  ;;  %p11552_p6 = por %p401_p4, %p400_p3 }
  0x14   : > { %15559 = sst [smem:[#allocation19_spill]] %s11546_s30  ;;  %p408_p8 = scmp.lt.s32.totalorder %s11410_s24, 3 }
  0x15   : > { %s15560_s0 = scalar_select %p11548_p5, 1, 0 }
  0x16   : > { %s15562_s17 = scalar_select %p11552_p6, 1, 0 }
  0x17   : > { %15561 = sst [smem:[#allocation20_spill]] %s15560_s0  ;;  %p15440_p9 = scmp.eq.s32.totalorder %s11531_s25, 0 }
  0x18   : > { %15563 = sst [smem:[#allocation21_spill]] %s15562_s17  ;;  %p11559_p10 = pnand %p8412_p7, %p408_p8 }
  0x19   : > { %s11412_s19 = smov [#allocation7]   ;;  %s11413_s28 = smov [#allocation4]  }
  0x1a   : > { %s15564_s18 = scalar_select %p11559_p10, 1, 0 }
  0x1b   : > { %p10728_p11 = pneg %p11559_p10  ;;  %s460_s20 = sshll.u32 %s11412_s19, 4  ;;  %s11565_s20 = int_to_ptr.vmem [resolvable:$true] %s460_s20 }
  0x1c   : > { %s432_s29 = sshll.u32 %s11413_s28, 4  ;;  %s11414_s30 = smov [#allocation9]   ;;  %s11573_s29 = int_to_ptr.vmem [resolvable:$true] %s432_s29 }
  0x1d   : > { %p11569_p12 = pnand %p15440_p9, %p10728_p11  ;;  %s11575_s23 = sshll.u32 %s11414_s30, 4  ;;  %s477_s23 = int_to_ptr.vmem [resolvable:$true] %s11575_s23 }
  0x1e   : > { %s11256_s21 = scalar_lea.hbm %s15428_s12, 9216 }
  0x1f   : > { %p11257_p13 = scmp.ne.s32.totalorder %s15428_s12, %s11256_s21  ;;  %p11585_p0 = pneg %p11569_p12 }
  0x20   : > { %p11263_p3 = scmp.lt.u32.totalorder %s11256_s21, %s15428_s12 }
  0x21   : > { %p11259_p1 = pnand %p11585_p0, %p11257_p13 }
  0x23   : > { %p11260_p2 = pneg %p11259_p1 }
  0x25   : > { %p11265_p4 = pnand %p11263_p3, %p11260_p2 }
  0x27   : > { %11268 = shalt.err (!%p11265_p4)
}
  0x28   : > { %s11269_s24 = scalar_lea.vmem %s11565_s20, 9216  ;;  %p11277_p9 = scmp.lt.s32.totalorder %s11565_s20, %s11565_s20 }
  0x29   : > { %p11270_p7 = scmp.ne.s32.totalorder %s11565_s20, %s11269_s24  ;;  %p11278_p6 = scmp.lt.s32.totalorder %s11269_s24, %s11269_s24 }
  0x2b   : > { %p11272_p8 = pnand %p11270_p7, %p11585_p0  ;;  %p11279_p13 = por %p11278_p6, %p11277_p9 }
  0x2d   : > { %p11273_p11 = pneg %p11272_p8 }
  0x2f   : > { %p11280_p1 = pnand %p11279_p13, %p11273_p11 }
  0x31   : > { %11283 = shalt.err (!%p11280_p1)
}
  0x32   : > { %s11415_s27 = smov 64   ;;  %s11416_s21 = smov 4  }
  0x33   : > { %10734 = dma.hbm_to_vmem [thread:$0]  (!%p11569_p12), %s15428_s12, 9216, %s11565_s20, [#allocation8], %s11415_s27, %s11415_s27, %s11416_s21  }
  0x34   : > { %s11284_s24 = scalar_lea.hbm %s15422_s6, 9216 }
  0x35   : > { %p11285_p6 = scmp.ne.s32.totalorder %s15422_s6, %s11284_s24  ;;  %p11291_p3 = scmp.lt.u32.totalorder %s11284_s24, %s15422_s6 }
  0x37   : > { %p11287_p9 = pnand %p11285_p6, %p11585_p0 }
  0x39   : > { %p11288_p2 = pneg %p11287_p9 }
  0x3b   : > { %p11293_p4 = pnand %p11291_p3, %p11288_p2 }
  0x3d   : > { %11296 = shalt.err (!%p11293_p4)
}
  0x3e   : > { %s11297_s20 = scalar_lea.vmem %s11573_s29, 9216  ;;  %p11305_p13 = scmp.lt.s32.totalorder %s11573_s29, %s11573_s29 }
  0x3f   : > { %p11298_p7 = scmp.ne.s32.totalorder %s11573_s29, %s11297_s20  ;;  %p11306_p1 = scmp.lt.s32.totalorder %s11297_s20, %s11297_s20 }
  0x41   : > { %p11300_p8 = pnand %p11298_p7, %p11585_p0  ;;  %p11307_p6 = por %p11306_p1, %p11305_p13 }
  0x43   : > { %p11301_p11 = pneg %p11300_p8 }
  0x45   : > { %p11308_p9 = pnand %p11307_p6, %p11301_p11 }
  0x47   : > { %11311 = shalt.err (!%p11308_p9)
}
  0x48   : > { %10731 = dma.hbm_to_vmem [thread:$0]  (!%p11569_p12), %s15422_s6, 9216, %s11573_s29, [#allocation5], %s11415_s27, %s11415_s27, %s11416_s21  }
  0x49   : > { %s11312_s17 = scalar_lea.hbm %s15430_s14, 1024 }
  0x4a   : > { %p11313_p2 = scmp.ne.s32.totalorder %s15430_s14, %s11312_s17  ;;  %p11319_p7 = scmp.lt.u32.totalorder %s11312_s17, %s15430_s14 }
  0x4c   : > { %p11315_p3 = pnand %p11313_p2, %p11585_p0 }
  0x4e   : > { %p11316_p4 = pneg %p11315_p3 }
  0x50   : > { %p11321_p8 = pnand %p11319_p7, %p11316_p4 }
  0x52   : > { %11324 = shalt.err (!%p11321_p8)
}
  0x53   : > { %s11325_s20 = scalar_lea.vmem %s477_s23, 1024  ;;  %p11333_p6 = scmp.lt.s32.totalorder %s477_s23, %s477_s23 }
  0x54   : > { %p11326_p11 = scmp.ne.s32.totalorder %s477_s23, %s11325_s20  ;;  %p11334_p9 = scmp.lt.s32.totalorder %s11325_s20, %s11325_s20 }
  0x56   : > { %p11328_p13 = pnand %p11326_p11, %p11585_p0  ;;  %p11335_p5 = por %p11334_p9, %p11333_p6 }
  0x58   : > { %p11329_p1 = pneg %p11328_p13 }
  0x5a   : > { %p11336_p10 = pnand %p11335_p5, %p11329_p1 }
  0x5c   : > { %11339 = shalt.err (!%p11336_p10)
}
  0x5d   : > { %10737 = dma.hbm_to_vmem [thread:$0]  (!%p11569_p12), %s15430_s14, 1024, %s477_s23, [#allocation8], %s11415_s27, %s11415_s27, %s11416_s21  }
  0x5e   : > { %p15567_p2 = scmp.ne.s32.totalorder %s15564_s18, 0 }
  0x60   : > { %509 = sbr.rel (%p15567_p2) target bundleno = 3478 (0xd96), region = 84 }
  0x67   : > { %p15568_p0 = scmp.eq.s32.totalorder %s11531_s25, 0 }
  0x69   : > { %11385 = dma.done.wait (%p15568_p0), [#allocation5], 9216   ;;  %p15569_p3 = pmov %p15568_p0 }
  0x6a   : > { %p15570_p5 = pmov %p15568_p0 }
  0x6b   : > { %11387 = vsyncadd (%p15569_p3), [#allocation5], 4294958080 }
  0x6c   : > { %11389 = dma.done.wait (%p15570_p5), [#allocation8], 10240   ;;  %p15571_p10 = pmov %p15568_p0 }
  0x6d   : > { %p570_p4 = scmp.lt.s32.totalorder %s11531_s25, 1  ;;  %v15449_v0 = vmov 0.0|0.0   ;;  %vm11418_vm0 = vmmov 0   ;;  %v15447_v1 = vmov 0.0   ;;  %v1126_v2 = vld [vmem:[%s15418_s2] sm:$0xff]  ;;  %v1127_v3 = vld [vmem:[%s15418_s2 + $0x8] sm:$0xff] }
  0x6e   : > { %11391 = vsyncadd (%p15571_p10), [#allocation8], 4294957056  ;;  %10218 = vmatprep.subr.bf16.mxu0 %v15449_v0  ;;  %9754 = vmatprep.mubr.msk.f32.mxu0 %vm11418_vm0, %v15447_v1  ;;  %v1128_v4 = vld [vmem:[%s15418_s2 + $0x10] sm:$0xff]  ;;  %v10219_v5 = vpack.c.bf16 %v1127_v3, %v1126_v2  ;;  %v1129_v6 = vld [vmem:[%s15418_s2 + $0x18] sm:$0xff]  ;;  %s15572_s13 = sld [smem:[#allocation65_spill]]  ;;  %vm1259_vm1 = vcmask 1041408  }
  0x6f   : > { %10242 = vmatprep.subr.bf16.mxu1 %v15449_v0  ;;  %9794 = vmatprep.mubr.msk.f32.mxu1 %vm11418_vm0, %v15447_v1  ;;  %s11675_s16 = scalar_select %p570_p4, %s11531_s25, 1  ;;  %v10222_v7 = vpack.c.bf16 %v1129_v6, %v1128_v4  ;;  %v1130_v8 = vld [vmem:[%s15418_s2 + $0x20] sm:$0xff]  ;;  %v1131_v9 = vld [vmem:[%s15418_s2 + $0x28] sm:$0xff]  ;;  %v1132_v12 = vld [vmem:[%s15418_s2 + $0x30] sm:$0xff]  ;;  %vm1255_vm2 = vcmask 15360   ;;  %vm11421_vm6 = vmmov 1  }
  0x70   : > { %10220 = vmatpush3.bf16.msra.mxu0 %v10219_v5  ;;  %10244 = vmatpush3.bf16.msra.mxu1 %v10219_v5  ;;  %v10225_v10 = vpack.c.bf16 %v1131_v9, %v1130_v8  ;;  %v1133_v13 = vld [vmem:[%s15418_s2 + $0x38] sm:$0xff]  ;;  %v1134_v15 = vld [vmem:[%s15418_s2 + $0x40] sm:$0xff]  ;;  %v1135_v16 = vld [vmem:[%s15418_s2 + $0x48] sm:$0xff]  ;;  %s15800_s30 = sld [smem:[#allocation66_spill]]  ;;  %s15804_s0 = sld [smem:[#allocation68_spill]] }
  0x71   : > { %s8677_s17 = sshll.u32 %s11675_s16, 7  ;;  %10221 = vmatprep.subr.bf16.mxu0 %v15449_v0  ;;  %10245 = vmatprep.subr.bf16.mxu1 %v15449_v0  ;;  %v10228_v19 = vpack.c.bf16 %v1133_v13, %v1132_v12  ;;  %v1136_v22 = vld [vmem:[%s15418_s2 + $0x50] sm:$0xff]  ;;  %v1137_v23 = vld [vmem:[%s15418_s2 + $0x58] sm:$0xff]  ;;  %v10231_v26 = vpack.c.bf16 %v1135_v16, %v1134_v15  ;;  %v1138_v30 = vld [vmem:[%s15418_s2 + $0x60] sm:$0xff]  ;;  %s577_s27 = scalar_lea.vmem %s15417_s1, %s11675_s16 }
  0x72   : > { %v1139_v31 = vld [vmem:[%s15418_s2 + $0x68] sm:$0xff]  ;;  %v10234_v34 = vpack.c.bf16 %v1137_v23, %v1136_v22  ;;  %v1140_v38 = vld [vmem:[%s15418_s2 + $0x70] sm:$0xff]  ;;  %v1141_v39 = vld [vmem:[%s15418_s2 + $0x78] sm:$0xff]  ;;  %s8710_s16 = sshll.u32 %s11531_s25, 11  ;;  %s11422_s28 = smov [#allocation10]  }
  0x73   : > { %v10237_v42 = vpack.c.bf16 %v1139_v31, %v1138_v30  ;;  %v10240_v48 = vpack.c.bf16 %v1141_v39, %v1140_v38  ;;  %vm2039_vm7 = vmpackc.low %vm11421_vm6, %vm11421_vm6 }
  0x74   : > { %s11700_s23 = scalar_lea.vmem %s15572_s13, %s8677_s17  ;;  %10223 = vmatpush3.bf16.msra.mxu0 %v10222_v7  ;;  %10247 = vmatpush3.bf16.msra.mxu1 %v10222_v7  ;;  %s15802_s13 = sld [smem:[#allocation67_spill]] }
  0x75   : > { %v11704_v11 = vld [vmem:[%s11700_s23] sm:$0xff]   ;;  %10224 = vmatprep.subr.bf16.mxu0 %v15449_v0  ;;  %10248 = vmatprep.subr.bf16.mxu1 %v15449_v0  ;;  %v11715_v14 = vld [vmem:[%s11700_s23 + $0x8] sm:$0xff]   ;;  %v11726_v20 = vld [vmem:[%s11700_s23 + $0x10] sm:$0xff]  }
  0x76   : > { %v613_v17 = vunpack.c.l.bf16 %v11704_v11  ;;  %v614_v18 = vunpack.c.h.bf16 %v11704_v11  ;;  %v615_v21 = vunpack.c.l.bf16 %v11715_v14  ;;  %v616_v24 = vunpack.c.h.bf16 %v11715_v14  ;;  %v11743_v27 = vld [vmem:[%s11700_s23 + $0x18] sm:$0xff]   ;;  %v11760_v35 = vld [vmem:[%s11700_s23 + $0x20] sm:$0xff]   ;;  %v11777_v43 = vld [vmem:[%s11700_s23 + $0x28] sm:$0xff]   ;;  %s15367_s17 = scalar_lea.hbm %s15804_s0, %s8710_s16 }
  0x77   : > { %v617_v28 = vunpack.c.l.bf16 %v11726_v20  ;;  %v618_v32 = vunpack.c.h.bf16 %v11726_v20  ;;  %v619_v36 = vunpack.c.l.bf16 %v11743_v27  ;;  %v620_v40 = vunpack.c.h.bf16 %v11743_v27  ;;  %v11788_v49 = vld [vmem:[%s11700_s23 + $0x30] sm:$0xff]   ;;  %v11799_v54 = vld [vmem:[%s11700_s23 + $0x38] sm:$0xff]   ;;  %v11809_v59 = vld [vmem:[%s11700_s23 + $0x40] sm:$0xff]  }
  0x78   : > { %10226 = vmatpush3.bf16.msra.mxu0 %v10225_v10  ;;  %10250 = vmatpush3.bf16.msra.mxu1 %v10225_v10  ;;  %v1146_v25 = vadd.f32 %v614_v18, %v613_v17  ;;  %v621_v44 = vunpack.c.l.bf16 %v11760_v35  ;;  %v622_v46 = vunpack.c.h.bf16 %v11760_v35  ;;  %v623_v50 = vunpack.c.l.bf16 %v11777_v43  ;;  %v11818_v2 = vld [vmem:[%s11700_s23 + $0x48] sm:$0xff]   ;;  %v11827_v7 = vld [vmem:[%s11700_s23 + $0x50] sm:$0xff]   ;;  %v11836_v13 = vld [vmem:[%s11700_s23 + $0x58] sm:$0xff]  }
  0x79   : > { %10227 = vmatprep.subr.bf16.mxu0 %v15449_v0  ;;  %10251 = vmatprep.subr.bf16.mxu1 %v15449_v0  ;;  %v624_v52 = vunpack.c.h.bf16 %v11777_v43  ;;  %v625_v55 = vunpack.c.l.bf16 %v11788_v49  ;;  %v626_v57 = vunpack.c.h.bf16 %v11788_v49  ;;  %v627_v60 = vunpack.c.l.bf16 %v11799_v54  ;;  %v11845_v23 = vld [vmem:[%s11700_s23 + $0x60] sm:$0xff]   ;;  %v11854_v31 = vld [vmem:[%s11700_s23 + $0x68] sm:$0xff]   ;;  %v11863_v39 = vld [vmem:[%s11700_s23 + $0x70] sm:$0xff]  }
  0x7a   : > { %v1147_v29 = vadd.f32 %v1146_v25, %v615_v21  ;;  %v628_v62 = vunpack.c.h.bf16 %v11799_v54  ;;  %v629_v3 = vunpack.c.l.bf16 %v11809_v59  ;;  %v630_v5 = vunpack.c.h.bf16 %v11809_v59 }
  0x7b   : > { %v631_v8 = vunpack.c.l.bf16 %v11818_v2  ;;  %v632_v10 = vunpack.c.h.bf16 %v11818_v2  ;;  %v633_v15 = vunpack.c.l.bf16 %v11827_v7  ;;  %v635_v25 = vunpack.c.l.bf16 %v11836_v13 }
  0x7c   : > { %10229 = vmatpush3.bf16.msra.mxu0 %v10228_v19  ;;  %10253 = vmatpush3.bf16.msra.mxu1 %v10228_v19  ;;  %v1148_v33 = vadd.f32 %v1147_v29, %v616_v24  ;;  %v634_v19 = vunpack.c.h.bf16 %v11827_v7  ;;  %v636_v29 = vunpack.c.h.bf16 %v11836_v13 }
  0x7d   : > { %10230 = vmatprep.subr.bf16.mxu0 %v15449_v0  ;;  %10254 = vmatprep.subr.bf16.mxu1 %v15449_v0 }
  0x7e   : > { %v1149_v37 = vadd.f32 %v1148_v33, %v617_v28  ;;  %v637_v33 = vunpack.c.l.bf16 %v11845_v23 }
  0x80   : > { %10232 = vmatpush3.bf16.msra.mxu0 %v10231_v26  ;;  %10256 = vmatpush3.bf16.msra.mxu1 %v10231_v26  ;;  %v1150_v41 = vadd.f32 %v1149_v37, %v618_v32  ;;  %v638_v37 = vunpack.c.h.bf16 %v11845_v23 }
  0x81   : > { %10233 = vmatprep.subr.bf16.mxu0 %v15449_v0  ;;  %10257 = vmatprep.subr.bf16.mxu1 %v15449_v0 }
  0x82   : > { %v1151_v45 = vadd.f32 %v1150_v41, %v619_v36  ;;  %v639_v41 = vunpack.c.l.bf16 %v11854_v31 }
  0x84   : > { %10235 = vmatpush3.bf16.msra.mxu0 %v10234_v34  ;;  %10259 = vmatpush3.bf16.msra.mxu1 %v10234_v34  ;;  %v1152_v47 = vadd.f32 %v1151_v45, %v620_v40  ;;  %v640_v45 = vunpack.c.h.bf16 %v11854_v31 }
  0x85   : > { %10236 = vmatprep.subr.bf16.mxu0 %v15449_v0  ;;  %10260 = vmatprep.subr.bf16.mxu1 %v15449_v0 }
  0x86   : > { %v1153_v51 = vadd.f32 %v1152_v47, %v621_v44 }
  0x88   : > { %10238 = vmatpush3.bf16.msra.mxu0 %v10237_v42  ;;  %10262 = vmatpush3.bf16.msra.mxu1 %v10237_v42  ;;  %v1154_v53 = vadd.f32 %v1153_v51, %v622_v46  ;;  %v641_v51 = vunpack.c.l.bf16 %v11863_v39 }
  0x89   : > { %10239 = vmatprep.subr.bf16.mxu0 %v15449_v0  ;;  %10263 = vmatprep.subr.bf16.mxu1 %v15449_v0 }
  0x8a   : > { %v1155_v56 = vadd.f32 %v1154_v53, %v623_v50 }
  0x8c   : > { %10241 = vmatpush3.bf16.msra.mxu0 %v10240_v48  ;;  %10265 = vmatpush3.bf16.msra.mxu1 %v10240_v48  ;;  %v1156_v58 = vadd.f32 %v1155_v56, %v624_v52  ;;  %v11872_v48 = vld [vmem:[%s11700_s23 + $0x78] sm:$0xff]   ;;  %v642_v56 = vunpack.c.h.bf16 %v11863_v39 }
  0x8d   : > { %9757 = vmatprep.subr.mxu0 %v15447_v1 }
  0x8e   : > { %v1157_v61 = vadd.f32 %v1156_v58, %v625_v55 }
  0x90   : > { %v1158_v63 = vadd.f32 %v1157_v61, %v626_v57  ;;  %v643_v61 = vunpack.c.l.bf16 %v11872_v48 }
  0x92   : > { %v1159_v4 = vadd.f32 %v1158_v63, %v627_v60 }
  0x94   : > { %v1160_v6 = vadd.f32 %v1159_v4, %v628_v62  ;;  %v644_v4 = vunpack.c.h.bf16 %v11872_v48 }
  0x96   : > { %v1161_v9 = vadd.f32 %v1160_v6, %v629_v3 }
  0x98   : > { %v1162_v12 = vadd.f32 %v1161_v9, %v630_v5 }
  0x9a   : > { %v1163_v16 = vadd.f32 %v1162_v12, %v631_v8 }
  0x9c   : > { %v1164_v22 = vadd.f32 %v1163_v16, %v632_v10 }
  0x9e   : > { %v1165_v26 = vadd.f32 %v1164_v22, %v633_v15 }
  0xa0   : > { %v1166_v30 = vadd.f32 %v1165_v26, %v634_v19 }
  0xa2   : > { %v1167_v34 = vadd.f32 %v1166_v30, %v635_v25 }
  0xa4   : > { %v1168_v38 = vadd.f32 %v1167_v34, %v636_v29 }
  0xa6   : > { %v1169_v42 = vadd.f32 %v1168_v38, %v637_v33  ;;  %v1142_v38 = vld [vmem:[%s15419_s3] sm:$0x3] }
  0xa8   : > { %v1170_v47 = vadd.f32 %v1169_v42, %v638_v37 }
  0xaa   : > { %v1171_v53 = vadd.f32 %v1170_v47, %v639_v41 }
  0xac   : > { %v1172_v58 = vadd.f32 %v1171_v53, %v640_v45 }
  0xae   : > { %v1173_v63 = vadd.f32 %v1172_v58, %v641_v51 }
  0xb0   : > { %v1174_v6 = vadd.f32 %v1173_v63, %v642_v56  ;;  %v645_v63 = vlaneseq }
  0xb2   : > { %v1175_v9 = vadd.f32 %v1174_v6, %v643_v61  ;;  %v11901_v6 = vshrl.u32 %v645_v63, 7 }
  0xb4   : > { %v1176_v12 = vadd.f32 %v1175_v9, %v644_v4  ;;  %15573 = vst [vmem:[#allocation22_spill] sm:$0xff] %v11901_v6 }
  0xb6   : > { %v1177_v16 = vrot.slane %v1176_v12, 4 }
  0xb8   : > { %v1178_v22 = vadd.f32 %v1177_v16, %v1176_v12  ;;  %v11904_v16 = vsub.s32 0, %v11901_v6 }
  0xba   : > { %v1179_v26 = vrot.slane %v1178_v22, 2  ;;  %15574 = vst [vmem:[#allocation23_spill] sm:$0xff] %v11904_v16 }
  0xbc   : > { %v1180_v30 = vadd.f32 %v1179_v26, %v1178_v22 }
  0xbe   : > { %v1181_v34 = vrot.slane %v1180_v30, 1 }
  0xc0   : > { %v1182_v42 = vadd.f32 %v1181_v34, %v1180_v30 }
  0xc2   : > { %9755 = vmatmul.mubr.f32.vlgmr.msra.gmra.mrb[0].mxu0 %v1182_v42 }
  0xc3   : > { %9758 = vmatpush3.msk.msra.mxu0 %vm1259_vm1, %v1142_v38  ;;  %9759 = vmatprep.mubr.msk.f32.mxu0 %vm11418_vm0, %v15447_v1 }
  0xc4   : > { %9797 = vmatprep.subr.mxu0 %v15447_v1 }
 0x195   : > { %v1249_v47 = vpop.f32.mrb[0].mxu0 }
 0x196   : > { %v1254_v53 = vmul.f32 0.001953125, %v1249_v47  ;;  %v9756_v58 = vpop.f32.mrb[1].mxu0 }
 0x198   : > { %9760 = vmatmul.mubr.msk.f32.vlgmr.msra.gmra.mrb[2].mxu0 %vm1255_vm2, %v1254_v53 }
 0x199   : > { %9798 = vmatpush3.msk.msra.mxu0 %vm1259_vm1, %v1142_v38  ;;  %9799 = vmatprep.mubr.msk.f32.mxu0 %vm11418_vm0, %v15447_v1 }
 0x26b   : > { %v1329_v9 = vpop.f32.mrb[2].mxu0 }
 0x26c   : > { %v9761_v12 = vpop.f32.mrb[3].mxu0  ;;  %v11907_v22 = vrot.slane %v1329_v9, %v11904_v16 }
 0x26e   : > { %v11912_v26 = vsub.f32 %v613_v17, %v11907_v22  ;;  %v11917_v30 = vsub.f32 %v614_v18, %v11907_v22  ;;  %v11922_v34 = vsub.f32 %v615_v21, %v11907_v22  ;;  %v11931_v17 = vsub.f32 %v616_v24, %v11907_v22 }
 0x26f   : > { %v11936_v11 = vsub.f32 %v617_v28, %v11907_v22  ;;  %v11943_v47 = vsub.f32 %v618_v32, %v11907_v22  ;;  %v11950_v24 = vsub.f32 %v619_v36, %v11907_v22  ;;  %v11957_v63 = vsub.f32 %v620_v40, %v11907_v22 }
 0x270   : > { %v1369_v38 = vmul.f32 %v11912_v26, %v11912_v26  ;;  %v1370_v42 = vmul.f32 %v11917_v30, %v11917_v30  ;;  %v1371_v18 = vmul.f32 %v11922_v34, %v11922_v34  ;;  %v1372_v53 = vmul.f32 %v11931_v17, %v11931_v17 }
 0x271   : > { %15575 = vst [vmem:[#allocation24_spill] sm:$0xff] %v11936_v11  ;;  %15576 = vst [vmem:[#allocation25_spill] sm:$0xff] %v11943_v47  ;;  %v1373_v28 = vmul.f32 %v11936_v11, %v11936_v11  ;;  %v1374_v20 = vmul.f32 %v11943_v47, %v11943_v47  ;;  %v11964_v9 = vsub.f32 %v621_v44, %v11907_v22 }
 0x272   : > { %v1401_v21 = vadd.f32 %v1370_v42, %v1369_v38  ;;  %15577 = vst [vmem:[#allocation26_spill] sm:$0xff] %v11950_v24  ;;  %15578 = vst [vmem:[#allocation27_spill] sm:$0xff] %v11957_v63  ;;  %v1375_v36 = vmul.f32 %v11950_v24, %v11950_v24  ;;  %v11971_v38 = vsub.f32 %v622_v46, %v11907_v22 }
 0x273   : > { %15579 = vst [vmem:[#allocation28_spill] sm:$0xff] %v11964_v9  ;;  %v1376_v27 = vmul.f32 %v11957_v63, %v11957_v63  ;;  %v11978_v42 = vsub.f32 %v623_v50, %v11907_v22  ;;  %v1377_v44 = vmul.f32 %v11964_v9, %v11964_v9 }
 0x274   : > { %v1402_v14 = vadd.f32 %v1401_v21, %v1371_v18  ;;  %15580 = vst [vmem:[#allocation29_spill] sm:$0xff] %v11971_v38  ;;  %v11985_v21 = vsub.f32 %v624_v52, %v11907_v22  ;;  %v1378_v35 = vmul.f32 %v11971_v38, %v11971_v38 }
 0x275   : > { %15581 = vst [vmem:[#allocation30_spill] sm:$0xff] %v11978_v42  ;;  %v1379_v50 = vmul.f32 %v11978_v42, %v11978_v42 }
 0x276   : > { %v1403_v58 = vadd.f32 %v1402_v14, %v1372_v53  ;;  %15582 = vst [vmem:[#allocation31_spill] sm:$0xff] %v11985_v21  ;;  %v11992_v53 = vsub.f32 %v625_v55, %v11907_v22  ;;  %v1380_v43 = vmul.f32 %v11985_v21, %v11985_v21 }
 0x278   : > { %v1404_v32 = vadd.f32 %v1403_v58, %v1373_v28  ;;  %v11999_v28 = vsub.f32 %v626_v57, %v11907_v22  ;;  %v12006_v58 = vsub.f32 %v627_v60, %v11907_v22  ;;  %v1381_v55 = vmul.f32 %v11992_v53, %v11992_v53 }
 0x27a   : > { %v1405_v12 = vadd.f32 %v1404_v32, %v1374_v20  ;;  %v12013_v32 = vsub.f32 %v628_v62, %v11907_v22  ;;  %v1382_v49 = vmul.f32 %v11999_v28, %v11999_v28  ;;  %v1383_v60 = vmul.f32 %v12006_v58, %v12006_v58 }
 0x27c   : > { %v1406_v40 = vadd.f32 %v1405_v12, %v1375_v36  ;;  %v12020_v36 = vsub.f32 %v629_v3, %v11907_v22  ;;  %v1384_v54 = vmul.f32 %v12013_v32, %v12013_v32 }
 0x27e   : > { %v1407_v18 = vadd.f32 %v1406_v40, %v1376_v27  ;;  %v12027_v27 = vsub.f32 %v630_v5, %v11907_v22  ;;  %v12034_v40 = vsub.f32 %v631_v8, %v11907_v22  ;;  %v1385_v3 = vmul.f32 %v12020_v36, %v12020_v36 }
 0x280   : > { %v1408_v46 = vadd.f32 %v1407_v18, %v1377_v44  ;;  %v12041_v18 = vsub.f32 %v632_v10, %v11907_v22  ;;  %v1386_v59 = vmul.f32 %v12027_v27, %v12027_v27  ;;  %v1387_v8 = vmul.f32 %v12034_v40, %v12034_v40 }
 0x282   : > { %v1409_v14 = vadd.f32 %v1408_v46, %v1378_v35  ;;  %v12048_v35 = vsub.f32 %v633_v15, %v11907_v22  ;;  %v1388_v2 = vmul.f32 %v12041_v18, %v12041_v18 }
 0x284   : > { %v1410_v52 = vadd.f32 %v1409_v14, %v1379_v50  ;;  %v12055_v50 = vsub.f32 %v634_v19, %v11907_v22  ;;  %v12062_v14 = vsub.f32 %v635_v25, %v11907_v22  ;;  %v1389_v15 = vmul.f32 %v12048_v35, %v12048_v35 }
 0x286   : > { %v1411_v20 = vadd.f32 %v1410_v52, %v1380_v43  ;;  %v12069_v52 = vsub.f32 %v636_v29, %v11907_v22  ;;  %v1390_v7 = vmul.f32 %v12055_v50, %v12055_v50  ;;  %v1391_v25 = vmul.f32 %v12062_v14, %v12062_v14 }
 0x288   : > { %v1412_v57 = vadd.f32 %v1411_v20, %v1381_v55  ;;  %v12076_v55 = vsub.f32 %v637_v33, %v11907_v22  ;;  %v1392_v13 = vmul.f32 %v12069_v52, %v12069_v52 }
 0x28a   : > { %v1413_v12 = vadd.f32 %v1412_v57, %v1382_v49  ;;  %v12083_v49 = vsub.f32 %v638_v37, %v11907_v22  ;;  %v12090_v57 = vsub.f32 %v639_v41, %v11907_v22  ;;  %v1393_v33 = vmul.f32 %v12076_v55, %v12076_v55 }
 0x28c   : > { %v1414_v62 = vadd.f32 %v1413_v12, %v1383_v60  ;;  %v12097_v12 = vsub.f32 %v640_v45, %v11907_v22  ;;  %v1394_v23 = vmul.f32 %v12083_v49, %v12083_v49  ;;  %v1395_v41 = vmul.f32 %v12090_v57, %v12090_v57 }
 0x28e   : > { %v1415_v44 = vadd.f32 %v1414_v62, %v1384_v54  ;;  %v12104_v54 = vsub.f32 %v641_v51, %v11907_v22  ;;  %v1396_v31 = vmul.f32 %v12097_v12, %v12097_v12 }
 0x290   : > { %v1416_v5 = vadd.f32 %v1415_v44, %v1385_v3  ;;  %v12111_v3 = vsub.f32 %v642_v56, %v11907_v22  ;;  %v12118_v44 = vsub.f32 %v643_v61, %v11907_v22  ;;  %v1397_v51 = vmul.f32 %v12104_v54, %v12104_v54 }
 0x292   : > { %v1417_v46 = vadd.f32 %v1416_v5, %v1386_v59  ;;  %v12125_v5 = vsub.f32 %v644_v4, %v11907_v22  ;;  %v1398_v39 = vmul.f32 %v12111_v3, %v12111_v3 }
 0x294   : > { %v1418_v10 = vadd.f32 %v1417_v46, %v1387_v8  ;;  %v1399_v8 = vmul.f32 %v12118_v44, %v12118_v44  ;;  %v1400_v61 = vmul.f32 %v12125_v5, %v12125_v5 }
 0x296   : > { %v1419_v43 = vadd.f32 %v1418_v10, %v1388_v2 }
 0x298   : > { %v1420_v19 = vadd.f32 %v1419_v43, %v1389_v15 }
 0x29a   : > { %v1421_v20 = vadd.f32 %v1420_v19, %v1390_v7 }
 0x29c   : > { %v1422_v29 = vadd.f32 %v1421_v20, %v1391_v25 }
 0x29e   : > { %v1423_v60 = vadd.f32 %v1422_v29, %v1392_v13  ;;  %v10793_v13 = vld [vmem:[#allocation4 + $0x40] sm:$0xff]  }
 0x29f   : > { %v10794_v29 = vld [vmem:[#allocation4] sm:$0xff]   ;;  %8844 = vmatprep.subr.bf16.mxu0 %v10793_v13  ;;  %10314 = vmatprep.subr.bf16.mxu1 %v10793_v13 }
 0x2a0   : > { %v1424_v37 = vadd.f32 %v1423_v60, %v1393_v33  ;;  %v10795_v33 = vld [vmem:[#allocation4 + $0x48] sm:$0xff]  }
 0x2a1   : > { %v10796_v60 = vld [vmem:[#allocation4 + $0x8] sm:$0xff]  }
 0x2a2   : > { %v1425_v62 = vadd.f32 %v1424_v37, %v1394_v23  ;;  %v10797_v23 = vld [vmem:[#allocation4 + $0x50] sm:$0xff]  }
 0x2a3   : > { %v10798_v37 = vld [vmem:[#allocation4 + $0x10] sm:$0xff]  }
 0x2a4   : > { %v1426_v45 = vadd.f32 %v1425_v62, %v1395_v41  ;;  %v10799_v41 = vld [vmem:[#allocation4 + $0x58] sm:$0xff]  }
 0x2a5   : > { %v10800_v62 = vld [vmem:[#allocation4 + $0x18] sm:$0xff]  }
 0x2a6   : > { %v1427_v59 = vadd.f32 %v1426_v45, %v1396_v31  ;;  %v10801_v31 = vld [vmem:[#allocation4 + $0x60] sm:$0xff]  }
 0x2a7   : > { %v10802_v45 = vld [vmem:[#allocation4 + $0x20] sm:$0xff]  }
 0x2a8   : > { %v1428_v56 = vadd.f32 %v1427_v59, %v1397_v51  ;;  %v10803_v51 = vld [vmem:[#allocation4 + $0x68] sm:$0xff]  }
 0x2a9   : > { %v10804_v59 = vld [vmem:[#allocation4 + $0x28] sm:$0xff]  }
 0x2aa   : > { %v1429_v46 = vadd.f32 %v1428_v56, %v1398_v39  ;;  %v10805_v39 = vld [vmem:[#allocation4 + $0x70] sm:$0xff]  }
 0x2ab   : > { %v10806_v56 = vld [vmem:[#allocation4 + $0x30] sm:$0xff]  }
 0x2ac   : > { %v1430_v2 = vadd.f32 %v1429_v46, %v1399_v8  ;;  %v15451_v8 = vmov 0   ;;  %v10807_v46 = vld [vmem:[#allocation4 + $0x78] sm:$0xff]  }
 0x2ad   : > { %1936 = vst [vmem:[#allocation2 + $0x8] sm:$0xff] %v15451_v8  ;;  %1939 = vst [vmem:[#allocation2 + $0x1a0] sm:$0xff] %v15451_v8 }
 0x2ae   : > { %v1431_v10 = vadd.f32 %v1430_v2, %v1400_v61  ;;  %5600 = vst [vmem:[#allocation3 + $0x8] sm:$0xff] %v15451_v8  ;;  %5603 = vst [vmem:[#allocation3 + $0x1a0] sm:$0xff] %v15451_v8  ;;  %v10808_v61 = vld [vmem:[#allocation4 + $0x38] sm:$0xff]   ;;  %v648_v2 = vadd.s32 16, %v11901_v6 }
 0x2b0   : > { %v1432_v15 = vrot.slane %v1431_v10, 4 }
 0x2b2   : > { %v1433_v43 = vadd.f32 %v1432_v15, %v1431_v10  ;;  %v682_v10 = vand.u32 15, %v11901_v6  ;;  %v658_v15 = vadd.s32 96, %v11901_v6 }
 0x2b4   : > { %v1434_v7 = vrot.slane %v1433_v43, 2  ;;  %vm12144_vm3 = vcmp.ge.s32.totalorder %v682_v10, 1 }
 0x2b5   : > { %vm2038_vm5 = vmpackc.low %vm12144_vm3, %vm12144_vm3 }
 0x2b6   : > { %v1435_v19 = vadd.f32 %v1434_v7, %v1433_v43  ;;  %v696_v43 = vand.u32 15, %v648_v2  ;;  %v660_v7 = vadd.s32 112, %v11901_v6 }
 0x2b8   : > { %v1436_v48 = vrot.slane %v1435_v19, 1  ;;  %vm12150_vm4 = vcmp.ge.s32.totalorder %v696_v43, 1  ;;  %v780_v13 = vand.u32 15, %v660_v7 }
 0x2b9   : > { %vm2040_vm8 = vmpackc.low %vm12150_vm4, %vm12150_vm4 }
 0x2ba   : > { %v1437_v4 = vadd.f32 %v1436_v48, %v1435_v19  ;;  %v662_v48 = vadd.s32 128, %v11901_v6  ;;  %vm12169_vm10 = vcmp.ge.s32.totalorder %v780_v13, 1 }
 0x2bb   : > { %vm2052_vm14 = vmpackc.low %vm12169_vm10, %vm12169_vm10  ;;  %vm2150_vm10 = vsmask.f32 7424 }
 0x2bc   : > { %9795 = vmatmul.mubr.f32.vlgmr.msra.gmra.mrb[0].mxu1 %v1437_v4  ;;  %v766_v4 = vand.u32 15, %v658_v15  ;;  %v2084_v7 = vsel %vm2052_vm14, 65537, %v15451_v8 }
 0x2bd   : > { %10322 = vmatpush3.bf16.msra.mxu1 %v10794_v29 }
 0x2be   : > { %10315 = vmatprep.subr.bf16.mxu1 %v10795_v33  ;;  %vm12161_vm9 = vcmp.ge.s32.totalorder %v766_v4, 1 }
 0x2bf   : > { %vm2050_vm12 = vmpackc.low %vm12161_vm9, %vm12161_vm9 }
 0x2c0   : > { %v2082_v15 = vsel %vm2050_vm12, 65537, %v15451_v8 }
 0x2c1   : > { %10323 = vmatpush3.bf16.msra.mxu1 %v10796_v60 }
 0x2c2   : > { %10316 = vmatprep.subr.bf16.mxu1 %v10797_v23 }
 0x2c5   : > { %10324 = vmatpush3.bf16.msra.mxu1 %v10798_v37 }
 0x2c6   : > { %10317 = vmatprep.subr.bf16.mxu1 %v10799_v41 }
 0x2c9   : > { %10325 = vmatpush3.bf16.msra.mxu1 %v10800_v62 }
 0x2ca   : > { %10318 = vmatprep.subr.bf16.mxu1 %v10801_v31 }
 0x2cd   : > { %10326 = vmatpush3.bf16.msra.mxu1 %v10802_v45 }
 0x2ce   : > { %10319 = vmatprep.subr.bf16.mxu1 %v10803_v51 }
 0x2d1   : > { %10327 = vmatpush3.bf16.msra.mxu1 %v10804_v59 }
 0x2d2   : > { %10320 = vmatprep.subr.bf16.mxu1 %v10805_v39 }
 0x2d5   : > { %10328 = vmatpush3.bf16.msra.mxu1 %v10806_v56 }
 0x2d6   : > { %10321 = vmatprep.subr.bf16.mxu1 %v10807_v46 }
 0x2d9   : > { %10329 = vmatpush3.bf16.msra.mxu1 %v10808_v61 }
 0x38f   : > { %v1504_v22 = vpop.f32.mrb[0].mxu1 }
 0x390   : > { %v1508_v25 = vmul.f32 0.001953125, %v1504_v22  ;;  %v9796_v20 = vpop.f32.mrb[1].mxu1  ;;  %v650_v22 = vadd.s32 32, %v11901_v6 }
 0x391   : > { %v664_v20 = vadd.s32 144, %v11901_v6 }
 0x392   : > { %9800 = vmatmul.mubr.msk.f32.vlgmr.msra.gmra.mrb[4].mxu0 %vm1255_vm2, %v1508_v25 }
 0x393   : > { %8845 = vmatpush3.bf16.msra.mxu0 %v10794_v29  ;;  %3273 = vmatprep.mubr.bf16.mxu0 %v15451_v8  ;;  %v794_v29 = vand.u32 15, %v662_v48 }
 0x394   : > { %8846 = vmatprep.subr.bf16.mxu0 %v10795_v33 }
 0x395   : > { %vm12175_vm11 = vcmp.ge.s32.totalorder %v794_v29, 1 }
 0x396   : > { %vm2054_vm3 = vmpackc.low %vm12175_vm11, %vm12175_vm11 }
 0x397   : > { %8847 = vmatpush3.bf16.msra.mxu0 %v10796_v60  ;;  %v710_v60 = vand.u32 15, %v650_v22  ;;  %v2086_v4 = vsel %vm2054_vm3, 65537, %v15451_v8 }
 0x398   : > { %8848 = vmatprep.subr.bf16.mxu0 %v10797_v23  ;;  %v808_v23 = vand.u32 15, %v664_v20 }
 0x399   : > { %vm12182_vm13 = vcmp.ge.s32.totalorder %v710_v60, 1  ;;  %v1957_v60 = vld [vmem:[#allocation2 + $0x8] sm:$0x80] }
 0x39a   : > { %vm12191_vm15 = vcmp.ge.s32.totalorder %v808_v23, 1  ;;  %vm2042_vm4 = vmpackc.low %vm12182_vm13, %vm12182_vm13 }
 0x39b   : > { %8849 = vmatpush3.bf16.msra.mxu0 %v10798_v37  ;;  %v2070_v37 = vsel %vm2038_vm5, 65537, %v15451_v8  ;;  %vm2056_vm5 = vmpackc.low %vm12191_vm15, %vm12191_vm15  ;;  %v2074_v20 = vsel %vm2042_vm4, 65537, %v15451_v8 }
 0x39c   : > { %8850 = vmatprep.subr.bf16.mxu0 %v10799_v41  ;;  %v12167_v41 = vsel %vm2039_vm7, 65537, %v15451_v8  ;;  %v2088_v33 = vsel %vm2056_vm5, 65537, %v15451_v8 }
 0x39d   : > { %15589 = vst [vmem:[#allocation32_spill] sm:$0xff] %v12167_v41  ;;  %v12211_v22 = vcombine.low %v2082_v15, %v12167_v41  ;;  %v8437_v29 = vcombine.low %v2084_v7, %v12167_v41  ;;  %v656_v7 = vadd.s32 80, %v11901_v6 }
 0x39f   : > { %8851 = vmatpush3.bf16.msra.mxu0 %v10800_v62  ;;  %v10811_v62 = vld [vmem:[#allocation4 + $0x90] sm:$0xff]   ;;  %v2207_v15 = vshll.u32 %v8437_v29, 16 }
 0x3a0   : > { %8852 = vmatprep.subr.bf16.mxu0 %v10801_v31  ;;  %v652_v31 = vadd.s32 48, %v11901_v6 }
 0x3a1   : > { %v2209_v1 = vrot.slane %v2207_v15, 1 }
 0x3a2   : > { %v724_v43 = vand.u32 15, %v652_v31  ;;  %v654_v31 = vadd.s32 64, %v11901_v6 }
 0x3a3   : > { %8853 = vmatpush3.bf16.msra.mxu0 %v10802_v45  ;;  %v10809_v45 = vld [vmem:[#allocation4 + $0x80] sm:$0xff]  }
 0x3a4   : > { %8854 = vmatprep.subr.bf16.mxu0 %v10803_v51  ;;  %v10810_v51 = vld [vmem:[#allocation4 + $0x88] sm:$0xff]   ;;  %vm12215_vm6 = vcmp.ge.s32.totalorder %v724_v43, 1  ;;  %v738_v2 = vand.u32 15, %v654_v31 }
 0x3a6   : > { %vm12245_vm11 = vcmp.ge.s32.totalorder %v738_v2, 1 }
 0x3a7   : > { %8855 = vmatpush3.bf16.msra.mxu0 %v10804_v59  ;;  %v2072_v59 = vsel %vm2040_vm8, 65537, %v15451_v8  ;;  %vm2044_vm8 = vmpackc.low %vm12215_vm6, %vm12215_vm6 }
 0x3a8   : > { %8856 = vmatprep.subr.bf16.mxu0 %v10805_v39  ;;  %v12196_v10 = vcombine.low %v2072_v59, %v12167_v41  ;;  %v8432_v59 = vcombine.low %v2074_v20, %v12167_v41  ;;  %v668_v39 = vadd.s32 176, %v11901_v6  ;;  %vm2046_vm14 = vmpackc.low %vm12245_vm11, %vm12245_vm11 }
 0x3aa   : > { %v2159_v25 = vshll.u32 %v12196_v10, 16  ;;  %v836_v43 = vand.u32 15, %v668_v39  ;;  %v2171_v21 = vshrl.u32 %v8432_v59, 16 }
 0x3ab   : > { %8857 = vmatpush3.bf16.msra.mxu0 %v10806_v56 }
 0x3ac   : > { %8858 = vmatprep.subr.bf16.mxu0 %v10807_v46  ;;  %v666_v46 = vadd.s32 160, %v11901_v6  ;;  %v2161_v56 = vrot.slane %v2159_v25, 1  ;;  %v2167_v25 = vshll.u32 %v8432_v59, 16  ;;  %vm12251_vm12 = vcmp.ge.s32.totalorder %v836_v43, 1 }
 0x3ad   : > { %vm2060_vm3 = vmpackc.low %vm12251_vm12, %vm12251_vm12 }
 0x3ae   : > { %v822_v19 = vand.u32 15, %v666_v46  ;;  %v2203_v46 = vshrl.u32 %v12211_v22, 16 }
 0x3af   : > { %8859 = vmatpush3.bf16.msra.mxu0 %v10808_v61  ;;  %v8430_v61 = vcombine.low %v2070_v37, %v12167_v41  ;;  %v12226_v37 = vcombine.low %v2086_v4, %v12167_v41 }
 0x3b0   : > { %9802 = vmatprep.subr.bf16.mxu0 %v10809_v45  ;;  %vm12221_vm7 = vcmp.ge.s32.totalorder %v822_v19, 1 }
 0x3b1   : > { %v2152_v48 = vshll.u32 %v8430_v61, 16  ;;  %v2155_v23 = vshrl.u32 %v8430_v61, 16  ;;  %v8439_v61 = vcombine.low %v2088_v33, %v12167_v41  ;;  %vm2058_vm9 = vmpackc.low %vm12221_vm7, %vm12221_vm7  ;;  %v2215_v19 = vshll.u32 %v12226_v37, 16 }
 0x3b2   : > { %3274 = vmatmul.mubr.bf16.vlgmr.msra.gmra.mrb[8].mxu0 %v15451_v8  ;;  %v2090_v20 = vsel %vm2058_vm9, 65537, %v15451_v8  ;;  %v752_v33 = vand.u32 15, %v656_v7 }
 0x3b3   : > { %9803 = vmatpush3.bf16.msra.mxu0 %v10809_v45  ;;  %v12229_v45 = vrot.slane %v2152_v48, 1  ;;  %v2076_v48 = vsel %vm2044_vm8, 65537, %v15451_v8  ;;  %v2223_v31 = vshll.u32 %v8439_v61, 16  ;;  %v12272_v15 = vcombine.low %v2090_v20, %v12167_v41 }
 0x3b4   : > { %9804 = vmatprep.subr.bf16.mxu0 %v10810_v51  ;;  %v12259_v0 = vcombine.low %v2076_v48, %v12167_v41  ;;  %vm12264_vm15 = vcmp.ge.s32.totalorder %v752_v33, 1  ;;  %v2217_v33 = vrot.slane %v2215_v19, 1  ;;  %v2169_v8 = vrot.slane %v2167_v25, 1 }
 0x3b5   : > { %15602 = vst [vmem:[#allocation33_spill] sm:$0xff] %v12229_v45  ;;  %vm2278_vm13 = vcmp.ne.s16.totalorder %v12229_v45, 0  ;;  %v2157_v7 = vor.u32 %v2155_v23, %v12229_v45  ;;  %vm2048_vm4 = vmpackc.low %vm12264_vm15, %vm12264_vm15  ;;  %v2227_v23 = vshrl.u32 %v8439_v61, 16  ;;  %v2231_v43 = vshll.u32 %v12272_v15, 16 }
 0x3b6   : > { %v2295_v48 = vsel %vm2278_vm13, %v1957_v60, 0  ;;  %v2175_v25 = vshll.u32 %v12259_v0, 16  ;;  %v2173_v42 = vor.u32 %v2171_v21, %v2169_v8 }
 0x3b7   : > { %9805 = vmatpush3.bf16.msra.mxu0 %v10810_v51  ;;  %v2199_v51 = vshll.u32 %v12211_v22, 16  ;;  %v670_v22 = vadd.s32 192, %v11901_v6  ;;  %v2314_v61 = vshrl.u32 %v2295_v48, 16 }
 0x3b8   : > { %9806 = vmatprep.subr.bf16.mxu0 %v10811_v62  ;;  %v2177_v21 = vrot.slane %v2175_v25, 1 }
 0x3b9   : > { %v850_v39 = vand.u32 15, %v670_v22  ;;  %v12256_v2 = vrot.slane %v2199_v51, 1  ;;  %v2219_v22 = vshrl.u32 %v12226_v37, 16  ;;  %v10812_v51 = vld [vmem:[#allocation4 + $0x98] sm:$0xff]   ;;  %v15609_v37 = vmov 0  }
 0x3ba   : > { %v2078_v20 = vsel %vm2046_vm14, 65537, %v15609_v37  ;;  %v2092_v60 = vsel %vm2060_vm3, 65537, %v15609_v37  ;;  %v2080_v4 = vsel %vm2048_vm4, 65537, %v15609_v37 }
 0x3bb   : > { %9807 = vmatpush3.bf16.msra.mxu0 %v10811_v62  ;;  %v2211_v62 = vshrl.u32 %v8437_v29, 16  ;;  %v2163_v29 = vshrl.u32 %v12196_v10, 16  ;;  %v2225_v10 = vrot.slane %v2223_v31, 1  ;;  %vm12288_vm5 = vcmp.ge.s32.totalorder %v850_v39, 1 }
 0x3bc   : > { %9808 = vmatprep.subr.bf16.mxu0 %v10812_v51  ;;  %v2205_v59 = vor.u32 %v2203_v46, %v12256_v2  ;;  %v2221_v45 = vor.u32 %v2219_v22, %v2217_v33  ;;  %v12298_v39 = vcombine.low %v2078_v20, %v12167_v41  ;;  %vm2062_vm6 = vmpackc.low %vm12288_vm5, %vm12288_vm5  ;;  %v12304_v46 = vsel %vm2150_vm10, %v2157_v7, %v2161_v56 }
 0x3bd   : > { %v2213_v19 = vor.u32 %v2211_v62, %v2209_v1  ;;  %v2165_v31 = vor.u32 %v2163_v29, %v2161_v56  ;;  %15612 = vst [vmem:[#allocation34_spill] sm:$0xff] %v12304_v46  ;;  %v2229_v62 = vor.u32 %v2227_v23, %v2225_v10  ;;  %v12316_v48 = vcombine.low %v2080_v4, %v12167_v41 }
 0x3be   : > { %v12310_v29 = vsel %vm2150_vm10, %v2205_v59, %v2209_v1  ;;  %v12318_v20 = vrot.slane %v2314_v61, 7  ;;  %v2233_v56 = vrot.slane %v2231_v43, 1  ;;  %v2094_v7 = vsel %vm2062_vm6, 65537, %v15609_v37 }
 0x3bf   : > { %9809 = vmatpush3.bf16.msra.mxu0 %v10812_v51  ;;  %v12307_v51 = vcombine.low %v2092_v60, %v12167_v41  ;;  %15613 = vst [vmem:[#allocation35_spill] sm:$0xff] %v12310_v29  ;;  %v12313_v22 = vsel %vm2150_vm10, %v2213_v19, %v2217_v33  ;;  %v12321_v13 = vsel %vm2150_vm10, %v2165_v31, %v2169_v8  ;;  %v10813_v33 = vld [vmem:[#allocation4 + $0xa0] sm:$0xff]   ;;  %v2179_v59 = vshrl.u32 %v12259_v0, 16 }
 0x3c0   : > { %15614 = vst [vmem:[#allocation36_spill] sm:$0xff] %v12313_v22  ;;  %15615 = vst [vmem:[#allocation37_spill] sm:$0xff] %v12318_v20  ;;  %v12325_v23 = vsel %vm2150_vm10, %v2221_v45, %v2225_v10  ;;  %v12328_v1 = vsel %vm2150_vm10, %v2173_v42, %v2177_v21  ;;  %v2183_v19 = vshll.u32 %v12298_v39, 16  ;;  %v12333_v25 = vsel %vm2150_vm10, %v2229_v62, %v2233_v56 }
 0x3c1   : > { %15616 = vst [vmem:[#allocation38_spill] sm:$0xff] %v12321_v13  ;;  %15617 = vst [vmem:[#allocation39_spill] sm:$0xff] %v12325_v23  ;;  %v2239_v8 = vshll.u32 %v12307_v51, 16  ;;  %v651_v60 = vadd.s32 40, %v11901_v6  ;;  %v653_v61 = vadd.s32 56, %v11901_v6  ;;  %9810 = vmatprep.subr.bf16.mxu0 %v10813_v33  ;;  %v2235_v45 = vshrl.u32 %v12272_v15, 16 }
 0x3c2   : > { %15618 = vst [vmem:[#allocation40_spill] sm:$0xff] %v12328_v1  ;;  %15619 = vst [vmem:[#allocation41_spill] sm:$0xff] %v12333_v25  ;;  %v2191_v42 = vshll.u32 %v12316_v48, 16  ;;  %v12341_v10 = vcombine.low %v2094_v7, %v12167_v41  ;;  %v655_v0 = vadd.s32 72, %v11901_v6  ;;  %v672_v31 = vadd.s32 208, %v11901_v6 }
 0x3c3   : > { %9811 = vmatpush3.bf16.msra.mxu0 %v10813_v33  ;;  %v649_v43 = vadd.s32 24, %v11901_v6  ;;  %v717_v4 = vand.u32 15, %v651_v60  ;;  %v731_v62 = vand.u32 15, %v653_v61  ;;  %v2181_v20 = vor.u32 %v2179_v59, %v2177_v21  ;;  %v10814_v61 = vld [vmem:[#allocation4 + $0xa8] sm:$0xff]  }
 0x3c4   : > { %v2185_v25 = vrot.slane %v2183_v19, 1  ;;  %v745_v1 = vand.u32 15, %v655_v0  ;;  %v657_v23 = vadd.s32 88, %v11901_v6  ;;  %v864_v15 = vand.u32 15, %v672_v31  ;;  %9812 = vmatprep.subr.bf16.mxu0 %v10814_v61 }
 0x3c5   : > { %v703_v13 = vand.u32 15, %v649_v43  ;;  %vm1099_vm7 = vcmp.lt.s32.totalorder %v717_v4, 15  ;;  %vm12347_vm8 = vcmp.lt.s32.totalorder %v731_v62, 15  ;;  %v12351_v22 = vor.u32 %v2235_v45, %v2233_v56 }
 0x3c6   : > { %v12353_v33 = vrot.slane %v2239_v8, 1  ;;  %v2187_v46 = vshrl.u32 %v12298_v39, 16  ;;  %v2247_v60 = vshll.u32 %v12341_v10, 16  ;;  %vm2563_vm9 = vmpackc.low %vm1099_vm7, %vm1099_vm7  ;;  %v12357_v21 = vrot.slane %v2191_v42, 1 }
 0x3c7   : > { %vm1088_vm11 = vcmp.ge.s32.totalorder %v864_v15, 1  ;;  %vm12359_vm12 = vcmp.lt.s32.totalorder %v703_v13, 15  ;;  %v2595_v19 = vsel %vm2563_vm9, 65537, %v15609_v37  ;;  %vm2565_vm14 = vmpackc.low %vm12347_vm8, %vm12347_vm8  ;;  %v12368_v56 = vsel %vm2150_vm10, %v2181_v20, %v2185_v25  ;;  %9813 = vmatpush3.bf16.msra.mxu0 %v10814_v61 }
 0x3c8   : > { %15624 = vst [vmem:[#allocation42_spill] sm:$0xff] %v12368_v56  ;;  %v2243_v39 = vshrl.u32 %v12307_v51, 16  ;;  %vm2064_vm15 = vmpackc.low %vm1088_vm11, %vm1088_vm11  ;;  %v12372_v8 = vcombine.low %v12167_v41, %v2595_v19  ;;  %v2597_v13 = vsel %vm2565_vm14, 65537, %v15609_v37  ;;  %v674_v42 = vadd.s32 224, %v11901_v6 }
 0x3c9   : > { %v2096_v45 = vsel %vm2064_vm15, 65537, %v15609_v37  ;;  %vm2561_vm3 = vmpackc.low %vm12359_vm12, %vm12359_vm12  ;;  %vm12380_vm4 = vcmp.lt.s32.totalorder %v745_v1, 15  ;;  %v759_v51 = vand.u32 15, %v657_v23  ;;  %v676_v0 = vadd.s32 240, %v11901_v6 }
 0x3ca   : > { %v647_v31 = vadd.s32 8, %v11901_v6  ;;  %v2593_v43 = vsel %vm2561_vm3, 65537, %v15609_v37  ;;  %v12388_v4 = vcombine.low %v12167_v41, %v2597_v13  ;;  %v12390_v62 = vrot.slane %v2247_v60, 1  ;;  %vm2567_vm6 = vmpackc.low %vm12380_vm4, %vm12380_vm4 }
 0x3cb   : > { %v8443_v15 = vcombine.low %v2096_v45, %v12167_v41  ;;  %v878_v7 = vand.u32 15, %v674_v42  ;;  %v8447_v1 = vcombine.low %v12167_v41, %v2593_v43  ;;  %v12394_v59 = vor.u32 %v2187_v46, %v2185_v25  ;;  %v10815_v43 = vld [vmem:[#allocation4 + $0x1c0] sm:$0xff]  }
 0x3cc   : > { %v2195_v23 = vshrl.u32 %v12316_v48, 16  ;;  %v892_v19 = vand.u32 15, %v676_v0  ;;  %v2686_v56 = vshrl.u32 %v12372_v8, 16  ;;  %v2245_v38 = vor.u32 %v2243_v39, %v12353_v33  ;;  %9116 = vmatprep.subr.bf16.mxu1 %v10815_v43 }
 0x3cd   : > { %v2251_v13 = vshrl.u32 %v12341_v10, 16  ;;  %vm1090_vm5 = vcmp.ge.s32.totalorder %v878_v7, 1  ;;  %v689_v60 = vand.u32 15, %v647_v31  ;;  %vm2312_vm7 = vsmask.f32 256 }
 0x3ce   : > { %vm2066_vm8 = vmpackc.low %vm1090_vm5, %vm1090_vm5  ;;  %vm12403_vm9 = vcmp.ge.s32.totalorder %v892_v19, 1  ;;  %v2694_v48 = vshrl.u32 %v12388_v4, 16  ;;  %vm12408_vm11 = vcmp.lt.s32.totalorder %v759_v51, 15  ;;  %v659_v10 = vadd.s32 104, %v11901_v6 }
 0x3cf   : > { %v2255_v61 = vshll.u32 %v8443_v15, 16  ;;  %v2098_v45 = vsel %vm2066_vm8, 65537, %v15609_v37  ;;  %vm2068_vm12 = vmpackc.low %vm12403_vm9, %vm12403_vm9  ;;  %vm1095_vm14 = vcmp.lt.s32.totalorder %v689_v60, 15  ;;  %v2678_v42 = vshrl.u32 %v8447_v1, 16 }
 0x3d0   : > { %v2197_v51 = vor.u32 %v2195_v23, %v12357_v21  ;;  %v8444_v7 = vcombine.low %v2098_v45, %v12167_v41  ;;  %vm2559_vm15 = vmpackc.low %vm1095_vm14, %vm1095_vm14  ;;  %v2688_v19 = vrot.slane %v2686_v56, 7  ;;  %v2253_v9 = vor.u32 %v2251_v13, %v12390_v62 }
 0x3d1   : > { %v2100_v63 = vsel %vm2068_vm12, 65537, %v15609_v37  ;;  %v2591_v24 = vsel %vm2559_vm15, 65537, %v15609_v37  ;;  %v2689_v46 = vshll.u32 %v12372_v8, 16  ;;  %v2257_v45 = vrot.slane %v2255_v61, 1  ;;  %vm2569_vm3 = vmpackc.low %vm12408_vm11, %vm12408_vm11 }
 0x3d2   : > { %v2263_v60 = vshll.u32 %v8444_v7, 16  ;;  %v8446_v23 = vcombine.low %v12167_v41, %v2591_v24  ;;  %v12427_v29 = vrot.slane %v2694_v48, 7  ;;  %v2697_v56 = vshll.u32 %v12388_v4, 16 }
 0x3d3   : > { %v2599_v8 = vsel %vm2567_vm6, 65537, %v15609_v37  ;;  %v2259_v13 = vshrl.u32 %v8443_v15, 16  ;;  %v2267_v43 = vshrl.u32 %v8444_v7, 16  ;;  %v2680_v47 = vrot.slane %v2678_v42, 7 }
 0x3d4   : > { %15632 = vst [vmem:[#allocation44_spill] sm:$0xff] %v12427_v29  ;;  %v2671_v24 = vshrl.u32 %v8446_v23, 16  ;;  %v2681_v61 = vshll.u32 %v8447_v1, 16  ;;  %v2691_v48 = vor.u32 %v2689_v46, %v2688_v19  ;;  %v12443_v20 = vsel %vm2150_vm10, %v12351_v22, %v12353_v33 }
 0x3d5   : > { %15633 = vst [vmem:[#allocation45_spill] sm:$0xff] %v12443_v20  ;;  %v2261_v4 = vor.u32 %v2259_v13, %v2257_v45  ;;  %v8450_v1 = vcombine.low %v12167_v41, %v2599_v8  ;;  %v12451_v25 = vsel %vm2150_vm10, %v12394_v59, %v12357_v21  ;;  %v2699_v42 = vor.u32 %v2697_v56, %v12427_v29 }
 0x3d6   : > { %v2683_v11 = vor.u32 %v2681_v61, %v2680_v47  ;;  %15635 = vst [vmem:[#allocation47_spill] sm:$0xff] %v12451_v25  ;;  %v2601_v22 = vsel %vm2569_vm3, 65537, %v15609_v37  ;;  %v773_v33 = vand.u32 15, %v659_v10  ;;  %v12457_v46 = vsel %vm2150_vm10, %v2245_v38, %v12390_v62 }
 0x3d7   : > { %15636 = vst [vmem:[#allocation48_spill] sm:$0xff] %v12457_v46  ;;  %v12467_v8 = vsel %vm2312_vm7, %v2680_v47, %v2691_v48  ;;  %v2702_v10 = vshrl.u32 %v8450_v1, 16  ;;  %v2705_v38 = vshll.u32 %v8450_v1, 16  ;;  %v12490_v13 = vadd.s32 120, %v11901_v6  ;;  %v12523_v1 = vld [vmem:[%s15420_s4] ss:$0 sm:$0xff] }
 0x3d8   : > { %15639 = vst [vmem:[#allocation51_spill] sm:$0xff] %v12467_v8  ;;  %vm1107_vm4 = vcmp.lt.s32.totalorder %v773_v33, 15  ;;  %vm15487_vm8 = vcmp.ne.s16.totalorder %v12457_v46, 0 }
 0x3d9   : > { %v12487_v56 = vrot.slane %v2702_v10, 7  ;;  %vm2571_vm5 = vmpackc.low %vm1107_vm4, %vm1107_vm4  ;;  %15647 = vst [vmem:[#allocation59_spill] sm:$0xff] %v12490_v13 }
 0x3db   : > { %15646 = vst [vmem:[#allocation58_spill] sm:$0xff] %v12487_v56 }
 0x465   : > { %v1578_v39 = vpop.f32.mrb[4].mxu0 }
 0x466   : > { %v1579_v0 = vadd.f32 1e-05, %v1578_v39  ;;  %v9801_v31 = vpop.f32.mrb[5].mxu0  ;;  %v12424_v39 = vcombine.low %v2100_v63, %v12167_v41 }
 0x467   : > { %v10819_v31 = vld [vmem:[#allocation4 + $0xb0] sm:$0xff]  }
 0x468   : > { %10977 = vrsqrt.f32 %v1579_v0  ;;  %15631 = vst [vmem:[#allocation43_spill] sm:$0xff] %v12424_v39  ;;  %v2265_v0 = vrot.slane %v2263_v60, 1  ;;  %v2271_v63 = vshll.u32 %v12424_v39, 16  ;;  %9814 = vmatprep.subr.bf16.mxu0 %v10819_v31  ;;  %v2673_v60 = vrot.slane %v2671_v24, 7 }
 0x469   : > { %9815 = vmatpush3.bf16.msra.mxu0 %v10819_v31  ;;  %v2674_v39 = vshll.u32 %v8446_v23, 16  ;;  %v12461_v23 = vsel %vm2150_vm10, %v2197_v51, %v12256_v2  ;;  %v12464_v31 = vsel %vm2150_vm10, %v2253_v9, %v2257_v45  ;;  %v12482_v9 = vcombine.low %v12167_v41, %v2601_v22  ;;  %v10824_v51 = vld [vmem:[#allocation4 + $0xb8] sm:$0xff]  }
 0x46a   : > { %v2269_v15 = vor.u32 %v2267_v43, %v2265_v0  ;;  %v12445_v7 = vrot.slane %v2271_v63, 1  ;;  %15637 = vst [vmem:[#allocation49_spill] sm:$0xff] %v12461_v23  ;;  %15638 = vst [vmem:[#allocation50_spill] sm:$0xff] %v12464_v31  ;;  %v12470_v21 = vsel %vm2150_vm10, %v2261_v4, %v2265_v0  ;;  %v12479_v2 = vsel %vm2312_vm7, %v2673_v60, %v2683_v11 }
 0x46b   : > { %15640 = vst [vmem:[#allocation52_spill] sm:$0xff] %v12470_v21  ;;  %v12476_v62 = vor.u32 %v2674_v39, %v2673_v60  ;;  %15643 = vst [vmem:[#allocation55_spill] sm:$0xff] %v12479_v2  ;;  %v12485_v45 = vsel %vm2312_vm7, %v2688_v19, %v2699_v42  ;;  %v12493_v39 = vadd.s32 136, %v11901_v6  ;;  %v2603_v43 = vsel %vm2571_vm5, 65537, %v15609_v37  ;;  %9816 = vmatprep.subr.bf16.mxu0 %v10824_v51 }
 0x46c   : > { %15634 = vst [vmem:[#allocation46_spill] sm:$0xff] %v12445_v7  ;;  %v12474_v59 = vsel %vm2150_vm10, %v2269_v15, %v12445_v7  ;;  %15644 = vst [vmem:[#allocation56_spill] sm:$0xff] %v12482_v9  ;;  %v12501_v63 = vadd.s32 152, %v11901_v6  ;;  %v12504_v19 = vor.u32 %v2705_v38, %v12487_v56  ;;  %v12508_v61 = vcombine.low %v12167_v41, %v2603_v43 }
 0x46d   : > { %15641 = vst [vmem:[#allocation53_spill] sm:$0xff] %v12474_v59  ;;  %15642 = vst [vmem:[#allocation54_spill] sm:$0xff] %v12476_v62  ;;  %9817 = vmatpush3.bf16.msra.mxu0 %v10824_v51  ;;  %vm15486_vm9 = vcmp.ne.s16.totalorder %v12464_v31, 0 }
 0x46e   : > { %15645 = vst [vmem:[#allocation57_spill] sm:$0xff] %v12485_v45  ;;  %15648 = vst [vmem:[#allocation60_spill] sm:$0xff] %v12493_v39 }
 0x46f   : > { %15649 = vst [vmem:[#allocation61_spill] sm:$0xff] %v12501_v63  ;;  %15650 = vst [vmem:[#allocation62_spill] sm:$0xff] %v12504_v19  ;;  %v15655_v19 = vld [vmem:[#allocation26_spill] sm:$0xff] }
 0x470   : > { %15651 = vst [vmem:[#allocation63_spill] sm:$0xff] %v12508_v61 }
 0x472   : > { %v10978_v47 = vpop.eup %10977 }
 0x473   : > { %v12496_v11 = vrot.slane %v10978_v47, %v11904_v16 }
 0x475   : > { %v1599_v4 = vmul.f32 %v12496_v11, %v11992_v53  ;;  %v1600_v37 = vmul.f32 %v12496_v11, %v11999_v28  ;;  %v12517_v15 = vmul.f32 %v12496_v11, %v12034_v40  ;;  %v12527_v42 = vmul.f32 %v12496_v11, %v12041_v18 }
 0x476   : > { %v1607_v53 = vmul.f32 %v12496_v11, %v12048_v35  ;;  %v1609_v28 = vmul.f32 %v12496_v11, %v12062_v14  ;;  %v1610_v40 = vmul.f32 %v12496_v11, %v12069_v52  ;;  %v1611_v22 = vmul.f32 %v12496_v11, %v12076_v55 }
 0x477   : > { %v1612_v33 = vmul.f32 %v12496_v11, %v12083_v49  ;;  %v1613_v10 = vmul.f32 %v12496_v11, %v12090_v57  ;;  %v1614_v18 = vmul.f32 %v12496_v11, %v12097_v12  ;;  %v1615_v35 = vmul.f32 %v12496_v11, %v12104_v54  ;;  %v12554_v49 = vld [vmem:[%s15421_s5] ss:$0 sm:$0xff] }
 0x478   : > { %v1616_v14 = vmul.f32 %v12496_v11, %v12111_v3  ;;  %v1617_v52 = vmul.f32 %v12496_v11, %v12118_v44  ;;  %v1618_v55 = vmul.f32 %v12496_v11, %v12125_v5  ;;  %v12558_v57 = vmul.f32 %v12496_v11, %v12055_v50  ;;  %v10829_v44 = vld [vmem:[#allocation4 + $0x100] sm:$0xff]  }
 0x479   : > { %v1637_v12 = vmul.f32 %v12523_v1, %v1599_v4  ;;  %v1638_v54 = vmul.f32 %v12523_v1, %v1600_v37  ;;  %v12563_v3 = vmul.f32 %v12523_v1, %v1607_v53  ;;  %v1647_v38 = vmul.f32 %v12523_v1, %v1609_v28  ;;  %8980 = vmatprep.subr.bf16.mxu0 %v10829_v44 }
 0x47a   : > { %v1648_v5 = vmul.f32 %v12523_v1, %v1610_v40  ;;  %v1649_v47 = vmul.f32 %v12523_v1, %v1611_v22  ;;  %v1650_v51 = vmul.f32 %v12523_v1, %v1612_v33  ;;  %v1651_v43 = vmul.f32 %v12523_v1, %v1613_v10 }
 0x47b   : > { %v1652_v50 = vmul.f32 %v12523_v1, %v1614_v18  ;;  %v1653_v4 = vmul.f32 %v12523_v1, %v1615_v35  ;;  %v1654_v37 = vmul.f32 %v12523_v1, %v1616_v14  ;;  %v1655_v53 = vmul.f32 %v12523_v1, %v1617_v52 }
 0x47c   : > { %v1656_v60 = vmul.f32 %v12523_v1, %v1618_v55  ;;  %v12576_v28 = vadd.f32 %v12554_v49, %v1637_v12  ;;  %v12579_v40 = vadd.f32 %v12554_v49, %v1638_v54  ;;  %v12582_v22 = vadd.f32 %v12554_v49, %v1647_v38 }
 0x47d   : > { %v12585_v33 = vadd.f32 %v12554_v49, %v1648_v5  ;;  %v12588_v10 = vadd.f32 %v12554_v49, %v1649_v47  ;;  %v12591_v18 = vadd.f32 %v12554_v49, %v1650_v51  ;;  %v12594_v35 = vadd.f32 %v12554_v49, %v1651_v43 }
 0x47e   : > { %v12597_v14 = vadd.f32 %v12554_v49, %v1652_v50  ;;  %v12600_v52 = vadd.f32 %v12554_v49, %v1653_v4  ;;  %v12603_v55 = vadd.f32 %v12554_v49, %v1654_v37  ;;  %v12606_v12 = vadd.f32 %v12554_v49, %v1655_v53 }
 0x47f   : > { %v12609_v54 = vadd.f32 %v12554_v49, %v1656_v60  ;;  %v1707_v44 = vsub.f32 0.0, %v12576_v28  ;;  %v1708_v38 = vsub.f32 0.0, %v12579_v40  ;;  %v1717_v5 = vsub.f32 0.0, %v12582_v22 }
 0x480   : > { %v1718_v47 = vsub.f32 0.0, %v12585_v33  ;;  %v1719_v51 = vsub.f32 0.0, %v12588_v10  ;;  %v1720_v43 = vsub.f32 0.0, %v12591_v18  ;;  %v1721_v50 = vsub.f32 0.0, %v12594_v35 }
 0x481   : > { %v1722_v4 = vsub.f32 0.0, %v12597_v14  ;;  %v1723_v37 = vsub.f32 0.0, %v12600_v52  ;;  %v1724_v60 = vsub.f32 0.0, %v12603_v55  ;;  %v1725_v53 = vsub.f32 0.0, %v12606_v12 }
 0x482   : > { %v1726_v48 = vsub.f32 0.0, %v12609_v54  ;;  %v1751_v24 = vmul.f32 1.442695, %v1707_v44  ;;  %v1753_v0 = vmul.f32 1.442695, %v1708_v38  ;;  %v1587_v6 = vmul.f32 %v12496_v11, %v11912_v26 }
 0x483   : > { %v1771_v16 = vmul.f32 1.442695, %v1717_v5  ;;  %v1773_v7 = vmul.f32 1.442695, %v1718_v47  ;;  %v1775_v41 = vmul.f32 1.442695, %v1719_v51  ;;  %v1588_v44 = vmul.f32 %v12496_v11, %v11917_v30 }
 0x484   : > { %10979 = vpow2.f32 %v1751_v24  ;;  %v1777_v63 = vmul.f32 1.442695, %v1720_v43  ;;  %v1779_v39 = vmul.f32 1.442695, %v1721_v50  ;;  %v1781_v13 = vmul.f32 1.442695, %v1722_v4 }
 0x485   : > { %10981 = vpow2.f32 %v1753_v0  ;;  %v1783_v23 = vmul.f32 1.442695, %v1723_v37  ;;  %v1785_v61 = vmul.f32 1.442695, %v1724_v60  ;;  %v1787_v56 = vmul.f32 1.442695, %v1725_v53 }
 0x486   : > { %10983 = vpow2.f32 %v1771_v16  ;;  %v1789_v9 = vmul.f32 1.442695, %v1726_v48  ;;  %v1625_v38 = vmul.f32 %v12523_v1, %v1587_v6  ;;  %v1601_v5 = vmul.f32 %v12496_v11, %v12006_v58 }
 0x487   : > { %10985 = vpow2.f32 %v1773_v7  ;;  %v1602_v26 = vmul.f32 %v12496_v11, %v12013_v32  ;;  %v1589_v0 = vmul.f32 %v12496_v11, %v11922_v34  ;;  %v1626_v24 = vmul.f32 %v12523_v1, %v1588_v44 }
 0x488   : > { %10987 = vpow2.f32 %v1775_v41  ;;  %v12636_v16 = vadd.f32 %v12554_v49, %v1625_v38  ;;  %v1590_v30 = vmul.f32 %v12496_v11, %v11931_v17  ;;  %v1639_v6 = vmul.f32 %v12523_v1, %v1601_v5 }
 0x489   : > { %10989 = vpow2.f32 %v1777_v63  ;;  %v1640_v58 = vmul.f32 %v12523_v1, %v1602_v26  ;;  %v1627_v7 = vmul.f32 %v12523_v1, %v1589_v0  ;;  %v12644_v32 = vadd.f32 %v12554_v49, %v1626_v24 }
 0x48a   : > { %10991 = vpow2.f32 %v1779_v39  ;;  %v1695_v34 = vsub.f32 0.0, %v12636_v16  ;;  %v1628_v41 = vmul.f32 %v12523_v1, %v1590_v30  ;;  %v12649_v48 = vadd.f32 %v12554_v49, %v1639_v6 }
 0x48b   : > { %10993 = vpow2.f32 %v1781_v13  ;;  %v12652_v17 = vadd.f32 %v12554_v49, %v1640_v58  ;;  %v12655_v63 = vadd.f32 %v12554_v49, %v1627_v7  ;;  %v1696_v39 = vsub.f32 0.0, %v12644_v32  ;;  %v15652_v58 = vld [vmem:[#allocation24_spill] sm:$0xff] }
 0x48c   : > { %10995 = vpow2.f32 %v1783_v23  ;;  %v1727_v47 = vmul.f32 1.442695, %v1695_v34  ;;  %v12659_v51 = vadd.f32 %v12554_v49, %v1628_v41  ;;  %v1709_v43 = vsub.f32 0.0, %v12649_v48  ;;  %v15653_v34 = vld [vmem:[#allocation25_spill] sm:$0xff] }
 0x48d   : > { %10997 = vpow2.f32 %v1785_v61  ;;  %v1710_v13 = vsub.f32 0.0, %v12652_v17  ;;  %v1697_v50 = vsub.f32 0.0, %v12655_v63  ;;  %v12666_v37 = vmul.f32 %v12523_v1, %v12558_v57 }
 0x48e   : > { %v10980_v4 = vpop.eup %10979  ;;  %10999 = vpow2.f32 %v1787_v56  ;;  %v12668_v23 = vmul.f32 1.442695, %v1696_v39  ;;  %v1603_v60 = vmul.f32 %v12496_v11, %v12020_v36  ;;  %v12672_v44 = vmul.f32 1.442695, %v1709_v43 }
 0x48f   : > { %v10982_v53 = vpop.eup %10981  ;;  %11001 = vpow2.f32 %v1789_v9  ;;  %v1803_v61 = vadd.f32 1.0, %v10980_v4  ;;  %v1698_v38 = vsub.f32 0.0, %v12659_v51  ;;  %v12675_v0 = vmul.f32 1.442695, %v1710_v13 }
 0x490   : > { %v10984_v5 = vpop.eup %10983  ;;  %v1804_v26 = vadd.f32 1.0, %v10982_v53  ;;  %11003 = vpow2.f32 %v1727_v47  ;;  %v12677_v57 = vmul.f32 1.442695, %v1697_v50  ;;  %v1604_v36 = vmul.f32 %v12496_v11, %v12027_v27 }
 0x491   : > { %v10986_v56 = vpop.eup %10985  ;;  %v1813_v24 = vadd.f32 1.0, %v10984_v5  ;;  %11005 = vrcp.f32 %v1803_v61  ;;  %v1641_v9 = vmul.f32 %v12523_v1, %v1603_v60  ;;  %v1591_v7 = vmul.f32 %v12496_v11, %v15652_v58 }
 0x492   : > { %v10988_v30 = vpop.eup %10987  ;;  %v1814_v6 = vadd.f32 1.0, %v10986_v56  ;;  %11007 = vrcp.f32 %v1804_v26  ;;  %v1592_v41 = vmul.f32 %v12496_v11, %v15653_v34  ;;  %v1642_v43 = vmul.f32 %v12523_v1, %v1604_v36  ;;  %v15654_v36 = vld [vmem:[#allocation35_spill] sm:$0xff] }
 0x493   : > { %v10990_v39 = vpop.eup %10989  ;;  %v1815_v47 = vadd.f32 1.0, %v10988_v30  ;;  %11009 = vrcp.f32 %v1813_v24  ;;  %v12688_v13 = vadd.f32 %v12554_v49, %v1641_v9  ;;  %v1629_v4 = vmul.f32 %v12523_v1, %v1591_v7 }
 0x494   : > { %v10992_v27 = vpop.eup %10991  ;;  %v1816_v50 = vadd.f32 1.0, %v10990_v39  ;;  %11011 = vrcp.f32 %v1814_v6  ;;  %v1630_v60 = vmul.f32 %v12523_v1, %v1592_v41  ;;  %v12693_v5 = vadd.f32 %v12554_v49, %v1642_v43 }
 0x495   : > { %v10994_v53 = vpop.eup %10993  ;;  %v1817_v61 = vadd.f32 1.0, %v10992_v27  ;;  %11013 = vrcp.f32 %v1815_v47  ;;  %v1711_v26 = vsub.f32 0.0, %v12688_v13  ;;  %vm15490_vm6 = vcmp.ne.s16.totalorder %v15654_v36, 0 }
 0x496   : > { %v10996_v56 = vpop.eup %10995  ;;  %v1818_v24 = vadd.f32 1.0, %v10994_v53  ;;  %11015 = vrcp.f32 %v1816_v50  ;;  %v12698_v9 = vadd.f32 %v12554_v49, %v1629_v4  ;;  %v12701_v30 = vadd.f32 %v12554_v49, %v1630_v60 }
 0x497   : > { %v10998_v6 = vpop.eup %10997  ;;  %v1819_v58 = vadd.f32 1.0, %v10996_v56  ;;  %11017 = vrcp.f32 %v1817_v61  ;;  %v1733_v7 = vmul.f32 1.442695, %v1698_v38  ;;  %v1712_v34 = vsub.f32 0.0, %v12693_v5 }
 0x498   : > { %v11000_v41 = vpop.eup %10999  ;;  %v1820_v39 = vadd.f32 1.0, %v10998_v6  ;;  %11019 = vrcp.f32 %v1818_v24  ;;  %v1759_v47 = vmul.f32 1.442695, %v1711_v26  ;;  %v1699_v43 = vsub.f32 0.0, %v12698_v9 }
 0x499   : > { %v11002_v27 = vpop.eup %11001  ;;  %v1821_v50 = vadd.f32 1.0, %v11000_v41  ;;  %11021 = vrcp.f32 %v1819_v58  ;;  %v1700_v4 = vsub.f32 0.0, %v12701_v30  ;;  %v1643_v60 = vmul.f32 %v12523_v1, %v12517_v15 }
 0x49a   : > { %v11004_v53 = vpop.eup %11003  ;;  %v1822_v56 = vadd.f32 1.0, %v11002_v27  ;;  %11023 = vrcp.f32 %v1820_v39  ;;  %v1761_v38 = vmul.f32 1.442695, %v1712_v34  ;;  %v1735_v61 = vmul.f32 1.442695, %v1699_v43  ;;  %v15656_v27 = vld [vmem:[#allocation27_spill] sm:$0xff] }
 0x49b   : > { %v11006_v29 = vpop.eup %11005  ;;  %11025 = vrcp.f32 %v1821_v50  ;;  %v1791_v6 = vadd.f32 1.0, %v11004_v53  ;;  %v1644_v26 = vmul.f32 %v12523_v1, %v12527_v42  ;;  %v12711_v24 = vadd.f32 %v12554_v49, %v1643_v60 }
 0x49c   : > { %v11008_v58 = vpop.eup %11007  ;;  %11027 = vrcp.f32 %v1822_v56  ;;  %v1899_v41 = vmul.f32 %v11006_v29, %v12576_v28  ;;  %v1593_v15 = vmul.f32 %v12496_v11, %v15655_v19  ;;  %v1594_v34 = vmul.f32 %v12496_v11, %v15656_v27 }
 0x49d   : > { %v12718_v39 = vpop.eup %11009  ;;  %v1900_v43 = vmul.f32 %v11008_v58, %v12579_v40  ;;  %11029 = vpow2.f32 %v12668_v23  ;;  %v12723_v42 = vadd.f32 %v12554_v49, %v1644_v26  ;;  %v1713_v50 = vsub.f32 0.0, %v12711_v24 }
 0x49e   : > { %v12726_v60 = vpop.eup %11011  ;;  %11031 = vrcp.f32 %v1791_v6  ;;  %v1737_v29 = vmul.f32 1.442695, %v1700_v4  ;;  %v1631_v19 = vmul.f32 %v12523_v1, %v1593_v15  ;;  %v1632_v28 = vmul.f32 %v12523_v1, %v1594_v34 }
 0x49f   : > { %v11014_v53 = vpop.eup %11013  ;;  %v1925_v56 = vpack.c.bf16 %v1900_v43, %v1899_v41  ;;  %11033 = vpow2.f32 %v12672_v44  ;;  %v1714_v40 = vsub.f32 0.0, %v12723_v42  ;;  %v12734_v23 = vadd.f32 %v12554_v49, %v12563_v3 }
 0x4a0   : > { %v11016_v26 = vpop.eup %11015  ;;  %11035 = vpow2.f32 %v12675_v0  ;;  %v1763_v58 = vmul.f32 1.442695, %v1713_v50  ;;  %v12738_v4 = vadd.f32 %v12554_v49, %v1631_v19  ;;  %v12741_v6 = vadd.f32 %v12554_v49, %v1632_v28 }
 0x4a1   : > { %v11018_v15 = vpop.eup %11017  ;;  %v12744_v41 = vmul.f32 %v11014_v53, %v12588_v10  ;;  %v12747_v44 = vmul.f32 %v11016_v26, %v12591_v18  ;;  %1947 = vst [vmem:[#allocation2 + $0xb0] sm:$0xff] %v1925_v56  ;;  %v12751_v3 = vsel %vm15490_vm6, %v1925_v56, 0  ;;  %11037 = vpow2.f32 %v12677_v57 }
 0x4a2   : > { %v11020_v0 = vpop.eup %11019  ;;  %v1913_v27 = vmul.f32 %v11018_v15, %v12594_v35  ;;  %11039 = vpow2.f32 %v1733_v7  ;;  %v1765_v34 = vmul.f32 1.442695, %v1714_v40  ;;  %v1701_v43 = vsub.f32 0.0, %v12738_v4 }
 0x4a3   : > { %v11022_v50 = vpop.eup %11021  ;;  %v1914_v10 = vmul.f32 %v11020_v0, %v12597_v14  ;;  %11041 = vpow2.f32 %v1759_v47  ;;  %v1702_v18 = vsub.f32 0.0, %v12741_v6  ;;  %v12760_v19 = vadd.f32 %v12554_v49, %v12666_v37 }
 0x4a4   : > { %v11024_v28 = vpop.eup %11023  ;;  %v1915_v57 = vmul.f32 %v11022_v50, %v12600_v52  ;;  %v2366_v53 = vshrl.u32 %v12751_v3, 16  ;;  %11043 = vpow2.f32 %v1761_v38  ;;  %v1739_v35 = vmul.f32 1.442695, %v1701_v43  ;;  %v15657_v43 = vld [vmem:[#allocation28_spill] sm:$0xff] }
 0x4a5   : > { %v11026_v7 = vpop.eup %11025  ;;  %v1916_v56 = vmul.f32 %v11024_v28, %v12603_v55  ;;  %v1932_v14 = vpack.c.bf16 %v1914_v10, %v1913_v27  ;;  %11045 = vpow2.f32 %v1735_v61  ;;  %v1741_v47 = vmul.f32 1.442695, %v1702_v18 }
 0x4a6   : > { %v11028_v40 = vpop.eup %11027  ;;  %v1917_v26 = vmul.f32 %v11026_v7, %v12606_v12  ;;  %11047 = vpow2.f32 %v1737_v29  ;;  %v1715_v37 = vsub.f32 0.0, %v12734_v23  ;;  %v1716_v52 = vsub.f32 0.0, %v12760_v19 }
 0x4a7   : > { %v11030_v15 = vpop.eup %11029  ;;  %v1918_v38 = vmul.f32 %v11028_v40, %v12609_v54  ;;  %v1933_v0 = vpack.c.bf16 %v1916_v56, %v1915_v57  ;;  %1954 = vst [vmem:[#allocation2 + $0x158] sm:$0xff] %v1932_v14  ;;  %11049 = vpow2.f32 %v1763_v58  ;;  %v1595_v55 = vmul.f32 %v12496_v11, %v15657_v43  ;;  %v15658_v54 = vld [vmem:[#allocation29_spill] sm:$0xff]  ;;  %v15660_v43 = vld [vmem:[#allocation34_spill] sm:$0xff] }
 0x4a8   : > { %v11032_v27 = vpop.eup %11031  ;;  %v1792_v61 = vadd.f32 1.0, %v11030_v15  ;;  %v12772_v50 = vrot.slane %v2366_v53, 7  ;;  %11051 = vpow2.f32 %v1765_v34  ;;  %v12774_v12 = vmul.f32 1.442695, %v1715_v37 }
 0x4a9   : > { %v11034_v29 = vpop.eup %11033  ;;  %v1934_v10 = vpack.c.bf16 %v1918_v38, %v1917_v26  ;;  %1955 = vst [vmem:[#allocation2 + $0x170] sm:$0xff] %v1933_v0  ;;  %11053 = vpow2.f32 %v1739_v35  ;;  %v12776_v18 = vmul.f32 1.442695, %v1716_v52  ;;  %v1596_v28 = vmul.f32 %v12496_v11, %v15658_v54  ;;  %v15659_v52 = vld [vmem:[#allocation30_spill] sm:$0xff] }
 0x4aa   : > { %v11036_v58 = vpop.eup %11035  ;;  %11055 = vrcp.f32 %v1792_v61  ;;  %v1805_v57 = vadd.f32 1.0, %v11034_v29  ;;  %v1633_v7 = vmul.f32 %v12523_v1, %v1595_v55  ;;  %v1909_v53 = vmul.f32 %v12718_v39, %v12582_v22  ;;  %v15661_v55 = vld [vmem:[#allocation31_spill] sm:$0xff] }
 0x4ab   : > { %v11038_v34 = vpop.eup %11037  ;;  %1956 = vst [vmem:[#allocation2 + $0x188] sm:$0xff] %v1934_v10  ;;  %v1806_v56 = vadd.f32 1.0, %v11036_v58  ;;  %11057 = vpow2.f32 %v1741_v47  ;;  %v1634_v35 = vmul.f32 %v12523_v1, %v1596_v28  ;;  %v1910_v14 = vmul.f32 %v12726_v60, %v12585_v33 }
 0x4ac   : > { %v11040_v40 = vpop.eup %11039  ;;  %11059 = vrcp.f32 %v1805_v57  ;;  %v1793_v26 = vadd.f32 1.0, %v11038_v34  ;;  %v12788_v37 = vadd.f32 %v12554_v49, %v1633_v7  ;;  %v1597_v22 = vmul.f32 %v12496_v11, %v15659_v52 }
 0x4ad   : > { %v11042_v39 = vpop.eup %11041  ;;  %11061 = vrcp.f32 %v1806_v56  ;;  %v1794_v15 = vadd.f32 1.0, %v11040_v40  ;;  %v12793_v38 = vadd.f32 %v12554_v49, %v1634_v35  ;;  %v12795_v47 = vpack.c.bf16 %v1910_v14, %v1909_v53  ;;  %v15662_v56 = vld [vmem:[#allocation36_spill] sm:$0xff] }
 0x4ae   : > { %v11044_v0 = vpop.eup %11043  ;;  %vm2279_vm11 = vcmp.ne.s16.totalorder %v15660_v43, 0  ;;  %11063 = vrcp.f32 %v1793_v26  ;;  %v1807_v33 = vadd.f32 1.0, %v11042_v39  ;;  %v1703_v60 = vsub.f32 0.0, %v12788_v37 }
 0x4af   : > { %v1598_v61 = vmul.f32 %v12496_v11, %v15661_v55  ;;  %v11046_v29 = vpop.eup %11045  ;;  %11065 = vrcp.f32 %v1794_v15  ;;  %v1808_v10 = vadd.f32 1.0, %v11044_v0  ;;  %v1704_v54 = vsub.f32 0.0, %v12793_v38  ;;  %1952 = vst [vmem:[#allocation2 + $0x128] sm:$0xff] %v12795_v47  ;;  %v15663_v0 = vld [vmem:[#allocation38_spill] sm:$0xff] }
 0x4b0   : > { %v2307_v28 = vsel %vm15487_vm8, %v12795_v47, 0  ;;  %v11048_v58 = vpop.eup %11047  ;;  %v1887_v57 = vmul.f32 %v11032_v27, %v12636_v16  ;;  %11067 = vrcp.f32 %v1807_v33  ;;  %v1795_v7 = vadd.f32 1.0, %v11046_v29 }
 0x4b1   : > { %v2406_v53 = vshrl.u32 %v2307_v28, 16  ;;  %v11050_v34 = vpop.eup %11049  ;;  %vm15488_vm12 = vcmp.ne.s16.totalorder %v15662_v56, 0  ;;  %11069 = vrcp.f32 %v1808_v10  ;;  %v1796_v11 = vadd.f32 1.0, %v11048_v58 }
 0x4b2   : > { %v1743_v35 = vmul.f32 1.442695, %v1703_v60  ;;  %v12808_v14 = vmul.f32 1.442695, %v1704_v54  ;;  %v11052_v40 = vpop.eup %11051  ;;  %11071 = vrcp.f32 %v1795_v7  ;;  %v1809_v26 = vadd.f32 1.0, %v11050_v34 }
 0x4b3   : > { %v2409_v52 = vshll.u32 %v2307_v28, 16  ;;  %v1635_v39 = vmul.f32 %v12523_v1, %v1597_v22  ;;  %v11054_v15 = vpop.eup %11053  ;;  %vm15500_vm14 = vcmp.ne.s16.totalorder %v15663_v0, 0  ;;  %11073 = vrcp.f32 %v1796_v11  ;;  %v15664_v28 = vld [vmem:[#allocation39_spill] sm:$0xff] }
 0x4b4   : > { %v1810_v16 = vadd.f32 1.0, %v11052_v40  ;;  %v1636_v27 = vmul.f32 %v12523_v1, %v1598_v61  ;;  %v12815_v33 = vpack.c.bf16 %v12747_v44, %v12744_v41  ;;  %v11056_v60 = vpop.eup %11055  ;;  %11075 = vrcp.f32 %v1809_v26 }
 0x4b5   : > { %v1797_v55 = vadd.f32 1.0, %v11054_v15  ;;  %v12817_v29 = vrot.slane %v2406_v53, 7  ;;  %v12820_v10 = vadd.f32 %v12554_v49, %v1635_v39  ;;  %v11058_v22 = vpop.eup %11057  ;;  %v1888_v54 = vmul.f32 %v11056_v60, %v12644_v32 }
 0x4b6   : > { %vm15489_vm15 = vcmp.ne.s16.totalorder %v15664_v28, 0  ;;  %11077 = vrcp.f32 %v1810_v16  ;;  %v12825_v1 = vadd.f32 %v12554_v49, %v1636_v27  ;;  %1953 = vst [vmem:[#allocation2 + $0x140] sm:$0xff] %v12815_v33  ;;  %v12831_v41 = vsel %vm15486_vm9, %v12815_v33, 0  ;;  %v11060_v44 = vpop.eup %11059  ;;  %v15665_v49 = vld [vmem:[#allocation40_spill] sm:$0xff] }
 0x4b7   : > { %v1798_v61 = vadd.f32 1.0, %v11058_v22  ;;  %11079 = vrcp.f32 %v1797_v55  ;;  %v1705_v58 = vsub.f32 0.0, %v12820_v10  ;;  %v2414_v32 = vshrl.u32 %v12831_v41, 16  ;;  %v11062_v7 = vpop.eup %11061 }
 0x4b8   : > { %v1919_v53 = vpack.c.bf16 %v1888_v54, %v1887_v57  ;;  %v1901_v34 = vmul.f32 %v11060_v44, %v12649_v48  ;;  %vm15491_vm3 = vcmp.ne.s16.totalorder %v15665_v49, 0  ;;  %11081 = vpow2.f32 %v12774_v12  ;;  %v11064_v40 = vpop.eup %11063  ;;  %v15666_v12 = vld [vmem:[#allocation41_spill] sm:$0xff] }
 0x4b9   : > { %v1706_v11 = vsub.f32 0.0, %v12825_v1  ;;  %v1902_v26 = vmul.f32 %v11062_v7, %v12652_v17  ;;  %11083 = vrcp.f32 %v1798_v61  ;;  %v12841_v39 = vor.u32 %v2409_v52, %v12817_v29  ;;  %v11066_v16 = vpop.eup %11065 }
 0x4ba   : > { %v12843_v15 = vmul.f32 1.442695, %v1705_v58  ;;  %1941 = vst [vmem:[#allocation2 + $0x20] sm:$0xff] %v1919_v53  ;;  %3281 = vmatprep.mubr.bf16.mxu0 %v1919_v53  ;;  %v2296_v48 = vsel %vm2279_vm11, %v1919_v53, 0  ;;  %v1889_v57 = vmul.f32 %v11064_v40, %v12655_v63  ;;  %vm15492_vm4 = vcmp.ne.s16.totalorder %v15666_v12, 0  ;;  %v11068_v17 = vpop.eup %11067 }
 0x4bb   : > { %11085 = vpow2.f32 %v12776_v18  ;;  %v12850_v27 = vrot.slane %v2414_v32, 7  ;;  %v1926_v60 = vpack.c.bf16 %v1902_v26, %v1901_v34  ;;  %v2318_v52 = vshrl.u32 %v2296_v48, 16  ;;  %v11070_v54 = vpop.eup %11069 }
 0x4bc   : > { %v1890_v55 = vmul.f32 %v11066_v16, %v12659_v51  ;;  %v12853_v22 = vmul.f32 1.442695, %v1706_v11  ;;  %v2321_v44 = vshll.u32 %v2296_v48, 16  ;;  %v1903_v61 = vmul.f32 %v11068_v17, %v12688_v13  ;;  %v11072_v58 = vpop.eup %11071  ;;  %v15667_v13 = vld [vmem:[#allocation42_spill] sm:$0xff] }
 0x4bd   : > { %11087 = vpow2.f32 %v1743_v35  ;;  %v2417_v63 = vshll.u32 %v12831_v41, 16  ;;  %1948 = vst [vmem:[#allocation2 + $0xc8] sm:$0xff] %v1926_v60  ;;  %3337 = vmatprep.mubr.bf16.mxu1 %v1926_v60  ;;  %v12857_v18 = vrot.slane %v2318_v52, 7  ;;  %v2303_v32 = vsel %vm15488_vm12, %v1926_v60, 0  ;;  %v11074_v53 = vpop.eup %11073 }
 0x4be   : > { %v1920_v7 = vpack.c.bf16 %v1890_v55, %v1889_v57  ;;  %v1904_v51 = vmul.f32 %v11070_v54, %v12693_v5  ;;  %v2374_v34 = vshrl.u32 %v2303_v32, 16  ;;  %v2377_v11 = vshll.u32 %v2303_v32, 16  ;;  %v11076_v35 = vpop.eup %11075 }
 0x4bf   : > { %v1891_v40 = vmul.f32 %v11072_v58, %v12698_v9  ;;  %vm15497_vm5 = vcmp.ne.s16.totalorder %v15667_v13, 0  ;;  %11089 = vpow2.f32 %v12808_v14  ;;  %v2323_v26 = vor.u32 %v2321_v44, %v12857_v18  ;;  %v15668_v14 = vld [vmem:[#allocation37_spill] sm:$0xff] }
 0x4c0   : > { %1942 = vst [vmem:[#allocation2 + $0x38] sm:$0xff] %v1920_v7  ;;  %v1927_v16 = vpack.c.bf16 %v1904_v51, %v1903_v61  ;;  %v2297_v48 = vsel %vm15500_vm14, %v1920_v7, 0  ;;  %v1892_v57 = vmul.f32 %v11074_v53, %v12701_v30  ;;  %v11078_v5 = vpop.eup %11077  ;;  %v2376_v17 = vrot.slane %v2374_v34, 7  ;;  %v10816_v34 = vld [vmem:[#allocation4 + $0x180] sm:$0xff]  }
 0x4c1   : > { %v2326_v60 = vshrl.u32 %v2297_v48, 16  ;;  %v2329_v52 = vshll.u32 %v2297_v48, 16  ;;  %v1905_v9 = vmul.f32 %v11076_v35, %v12711_v24  ;;  %vm15493_vm9 = vcmp.ne.s16.totalorder %v12470_v21, 0  ;;  %v11080_v55 = vpop.eup %11079  ;;  %v10817_v48 = vld [vmem:[#allocation4 + $0x1c8] sm:$0xff]  }
 0x4c2   : > { %v2324_v54 = vsel %vm2312_vm7, %v15668_v14, %v2323_v26  ;;  %1949 = vst [vmem:[#allocation2 + $0xe0] sm:$0xff] %v1927_v16  ;;  %v2304_v44 = vsel %vm15489_vm15, %v1927_v16, 0  ;;  %v12875_v61 = vpack.c.bf16 %v1892_v57, %v1891_v40  ;;  %v1906_v30 = vmul.f32 %v11078_v5, %v12723_v42  ;;  %v11082_v58 = vpop.eup %11081 }
 0x4c3   : > { %2461 = vst [vmem:[#allocation2 + $0x18] sm:$0xff] %v2324_v54  ;;  %3282 = vmatmul.mubr.bf16.gmra.mrb[12].mxu0 %v2324_v54  ;;  %v2379_v32 = vor.u32 %v2377_v11, %v2376_v17  ;;  %v2328_v51 = vrot.slane %v2326_v60, 7  ;;  %v2382_v24 = vshrl.u32 %v2304_v44, 16  ;;  %v2385_v53 = vshll.u32 %v2304_v44, 16  ;;  %v11084_v35 = vpop.eup %11083 }
 0x4c4   : > { %vm15494_vm8 = vcmp.ne.s16.totalorder %v12474_v59, 0  ;;  %vm2797_vm12 = vcmp.ne.s16.totalorder %v12476_v62, 0  ;;  %3289 = vmatprep.mubr.bf16.mxu0 %v1920_v7  ;;  %1943 = vst [vmem:[#allocation2 + $0x50] sm:$0xff] %v12875_v61  ;;  %v12881_v40 = vpack.c.bf16 %v1906_v30, %v1905_v9  ;;  %v2298_v42 = vsel %vm15491_vm3, %v12875_v61, 0 }
 0x4c5   : > { %v1893_v11 = vmul.f32 %v11080_v55, %v12738_v4  ;;  %v1811_v26 = vadd.f32 1.0, %v11082_v58  ;;  %v11086_v57 = vpop.eup %11085  ;;  %v2380_v5 = vsel %vm2312_vm7, %v12772_v50, %v2379_v32  ;;  %v2331_v60 = vor.u32 %v2329_v52, %v2328_v51 }
 0x4c6   : > { %v2384_v14 = vrot.slane %v2382_v24, 7  ;;  %v2334_v54 = vshrl.u32 %v2298_v42, 16  ;;  %vm2798_vm15 = vcmp.ne.s16.totalorder %v12479_v2, 0  ;;  %vm15501_vm6 = vcmp.ne.s16.totalorder %v12467_v8, 0  ;;  %2468 = vst [vmem:[#allocation2 + $0xc0] sm:$0xff] %v2380_v5  ;;  %3338 = vmatmul.mubr.bf16.vlgmr.msra.gmra.mrb[4].mxu1 %v2380_v5  ;;  %1950 = vst [vmem:[#allocation2 + $0xf8] sm:$0xff] %v12881_v40 }
 0x4c7   : > { %v2337_v7 = vshll.u32 %v2298_v42, 16  ;;  %v2305_v4 = vsel %vm15492_vm4, %v12881_v40, 0  ;;  %v1894_v9 = vmul.f32 %v11084_v35, %v12741_v6  ;;  %v1812_v55 = vadd.f32 1.0, %v11086_v57  ;;  %v11088_v44 = vpop.eup %11087  ;;  %3345 = vmatprep.mubr.bf16.mxu1 %v1927_v16  ;;  %9117 = vmatpush3.bf16.msra.mxu1 %v10816_v34  ;;  %v10818_v24 = vld [vmem:[#allocation4 + $0x188] sm:$0xff]   ;;  %v10820_v35 = vld [vmem:[#allocation4 + $0x1d0] sm:$0xff]   ;;  %v12907_v34 = vld [vmem:[#allocation2 + $0x158] sm:$0xff] }
 0x4c8   : > { %v2332_v52 = vsel %vm2312_vm7, %v12857_v18, %v2331_v60  ;;  %v2387_v30 = vor.u32 %v2385_v53, %v2384_v14  ;;  %v12898_v58 = vrot.slane %v2334_v54, 7  ;;  %v2390_v32 = vshrl.u32 %v2305_v4, 16  ;;  %9118 = vmatprep.subr.bf16.mxu1 %v10817_v48 }
 0x4c9   : > { %vm15499_vm3 = vcmp.ne.s16.totalorder %v12485_v45, 0  ;;  %2462 = vst [vmem:[#allocation2 + $0x30] sm:$0xff] %v2332_v52  ;;  %v2393_v42 = vshll.u32 %v2305_v4, 16  ;;  %v12901_v5 = vpack.c.bf16 %v1894_v9, %v1893_v11  ;;  %11091 = vrcp.f32 %v1811_v26  ;;  %v11090_v16 = vpop.eup %11089  ;;  %v12919_v9 = vld [vmem:[#allocation2 + $0x170] sm:$0xff] }
 0x4ca   : > { %v1799_v6 = vadd.f32 1.0, %v11088_v44  ;;  %v2388_v57 = vsel %vm2312_vm7, %v2376_v17, %v2387_v30  ;;  %v2339_v18 = vor.u32 %v2337_v7, %v12898_v58  ;;  %v12905_v53 = vrot.slane %v2390_v32, 7  ;;  %v10821_v7 = vld [vmem:[#allocation4 + $0x190] sm:$0xff]  }
 0x4cb   : > { %11093 = vrcp.f32 %v1812_v55  ;;  %2469 = vst [vmem:[#allocation2 + $0xd8] sm:$0xff] %v2388_v57  ;;  %1944 = vst [vmem:[#allocation2 + $0x68] sm:$0xff] %v12901_v5  ;;  %v2299_v11 = vsel %vm15497_vm5, %v12901_v5, 0  ;;  %v1800_v26 = vadd.f32 1.0, %v11090_v16  ;;  %v2419_v17 = vor.u32 %v2417_v63, %v12850_v27  ;;  %3290 = vmatmul.mubr.bf16.gmra.mrb[16].mxu0 %v2332_v52  ;;  %9119 = vmatpush3.bf16.msra.mxu1 %v10818_v24  ;;  %v12921_v55 = vld [vmem:[#allocation2 + $0x20] sm:$0xff]  ;;  %v10822_v63 = vld [vmem:[#allocation4 + $0x1d8] sm:$0xff]  }
 0x4cc   : > { %11095 = vrcp.f32 %v1799_v6  ;;  %v2340_v48 = vsel %vm2312_vm7, %v2328_v51, %v2339_v18  ;;  %v2395_v60 = vor.u32 %v2393_v42, %v12905_v53  ;;  %v2342_v54 = vshrl.u32 %v2299_v11, 16  ;;  %3297 = vmatprep.mubr.bf16.mxu0 %v12875_v61  ;;  %9120 = vmatprep.subr.bf16.mxu1 %v10820_v35  ;;  %v12937_v24 = vld [vmem:[#allocation2 + $0x38] sm:$0xff] }
 0x4cd   : > { %2463 = vst [vmem:[#allocation2 + $0x48] sm:$0xff] %v2340_v48  ;;  %v2345_v44 = vshll.u32 %v2299_v11, 16  ;;  %11097 = vrcp.f32 %v1800_v26  ;;  %v12926_v41 = vsel %vm2312_vm7, %v12817_v29, %v2419_v17  ;;  %v2309_v51 = vsel %vm15493_vm9, %v12907_v34, 0  ;;  %v10823_v6 = vld [vmem:[#allocation4 + $0x198] sm:$0xff]  }
 0x4ce   : > { %v2396_v52 = vsel %vm2312_vm7, %v2384_v14, %v2395_v60  ;;  %v12932_v30 = vrot.slane %v2342_v54, 7  ;;  %vm15495_vm4 = vcmp.ne.s16.totalorder %v12443_v20, 0  ;;  %11099 = vpow2.f32 %v12843_v15  ;;  %2473 = vst [vmem:[#allocation2 + $0x138] sm:$0xff] %v12926_v41  ;;  %3346 = vmatmul.mubr.bf16.gmra.mrb[8].mxu1 %v2388_v57 }
 0x4cf   : > { %v2422_v32 = vshrl.u32 %v2309_v51, 16  ;;  %2470 = vst [vmem:[#allocation2 + $0xf0] sm:$0xff] %v2396_v52  ;;  %11101 = vpow2.f32 %v12853_v22  ;;  %v2425_v29 = vshll.u32 %v2309_v51, 16  ;;  %v2310_v14 = vsel %vm15494_vm8, %v12919_v9, 0  ;;  %3353 = vmatprep.mubr.bf16.mxu1 %v12881_v40  ;;  %9121 = vmatpush3.bf16.msra.mxu1 %v10821_v7  ;;  %v10825_v22 = vld [vmem:[#allocation4 + $0x1e0] sm:$0xff]  }
 0x4d0   : > { %v2814_v42 = vsel %vm2797_vm12, %v12921_v55, 0  ;;  %v2347_v15 = vor.u32 %v2345_v44, %v12932_v30  ;;  %v2430_v16 = vshrl.u32 %v2310_v14, 16  ;;  %v2433_v57 = vshll.u32 %v2310_v14, 16  ;;  %9122 = vmatprep.subr.bf16.mxu1 %v10822_v63 }
 0x4d1   : > { %v2424_v35 = vrot.slane %v2422_v32, 7  ;;  %vm15496_vm9 = vcmp.ne.s16.totalorder %v12451_v25, 0  ;;  %v2815_v18 = vsel %vm2798_vm15, %v12937_v24, 0  ;;  %v2832_v11 = vshrl.u32 %v2814_v42, 16  ;;  %v15698_v25 = vld [vmem:[#allocation43_spill] sm:$0xff] }
 0x4d2   : > { %v2834_v26 = vshll.u32 %v2814_v42, 16  ;;  %v2816_v40 = vsel %vm15501_vm6, %v12875_v61, 0  ;;  %v12957_v17 = vsel %vm2312_vm7, %v12898_v58, %v2347_v15  ;;  %v12959_v54 = vrot.slane %v2430_v16, 7  ;;  %v10826_v42 = vld [vmem:[#allocation4 + $0x1a0] sm:$0xff]  }
 0x4d3   : > { %v2427_v60 = vor.u32 %v2425_v29, %v2424_v35  ;;  %v2839_v7 = vshll.u32 %v2815_v18, 16  ;;  %v11092_v44 = vpop.eup %11091  ;;  %2464 = vst [vmem:[#allocation2 + $0x60] sm:$0xff] %v12957_v17  ;;  %v2843_v51 = vshrl.u32 %v2815_v18, 16  ;;  %v2847_v32 = vshll.u32 %v2816_v40, 16  ;;  %3298 = vmatmul.mubr.bf16.gmra.mrb[20].mxu0 %v2340_v48  ;;  %9123 = vmatpush3.bf16.msra.mxu1 %v10823_v6  ;;  %v10827_v48 = vld [vmem:[#allocation4 + $0x1e8] sm:$0xff]  }
 0x4d4   : > { %v2836_v63 = vrot.slane %v2834_v26, 1  ;;  %v12965_v14 = vsel %vm15499_vm3, %v12901_v5, 0  ;;  %v1907_v58 = vmul.f32 %v11092_v44, %v12734_v23  ;;  %v2435_v15 = vor.u32 %v2433_v57, %v12959_v54  ;;  %3305 = vmatprep.mubr.bf16.mxu0 %v12901_v5  ;;  %9124 = vmatprep.subr.bf16.mxu1 %v10825_v22 }
 0x4d5   : > { %v11094_v61 = vpop.eup %11093  ;;  %v12970_v29 = vsel %vm2312_vm7, %v12850_v27, %v2427_v60  ;;  %v2841_v16 = vrot.slane %v2839_v7, 1  ;;  %v2849_v23 = vrot.slane %v2847_v32, 1  ;;  %v2851_v6 = vshrl.u32 %v2816_v40, 16 }
 0x4d6   : > { %v11096_v18 = vpop.eup %11095  ;;  %v1908_v26 = vmul.f32 %v11094_v61, %v12760_v19  ;;  %2474 = vst [vmem:[#allocation2 + $0x150] sm:$0xff] %v12970_v29  ;;  %v2837_v4 = vor.u32 %v2836_v63, %v2832_v11  ;;  %v12978_v27 = vsel %vm2312_vm7, %v2424_v35, %v2435_v15  ;;  %v2855_v57 = vshll.u32 %v12965_v14, 16  ;;  %3354 = vmatmul.mubr.bf16.gmra.mrb[12].mxu1 %v2396_v52  ;;  %v15669_v11 = vld [vmem:[#allocation62_spill] sm:$0xff]  ;;  %v15670_v63 = vld [vmem:[#allocation44_spill] sm:$0xff]  ;;  %v10828_v52 = vld [vmem:[#allocation4 + $0x1a8] sm:$0xff]  }
 0x4d7   : > { %v1895_v44 = vmul.f32 %v11096_v18, %v12788_v37  ;;  %v2845_v60 = vor.u32 %v2843_v51, %v2841_v16  ;;  %v11098_v7 = vpop.eup %11097  ;;  %2475 = vst [vmem:[#allocation2 + $0x168] sm:$0xff] %v12978_v27  ;;  %v2853_v22 = vor.u32 %v2851_v6, %v2849_v23  ;;  %v12988_v40 = vsel %vm2312_vm7, %v15670_v63, %v15669_v11  ;;  %v10833_v63 = vld [vmem:[#allocation4 + $0x1f8] sm:$0xff]  }
 0x4d8   : > { %v1929_v5 = vpack.c.bf16 %v1908_v26, %v1907_v58  ;;  %v12983_v19 = vsel %vm2150_vm10, %v2837_v4, %v2841_v16  ;;  %15671 = vst [vmem:[#allocation24_spill] sm:$0xff] %v12988_v40  ;;  %v11100_v37 = vpop.eup %11099  ;;  %v1896_v35 = vmul.f32 %v11098_v7, %v12793_v38  ;;  %v15672_v51 = vshll.u32 %v12751_v3, 16  ;;  %9125 = vmatpush3.bf16.msra.mxu1 %v10826_v42  ;;  %v10831_v16 = vld [vmem:[#allocation4 + $0x1f0] sm:$0xff]  }
 0x4d9   : > { %2979 = vst [vmem:[#allocation2 + $0x28] sm:$0xff] %v12983_v19  ;;  %v12998_v4 = vsel %vm2150_vm10, %v2845_v60, %v2849_v23  ;;  %v2857_v61 = vrot.slane %v2855_v57, 1  ;;  %v11102_v58 = vpop.eup %11101  ;;  %v1801_v38 = vadd.f32 1.0, %v11100_v37  ;;  %9126 = vmatprep.subr.bf16.mxu1 %v10827_v48  ;;  %vm15498_vm8 = vcmp.ne.s16.totalorder %v12988_v40, 0  ;;  %v15673_v3 = vld [vmem:[#allocation56_spill] sm:$0xff] }
 0x4da   : > { %v12994_v32 = vor.u32 %v15672_v51, %v12772_v50  ;;  %1951 = vst [vmem:[#allocation2 + $0x110] sm:$0xff] %v1929_v5  ;;  %3361 = vmatprep.mubr.bf16.mxu1 %v1929_v5  ;;  %v2306_v15 = vsel %vm15495_vm4, %v1929_v5, 0  ;;  %2980 = vst [vmem:[#allocation2 + $0x40] sm:$0xff] %v12998_v4  ;;  %v15674_v50 = vshrl.u32 %v15673_v3, 16  ;;  %v13008_v26 = vpack.c.bf16 %v1896_v35, %v1895_v44  ;;  %v15676_v51 = vld [vmem:[#allocation58_spill] sm:$0xff] }
 0x4db   : > { %v2398_v18 = vshrl.u32 %v2306_v15, 16  ;;  %v1802_v23 = vadd.f32 1.0, %v11102_v58  ;;  %v2859_v6 = vshrl.u32 %v12965_v14, 16  ;;  %v2401_v60 = vshll.u32 %v2306_v15, 16  ;;  %3306 = vmatmul.mubr.bf16.gmra.mrb[24].mxu0 %v12957_v17  ;;  %v10832_v14 = vld [vmem:[#allocation4 + $0x1b0] sm:$0xff]  }
 0x4dc   : > { %v13006_v42 = vrot.slane %v15674_v50, 7  ;;  %11103 = vrcp.f32 %v1801_v38  ;;  %v13012_v57 = vsel %vm2150_vm10, %v2853_v22, %v2857_v61  ;;  %v15675_v48 = vshll.u32 %v15673_v3, 16  ;;  %1945 = vst [vmem:[#allocation2 + $0x80] sm:$0xff] %v13008_v26  ;;  %9127 = vmatpush3.bf16.msra.mxu1 %v10828_v52  ;;  %3313 = vmatprep.mubr.bf16.mxu0 %v13008_v26 }
 0x4dd   : > { %v2400_v5 = vrot.slane %v2398_v18, 7  ;;  %v2300_v44 = vsel %vm15496_vm9, %v13008_v26, 0  ;;  %11105 = vrcp.f32 %v1802_v23  ;;  %2981 = vst [vmem:[#allocation2 + $0x58] sm:$0xff] %v13012_v57  ;;  %v2818_v22 = vsel %vm15498_vm8, %v13008_v26, 0  ;;  %9128 = vmatprep.subr.bf16.mxu1 %v10831_v16  ;;  %v15678_v23 = vld [vmem:[#allocation63_spill] sm:$0xff] }
 0x4de   : > { %v2715_v7 = vor.u32 %v15675_v48, %v13006_v42  ;;  %v2350_v11 = vshrl.u32 %v2300_v44, 16  ;;  %v2861_v37 = vor.u32 %v2859_v6, %v2857_v61  ;;  %v2863_v35 = vshll.u32 %v2818_v22, 16  ;;  %v15679_v6 = vld [vmem:[#allocation49_spill] sm:$0xff] }
 0x4df   : > { %v2403_v15 = vor.u32 %v2401_v60, %v2400_v5  ;;  %v2353_v52 = vshll.u32 %v2300_v44, 16  ;;  %v2412_v38 = vsel %vm2312_vm7, %v2400_v5, %v12841_v39  ;;  %v2867_v3 = vshrl.u32 %v2818_v22, 16  ;;  %v10834_v60 = vld [vmem:[#allocation4 + $0x1b8] sm:$0xff]   ;;  %v15682_v5 = vld [vmem:[#allocation60_spill] sm:$0xff] }
 0x4e0   : > { %v13029_v58 = vsel %vm2312_vm7, %v15676_v51, %v2715_v7  ;;  %v13033_v50 = vrot.slane %v2350_v11, 7  ;;  %2472 = vst [vmem:[#allocation2 + $0x120] sm:$0xff] %v2412_v38  ;;  %v2865_v18 = vrot.slane %v2863_v35, 1  ;;  %v2718_v48 = vshrl.u32 %v15678_v23, 16  ;;  %9129 = vmatpush3.bf16.msra.mxu1 %v10832_v14  ;;  %v15680_v7 = vld [vmem:[#allocation59_spill] sm:$0xff]  ;;  %v15686_v11 = vld [vmem:[#allocation61_spill] sm:$0xff] }
 0x4e1   : > { %15677 = vst [vmem:[#allocation25_spill] sm:$0xff] %v13029_v58  ;;  %v2721_v16 = vshll.u32 %v15678_v23, 16  ;;  %v2404_v61 = vsel %vm2312_vm7, %v12905_v53, %v2403_v15  ;;  %vm15511_vm4 = vcmp.ne.s16.totalorder %v15679_v6, 0  ;;  %vm2802_vm9 = vcmp.ne.s16.totalorder %v13029_v58, 0  ;;  %9130 = vmatprep.subr.bf16.mxu1 %v10833_v63  ;;  %v13058_v23 = vld [vmem:[#allocation2 + $0x8] sm:$0xff]  ;;  %v15687_v63 = vld [vmem:[#allocation22_spill] sm:$0xff] }
 0x4e2   : > { %v15681_v39 = vand.u32 15, %v15680_v7  ;;  %v15683_v44 = vand.u32 15, %v15682_v5  ;;  %v815_v35 = vand.u32 15, %v15686_v11  ;;  %2471 = vst [vmem:[#allocation2 + $0x108] sm:$0xff] %v2404_v61  ;;  %3362 = vmatmul.mubr.bf16.gmra.mrb[16].mxu1 %v2404_v61  ;;  %v2355_v53 = vor.u32 %v2353_v52, %v13033_v50  ;;  %v10862_v58 = vld [vmem:[#allocation4 + $0x228] sm:$0xff]  }
 0x4e3   : > { %v13052_v14 = vsel %vm2150_vm10, %v2861_v37, %v2865_v18  ;;  %v13054_v51 = vor.u32 %v2867_v3, %v2865_v18  ;;  %v2720_v15 = vrot.slane %v2718_v48, 7  ;;  %3369 = vmatprep.mubr.bf16.mxu1 %v12795_v47  ;;  %v667_v37 = vadd.s32 168, %v15687_v63  ;;  %v15688_v18 = vld [vmem:[#allocation32_spill] sm:$0xff] }
 0x4e4   : > { %vm1109_vm5 = vcmp.lt.s32.totalorder %v15681_v39, 15  ;;  %vm13045_vm8 = vcmp.lt.s32.totalorder %v15683_v44, 15  ;;  %2982 = vst [vmem:[#allocation2 + $0x70] sm:$0xff] %v13052_v14  ;;  %vm1113_vm6 = vcmp.lt.s32.totalorder %v815_v35, 15  ;;  %v669_v52 = vadd.s32 184, %v15687_v63  ;;  %v13074_v39 = vld [vmem:[#allocation2 + $0xb0] sm:$0xff]  ;;  %9131 = vmatpush3.bf16.msra.mxu1 %v10834_v60 }
 0x4e5   : > { %vm2573_vm3 = vmpackc.low %vm1109_vm5, %vm1109_vm5  ;;  %v13068_v3 = vsel %vm2312_vm7, %v12932_v30, %v2355_v53  ;;  %v2723_v47 = vor.u32 %v2721_v16, %v2720_v15  ;;  %v829_v22 = vand.u32 15, %v667_v37  ;;  %v15690_v59 = vmov 0.0|0.0  }
 0x4e6   : > { %v2605_v7 = vsel %vm2573_vm3, 65537, %v13058_v23  ;;  %vm2575_vm14 = vmpackc.low %vm13045_vm8, %vm13045_vm8  ;;  %2465 = vst [vmem:[#allocation2 + $0x78] sm:$0xff] %v13068_v3  ;;  %3314 = vmatmul.mubr.bf16.gmra.mrb[28].mxu0 %v13068_v3  ;;  %v843_v30 = vand.u32 15, %v669_v52  ;;  %v11104_v11 = vpop.eup %11103  ;;  %10266 = vmatprep.subr.bf16.mxu1 %v15690_v59 }
 0x4e7   : > { %v8453_v48 = vcombine.low %v15688_v18, %v2605_v7  ;;  %v2607_v61 = vsel %vm2575_vm14, 65537, %v13058_v23  ;;  %vm2577_vm5 = vmpackc.low %vm1113_vm6, %vm1113_vm6  ;;  %v13080_v16 = vsel %vm2312_vm7, %v13006_v42, %v2723_v47  ;;  %v11106_v21 = vpop.eup %11105  ;;  %v1897_v60 = vmul.f32 %v11104_v11, %v12820_v10 }
 0x4e8   : > { %v8454_v5 = vcombine.low %v15688_v18, %v2607_v61  ;;  %v2609_v44 = vsel %vm2577_vm5, 65537, %v13058_v23  ;;  %15689 = vst [vmem:[#allocation26_spill] sm:$0xff] %v13080_v16  ;;  %vm15512_vm6 = vcmp.ne.s16.totalorder %v13080_v16, 0  ;;  %v1898_v37 = vmul.f32 %v11106_v21, %v12825_v1 }
 0x4e9   : > { %v2726_v35 = vshrl.u32 %v8453_v48, 16  ;;  %v2729_v53 = vshll.u32 %v8453_v48, 16  ;;  %v8455_v7 = vcombine.low %v15688_v18, %v2609_v44  ;;  %v2820_v42 = vsel %vm15512_vm6, %v13074_v39, 0 }
 0x4ea   : > { %v2734_v61 = vshrl.u32 %v8454_v5, 16  ;;  %v2737_v31 = vshll.u32 %v8454_v5, 16  ;;  %v2879_v48 = vshll.u32 %v2820_v42, 16  ;;  %v2883_v46 = vshrl.u32 %v2820_v42, 16  ;;  %3370 = vmatmul.mubr.bf16.gmra.mrb[20].mxu1 %v2412_v38 }
 0x4eb   : > { %v2728_v52 = vrot.slane %v2726_v35, 7  ;;  %v2742_v47 = vshrl.u32 %v8455_v7, 16  ;;  %v2745_v20 = vshll.u32 %v8455_v7, 16  ;;  %v13090_v12 = vpack.c.bf16 %v1898_v37, %v1897_v60  ;;  %3377 = vmatprep.mubr.bf16.mxu1 %v12815_v33 }
 0x4ec   : > { %v2736_v44 = vrot.slane %v2734_v61, 7  ;;  %vm13094_vm8 = vcmp.lt.s32.totalorder %v829_v22, 15  ;;  %v2881_v21 = vrot.slane %v2879_v48, 1  ;;  %vm13099_vm14 = vcmp.lt.s32.totalorder %v843_v30, 15 }
 0x4ed   : > { %v2731_v10 = vor.u32 %v2729_v53, %v2728_v52  ;;  %v13092_v11 = vrot.slane %v2742_v47, 7  ;;  %v13104_v7 = vadd.s32 200, %v15687_v63  ;;  %1946 = vst [vmem:[#allocation2 + $0x98] sm:$0xff] %v13090_v12  ;;  %3321 = vmatprep.mubr.bf16.mxu0 %v13090_v12  ;;  %v2301_v38 = vsel %vm15511_vm4, %v13090_v12, 0  ;;  %v13120_v47 = vld [vmem:[#allocation2 + $0xe0] sm:$0xff]  ;;  %vm2579_vm6 = vmpackc.low %vm13094_vm8, %vm13094_vm8 }
 0x4ee   : > { %v2739_v1 = vor.u32 %v2737_v31, %v2736_v44  ;;  %v2819_v22 = vsel %vm2802_vm9, %v13090_v12, 0  ;;  %v13114_v31 = vld [vmem:[#allocation2 + $0xc8] sm:$0xff]  ;;  %v2358_v60 = vshrl.u32 %v2301_v38, 16  ;;  %v2361_v61 = vshll.u32 %v2301_v38, 16 }
 0x4ef   : > { %v13117_v30 = vsel %vm2312_vm7, %v2720_v15, %v2731_v10  ;;  %v2747_v53 = vor.u32 %v2745_v20, %v13092_v11  ;;  %v2871_v37 = vshll.u32 %v2819_v22, 16  ;;  %v2875_v42 = vshrl.u32 %v2819_v22, 16  ;;  %v13133_v10 = vld [vmem:[#allocation2 + $0xf8] sm:$0xff] }
 0x4f0   : > { %15695 = vst [vmem:[#allocation27_spill] sm:$0xff] %v13117_v30  ;;  %vm15519_vm3 = vcmp.ne.s16.totalorder %v13117_v30, 0  ;;  %v2885_v48 = vor.u32 %v2883_v46, %v2881_v21  ;;  %v13124_v28 = vsel %vm2312_vm7, %v2728_v52, %v2739_v1  ;;  %v2360_v36 = vrot.slane %v2358_v60, 7 }
 0x4f1   : > { %15696 = vst [vmem:[#allocation28_spill] sm:$0xff] %v13124_v28  ;;  %v13127_v56 = vsel %vm2312_vm7, %v2736_v44, %v2747_v53  ;;  %v2873_v15 = vrot.slane %v2871_v37, 1  ;;  %v2821_v20 = vsel %vm15519_vm3, %v13114_v31, 0  ;;  %vm15513_vm5 = vcmp.ne.s16.totalorder %v13124_v28, 0 }
 0x4f2   : > { %15697 = vst [vmem:[#allocation29_spill] sm:$0xff] %v13127_v56  ;;  %v2887_v38 = vshll.u32 %v2821_v20, 16  ;;  %v2822_v46 = vsel %vm15513_vm5, %v13120_v47, 0  ;;  %v2891_v52 = vshrl.u32 %v2821_v20, 16  ;;  %vm15518_vm4 = vcmp.ne.s16.totalorder %v13127_v56, 0  ;;  %3378 = vmatmul.mubr.bf16.gmra.mrb[24].mxu1 %v12926_v41  ;;  %vm2581_vm5 = vmpackc.low %vm13099_vm14, %vm13099_vm14 }
 0x4f3   : > { %v2363_v44 = vor.u32 %v2361_v61, %v2360_v36  ;;  %v13144_v1 = vsel %vm2312_vm7, %v2360_v36, %v12994_v32  ;;  %v13148_v22 = vsel %vm2150_vm10, %v13054_v51, %v2873_v15  ;;  %v2877_v53 = vor.u32 %v2875_v42, %v2873_v15  ;;  %3385 = vmatprep.mubr.bf16.mxu1 %v12907_v34 }
 0x4f4   : > { %2467 = vst [vmem:[#allocation2 + $0xa8] sm:$0xff] %v13144_v1  ;;  %2983 = vst [vmem:[#allocation2 + $0x88] sm:$0xff] %v13148_v22  ;;  %v2889_v60 = vrot.slane %v2887_v38, 1  ;;  %v2895_v37 = vshll.u32 %v2822_v46, 16  ;;  %v2823_v61 = vsel %vm15518_vm4, %v13133_v10, 0  ;;  %v2899_v20 = vshrl.u32 %v2822_v46, 16 }
 0x4f5   : > { %v13161_v36 = vsel %vm2312_vm7, %v13033_v50, %v2363_v44  ;;  %v13165_v41 = vsel %vm2150_vm10, %v2877_v53, %v2881_v21  ;;  %v2903_v32 = vshll.u32 %v2823_v61, 16  ;;  %v2611_v51 = vsel %vm2579_vm6, 65537, %v13058_v23 }
 0x4f6   : > { %2466 = vst [vmem:[#allocation2 + $0x90] sm:$0xff] %v13161_v36  ;;  %3322 = vmatmul.mubr.bf16.gmra.mrb[32].mxu0 %v13161_v36  ;;  %2984 = vst [vmem:[#allocation2 + $0xa0] sm:$0xff] %v13165_v41  ;;  %v13177_v50 = vsel %vm2150_vm10, %v2885_v48, %v2889_v60  ;;  %v2893_v42 = vor.u32 %v2891_v52, %v2889_v60  ;;  %v2897_v21 = vrot.slane %v2895_v37, 1  ;;  %v2613_v38 = vsel %vm2581_vm5, 65537, %v13058_v23 }
 0x4f7   : > { %v8456_v15 = vcombine.low %v15688_v18, %v2611_v51  ;;  %3329 = vmatprep.mubr.bf16.mxu0 %v13074_v39  ;;  %2985 = vst [vmem:[#allocation2 + $0xb8] sm:$0xff] %v13177_v50  ;;  %v2905_v5 = vrot.slane %v2903_v32, 1  ;;  %v857_v46 = vand.u32 15, %v13104_v7  ;;  %v2907_v60 = vshrl.u32 %v2823_v61, 16 }
 0x4f8   : > { %v13190_v48 = vsel %vm2150_vm10, %v2893_v42, %v2897_v21  ;;  %v2901_v52 = vor.u32 %v2899_v20, %v2897_v21  ;;  %v8457_v37 = vcombine.low %v15688_v18, %v2613_v38  ;;  %v673_v32 = vadd.s32 216, %v15687_v63 }
 0x4f9   : > { %v2750_v44 = vshrl.u32 %v8456_v15, 16  ;;  %v2753_v53 = vshll.u32 %v8456_v15, 16  ;;  %2986 = vst [vmem:[#allocation2 + $0xd0] sm:$0xff] %v13190_v48  ;;  %vm1119_vm6 = vcmp.lt.s32.totalorder %v857_v46, 15  ;;  %v675_v7 = vadd.s32 232, %v15687_v63 }
 0x4fa   : > { %v13196_v35 = vsel %vm2150_vm10, %v2901_v52, %v2905_v5  ;;  %vm2583_vm8 = vmpackc.low %vm1119_vm6, %vm1119_vm6  ;;  %v677_v42 = vadd.s32 248, %v15687_v63  ;;  %v2758_v20 = vshrl.u32 %v8457_v37, 16  ;;  %v2761_v21 = vshll.u32 %v8457_v37, 16  ;;  %3386 = vmatmul.mubr.bf16.gmra.mrb[28].mxu1 %v12970_v29 }
 0x4fb   : > { %v2752_v51 = vrot.slane %v2750_v44, 7  ;;  %2987 = vst [vmem:[#allocation2 + $0xe8] sm:$0xff] %v13196_v35  ;;  %v2615_v61 = vsel %vm2583_vm8, 65537, %v13058_v23  ;;  %v871_v15 = vand.u32 15, %v673_v32  ;;  %v885_v52 = vand.u32 15, %v675_v7  ;;  %3393 = vmatprep.mubr.bf16.mxu1 %v12919_v9  ;;  %v13205_v44 = vld [vmem:[#allocation2 + $0x110] sm:$0xff] }
 0x4fc   : > { %v8458_v46 = vcombine.low %v15688_v18, %v2615_v61  ;;  %v899_v6 = vand.u32 15, %v677_v42  ;;  %v2909_v56 = vor.u32 %v2907_v60, %v2905_v5  ;;  %v2760_v63 = vrot.slane %v2758_v20, 7  ;;  %v13223_v60 = vld [vmem:[#allocation2 + $0x128] sm:$0xff] }
 0x4fd   : > { %v2755_v38 = vor.u32 %v2753_v53, %v2752_v51  ;;  %vm1121_vm14 = vcmp.lt.s32.totalorder %v871_v15, 15  ;;  %v2275_v28 = vshrl.u32 %v15698_v25, 16  ;;  %vm1123_vm6 = vcmp.lt.s32.totalorder %v885_v52, 15  ;;  %v15705_v25 = vld [vmem:[#allocation46_spill] sm:$0xff] }
 0x4fe   : > { %3330 = vmatmul.mubr.bf16.gmra.mrb[36].mxu0 %v13144_v1  ;;  %v2766_v29 = vshrl.u32 %v8458_v46, 16  ;;  %v2769_v53 = vshll.u32 %v8458_v46, 16  ;;  %vm2585_vm5 = vmpackc.low %vm1121_vm14, %vm1121_vm14  ;;  %v2763_v32 = vor.u32 %v2761_v21, %v2760_v63  ;;  %vm13216_vm3 = vcmp.lt.s32.totalorder %v899_v6, 15 }
 0x4ff   : > { %v13211_v37 = vsel %vm2312_vm7, %v13092_v11, %v2755_v38  ;;  %9818 = vmatprep.mubr.bf16.mxu0 %v13058_v23  ;;  %v2617_v5 = vsel %vm2585_vm5, 65537, %v13058_v23  ;;  %vm2587_vm4 = vmpackc.low %vm1123_vm6, %vm1123_vm6 }
 0x500   : > { %15699 = vst [vmem:[#allocation30_spill] sm:$0xff] %v13211_v37  ;;  %vm2807_vm8 = vcmp.ne.s16.totalorder %v13211_v37, 0  ;;  %v2768_v7 = vrot.slane %v2766_v29, 7  ;;  %v8459_v42 = vcombine.low %v15688_v18, %v2617_v5  ;;  %v2619_v20 = vsel %vm2587_vm4, 65537, %v13058_v23  ;;  %v10830_v37 = vld [vmem:[#allocation4 + $0xc0] sm:$0xff]   ;;  %vm2589_vm4 = vmpackc.low %vm13216_vm3, %vm13216_vm3 }
 0x501   : > { %v2824_v11 = vsel %vm2807_vm8, %v13205_v44, 0  ;;  %v13228_v21 = vsel %vm2312_vm7, %v2752_v51, %v2763_v32  ;;  %v8460_v6 = vcombine.low %v15688_v18, %v2619_v20  ;;  %v10835_v51 = vld [vmem:[#allocation4 + $0x108] sm:$0xff]  }
 0x502   : > { %v2911_v61 = vshll.u32 %v2824_v11, 16  ;;  %15702 = vst [vmem:[#allocation31_spill] sm:$0xff] %v13228_v21  ;;  %v2915_v15 = vshrl.u32 %v2824_v11, 16  ;;  %vm2808_vm14 = vcmp.ne.s16.totalorder %v13228_v21, 0  ;;  %v2771_v38 = vor.u32 %v2769_v53, %v2768_v7  ;;  %3394 = vmatmul.mubr.bf16.gmra.mrb[32].mxu1 %v12978_v27 }
 0x503   : > { %v2774_v46 = vshrl.u32 %v8459_v42, 16  ;;  %v2777_v52 = vshll.u32 %v8459_v42, 16  ;;  %v2825_v29 = vsel %vm2808_vm14, %v13223_v60, 0  ;;  %v2782_v5 = vshrl.u32 %v8460_v6, 16  ;;  %4431 = vmatprep.mubr.bf16.mxu1 %v12937_v24 }
 0x504   : > { %v2913_v30 = vrot.slane %v2911_v61, 1  ;;  %v2785_v13 = vshll.u32 %v8460_v6, 16  ;;  %v2919_v32 = vshll.u32 %v2825_v29, 16  ;;  %v13240_v53 = vsel %vm2312_vm7, %v2760_v63, %v2771_v38 }
 0x505   : > { %15703 = vst [vmem:[#allocation37_spill] sm:$0xff] %v13240_v53  ;;  %v2923_v11 = vshrl.u32 %v2825_v29, 16  ;;  %v2776_v42 = vrot.slane %v2774_v46, 7  ;;  %vm2809_vm5 = vcmp.ne.s16.totalorder %v13240_v53, 0  ;;  %v13247_v6 = vrot.slane %v2782_v5, 7  ;;  %v10837_v29 = vld [vmem:[#allocation4 + $0x110] sm:$0xff]  }
 0x506   : > { %v13244_v20 = vsel %vm2150_vm10, %v2909_v56, %v2913_v30  ;;  %v2917_v61 = vor.u32 %v2915_v15, %v2913_v30  ;;  %9819 = vmatmul.mubr.bf16.vlgmr.msra.gmra.mrb[40].mxu0 %v12983_v19  ;;  %v2921_v27 = vrot.slane %v2919_v32, 1  ;;  %v2826_v63 = vsel %vm2809_vm5, %v12815_v33, 0  ;;  %v10836_v30 = vld [vmem:[#allocation4 + $0xc8] sm:$0xff]  }
 0x507   : > { %2988 = vst [vmem:[#allocation2 + $0x100] sm:$0xff] %v13244_v20  ;;  %v2779_v38 = vor.u32 %v2777_v52, %v2776_v42  ;;  %v2621_v56 = vsel %vm2589_vm4, 65537, %v13058_v23  ;;  %8981 = vmatpush3.bf16.msra.mxu0 %v10830_v37  ;;  %9822 = vmatprep.mubr.bf16.mxu0 %v12998_v4  ;;  %v2927_v19 = vshll.u32 %v2826_v63, 16  ;;  %v2787_v15 = vor.u32 %v2785_v13, %v13247_v6 }
 0x508   : > { %v8461_v46 = vcombine.low %v15688_v18, %v2621_v56  ;;  %8982 = vmatprep.subr.bf16.mxu0 %v10835_v51  ;;  %v13264_v33 = vsel %vm2150_vm10, %v2917_v61, %v2921_v27  ;;  %v2925_v52 = vor.u32 %v2923_v11, %v2921_v27  ;;  %v13270_v32 = vor.u32 %v2275_v28, %v15705_v25  ;;  %v13284_v28 = vld [vmem:[#allocation2 + $0x30] sm:$0xff]  ;;  %v10839_v56 = vld [vmem:[#allocation4 + $0x118] sm:$0xff]  }
 0x509   : > { %v13267_v5 = vsel %vm2312_vm7, %v2768_v7, %v2779_v38  ;;  %2989 = vst [vmem:[#allocation2 + $0x118] sm:$0xff] %v13264_v33  ;;  %v2929_v4 = vrot.slane %v2927_v19, 1  ;;  %v13275_v13 = vsel %vm2312_vm7, %v2776_v42, %v2787_v15  ;;  %v13281_v7 = vld [vmem:[#allocation2 + $0x188] sm:$0xff]  ;;  %v10838_v11 = vld [vmem:[#allocation4 + $0xd0] sm:$0xff]   ;;  %v2931_v42 = vshrl.u32 %v2826_v63, 16 }
 0x50a   : > { %15704 = vst [vmem:[#allocation62_spill] sm:$0xff] %v13267_v5  ;;  %15706 = vst [vmem:[#allocation44_spill] sm:$0xff] %v13270_v32  ;;  %vm2810_vm3 = vcmp.ne.s16.totalorder %v13267_v5, 0  ;;  %v2790_v18 = vshrl.u32 %v8461_v46, 16  ;;  %vm15524_vm6 = vcmp.ne.s16.totalorder %v13275_v13, 0  ;;  %v2793_v51 = vshll.u32 %v8461_v46, 16  ;;  %4432 = vmatmul.mubr.bf16.vlgmr.msra.gmra.mrb[36].mxu1 %v13284_v28 }
 0x50b   : > { %15707 = vst [vmem:[#allocation56_spill] sm:$0xff] %v13275_v13  ;;  %v2827_v37 = vsel %vm2810_vm3, %v12907_v34, 0  ;;  %vm15525_vm4 = vcmp.ne.s16.totalorder %v13270_v32, 0  ;;  %8983 = vmatpush3.bf16.msra.mxu0 %v10836_v30  ;;  %v13287_v61 = vsel %vm2150_vm10, %v2925_v52, %v2929_v4  ;;  %v2828_v34 = vsel %vm15524_vm6, %v12919_v9, 0  ;;  %v13293_v38 = vld [vmem:[#allocation2 + $0x50] sm:$0xff]  ;;  %v13323_v32 = vld [vmem:[#allocation2 + $0x48] sm:$0xff] }
 0x50c   : > { %v2935_v27 = vshll.u32 %v2827_v37, 16  ;;  %8984 = vmatprep.subr.bf16.mxu0 %v10837_v29  ;;  %2990 = vst [vmem:[#allocation2 + $0x130] sm:$0xff] %v13287_v61  ;;  %v2943_v30 = vshll.u32 %v2828_v34, 16  ;;  %v13296_v19 = vrot.slane %v2790_v18, 7  ;;  %4439 = vmatprep.mubr.bf16.mxu1 %v13293_v38  ;;  %v2933_v15 = vor.u32 %v2931_v42, %v2929_v4  ;;  %v2493_v52 = vld [vmem:[#allocation2 + $0x1a0] sm:$0x1] }
 0x50d   : > { %v2939_v46 = vshrl.u32 %v2827_v37, 16  ;;  %v2311_v9 = vsel %vm15525_vm4, %v13281_v7, 0  ;;  %v10840_v18 = vld [vmem:[#allocation4 + $0xd8] sm:$0xff]   ;;  %v8860_v37 = vpop.f32.mrb[8].mxu0 }
 0x50e   : > { %15708 = vst [vmem:[#allocation58_spill] sm:$0xff] %v13296_v19  ;;  %v2937_v63 = vrot.slane %v2935_v27, 1  ;;  %9823 = vmatmul.mubr.bf16.gmra.mrb[44].mxu0 %v13012_v57  ;;  %v2795_v29 = vor.u32 %v2793_v51, %v13296_v19  ;;  %v2438_v25 = vshrl.u32 %v2311_v9, 16  ;;  %v2945_v42 = vrot.slane %v2943_v30, 1  ;;  %v10841_v27 = vld [vmem:[#allocation4 + $0x120] sm:$0xff]  }
 0x50f   : > { %9826 = vmatprep.mubr.bf16.mxu0 %v13052_v14  ;;  %8985 = vmatpush3.bf16.msra.mxu0 %v10838_v11  ;;  %vm2813_vm6 = vcmp.ne.s16.totalorder %v13296_v19, 0  ;;  %v2441_v14 = vshll.u32 %v2311_v9, 16  ;;  %v2947_v30 = vshrl.u32 %v2828_v34, 16 }
 0x510   : > { %v13306_v13 = vsel %vm2150_vm10, %v2933_v15, %v2937_v63  ;;  %v2941_v4 = vor.u32 %v2939_v46, %v2937_v63  ;;  %8986 = vmatprep.subr.bf16.mxu0 %v10839_v56  ;;  %v13312_v57 = vsel %vm2312_vm7, %v13247_v6, %v2795_v29  ;;  %v2440_v51 = vrot.slane %v2438_v25, 7  ;;  %v10842_v6 = vld [vmem:[#allocation4 + $0xe0] sm:$0xff]   ;;  %v10843_v25 = vld [vmem:[#allocation4 + $0x128] sm:$0xff]  }
 0x511   : > { %2991 = vst [vmem:[#allocation2 + $0x148] sm:$0xff] %v13306_v13  ;;  %15709 = vst [vmem:[#allocation63_spill] sm:$0xff] %v13312_v57  ;;  %v2830_v11 = vsel %vm2813_vm6, %v2493_v52, 0  ;;  %vm2812_vm4 = vcmp.ne.s16.totalorder %v13312_v57, 0  ;;  %v2949_v9 = vor.u32 %v2947_v30, %v2945_v42  ;;  %v13326_v52 = vld [vmem:[#allocation2 + $0x68] sm:$0xff] }
 0x512   : > { %v13317_v15 = vsel %vm2150_vm10, %v2941_v4, %v2945_v42  ;;  %v2959_v63 = vshll.u32 %v2830_v11, 16  ;;  %v2829_v56 = vsel %vm2812_vm4, %v13281_v7, 0  ;;  %v2443_v46 = vor.u32 %v2441_v14, %v2440_v51  ;;  %4440 = vmatmul.mubr.bf16.gmra.mrb[40].mxu1 %v13323_v32  ;;  %v10844_v42 = vld [vmem:[#allocation4 + $0xe8] sm:$0xff]  }
 0x513   : > { %8987 = vmatpush3.bf16.msra.mxu0 %v10840_v18  ;;  %v2951_v29 = vshll.u32 %v2829_v56, 16  ;;  %4447 = vmatprep.mubr.bf16.mxu1 %v13326_v52  ;;  %v2955_v51 = vshrl.u32 %v2829_v56, 16  ;;  %v8861_v18 = vpop.f32.mrb[9].mxu0  ;;  %v10856_v56 = vld [vmem:[#allocation4 + $0x178] sm:$0xff]  }
 0x514   : > { %8988 = vmatprep.subr.bf16.mxu0 %v10841_v27  ;;  %v13330_v34 = vsel %vm2312_vm7, %v12959_v54, %v2443_v46  ;;  %v2961_v14 = vrot.slane %v2959_v63, 1  ;;  %v13338_v27 = vadd.f32 %v8861_v18, %v8860_v37  ;;  %v8863_v30 = vpop.f32.mrb[10].mxu0  ;;  %v10845_v46 = vld [vmem:[#allocation4 + $0x130] sm:$0xff]   ;;  %v10848_v37 = vld [vmem:[#allocation4 + $0xf8] sm:$0xff]  }
 0x515   : > { %v2953_v4 = vrot.slane %v2951_v29, 1  ;;  %v8864_v57 = vpop.f32.mrb[11].mxu0  ;;  %v4198_v18 = vld [vmem:[#allocation2 + $0x170] sm:$0xff] }
 0x516   : > { %9827 = vmatmul.mubr.bf16.gmra.mrb[48].mxu0 %v13148_v22  ;;  %v13340_v29 = vadd.f32 %v8864_v57, %v8863_v30  ;;  %v10846_v22 = vld [vmem:[#allocation4 + $0xf0] sm:$0xff]   ;;  %v10849_v57 = vld [vmem:[#allocation4 + $0x140] sm:$0xff]  }
 0x517   : > { %9830 = vmatprep.mubr.bf16.mxu0 %v13165_v41  ;;  %8989 = vmatpush3.bf16.msra.mxu0 %v10842_v6  ;;  %v13336_v11 = vsel %vm2150_vm10, %v2949_v9, %v2953_v4  ;;  %v2957_v54 = vor.u32 %v2955_v51, %v2953_v4  ;;  %v10847_v41 = vld [vmem:[#allocation4 + $0x138] sm:$0xff]   ;;  %v3572_v6 = vld [vmem:[#allocation2 + $0x60] sm:$0xff]  ;;  %v3582_v30 = vld [vmem:[#allocation2 + $0xb0] sm:$0xff] }
 0x518   : > { %8990 = vmatprep.subr.bf16.mxu0 %v10843_v25  ;;  %v3576_v9 = vld [vmem:[#allocation2 + $0x80] sm:$0xff]  ;;  %v3575_v4 = vld [vmem:[#allocation2 + $0x78] sm:$0xff] }
 0x519   : > { %v13343_v63 = vsel %vm2150_vm10, %v2957_v54, %v2961_v14  ;;  %v13381_v25 = vld [vmem:[#allocation4 + $0x200] sm:$0xff]   ;;  %v3579_v51 = vld [vmem:[#allocation2 + $0x98] sm:$0xff]  ;;  %v4194_v14 = vld [vmem:[#allocation2 + $0x150] sm:$0xff] }
 0x51a   : > { %4448 = vmatmul.mubr.bf16.gmra.mrb[44].mxu1 %v12957_v17  ;;  %v13367_v17 = vld [vmem:[#allocation2 + $0xd8] sm:$0xff]  ;;  %v13384_v54 = vld [vmem:[#allocation2 + $0x168] sm:$0xff] }
 0x51b   : > { %8991 = vmatpush3.bf16.msra.mxu0 %v10844_v42  ;;  %4455 = vmatprep.mubr.bf16.mxu1 %v13008_v26  ;;  %v10850_v26 = vld [vmem:[#allocation4 + $0x148] sm:$0xff]   ;;  %v3578_v42 = vld [vmem:[#allocation2 + $0x90] sm:$0xff] }
 0x51c   : > { %8992 = vmatprep.subr.bf16.mxu0 %v10845_v46  ;;  %v3581_v46 = vld [vmem:[#allocation2 + $0xa8] sm:$0xff] }
 0x51e   : > { %9831 = vmatmul.mubr.bf16.gmra.mrb[52].mxu0 %v13177_v50  ;;  %v4185_v50 = vld [vmem:[#allocation2 + $0x108] sm:$0xff] }
 0x51f   : > { %9834 = vmatprep.mubr.bf16.mxu0 %v13190_v48  ;;  %8993 = vmatpush3.bf16.msra.mxu0 %v10846_v22  ;;  %v10855_v48 = vld [vmem:[#allocation4 + $0x170] sm:$0xff]   ;;  %v15710_v22 = vmov 0.0  }
 0x520   : > { %8994 = vmatprep.subr.bf16.mxu0 %v10847_v41 }
 0x522   : > { %4456 = vmatmul.mubr.bf16.gmra.mrb[48].mxu1 %v13068_v3  ;;  %v3563_v3 = vld [vmem:[#allocation2 + $0x18] sm:$0xff] }
 0x523   : > { %8995 = vmatpush3.bf16.msra.mxu0 %v10848_v37  ;;  %4463 = vmatprep.mubr.bf16.mxu1 %v13090_v12  ;;  %v13361_v12 = vld [vmem:[#allocation2 + $0xc0] sm:$0xff] }
 0x524   : > { %9850 = vmatprep.subr.bf16.mxu0 %v10849_v57 }
 0x526   : > { %9835 = vmatmul.mubr.bf16.gmra.mrb[56].mxu0 %v13196_v35 }
 0x527   : > { %9838 = vmatprep.mubr.bf16.mxu0 %v13244_v20 }
 0x52a   : > { %4464 = vmatmul.mubr.bf16.gmra.mrb[52].mxu1 %v13161_v36  ;;  %v10853_v36 = vld [vmem:[#allocation4 + $0x160] sm:$0xff]  }
 0x52b   : > { %4471 = vmatprep.mubr.bf16.mxu1 %v13074_v39  ;;  %v10851_v39 = vld [vmem:[#allocation4 + $0x150] sm:$0xff]  }
 0x52e   : > { %9839 = vmatmul.mubr.bf16.gmra.mrb[60].mxu0 %v13264_v33 }
 0x52f   : > { %9842 = vmatprep.mubr.bf16.mxu0 %v13287_v61 }
 0x532   : > { %4472 = vmatmul.mubr.bf16.gmra.mrb[56].mxu1 %v13144_v1  ;;  %v13372_v1 = vld [vmem:[#allocation2 + $0xf0] sm:$0xff] }
 0x533   : > { %4479 = vmatprep.mubr.bf16.mxu1 %v13114_v31 }
 0x536   : > { %9843 = vmatmul.mubr.bf16.gmra.mrb[64].mxu0 %v13306_v13 }
 0x537   : > { %9846 = vmatprep.mubr.bf16.mxu0 %v13317_v15 }
 0x53a   : > { %4480 = vmatmul.mubr.bf16.gmra.mrb[60].mxu1 %v13361_v12 }
 0x53b   : > { %4487 = vmatprep.mubr.bf16.mxu1 %v13120_v47 }
 0x53e   : > { %9847 = vmatmul.mubr.bf16.gmra.mrb[68].mxu0 %v13336_v11 }
 0x53f   : > { %3836 = vmatprep.mubr.bf16.mxu0 %v12921_v55  ;;  %v10852_v55 = vld [vmem:[#allocation4 + $0x158] sm:$0xff]  }
 0x542   : > { %4488 = vmatmul.mubr.bf16.gmra.mrb[64].mxu1 %v13367_v17 }
 0x543   : > { %4495 = vmatprep.mubr.bf16.mxu1 %v13133_v10 }
 0x546   : > { %3837 = vmatmul.mubr.bf16.vlgmr.msra.gmra.mrb[72].mxu0 %v3563_v3 }
 0x547   : > { %9851 = vmatpush3.bf16.msra.mxu0 %v10849_v57  ;;  %3844 = vmatprep.mubr.bf16.mxu0 %v12937_v24  ;;  %v10854_v24 = vld [vmem:[#allocation4 + $0x168] sm:$0xff]  }
 0x548   : > { %9852 = vmatprep.subr.bf16.mxu0 %v10850_v26 }
 0x54a   : > { %4496 = vmatmul.mubr.bf16.gmra.mrb[68].mxu1 %v13372_v1 }
 0x54b   : > { %9853 = vmatpush3.bf16.msra.mxu0 %v10850_v26  ;;  %4503 = vmatprep.mubr.bf16.mxu1 %v13205_v44 }
 0x54c   : > { %9854 = vmatprep.subr.bf16.mxu0 %v10851_v39 }
 0x54e   : > { %3845 = vmatmul.mubr.bf16.gmra.mrb[76].mxu0 %v13284_v28  ;;  %v4188_v28 = vld [vmem:[#allocation2 + $0x120] sm:$0xff] }
 0x54f   : > { %3852 = vmatprep.mubr.bf16.mxu0 %v13293_v38  ;;  %9855 = vmatpush3.bf16.msra.mxu0 %v10851_v39  ;;  %v4192_v38 = vld [vmem:[#allocation2 + $0x140] sm:$0xff] }
 0x550   : > { %9856 = vmatprep.subr.bf16.mxu0 %v10852_v55 }
 0x552   : > { %4504 = vmatmul.mubr.bf16.gmra.mrb[72].mxu1 %v4185_v50 }
 0x553   : > { %9857 = vmatpush3.bf16.msra.mxu0 %v10852_v55  ;;  %4511 = vmatprep.mubr.bf16.mxu1 %v13223_v60 }
 0x554   : > { %9858 = vmatprep.subr.bf16.mxu0 %v10853_v36 }
 0x556   : > { %3853 = vmatmul.mubr.bf16.gmra.mrb[80].mxu0 %v13323_v32  ;;  %v4191_v32 = vld [vmem:[#allocation2 + $0x138] sm:$0xff] }
 0x557   : > { %3860 = vmatprep.mubr.bf16.mxu0 %v13326_v52  ;;  %9859 = vmatpush3.bf16.msra.mxu0 %v10853_v36  ;;  %v4195_v52 = vld [vmem:[#allocation2 + $0x158] sm:$0xff] }
 0x558   : > { %9860 = vmatprep.subr.bf16.mxu0 %v10854_v24 }
 0x55a   : > { %4512 = vmatmul.mubr.bf16.gmra.mrb[76].mxu1 %v4188_v28 }
 0x55b   : > { %9861 = vmatpush3.bf16.msra.mxu0 %v10854_v24  ;;  %4519 = vmatprep.mubr.bf16.mxu1 %v4192_v38 }
 0x55c   : > { %9862 = vmatprep.subr.bf16.mxu0 %v10855_v48 }
 0x55e   : > { %3861 = vmatmul.mubr.bf16.gmra.mrb[84].mxu0 %v3572_v6 }
 0x55f   : > { %3868 = vmatprep.mubr.bf16.mxu0 %v3576_v9  ;;  %9863 = vmatpush3.bf16.msra.mxu0 %v10855_v48 }
 0x560   : > { %9864 = vmatprep.subr.bf16.mxu0 %v10856_v56 }
 0x562   : > { %4520 = vmatmul.mubr.bf16.gmra.mrb[80].mxu1 %v4191_v32 }
 0x563   : > { %9865 = vmatpush3.bf16.msra.mxu0 %v10856_v56  ;;  %4527 = vmatprep.mubr.bf16.mxu1 %v4195_v52 }
 0x564   : > { %9898 = vmatprep.subr.bf16.mxu0 %v13381_v25 }
 0x566   : > { %3869 = vmatmul.mubr.bf16.gmra.mrb[88].mxu0 %v3575_v4 }
 0x567   : > { %3876 = vmatprep.mubr.bf16.mxu0 %v3579_v51 }
 0x56a   : > { %4528 = vmatmul.mubr.bf16.gmra.mrb[84].mxu1 %v4194_v14 }
 0x56b   : > { %4535 = vmatprep.mubr.bf16.mxu1 %v4198_v18 }
 0x56e   : > { %3877 = vmatmul.mubr.bf16.gmra.mrb[92].mxu0 %v3578_v42 }
 0x56f   : > { %3884 = vmatprep.mubr.bf16.mxu0 %v3582_v30 }
 0x572   : > { %4536 = vmatmul.mubr.bf16.gmra.mrb[88].mxu1 %v13384_v54 }
 0x573   : > { %4543 = vmatprep.mubr.bf16.mxu1 %v13281_v7 }
 0x576   : > { %3885 = vmatmul.mubr.bf16.gmra.mrb[96].mxu0 %v3581_v46 }
 0x577   : > { %3892 = vmatprep.mubr.bf16.mxu0 %v13114_v31 }
 0x57a   : > { %4544 = vmatmul.mubr.bf16.gmra.mrb[92].mxu1 %v13330_v34 }
 0x57b   : > { %4551 = vmatprep.mubr.bf16.mxu1 %v13058_v23 }
 0x57e   : > { %3893 = vmatmul.mubr.bf16.gmra.mrb[100].mxu0 %v13361_v12 }
 0x57f   : > { %3900 = vmatprep.mubr.bf16.mxu0 %v13120_v47 }
 0x582   : > { %4552 = vmatmul.mubr.bf16.gmra.mrb[96].mxu1 %v13058_v23 }
 0x583   : > { %9978 = vmatprep.mubr.msk.f32.mxu1 %vm11418_vm0, %v15710_v22 }
 0x586   : > { %3901 = vmatmul.mubr.bf16.gmra.mrb[104].mxu0 %v13367_v17 }
 0x587   : > { %3908 = vmatprep.mubr.bf16.mxu0 %v13133_v10 }
 0x58e   : > { %3909 = vmatmul.mubr.bf16.gmra.mrb[108].mxu0 %v13372_v1 }
 0x58f   : > { %3916 = vmatprep.mubr.bf16.mxu0 %v13205_v44 }
 0x596   : > { %3917 = vmatmul.mubr.bf16.gmra.mrb[112].mxu0 %v4185_v50  ;;  %v8866_v31 = vpop.f32.mrb[12].mxu0 }
 0x597   : > { %3924 = vmatprep.mubr.bf16.mxu0 %v13223_v60  ;;  %v8867_v41 = vpop.f32.mrb[13].mxu0 }
 0x598   : > { %v13401_v37 = vadd.f32 %v8867_v41, %v8866_v31  ;;  %v8869_v47 = vpop.f32.mrb[14].mxu0 }
 0x599   : > { %v8908_v23 = vpop.f32.mrb[4].mxu1  ;;  %v8870_v57 = vpop.f32.mrb[15].mxu0 }
 0x59a   : > { %v8909_v12 = vpop.f32.mrb[5].mxu1  ;;  %v13403_v26 = vadd.f32 %v8870_v57, %v8869_v47 }
 0x59b   : > { %v13405_v10 = vadd.f32 %v8909_v12, %v8908_v23  ;;  %v8911_v17 = vpop.f32.mrb[6].mxu1 }
 0x59c   : > { %v8912_v3 = vpop.f32.mrb[7].mxu1 }
 0x59d   : > { %v13407_v44 = vadd.f32 %v8912_v3, %v8911_v17 }
 0x59e   : > { %3925 = vmatmul.mubr.bf16.gmra.mrb[116].mxu0 %v4188_v28  ;;  %v8872_v39 = vpop.f32.mrb[16].mxu0 }
 0x59f   : > { %3932 = vmatprep.mubr.bf16.mxu0 %v4192_v38  ;;  %v8873_v60 = vpop.f32.mrb[17].mxu0 }
 0x5a0   : > { %v13409_v1 = vadd.f32 %v8873_v60, %v8872_v39  ;;  %v8875_v55 = vpop.f32.mrb[18].mxu0 }
 0x5a1   : > { %v8914_v36 = vpop.f32.mrb[8].mxu1  ;;  %v8876_v50 = vpop.f32.mrb[19].mxu0 }
 0x5a2   : > { %v8915_v24 = vpop.f32.mrb[9].mxu1  ;;  %v13411_v48 = vadd.f32 %v8876_v50, %v8875_v55 }
 0x5a3   : > { %v13413_v28 = vadd.f32 %v8915_v24, %v8914_v36  ;;  %v8917_v38 = vpop.f32.mrb[10].mxu1 }
 0x5a4   : > { %v8918_v56 = vpop.f32.mrb[11].mxu1 }
 0x5a5   : > { %v13415_v6 = vadd.f32 %v8918_v56, %v8917_v38 }
 0x5a6   : > { %3933 = vmatmul.mubr.bf16.gmra.mrb[120].mxu0 %v4191_v32  ;;  %v8878_v9 = vpop.f32.mrb[20].mxu0 }
 0x5a7   : > { %3940 = vmatprep.mubr.bf16.mxu0 %v4195_v52  ;;  %v8879_v4 = vpop.f32.mrb[21].mxu0 }
 0x5a8   : > { %v13417_v51 = vadd.f32 %v8879_v4, %v8878_v9  ;;  %v8881_v42 = vpop.f32.mrb[22].mxu0 }
 0x5a9   : > { %v8920_v30 = vpop.f32.mrb[12].mxu1  ;;  %v8882_v46 = vpop.f32.mrb[23].mxu0 }
 0x5aa   : > { %v8921_v31 = vpop.f32.mrb[13].mxu1  ;;  %v13419_v32 = vadd.f32 %v8882_v46, %v8881_v42 }
 0x5ab   : > { %v13421_v41 = vadd.f32 %v8921_v31, %v8920_v30  ;;  %v8923_v52 = vpop.f32.mrb[14].mxu1 }
 0x5ac   : > { %v8924_v47 = vpop.f32.mrb[15].mxu1 }
 0x5ad   : > { %v13423_v23 = vadd.f32 %v8924_v47, %v8923_v52 }
 0x5ae   : > { %3941 = vmatmul.mubr.bf16.gmra.mrb[124].mxu0 %v4194_v14  ;;  %v8884_v57 = vpop.f32.mrb[24].mxu0 }
 0x5af   : > { %3948 = vmatprep.mubr.bf16.mxu0 %v4198_v18  ;;  %v8885_v12 = vpop.f32.mrb[25].mxu0 }
 0x5b0   : > { %v13425_v17 = vadd.f32 %v8885_v12, %v8884_v57  ;;  %v8887_v3 = vpop.f32.mrb[26].mxu0  ;;  %v10858_v12 = vld [vmem:[#allocation4 + $0x208] sm:$0xff]  }
 0x5b1   : > { %v8888_v39 = vpop.f32.mrb[27].mxu0 }
 0x5b2   : > { %v13428_v60 = vadd.f32 %v8888_v39, %v8887_v3  ;;  %v13444_v3 = vld [vmem:[#allocation2 + $0x40] sm:$0xff]  ;;  %v13447_v39 = vld [vmem:[#allocation2 + $0x58] sm:$0xff] }
 0x5b5   : > { %v8926_v14 = vpop.f32.mrb[16].mxu1 }
 0x5b6   : > { %3949 = vmatmul.mubr.bf16.gmra.mrb[128].mxu0 %v13384_v54  ;;  %v8927_v18 = vpop.f32.mrb[17].mxu1  ;;  %v3565_v54 = vld [vmem:[#allocation2 + $0x28] sm:$0xff] }
 0x5b7   : > { %3956 = vmatprep.mubr.bf16.mxu0 %v13281_v7  ;;  %v13431_v55 = vadd.f32 %v8927_v18, %v8926_v14  ;;  %v8929_v36 = vpop.f32.mrb[18].mxu1  ;;  %v10859_v18 = vld [vmem:[#allocation4 + $0x210] sm:$0xff]  }
 0x5b8   : > { %v8930_v50 = vpop.f32.mrb[19].mxu1 }
 0x5b9   : > { %v8890_v24 = vpop.f32.mrb[28].mxu0  ;;  %v13433_v38 = vadd.f32 %v8930_v50, %v8929_v36 }
 0x5ba   : > { %v8891_v56 = vpop.f32.mrb[29].mxu0 }
 0x5bb   : > { %v13435_v9 = vadd.f32 %v8891_v56, %v8890_v24  ;;  %v8893_v4 = vpop.f32.mrb[30].mxu0 }
 0x5bc   : > { %v8894_v42 = vpop.f32.mrb[31].mxu0 }
 0x5bd   : > { %v13438_v30 = vadd.f32 %v8894_v42, %v8893_v4  ;;  %v8932_v7 = vpop.f32.mrb[20].mxu1 }
 0x5be   : > { %3957 = vmatmul.mubr.bf16.gmra.mrb[132].mxu0 %v13330_v34  ;;  %v8933_v46 = vpop.f32.mrb[21].mxu1 }
 0x5bf   : > { %9866 = vmatprep.mubr.bf16.mxu0 %v3565_v54  ;;  %v13440_v31 = vadd.f32 %v8933_v46, %v8932_v7  ;;  %v8935_v52 = vpop.f32.mrb[22].mxu1 }
 0x5c0   : > { %v8936_v47 = vpop.f32.mrb[23].mxu1 }
 0x5c1   : > { %v13442_v57 = vadd.f32 %v8936_v47, %v8935_v52  ;;  %v13459_v47 = vld [vmem:[#allocation2 + $0x70] sm:$0xff] }
 0x5c5   : > { %v8938_v34 = vpop.f32.mrb[24].mxu1 }
 0x5c6   : > { %9867 = vmatmul.mubr.bf16.vlgmr.msra.gmra.mrb[40].mxu0 %v13444_v3  ;;  %v8939_v14 = vpop.f32.mrb[25].mxu1 }
 0x5c7   : > { %9899 = vmatpush3.bf16.msra.mxu0 %v13381_v25  ;;  %9870 = vmatprep.mubr.bf16.mxu0 %v13447_v39  ;;  %v13451_v50 = vadd.f32 %v8939_v14, %v8938_v34  ;;  %v8941_v24 = vpop.f32.mrb[26].mxu1  ;;  %v10860_v25 = vld [vmem:[#allocation4 + $0x218] sm:$0xff]   ;;  %v13462_v34 = vld [vmem:[#allocation2 + $0x88] sm:$0xff] }
 0x5c8   : > { %9900 = vmatprep.subr.bf16.mxu0 %v10858_v12  ;;  %v8942_v4 = vpop.f32.mrb[27].mxu1 }
 0x5c9   : > { %v8896_v36 = vpop.f32.mrb[32].mxu0  ;;  %15711 = vst [vmem:[#allocation59_spill] sm:$0xff] %v13451_v50  ;;  %v13455_v7 = vadd.f32 %v8942_v4, %v8941_v24  ;;  %v10861_v24 = vld [vmem:[#allocation4 + $0x220] sm:$0xff]  }
 0x5ca   : > { %v8897_v56 = vpop.f32.mrb[33].mxu0 }
 0x5cb   : > { %v13453_v42 = vadd.f32 %v8897_v56, %v8896_v36  ;;  %v8899_v54 = vpop.f32.mrb[34].mxu0  ;;  %15712 = vst [vmem:[#allocation60_spill] sm:$0xff] %v13455_v7  ;;  %9901 = vmatpush3.bf16.msra.mxu0 %v10858_v12 }
 0x5cc   : > { %v8900_v46 = vpop.f32.mrb[35].mxu0  ;;  %9902 = vmatprep.subr.bf16.mxu0 %v10859_v18 }
 0x5cd   : > { %v13457_v52 = vadd.f32 %v8900_v46, %v8899_v54  ;;  %v8944_v14 = vpop.f32.mrb[28].mxu1 }
 0x5ce   : > { %9871 = vmatmul.mubr.bf16.gmra.mrb[44].mxu0 %v13459_v47  ;;  %v8945_v36 = vpop.f32.mrb[29].mxu1 }
 0x5cf   : > { %9874 = vmatprep.mubr.bf16.mxu0 %v13462_v34  ;;  %9903 = vmatpush3.bf16.msra.mxu0 %v10859_v18  ;;  %v13465_v12 = vadd.f32 %v8945_v36, %v8944_v14  ;;  %v8947_v4 = vpop.f32.mrb[30].mxu1  ;;  %v13473_v18 = vld [vmem:[#allocation2 + $0xa0] sm:$0xff]  ;;  %v13476_v14 = vld [vmem:[#allocation2 + $0xb8] sm:$0xff] }
 0x5d0   : > { %9904 = vmatprep.subr.bf16.mxu0 %v10860_v25  ;;  %v8948_v54 = vpop.f32.mrb[31].mxu1 }
 0x5d1   : > { %v8902_v56 = vpop.f32.mrb[36].mxu0  ;;  %15713 = vst [vmem:[#allocation61_spill] sm:$0xff] %v13465_v12  ;;  %v13469_v21 = vadd.f32 %v8948_v54, %v8947_v4 }
 0x5d2   : > { %v8903_v5 = vpop.f32.mrb[37].mxu0 }
 0x5d3   : > { %v13467_v46 = vadd.f32 %v8903_v5, %v8902_v56  ;;  %v8905_v53 = vpop.f32.mrb[38].mxu0  ;;  %15714 = vst [vmem:[#allocation22_spill] sm:$0xff] %v13469_v21  ;;  %9905 = vmatpush3.bf16.msra.mxu0 %v10860_v25  ;;  %v10863_v56 = vld [vmem:[#allocation4 + $0x230] sm:$0xff]  }
 0x5d4   : > { %v8906_v16 = vpop.f32.mrb[39].mxu0  ;;  %9906 = vmatprep.subr.bf16.mxu0 %v10861_v24 }
 0x5d5   : > { %v13471_v49 = vadd.f32 %v8906_v16, %v8905_v53  ;;  %v8950_v36 = vpop.f32.mrb[32].mxu1  ;;  %v10864_v16 = vld [vmem:[#allocation4 + $0x238] sm:$0xff]   ;;  %v3586_v53 = vld [vmem:[#allocation2 + $0xd0] sm:$0xff] }
 0x5d6   : > { %9875 = vmatmul.mubr.bf16.gmra.mrb[48].mxu0 %v13473_v18  ;;  %v8951_v5 = vpop.f32.mrb[33].mxu1 }
 0x5d7   : > { %9878 = vmatprep.mubr.bf16.mxu0 %v13476_v14  ;;  %9907 = vmatpush3.bf16.msra.mxu0 %v10861_v24  ;;  %v13479_v4 = vadd.f32 %v8951_v5, %v8950_v36  ;;  %v8953_v25 = vpop.f32.mrb[34].mxu1 }
 0x5d8   : > { %9908 = vmatprep.subr.bf16.mxu0 %v10862_v58  ;;  %v8954_v54 = vpop.f32.mrb[35].mxu1 }
 0x5d9   : > { %15715 = vst [vmem:[#allocation32_spill] sm:$0xff] %v13479_v4  ;;  %v13481_v40 = vadd.f32 %v8954_v54, %v8953_v25 }
 0x5db   : > { %15716 = vst [vmem:[#allocation43_spill] sm:$0xff] %v13481_v40  ;;  %9909 = vmatpush3.bf16.msra.mxu0 %v10862_v58 }
 0x5dc   : > { %9910 = vmatprep.subr.bf16.mxu0 %v10863_v56 }
 0x5dd   : > { %v9132_v45 = vpop.f32.mrb[36].mxu1 }
 0x5de   : > { %9879 = vmatmul.mubr.bf16.gmra.mrb[52].mxu0 %v3586_v53  ;;  %v9133_v0 = vpop.f32.mrb[37].mxu1 }
 0x5df   : > { %9882 = vmatprep.mubr.bf16.mxu0 %v13196_v35  ;;  %9911 = vmatpush3.bf16.msra.mxu0 %v10863_v56  ;;  %v13484_v24 = vadd.f32 %v9133_v0, %v9132_v45  ;;  %v9135_v8 = vpop.f32.mrb[38].mxu1 }
 0x5e0   : > { %9912 = vmatprep.subr.bf16.mxu0 %v10864_v16  ;;  %v9136_v36 = vpop.f32.mrb[39].mxu1 }
 0x5e1   : > { %v13486_v5 = vadd.f32 %v9136_v36, %v9135_v8 }
 0x5e3   : > { %9913 = vmatpush3.bf16.msra.mxu0 %v10864_v16 }
 0x5e5   : > { %v9138_v58 = vpop.f32.mrb[40].mxu1 }
 0x5e6   : > { %9883 = vmatmul.mubr.bf16.gmra.mrb[56].mxu0 %v13244_v20  ;;  %v9139_v25 = vpop.f32.mrb[41].mxu1 }
 0x5e7   : > { %9886 = vmatprep.mubr.bf16.mxu0 %v13264_v33  ;;  %v13490_v54 = vadd.f32 %v9139_v25, %v9138_v58  ;;  %v9141_v35 = vpop.f32.mrb[42].mxu1 }
 0x5e8   : > { %v9142_v2 = vpop.f32.mrb[43].mxu1 }
 0x5e9   : > { %v13492_v56 = vadd.f32 %v9142_v2, %v9141_v35 }
 0x5ed   : > { %v9144_v45 = vpop.f32.mrb[44].mxu1 }
 0x5ee   : > { %9887 = vmatmul.mubr.bf16.gmra.mrb[60].mxu0 %v13287_v61  ;;  %v9145_v8 = vpop.f32.mrb[45].mxu1 }
 0x5ef   : > { %9890 = vmatprep.mubr.bf16.mxu0 %v13306_v13  ;;  %v13496_v0 = vadd.f32 %v9145_v8, %v9144_v45  ;;  %v9147_v16 = vpop.f32.mrb[46].mxu1 }
 0x5f0   : > { %v9148_v20 = vpop.f32.mrb[47].mxu1 }
 0x5f1   : > { %v13498_v36 = vadd.f32 %v9148_v20, %v9147_v16 }
 0x5f5   : > { %v9150_v33 = vpop.f32.mrb[48].mxu1 }
 0x5f6   : > { %9891 = vmatmul.mubr.bf16.gmra.mrb[64].mxu0 %v13317_v15  ;;  %v9151_v58 = vpop.f32.mrb[49].mxu1 }
 0x5f7   : > { %9894 = vmatprep.mubr.bf16.mxu0 %v13336_v11  ;;  %v13502_v2 = vadd.f32 %v9151_v58, %v9150_v33  ;;  %v9153_v25 = vpop.f32.mrb[50].mxu1 }
 0x5f8   : > { %v9154_v61 = vpop.f32.mrb[51].mxu1 }
 0x5f9   : > { %v13504_v35 = vadd.f32 %v9154_v61, %v9153_v25 }
 0x5fd   : > { %v9156_v13 = vpop.f32.mrb[52].mxu1 }
 0x5fe   : > { %9895 = vmatmul.mubr.bf16.gmra.mrb[68].mxu0 %v13343_v63  ;;  %v9157_v45 = vpop.f32.mrb[53].mxu1 }
 0x5ff   : > { %9914 = vmatprep.mubr.bf16.mxu0 %v13444_v3  ;;  %v13508_v8 = vadd.f32 %v9157_v45, %v9156_v13  ;;  %v9159_v16 = vpop.f32.mrb[54].mxu1 }
 0x600   : > { %v9160_v20 = vpop.f32.mrb[55].mxu1 }
 0x601   : > { %v13510_v62 = vadd.f32 %v9160_v20, %v9159_v16 }
 0x605   : > { %v9162_v33 = vpop.f32.mrb[56].mxu1 }
 0x606   : > { %9915 = vmatmul.mubr.bf16.vlgmr.msra.gmra.mrb[40].mxu0 %v13447_v39  ;;  %v9163_v58 = vpop.f32.mrb[57].mxu1 }
 0x607   : > { %9918 = vmatprep.mubr.bf16.mxu0 %v13459_v47  ;;  %v13514_v25 = vadd.f32 %v9163_v58, %v9162_v33  ;;  %v9165_v61 = vpop.f32.mrb[58].mxu1  ;;  %v13537_v33 = vld [vmem:[%s15423_s7] ss:$0 sm:$0xff]  ;;  %v4795_v58 = vld [vmem:[%s15424_s8 + $0x18] sm:$0xff] }
 0x608   : > { %v9166_v43 = vpop.f32.mrb[59].mxu1  ;;  %v3276_v40 = vadd.f32 %v13338_v27, %v13537_v33 }
 0x609   : > { %v13516_v19 = vadd.f32 %v9166_v43, %v9165_v61  ;;  %v4792_v43 = vld [vmem:[%s15424_s8] sm:$0xff] }
 0x60d   : > { %v9168_v3 = vpop.f32.mrb[60].mxu1 }
 0x60e   : > { %9919 = vmatmul.mubr.bf16.gmra.mrb[44].mxu0 %v13462_v34  ;;  %v9169_v13 = vpop.f32.mrb[61].mxu1  ;;  %v4793_v34 = vld [vmem:[%s15424_s8 + $0x8] sm:$0xff] }
 0x60f   : > { %9922 = vmatprep.mubr.bf16.mxu0 %v13473_v18  ;;  %v13520_v45 = vadd.f32 %v9169_v13, %v9168_v3  ;;  %v9171_v16 = vpop.f32.mrb[62].mxu1  ;;  %v4794_v18 = vld [vmem:[%s15424_s8 + $0x10] sm:$0xff] }
 0x610   : > { %v9172_v39 = vpop.f32.mrb[63].mxu1  ;;  %v13547_v22 = vpack.c.bf16 %v4795_v58, %v4794_v18  ;;  %v3279_v18 = vadd.f32 %v13340_v29, %v13537_v33 }
 0x611   : > { %v13522_v20 = vadd.f32 %v9172_v39, %v9171_v16 }
 0x615   : > { %v9174_v47 = vpop.f32.mrb[64].mxu1 }
 0x616   : > { %9923 = vmatmul.mubr.bf16.gmra.mrb[48].mxu0 %v13476_v14  ;;  %v9175_v14 = vpop.f32.mrb[65].mxu1 }
 0x617   : > { %9926 = vmatprep.mubr.bf16.mxu0 %v3586_v53  ;;  %v13539_v53 = vpack.c.bf16 %v4793_v34, %v4792_v43  ;;  %v13544_v3 = vadd.f32 %v9175_v14, %v9174_v47  ;;  %v9177_v13 = vpop.f32.mrb[66].mxu1  ;;  %v4796_v47 = vld [vmem:[%s15424_s8 + $0x20] sm:$0xff]  ;;  %v4797_v14 = vld [vmem:[%s15424_s8 + $0x28] sm:$0xff] }
 0x618   : > { %v9178_v39 = vpop.f32.mrb[67].mxu1 }
 0x619   : > { %15717 = vst [vmem:[#allocation46_spill] sm:$0xff] %v13539_v53  ;;  %v8996_v61 = vpop.f32.mrb[72].mxu0  ;;  %10268 = vmatpush3.bf16.msra.mxu1 %v13539_v53  ;;  %v13551_v34 = vadd.f32 %v9178_v39, %v9177_v13  ;;  %v4184_v13 = vld [vmem:[#allocation2 + $0x100] sm:$0xff] }
 0x61a   : > { %v8997_v16 = vpop.f32.mrb[73].mxu0  ;;  %10269 = vmatprep.subr.bf16.mxu1 %v15690_v59 }
 0x61b   : > { %v8998_v4 = vadd.f32 %v8997_v16, %v8996_v61  ;;  %v8999_v43 = vpop.f32.mrb[74].mxu0  ;;  %v4181_v61 = vld [vmem:[#allocation2 + $0xe8] sm:$0xff]  ;;  %v13563_v16 = vpack.c.bf16 %v4797_v14, %v4796_v47  ;;  %v3284_v47 = vadd.f32 %v13401_v37, %v13537_v33 }
 0x61c   : > { %v9000_v53 = vpop.f32.mrb[75].mxu0 }
 0x61d   : > { %v10333_v58 = vadd.f32 %v8998_v4, %v3276_v40  ;;  %v9001_v27 = vadd.f32 %v9000_v53, %v8999_v43  ;;  %10271 = vmatpush3.bf16.msra.mxu1 %v13547_v22  ;;  %15718 = vst [vmem:[#allocation64_spill] sm:$0xff] %v13563_v16  ;;  %v9180_v21 = vpop.f32.mrb[68].mxu1 }
 0x61e   : > { %9927 = vmatmul.mubr.bf16.gmra.mrb[52].mxu0 %v4181_v61  ;;  %10272 = vmatprep.subr.bf16.mxu1 %v15690_v59  ;;  %v9181_v7 = vpop.f32.mrb[69].mxu1  ;;  %v4190_v61 = vld [vmem:[#allocation2 + $0x130] sm:$0xff] }
 0x61f   : > { %v10339_v39 = vadd.f32 %v9001_v27, %v3279_v18  ;;  %9930 = vmatprep.mubr.bf16.mxu0 %v4184_v13  ;;  %v13567_v12 = vadd.f32 %v10333_v58, %v13484_v24  ;;  %v13569_v29 = vadd.f32 %v9181_v7, %v9180_v21  ;;  %v9183_v40 = vpop.f32.mrb[70].mxu1  ;;  %v3287_v21 = vadd.f32 %v13403_v26, %v13537_v33  ;;  %v4187_v58 = vld [vmem:[#allocation2 + $0x118] sm:$0xff] }
 0x620   : > { %v9184_v43 = vpop.f32.mrb[71].mxu1 }
 0x621   : > { %v9002_v50 = vpop.f32.mrb[76].mxu0  ;;  %v13572_v4 = vadd.f32 %v10339_v39, %v13486_v5  ;;  %10274 = vmatpush3.bf16.msra.mxu1 %v13563_v16  ;;  %v13577_v27 = vadd.f32 %v9184_v43, %v9183_v40 }
 0x622   : > { %v9003_v53 = vpop.f32.mrb[77].mxu0  ;;  %10275 = vmatprep.subr.bf16.mxu1 %v15690_v59 }
 0x623   : > { %v9004_v14 = vadd.f32 %v9003_v53, %v9002_v50  ;;  %v9005_v18 = vpop.f32.mrb[78].mxu0 }
 0x624   : > { %v9006_v24 = vpop.f32.mrb[79].mxu0 }
 0x625   : > { %v10330_v7 = vadd.f32 %v9004_v14, %v3284_v47  ;;  %v9007_v5 = vadd.f32 %v9006_v24, %v9005_v18  ;;  %v9186_v39 = vpop.f32.mrb[72].mxu1  ;;  %v3292_v14 = vadd.f32 %v13409_v1, %v13537_v33 }
 0x626   : > { %9931 = vmatmul.mubr.bf16.gmra.mrb[56].mxu0 %v4187_v58  ;;  %v9187_v50 = vpop.f32.mrb[73].mxu1 }
 0x627   : > { %v10336_v13 = vadd.f32 %v9007_v5, %v3287_v21  ;;  %9934 = vmatprep.mubr.bf16.mxu0 %v4190_v61  ;;  %v13583_v37 = vadd.f32 %v10330_v7, %v13490_v54  ;;  %v13585_v53 = vadd.f32 %v9187_v50, %v9186_v39  ;;  %v9189_v43 = vpop.f32.mrb[74].mxu1  ;;  %v3295_v54 = vadd.f32 %v13411_v48, %v13537_v33  ;;  %v4193_v61 = vld [vmem:[#allocation2 + $0x148] sm:$0xff] }
 0x628   : > { %v9190_v47 = vpop.f32.mrb[75].mxu1 }
 0x629   : > { %v9008_v40 = vpop.f32.mrb[80].mxu0  ;;  %v13588_v16 = vadd.f32 %v10336_v13, %v13492_v56  ;;  %v13592_v21 = vadd.f32 %v9190_v47, %v9189_v43 }
 0x62a   : > { %v9009_v26 = vpop.f32.mrb[81].mxu0 }
 0x62b   : > { %v9010_v18 = vadd.f32 %v9009_v26, %v9008_v40  ;;  %v9011_v24 = vpop.f32.mrb[82].mxu0 }
 0x62c   : > { %v9012_v5 = vpop.f32.mrb[83].mxu0 }
 0x62d   : > { %v10345_v7 = vadd.f32 %v9010_v18, %v3292_v14  ;;  %v9013_v58 = vadd.f32 %v9012_v5, %v9011_v24  ;;  %v9192_v56 = vpop.f32.mrb[76].mxu1  ;;  %v3300_v14 = vadd.f32 %v13417_v51, %v13537_v33 }
 0x62e   : > { %9935 = vmatmul.mubr.bf16.gmra.mrb[60].mxu0 %v4193_v61  ;;  %v9193_v1 = vpop.f32.mrb[77].mxu1 }
 0x62f   : > { %v10351_v39 = vadd.f32 %v9013_v58, %v3295_v54  ;;  %9938 = vmatprep.mubr.bf16.mxu0 %v13317_v15  ;;  %v13598_v13 = vadd.f32 %v10345_v7, %v13496_v0  ;;  %v13600_v40 = vadd.f32 %v9193_v1, %v9192_v56  ;;  %v9195_v43 = vpop.f32.mrb[78].mxu1  ;;  %v3303_v0 = vadd.f32 %v13419_v32, %v13537_v33 }
 0x630   : > { %v9196_v47 = vpop.f32.mrb[79].mxu1 }
 0x631   : > { %v9014_v50 = vpop.f32.mrb[84].mxu0  ;;  %v13603_v26 = vadd.f32 %v10351_v39, %v13498_v36  ;;  %v13607_v15 = vadd.f32 %v9196_v47, %v9195_v43 }
 0x632   : > { %v9015_v48 = vpop.f32.mrb[85].mxu0 }
 0x633   : > { %v9016_v18 = vadd.f32 %v9015_v48, %v9014_v50  ;;  %v9017_v24 = vpop.f32.mrb[86].mxu0 }
 0x634   : > { %v9018_v5 = vpop.f32.mrb[87].mxu0 }
 0x635   : > { %v10342_v54 = vadd.f32 %v9016_v18, %v3300_v14  ;;  %v9019_v7 = vadd.f32 %v9018_v5, %v9017_v24  ;;  %v9198_v36 = vpop.f32.mrb[80].mxu1  ;;  %v13627_v5 = vld [vmem:[#allocation2 + $0x8] sm:$0xff] }
 0x636   : > { %9939 = vmatmul.mubr.bf16.gmra.mrb[64].mxu0 %v13336_v11  ;;  %v9199_v51 = vpop.f32.mrb[81].mxu1  ;;  %v3308_v11 = vadd.f32 %v13425_v17, %v13537_v33 }
 0x637   : > { %v10348_v58 = vadd.f32 %v9019_v7, %v3303_v0  ;;  %9942 = vmatprep.mubr.bf16.mxu0 %v13343_v63  ;;  %v13614_v61 = vadd.f32 %v10342_v54, %v13502_v2  ;;  %v13616_v56 = vadd.f32 %v9199_v51, %v9198_v36  ;;  %v9201_v1 = vpop.f32.mrb[82].mxu1  ;;  %v3311_v2 = vadd.f32 %v13428_v60, %v13537_v33 }
 0x638   : > { %v9202_v43 = vpop.f32.mrb[83].mxu1 }
 0x639   : > { %v9020_v39 = vpop.f32.mrb[88].mxu0  ;;  %v13619_v50 = vadd.f32 %v10348_v58, %v13504_v35  ;;  %v13623_v63 = vadd.f32 %v9202_v43, %v9201_v1  ;;  %v3316_v1 = vadd.f32 %v13435_v9, %v13537_v33 }
 0x63a   : > { %v9021_v32 = vpop.f32.mrb[89].mxu0 }
 0x63b   : > { %v9022_v48 = vadd.f32 %v9021_v32, %v9020_v39  ;;  %v9023_v47 = vpop.f32.mrb[90].mxu0 }
 0x63c   : > { %v9024_v14 = vpop.f32.mrb[91].mxu0 }
 0x63d   : > { %v10357_v18 = vadd.f32 %v9022_v48, %v3308_v11  ;;  %v9025_v24 = vadd.f32 %v9024_v14, %v9023_v47  ;;  %v9204_v0 = vpop.f32.mrb[84].mxu1  ;;  %v3319_v48 = vadd.f32 %v13438_v30, %v13537_v33  ;;  %v3324_v30 = vadd.f32 %v13453_v42, %v13537_v33 }
 0x63e   : > { %9943 = vmatmul.mubr.bf16.gmra.mrb[68].mxu0 %v13627_v5  ;;  %v9205_v17 = vpop.f32.mrb[85].mxu1 }
 0x63f   : > { %v10363_v35 = vadd.f32 %v9025_v24, %v3311_v2  ;;  %v13631_v54 = vadd.f32 %v10357_v18, %v13508_v8  ;;  %6295 = vmatprep.mubr.bf16.mxu0 %v13627_v5  ;;  %v13634_v58 = vadd.f32 %v9205_v17, %v9204_v0  ;;  %v9207_v36 = vpop.f32.mrb[86].mxu1 }
 0x640   : > { %v9208_v39 = vpop.f32.mrb[87].mxu1 }
 0x641   : > { %v9026_v7 = vpop.f32.mrb[92].mxu0  ;;  %v13637_v60 = vadd.f32 %v10363_v35, %v13510_v62  ;;  %v13641_v11 = vadd.f32 %v9208_v39, %v9207_v36 }
 0x642   : > { %v9027_v51 = vpop.f32.mrb[93].mxu0 }
 0x643   : > { %v9028_v32 = vadd.f32 %v9027_v51, %v9026_v7  ;;  %v9029_v43 = vpop.f32.mrb[94].mxu0 }
 0x644   : > { %v9030_v8 = vpop.f32.mrb[95].mxu0 }
 0x645   : > { %v10354_v47 = vadd.f32 %v9028_v32, %v3316_v1  ;;  %v9031_v14 = vadd.f32 %v9030_v8, %v9029_v43  ;;  %v9210_v18 = vpop.f32.mrb[88].mxu1 }
 0x646   : > { %v9211_v24 = vpop.f32.mrb[89].mxu1 }
 0x647   : > { %v10360_v2 = vadd.f32 %v9031_v14, %v3319_v48  ;;  %v13646_v62 = vadd.f32 %v10354_v47, %v13514_v25  ;;  %v13648_v0 = vadd.f32 %v9211_v24, %v9210_v18  ;;  %v9213_v9 = vpop.f32.mrb[90].mxu1  ;;  %v3327_v25 = vadd.f32 %v13457_v52, %v13537_v33 }
 0x648   : > { %v9214_v36 = vpop.f32.mrb[91].mxu1  ;;  %v3332_v52 = vadd.f32 %v13467_v46, %v13537_v33 }
 0x649   : > { %v9032_v35 = vpop.f32.mrb[96].mxu0  ;;  %v13651_v17 = vadd.f32 %v10360_v2, %v13516_v19  ;;  %v13655_v1 = vadd.f32 %v9214_v36, %v9213_v9 }
 0x64a   : > { %v9033_v7 = vpop.f32.mrb[97].mxu0 }
 0x64b   : > { %v9034_v51 = vadd.f32 %v9033_v7, %v9032_v35  ;;  %v9035_v39 = vpop.f32.mrb[98].mxu0 }
 0x64c   : > { %v9036_v32 = vpop.f32.mrb[99].mxu0 }
 0x64d   : > { %v10369_v43 = vadd.f32 %v9034_v51, %v3324_v30  ;;  %v9037_v8 = vadd.f32 %v9036_v32, %v9035_v39  ;;  %v9216_v47 = vpop.f32.mrb[92].mxu1 }
 0x64e   : > { %v9217_v14 = vpop.f32.mrb[93].mxu1 }
 0x64f   : > { %v10375_v48 = vadd.f32 %v9037_v8, %v3327_v25  ;;  %v13660_v19 = vadd.f32 %v10369_v43, %v13520_v45  ;;  %v13662_v18 = vadd.f32 %v9217_v14, %v9216_v47  ;;  %v9219_v42 = vpop.f32.mrb[94].mxu1  ;;  %v3335_v45 = vadd.f32 %v13471_v49, %v13537_v33 }
 0x650   : > { %v9220_v9 = vpop.f32.mrb[95].mxu1  ;;  %v3340_v49 = vadd.f32 %v13405_v10, %v13537_v33 }
 0x651   : > { %v9038_v2 = vpop.f32.mrb[100].mxu0  ;;  %v13665_v24 = vadd.f32 %v10375_v48, %v13522_v20  ;;  %v13669_v30 = vadd.f32 %v9220_v9, %v9219_v42 }
 0x652   : > { %v9039_v35 = vpop.f32.mrb[101].mxu0 }
 0x653   : > { %v9040_v7 = vadd.f32 %v9039_v35, %v9038_v2  ;;  %v9041_v36 = vpop.f32.mrb[102].mxu0 }
 0x654   : > { %v9042_v51 = vpop.f32.mrb[103].mxu0 }
 0x655   : > { %v10366_v39 = vadd.f32 %v9040_v7, %v3332_v52  ;;  %v9043_v32 = vadd.f32 %v9042_v51, %v9041_v36  ;;  %v9222_v43 = vpop.f32.mrb[96].mxu1 }
 0x656   : > { %v9223_v8 = vpop.f32.mrb[97].mxu1 }
 0x657   : > { %v10372_v25 = vadd.f32 %v9043_v32, %v3335_v45  ;;  %v13674_v20 = vadd.f32 %v10366_v39, %v13544_v3  ;;  %v13676_v47 = vadd.f32 %v9223_v8, %v9222_v43  ;;  %v9225_v46 = vpop.f32.mrb[98].mxu1  ;;  %v3343_v3 = vadd.f32 %v13407_v44, %v13537_v33  ;;  %v4799_v45 = vld [vmem:[%s15424_s8 + $0x38] sm:$0xff] }
 0x658   : > { %v9226_v42 = vpop.f32.mrb[99].mxu1  ;;  %v3348_v8 = vadd.f32 %v13413_v28, %v13537_v33  ;;  %v3356_v28 = vadd.f32 %v13421_v41, %v13537_v33 }
 0x659   : > { %v9044_v48 = vpop.f32.mrb[104].mxu0  ;;  %v13679_v14 = vadd.f32 %v10372_v25, %v13551_v34  ;;  %v13683_v52 = vadd.f32 %v9226_v42, %v9225_v46  ;;  %v4798_v34 = vld [vmem:[%s15424_s8 + $0x30] sm:$0xff]  ;;  %v3351_v42 = vadd.f32 %v13415_v6, %v13537_v33  ;;  %v3359_v6 = vadd.f32 %v13423_v23, %v13537_v33 }
 0x65a   : > { %v9045_v2 = vpop.f32.mrb[105].mxu0  ;;  %v13693_v10 = vpack.c.bf16 %v4799_v45, %v4798_v34 }
 0x65b   : > { %v9046_v35 = vadd.f32 %v9045_v2, %v9044_v48  ;;  %v9047_v9 = vpop.f32.mrb[106].mxu0 }
 0x65c   : > { %v9048_v7 = vpop.f32.mrb[107].mxu0  ;;  %10277 = vmatpush3.bf16.msra.mxu1 %v13693_v10 }
 0x65d   : > { %v10381_v36 = vadd.f32 %v9046_v35, %v3340_v49  ;;  %v9049_v51 = vadd.f32 %v9048_v7, %v9047_v9  ;;  %10278 = vmatprep.subr.bf16.mxu1 %v15690_v59 }
 0x65f   : > { %v10387_v39 = vadd.f32 %v9049_v51, %v3343_v3  ;;  %v13696_v32 = vadd.f32 %v10381_v36, %v13569_v29 }
 0x661   : > { %v9050_v25 = vpop.f32.mrb[108].mxu0  ;;  %v13700_v44 = vadd.f32 %v10387_v39, %v13577_v27 }
 0x662   : > { %v9051_v43 = vpop.f32.mrb[109].mxu0 }
 0x663   : > { %v9052_v48 = vadd.f32 %v9051_v43, %v9050_v25  ;;  %v9053_v46 = vpop.f32.mrb[110].mxu0 }
 0x664   : > { %v9054_v2 = vpop.f32.mrb[111].mxu0 }
 0x665   : > { %v10378_v29 = vadd.f32 %v9052_v48, %v3348_v8  ;;  %v9055_v49 = vadd.f32 %v9054_v2, %v9053_v46  ;;  %v3364_v46 = vadd.f32 %v13431_v55, %v13537_v33  ;;  %v3372_v55 = vadd.f32 %v13440_v31, %v13537_v33 }
 0x667   : > { %v10384_v35 = vadd.f32 %v9055_v49, %v3351_v42  ;;  %v13708_v9 = vadd.f32 %v10378_v29, %v13585_v53  ;;  %v4800_v53 = vld [vmem:[%s15424_s8 + $0x40] sm:$0xff] }
 0x669   : > { %v9056_v27 = vpop.f32.mrb[112].mxu0  ;;  %v13711_v7 = vadd.f32 %v10384_v35, %v13592_v21  ;;  %v4801_v21 = vld [vmem:[%s15424_s8 + $0x48] sm:$0xff] }
 0x66a   : > { %v9057_v3 = vpop.f32.mrb[113].mxu0  ;;  %v13726_v41 = vpack.c.bf16 %v4801_v21, %v4800_v53 }
 0x66b   : > { %v9058_v36 = vadd.f32 %v9057_v3, %v9056_v27  ;;  %v9059_v51 = vpop.f32.mrb[114].mxu0 }
 0x66c   : > { %v9060_v34 = vpop.f32.mrb[115].mxu0  ;;  %10280 = vmatpush3.bf16.msra.mxu1 %v13726_v41 }
 0x66d   : > { %v10393_v45 = vadd.f32 %v9058_v36, %v3356_v28  ;;  %v9061_v39 = vadd.f32 %v9060_v34, %v9059_v51  ;;  %10281 = vmatprep.subr.bf16.mxu1 %v15690_v59 }
 0x66f   : > { %v10399_v25 = vadd.f32 %v9061_v39, %v3359_v6  ;;  %v13724_v43 = vadd.f32 %v10393_v45, %v13600_v40  ;;  %v3367_v40 = vadd.f32 %v13433_v38, %v13537_v33  ;;  %v3375_v38 = vadd.f32 %v13442_v57, %v13537_v33 }
 0x671   : > { %v9062_v8 = vpop.f32.mrb[116].mxu0  ;;  %v13729_v48 = vadd.f32 %v10399_v25, %v13607_v15 }
 0x672   : > { %v9063_v23 = vpop.f32.mrb[117].mxu0 }
 0x673   : > { %v9064_v2 = vadd.f32 %v9063_v23, %v9062_v8  ;;  %v9065_v42 = vpop.f32.mrb[118].mxu0  ;;  %v15719_v23 = vld [vmem:[#allocation59_spill] sm:$0xff] }
 0x674   : > { %v9066_v29 = vpop.f32.mrb[119].mxu0 }
 0x675   : > { %v10390_v49 = vadd.f32 %v9064_v2, %v3364_v46  ;;  %v9067_v35 = vadd.f32 %v9066_v29, %v9065_v42  ;;  %v3380_v46 = vadd.f32 %v15719_v23, %v13537_v33 }
 0x677   : > { %v10396_v27 = vadd.f32 %v9067_v35, %v3367_v40  ;;  %v13738_v15 = vadd.f32 %v10390_v49, %v13616_v56  ;;  %v4802_v56 = vld [vmem:[%s15424_s8 + $0x50] sm:$0xff] }
 0x679   : > { %v9068_v3 = vpop.f32.mrb[120].mxu0  ;;  %v13741_v28 = vadd.f32 %v10396_v27, %v13623_v63  ;;  %v4803_v63 = vld [vmem:[%s15424_s8 + $0x58] sm:$0xff] }
 0x67a   : > { %v9069_v36 = vpop.f32.mrb[121].mxu0  ;;  %v13756_v31 = vpack.c.bf16 %v4803_v63, %v4802_v56 }
 0x67b   : > { %v9070_v51 = vadd.f32 %v9069_v36, %v9068_v3  ;;  %v9071_v34 = vpop.f32.mrb[122].mxu0 }
 0x67c   : > { %v9072_v6 = vpop.f32.mrb[123].mxu0  ;;  %10283 = vmatpush3.bf16.msra.mxu1 %v13756_v31 }
 0x67d   : > { %v10405_v45 = vadd.f32 %v9070_v51, %v3372_v55  ;;  %v9073_v39 = vadd.f32 %v9072_v6, %v9071_v34  ;;  %10284 = vmatprep.subr.bf16.mxu1 %v15690_v59  ;;  %v15721_v51 = vld [vmem:[#allocation61_spill] sm:$0xff] }
 0x67e   : > { %v3388_v34 = vadd.f32 %v15721_v51, %v13537_v33 }
 0x67f   : > { %v10411_v25 = vadd.f32 %v9073_v39, %v3375_v38  ;;  %v13754_v53 = vadd.f32 %v10405_v45, %v13634_v58  ;;  %v15720_v58 = vld [vmem:[#allocation60_spill] sm:$0xff]  ;;  %v15722_v39 = vld [vmem:[#allocation22_spill] sm:$0xff] }
 0x680   : > { %v3383_v40 = vadd.f32 %v15720_v58, %v13537_v33 }
 0x681   : > { %v9074_v21 = vpop.f32.mrb[124].mxu0  ;;  %v13759_v8 = vadd.f32 %v10411_v25, %v13641_v11  ;;  %v3391_v25 = vadd.f32 %v15722_v39, %v13537_v33 }
 0x682   : > { %v9075_v57 = vpop.f32.mrb[125].mxu0 }
 0x683   : > { %v9076_v2 = vadd.f32 %v9075_v57, %v9074_v21  ;;  %v9077_v42 = vpop.f32.mrb[126].mxu0 }
 0x684   : > { %v9078_v29 = vpop.f32.mrb[127].mxu0 }
 0x685   : > { %v10402_v49 = vadd.f32 %v9076_v2, %v3380_v46  ;;  %v9079_v35 = vadd.f32 %v9078_v29, %v9077_v42  ;;  %v15723_v29 = vld [vmem:[#allocation32_spill] sm:$0xff] }
 0x686   : > { %v3396_v58 = vadd.f32 %v15723_v29, %v13537_v33 }
 0x687   : > { %v10408_v27 = vadd.f32 %v9079_v35, %v3383_v40  ;;  %v13768_v11 = vadd.f32 %v10402_v49, %v13648_v0  ;;  %v4804_v0 = vld [vmem:[%s15424_s8 + $0x60] sm:$0xff] }
 0x689   : > { %v9080_v3 = vpop.f32.mrb[128].mxu0  ;;  %v13771_v36 = vadd.f32 %v10408_v27, %v13655_v1  ;;  %v4805_v1 = vld [vmem:[%s15424_s8 + $0x68] sm:$0xff] }
 0x68a   : > { %v9081_v55 = vpop.f32.mrb[129].mxu0  ;;  %v13786_v23 = vpack.c.bf16 %v4805_v1, %v4804_v0 }
 0x68b   : > { %v9082_v6 = vadd.f32 %v9081_v55, %v9080_v3  ;;  %v9083_v38 = vpop.f32.mrb[130].mxu0 }
 0x68c   : > { %v9084_v45 = vpop.f32.mrb[131].mxu0  ;;  %10286 = vmatpush3.bf16.msra.mxu1 %v13786_v23 }
 0x68d   : > { %v10417_v56 = vadd.f32 %v9082_v6, %v3388_v34  ;;  %v9085_v63 = vadd.f32 %v9084_v45, %v9083_v38  ;;  %10287 = vmatprep.subr.bf16.mxu1 %v15690_v59  ;;  %v4806_v6 = vld [vmem:[%s15424_s8 + $0x70] sm:$0xff]  ;;  %v4807_v38 = vld [vmem:[%s15424_s8 + $0x78] sm:$0xff] }
 0x68e   : > { %v13809_v45 = vpack.c.bf16 %v4807_v38, %v4806_v6 }
 0x68f   : > { %v10423_v21 = vadd.f32 %v9085_v63, %v3391_v25  ;;  %v13784_v57 = vadd.f32 %v10417_v56, %v13662_v18  ;;  %v15724_v18 = vld [vmem:[#allocation43_spill] sm:$0xff] }
 0x690   : > { %v3399_v27 = vadd.f32 %v15724_v18, %v13537_v33  ;;  %10289 = vmatpush3.bf16.msra.mxu1 %v13809_v45  ;;  %v15725_v33 = vmov 0.0  }
 0x691   : > { %v9086_v46 = vpop.f32.mrb[132].mxu0  ;;  %v13789_v2 = vadd.f32 %v10423_v21, %v13669_v30  ;;  %9981 = vmatprep.subr.mxu1 %v15725_v33 }
 0x692   : > { %v9087_v42 = vpop.f32.mrb[133].mxu0 }
 0x693   : > { %v9088_v40 = vadd.f32 %v9087_v42, %v9086_v46  ;;  %v9089_v49 = vpop.f32.mrb[134].mxu0 }
 0x694   : > { %v9090_v35 = vpop.f32.mrb[135].mxu0 }
 0x695   : > { %v10414_v3 = vadd.f32 %v9088_v40, %v3396_v58  ;;  %v9091_v55 = vadd.f32 %v9090_v35, %v9089_v49 }
 0x697   : > { %v10420_v51 = vadd.f32 %v9091_v55, %v3399_v27  ;;  %v13798_v30 = vadd.f32 %v10414_v3, %v13676_v47 }
 0x699   : > { %v13801_v34 = vadd.f32 %v10420_v51, %v13683_v52  ;;  %v13817_v52 = vld [vmem:[%s577_s27] ss:$0 sm:$0xff]  ;;  %s15803_s27 = sld [smem:[#allocation20_spill]] }
 0x69f   : > { %p15805_p7 = scmp.ne.s32.totalorder %s15803_s27, 0 }
 0x6d9   : > { %v9916_v47 = vpop.f32.mrb[40].mxu0 }
 0x6da   : > { %v10332_v39 = vadd.f32 %v13583_v37, %v9916_v47  ;;  %v4594_v25 = vpop.f32.mrb[41].mxu0 }
 0x6db   : > { %v10335_v56 = vadd.f32 %v13567_v12, %v4594_v25  ;;  %v9917_v63 = vpop.f32.mrb[42].mxu0 }
 0x6dc   : > { %v13822_v21 = vadd.f32 %v10332_v39, %v13817_v52  ;;  %v10338_v0 = vadd.f32 %v13588_v16, %v9917_v63  ;;  %v4597_v1 = vpop.f32.mrb[43].mxu0 }
 0x6dd   : > { %v13826_v46 = vadd.f32 %v10335_v56, %v13817_v52  ;;  %v10341_v42 = vadd.f32 %v13572_v4, %v4597_v1 }
 0x6de   : > { %v13830_v29 = vadd.f32 %v10338_v0, %v13817_v52 }
 0x6df   : > { %v13833_v37 = vadd.f32 %v10341_v42, %v13817_v52 }
 0x6e1   : > { %v4812_v12 = vadd.f32 %v13833_v37, %v13826_v46  ;;  %v9920_v58 = vpop.f32.mrb[44].mxu0 }
 0x6e2   : > { %v10344_v40 = vadd.f32 %v13614_v61, %v9920_v58  ;;  %v4610_v49 = vpop.f32.mrb[45].mxu0 }
 0x6e3   : > { %v4813_v16 = vadd.f32 %v4812_v12, %v13822_v21  ;;  %v10347_v35 = vadd.f32 %v13598_v13, %v4610_v49  ;;  %v9921_v18 = vpop.f32.mrb[46].mxu0 }
 0x6e4   : > { %v13841_v4 = vadd.f32 %v10344_v40, %v13817_v52  ;;  %v10350_v27 = vadd.f32 %v13619_v50, %v9921_v18  ;;  %v4613_v3 = vpop.f32.mrb[47].mxu0 }
 0x6e5   : > { %v13845_v55 = vadd.f32 %v10347_v35, %v13817_v52  ;;  %v4814_v51 = vadd.f32 %v4813_v16, %v13830_v29  ;;  %v10353_v6 = vadd.f32 %v13603_v26, %v4613_v3 }
 0x6e6   : > { %v13850_v61 = vadd.f32 %v10350_v27, %v13817_v52 }
 0x6e7   : > { %v4815_v38 = vadd.f32 %v4814_v51, %v13845_v55  ;;  %v13854_v13 = vadd.f32 %v10353_v6, %v13817_v52 }
 0x6e9   : > { %v4816_v47 = vadd.f32 %v4815_v38, %v13854_v13  ;;  %v9924_v39 = vpop.f32.mrb[48].mxu0 }
 0x6ea   : > { %v10356_v50 = vadd.f32 %v13646_v62, %v9924_v39  ;;  %v4626_v25 = vpop.f32.mrb[49].mxu0 }
 0x6eb   : > { %v4817_v56 = vadd.f32 %v4816_v47, %v13841_v4  ;;  %v10359_v63 = vadd.f32 %v13631_v54, %v4626_v25  ;;  %v9925_v0 = vpop.f32.mrb[50].mxu0 }
 0x6ec   : > { %v13861_v26 = vadd.f32 %v10356_v50, %v13817_v52  ;;  %v10362_v1 = vadd.f32 %v13651_v17, %v9925_v0  ;;  %v4629_v42 = vpop.f32.mrb[51].mxu0 }
 0x6ed   : > { %v13865_v12 = vadd.f32 %v10359_v63, %v13817_v52  ;;  %v4818_v58 = vadd.f32 %v4817_v56, %v13850_v61  ;;  %v10365_v40 = vadd.f32 %v13637_v60, %v4629_v42 }
 0x6ee   : > { %v13870_v62 = vadd.f32 %v10362_v1, %v13817_v52 }
 0x6ef   : > { %v4819_v49 = vadd.f32 %v4818_v58, %v13865_v12  ;;  %v13874_v54 = vadd.f32 %v10365_v40, %v13817_v52 }
 0x6f1   : > { %v4820_v16 = vadd.f32 %v4819_v49, %v13874_v54  ;;  %v9928_v35 = vpop.f32.mrb[52].mxu0 }
 0x6f2   : > { %v10368_v17 = vadd.f32 %v13674_v20, %v9928_v35  ;;  %v4642_v18 = vpop.f32.mrb[53].mxu0 }
 0x6f3   : > { %v4821_v27 = vadd.f32 %v4820_v16, %v13861_v26  ;;  %v10371_v3 = vadd.f32 %v13660_v19, %v4642_v18  ;;  %v9929_v51 = vpop.f32.mrb[54].mxu0 }
 0x6f4   : > { %v13881_v60 = vadd.f32 %v10368_v17, %v13817_v52  ;;  %v10374_v6 = vadd.f32 %v13679_v14, %v9929_v51  ;;  %v4645_v38 = vpop.f32.mrb[55].mxu0 }
 0x6f5   : > { %v13885_v47 = vadd.f32 %v10371_v3, %v13817_v52  ;;  %v4822_v39 = vadd.f32 %v4821_v27, %v13870_v62  ;;  %v10377_v50 = vadd.f32 %v13665_v24, %v4645_v38 }
 0x6f6   : > { %v13890_v20 = vadd.f32 %v10374_v6, %v13817_v52 }
 0x6f7   : > { %v4823_v25 = vadd.f32 %v4822_v39, %v13885_v47  ;;  %v13894_v19 = vadd.f32 %v10377_v50, %v13817_v52 }
 0x6f9   : > { %v4824_v56 = vadd.f32 %v4823_v25, %v13894_v19  ;;  %v9932_v63 = vpop.f32.mrb[56].mxu0 }
 0x6fa   : > { %v10380_v14 = vadd.f32 %v13708_v9, %v9932_v63  ;;  %v4658_v0 = vpop.f32.mrb[57].mxu0 }
 0x6fb   : > { %v4825_v1 = vadd.f32 %v4824_v56, %v13881_v60  ;;  %v10383_v42 = vadd.f32 %v13696_v32, %v4658_v0  ;;  %v9933_v58 = vpop.f32.mrb[58].mxu0 }
 0x6fc   : > { %v13901_v24 = vadd.f32 %v10380_v14, %v13817_v52  ;;  %v10386_v40 = vadd.f32 %v13711_v7, %v9933_v58  ;;  %v4661_v49 = vpop.f32.mrb[59].mxu0 }
 0x6fd   : > { %v13905_v16 = vadd.f32 %v10383_v42, %v13817_v52  ;;  %v4826_v35 = vadd.f32 %v4825_v1, %v13890_v20  ;;  %v10389_v17 = vadd.f32 %v13700_v44, %v4661_v49 }
 0x6fe   : > { %v13910_v9 = vadd.f32 %v10386_v40, %v13817_v52 }
 0x6ff   : > { %v4827_v18 = vadd.f32 %v4826_v35, %v13905_v16  ;;  %v13914_v32 = vadd.f32 %v10389_v17, %v13817_v52 }
 0x701   : > { %v4828_v27 = vadd.f32 %v4827_v18, %v13914_v32  ;;  %v9936_v3 = vpop.f32.mrb[60].mxu0 }
 0x702   : > { %v10392_v7 = vadd.f32 %v13738_v15, %v9936_v3  ;;  %v4674_v51 = vpop.f32.mrb[61].mxu0 }
 0x703   : > { %v4829_v6 = vadd.f32 %v4828_v27, %v13901_v24  ;;  %v10395_v38 = vadd.f32 %v13724_v43, %v4674_v51  ;;  %v9937_v39 = vpop.f32.mrb[62].mxu0 }
 0x704   : > { %v13921_v44 = vadd.f32 %v10392_v7, %v13817_v52  ;;  %v10398_v50 = vadd.f32 %v13741_v28, %v9937_v39  ;;  %v4677_v25 = vpop.f32.mrb[63].mxu0 }
 0x705   : > { %v13925_v56 = vadd.f32 %v10395_v38, %v13817_v52  ;;  %v4830_v63 = vadd.f32 %v4829_v6, %v13910_v9  ;;  %v10401_v14 = vadd.f32 %v13729_v48, %v4677_v25 }
 0x706   : > { %v13930_v15 = vadd.f32 %v10398_v50, %v13817_v52 }
 0x707   : > { %v4831_v0 = vadd.f32 %v4830_v63, %v13925_v56  ;;  %v13934_v43 = vadd.f32 %v10401_v14, %v13817_v52 }
 0x709   : > { %v4832_v1 = vadd.f32 %v4831_v0, %v13934_v43  ;;  %v9940_v42 = vpop.f32.mrb[64].mxu0 }
 0x70a   : > { %v10404_v28 = vadd.f32 %v13768_v11, %v9940_v42  ;;  %v4690_v58 = vpop.f32.mrb[65].mxu0 }
 0x70b   : > { %v4833_v40 = vadd.f32 %v4832_v1, %v13921_v44  ;;  %v10407_v49 = vadd.f32 %v13754_v53, %v4690_v58  ;;  %v9941_v35 = vpop.f32.mrb[66].mxu0 }
 0x70c   : > { %v13941_v48 = vadd.f32 %v10404_v28, %v13817_v52  ;;  %v10410_v17 = vadd.f32 %v13771_v36, %v9941_v35  ;;  %v4693_v18 = vpop.f32.mrb[67].mxu0 }
 0x70d   : > { %v13945_v27 = vadd.f32 %v10407_v49, %v13817_v52  ;;  %v4834_v3 = vadd.f32 %v4833_v40, %v13930_v15  ;;  %v10413_v7 = vadd.f32 %v13759_v8, %v4693_v18 }
 0x70e   : > { %v13950_v11 = vadd.f32 %v10410_v17, %v13817_v52 }
 0x70f   : > { %v4835_v51 = vadd.f32 %v4834_v3, %v13945_v27  ;;  %v13954_v53 = vadd.f32 %v10413_v7, %v13817_v52 }
 0x711   : > { %v4836_v6 = vadd.f32 %v4835_v51, %v13954_v53  ;;  %v9944_v38 = vpop.f32.mrb[68].mxu0  ;;  %v13982_v51 = vld [vmem:[%s15425_s9] sm:$0x3] }
 0x712   : > { %v10416_v36 = vadd.f32 %v13798_v30, %v9944_v38  ;;  %v4706_v39 = vpop.f32.mrb[69].mxu0 }
 0x713   : > { %v4837_v50 = vadd.f32 %v4836_v6, %v13941_v48  ;;  %v10419_v25 = vadd.f32 %v13784_v57, %v4706_v39  ;;  %v9945_v63 = vpop.f32.mrb[70].mxu0  ;;  %v15727_v39 = vld [vmem:[#allocation64_spill] sm:$0xff] }
 0x714   : > { %v13961_v8 = vadd.f32 %v10416_v36, %v13817_v52  ;;  %v10422_v14 = vadd.f32 %v13801_v34, %v9945_v63  ;;  %v4709_v0 = vpop.f32.mrb[71].mxu0  ;;  %v15726_v36 = vld [vmem:[#allocation46_spill] sm:$0xff] }
 0x715   : > { %v13965_v1 = vadd.f32 %v10419_v25, %v13817_v52  ;;  %v4838_v42 = vadd.f32 %v4837_v50, %v13950_v11  ;;  %v10425_v28 = vadd.f32 %v13789_v2, %v4709_v0  ;;  %v15728_v50 = vld [vmem:[#allocation23_spill] sm:$0xff] }
 0x716   : > { %v13970_v30 = vadd.f32 %v10422_v14, %v13817_v52 }
 0x717   : > { %v4839_v58 = vadd.f32 %v4838_v42, %v13965_v1  ;;  %v13974_v57 = vadd.f32 %v10425_v28, %v13817_v52 }
 0x719   : > { %v4840_v40 = vadd.f32 %v4839_v58, %v13974_v57 }
 0x71b   : > { %v4841_v34 = vadd.f32 %v4840_v40, %v13961_v8 }
 0x71d   : > { %v4842_v49 = vadd.f32 %v4841_v34, %v13970_v30 }
 0x71f   : > { %v4843_v35 = vrot.slane %v4842_v49, 4 }
 0x721   : > { %v4844_v17 = vadd.f32 %v4843_v35, %v4842_v49 }
 0x723   : > { %v4845_v18 = vrot.slane %v4844_v17, 2 }
 0x725   : > { %v4846_v3 = vadd.f32 %v4845_v18, %v4844_v17 }
 0x727   : > { %v4847_v7 = vrot.slane %v4846_v3, 1 }
 0x729   : > { %v4848_v2 = vadd.f32 %v4847_v7, %v4846_v3 }
 0x72b   : > { %9979 = vmatmul.mubr.f32.vlgmr.msra.gmra.mrb[2].mxu1 %v4848_v2 }
 0x72c   : > { %9982 = vmatpush3.msk.msra.mxu1 %vm1259_vm1, %v13982_v51  ;;  %9983 = vmatprep.mubr.msk.f32.mxu1 %vm11418_vm0, %v15725_v33 }
 0x72d   : > { %10290 = vmatprep.subr.bf16.mxu1 %v15690_v59 }
 0x7fe   : > { %v4915_v52 = vpop.f32.mrb[2].mxu1 }
 0x7ff   : > { %v4920_v6 = vmul.f32 0.0009765625, %v4915_v52  ;;  %v9980_v38 = vpop.f32.mrb[3].mxu1 }
 0x801   : > { %9984 = vmatmul.mubr.msk.f32.vlgmr.msra.gmra.mrb[100].mxu1 %vm1255_vm2, %v4920_v6 }
 0x802   : > { %10292 = vmatpush3.bf16.msra.mxu1 %v15726_v36  ;;  %10018 = vmatprep.mubr.msk.f32.mxu1 %vm11418_vm0, %v15725_v33 }
 0x803   : > { %10293 = vmatprep.subr.bf16.mxu1 %v15690_v59 }
 0x806   : > { %10295 = vmatpush3.bf16.msra.mxu1 %v13547_v22 }
 0x807   : > { %10296 = vmatprep.subr.bf16.mxu1 %v15690_v59 }
 0x80a   : > { %10298 = vmatpush3.bf16.msra.mxu1 %v15727_v39 }
 0x80b   : > { %10299 = vmatprep.subr.bf16.mxu1 %v15690_v59 }
 0x80e   : > { %10301 = vmatpush3.bf16.msra.mxu1 %v13693_v10 }
 0x80f   : > { %10302 = vmatprep.subr.bf16.mxu1 %v15690_v59 }
 0x812   : > { %10304 = vmatpush3.bf16.msra.mxu1 %v13726_v41 }
 0x813   : > { %10305 = vmatprep.subr.bf16.mxu1 %v15690_v59 }
 0x816   : > { %10307 = vmatpush3.bf16.msra.mxu1 %v13756_v31 }
 0x817   : > { %10308 = vmatprep.subr.bf16.mxu1 %v15690_v59 }
 0x81a   : > { %10310 = vmatpush3.bf16.msra.mxu1 %v13786_v23 }
 0x81b   : > { %10311 = vmatprep.subr.bf16.mxu1 %v15690_v59 }
 0x81e   : > { %10313 = vmatpush3.bf16.msra.mxu1 %v13809_v45 }
 0x81f   : > { %10021 = vmatprep.subr.mxu1 %v15725_v33 }
 0x8d4   : > { %v4993_v22 = vpop.f32.mrb[100].mxu1 }
 0x8d5   : > { %v9985_v10 = vpop.f32.mrb[101].mxu1  ;;  %v14009_v25 = vrot.slane %v4993_v22, %v15728_v50 }
 0x8d7   : > { %v14013_v41 = vsub.f32 %v13826_v46, %v14009_v25  ;;  %v14017_v31 = vsub.f32 %v13833_v37, %v14009_v25  ;;  %v14021_v59 = vsub.f32 %v13822_v21, %v14009_v25  ;;  %v14029_v63 = vsub.f32 %v13830_v29, %v14009_v25 }
 0x8d8   : > { %v14033_v46 = vsub.f32 %v13845_v55, %v14009_v25  ;;  %v14039_v21 = vsub.f32 %v13854_v13, %v14009_v25  ;;  %v14045_v29 = vsub.f32 %v13841_v4, %v14009_v25  ;;  %v14051_v58 = vsub.f32 %v13850_v61, %v14009_v25 }
 0x8d9   : > { %v5033_v23 = vmul.f32 %v14013_v41, %v14013_v41  ;;  %v5034_v45 = vmul.f32 %v14017_v31, %v14017_v31  ;;  %v5035_v37 = vmul.f32 %v14021_v59, %v14021_v59  ;;  %v5036_v0 = vmul.f32 %v14029_v63, %v14029_v63 }
 0x8da   : > { %v5037_v55 = vmul.f32 %v14033_v46, %v14033_v46  ;;  %v5038_v13 = vmul.f32 %v14039_v21, %v14039_v21  ;;  %v14057_v34 = vsub.f32 %v13865_v12, %v14009_v25  ;;  %v5039_v4 = vmul.f32 %v14045_v29, %v14045_v29 }
 0x8db   : > { %v5065_v14 = vadd.f32 %v5034_v45, %v5033_v23  ;;  %v14063_v35 = vsub.f32 %v13874_v54, %v14009_v25  ;;  %v5040_v61 = vmul.f32 %v14051_v58, %v14051_v58  ;;  %v14069_v18 = vsub.f32 %v13861_v26, %v14009_v25 }
 0x8dc   : > { %v5041_v12 = vmul.f32 %v14057_v34, %v14057_v34  ;;  %v14075_v7 = vsub.f32 %v13870_v62, %v14009_v25  ;;  %v14081_v52 = vsub.f32 %v13885_v47, %v14009_v25  ;;  %v14087_v38 = vsub.f32 %v13894_v19, %v14009_v25 }
 0x8dd   : > { %v5066_v42 = vadd.f32 %v5065_v14, %v5035_v37  ;;  %v5042_v54 = vmul.f32 %v14063_v35, %v14063_v35  ;;  %v5043_v26 = vmul.f32 %v14069_v18, %v14069_v18  ;;  %v14093_v39 = vsub.f32 %v13881_v60, %v14009_v25 }
 0x8de   : > { %v5044_v62 = vmul.f32 %v14075_v7, %v14075_v7  ;;  %v5045_v47 = vmul.f32 %v14081_v52, %v14081_v52  ;;  %v14099_v10 = vsub.f32 %v13890_v20, %v14009_v25  ;;  %v5046_v19 = vmul.f32 %v14087_v38, %v14087_v38 }
 0x8df   : > { %v5067_v28 = vadd.f32 %v5066_v42, %v5036_v0  ;;  %v14105_v45 = vsub.f32 %v13905_v16, %v14009_v25  ;;  %v5047_v60 = vmul.f32 %v14093_v39, %v14093_v39  ;;  %v14111_v14 = vsub.f32 %v13914_v32, %v14009_v25 }
 0x8e0   : > { %v5048_v20 = vmul.f32 %v14099_v10, %v14099_v10  ;;  %v14117_v42 = vsub.f32 %v13901_v24, %v14009_v25 }
 0x8e1   : > { %v5068_v40 = vadd.f32 %v5067_v28, %v5037_v55  ;;  %v5049_v16 = vmul.f32 %v14105_v45, %v14105_v45  ;;  %v14123_v28 = vsub.f32 %v13910_v9, %v14009_v25  ;;  %v5050_v32 = vmul.f32 %v14111_v14, %v14111_v14 }
 0x8e2   : > { %v5051_v24 = vmul.f32 %v14117_v42, %v14117_v42 }
 0x8e3   : > { %v5069_v49 = vadd.f32 %v5068_v40, %v5038_v13  ;;  %v14129_v40 = vsub.f32 %v13925_v56, %v14009_v25  ;;  %v5052_v9 = vmul.f32 %v14123_v28, %v14123_v28 }
 0x8e5   : > { %v5070_v17 = vadd.f32 %v5069_v49, %v5039_v4  ;;  %v14135_v49 = vsub.f32 %v13934_v43, %v14009_v25  ;;  %v5053_v56 = vmul.f32 %v14129_v40, %v14129_v40 }
 0x8e7   : > { %v5071_v3 = vadd.f32 %v5070_v17, %v5040_v61  ;;  %v14141_v17 = vsub.f32 %v13921_v44, %v14009_v25  ;;  %v5054_v43 = vmul.f32 %v14135_v49, %v14135_v49 }
 0x8e9   : > { %v5072_v2 = vadd.f32 %v5071_v3, %v5041_v12  ;;  %v14147_v3 = vsub.f32 %v13930_v15, %v14009_v25  ;;  %v5055_v44 = vmul.f32 %v14141_v17, %v14141_v17 }
 0x8eb   : > { %v5073_v6 = vadd.f32 %v5072_v2, %v5042_v54  ;;  %v14153_v2 = vsub.f32 %v13945_v27, %v14009_v25  ;;  %v5056_v15 = vmul.f32 %v14147_v3, %v14147_v3 }
 0x8ed   : > { %v5074_v36 = vadd.f32 %v5073_v6, %v5043_v26  ;;  %v14159_v6 = vsub.f32 %v13954_v53, %v14009_v25  ;;  %v5057_v27 = vmul.f32 %v14153_v2, %v14153_v2 }
 0x8ef   : > { %v5075_v22 = vadd.f32 %v5074_v36, %v5044_v62  ;;  %v14165_v36 = vsub.f32 %v13941_v48, %v14009_v25  ;;  %v5058_v53 = vmul.f32 %v14159_v6, %v14159_v6 }
 0x8f1   : > { %v5076_v23 = vadd.f32 %v5075_v22, %v5045_v47  ;;  %v14171_v22 = vsub.f32 %v13950_v11, %v14009_v25  ;;  %v5059_v48 = vmul.f32 %v14165_v36, %v14165_v36 }
 0x8f3   : > { %v5077_v37 = vadd.f32 %v5076_v23, %v5046_v19  ;;  %v14177_v23 = vsub.f32 %v13965_v1, %v14009_v25  ;;  %v5060_v11 = vmul.f32 %v14171_v22, %v14171_v22 }
 0x8f5   : > { %v5078_v0 = vadd.f32 %v5077_v37, %v5047_v60  ;;  %v14183_v37 = vsub.f32 %v13974_v57, %v14009_v25  ;;  %v5061_v1 = vmul.f32 %v14177_v23, %v14177_v23 }
 0x8f7   : > { %v5079_v55 = vadd.f32 %v5078_v0, %v5048_v20  ;;  %v14189_v0 = vsub.f32 %v13961_v8, %v14009_v25  ;;  %v5062_v57 = vmul.f32 %v14183_v37, %v14183_v37 }
 0x8f9   : > { %v5080_v13 = vadd.f32 %v5079_v55, %v5049_v16  ;;  %v14195_v55 = vsub.f32 %v13970_v30, %v14009_v25 }
 0x8fb   : > { %v5081_v4 = vadd.f32 %v5080_v13, %v5050_v32  ;;  %v5063_v13 = vmul.f32 %v14189_v0, %v14189_v0  ;;  %v5064_v8 = vmul.f32 %v14195_v55, %v14195_v55 }
 0x8fd   : > { %v5082_v61 = vadd.f32 %v5081_v4, %v5051_v24 }
 0x8ff   : > { %v5083_v12 = vadd.f32 %v5082_v61, %v5052_v9 }
 0x901   : > { %v5084_v54 = vadd.f32 %v5083_v12, %v5053_v56 }
 0x903   : > { %v5085_v26 = vadd.f32 %v5084_v54, %v5054_v43 }
 0x905   : > { %v5086_v62 = vadd.f32 %v5085_v26, %v5055_v44 }
 0x907   : > { %v5087_v47 = vadd.f32 %v5086_v62, %v5056_v15  ;;  %v10865_v15 = vld [vmem:[#allocation7 + $0x40] sm:$0xff]  }
 0x908   : > { %v10866_v62 = vld [vmem:[#allocation7] sm:$0xff]   ;;  %9290 = vmatprep.subr.bf16.mxu0 %v10865_v15 }
 0x909   : > { %v5088_v19 = vadd.f32 %v5087_v47, %v5057_v27  ;;  %9291 = vmatpush3.bf16.msra.mxu0 %v10866_v62  ;;  %v10867_v27 = vld [vmem:[#allocation7 + $0x48] sm:$0xff]  }
 0x90a   : > { %v10868_v47 = vld [vmem:[#allocation7 + $0x8] sm:$0xff]   ;;  %9292 = vmatprep.subr.bf16.mxu0 %v10867_v27 }
 0x90b   : > { %v5089_v60 = vadd.f32 %v5088_v19, %v5058_v53  ;;  %v10869_v53 = vld [vmem:[#allocation7 + $0x50] sm:$0xff]   ;;  %v10874_v19 = vld [vmem:[#allocation7 + $0x80] sm:$0xff]  }
 0x90d   : > { %v5090_v20 = vadd.f32 %v5089_v60, %v5059_v48  ;;  %9293 = vmatpush3.bf16.msra.mxu0 %v10868_v47  ;;  %v10872_v48 = vld [vmem:[#allocation7 + $0x18] sm:$0xff]   ;;  %v10877_v60 = vld [vmem:[#allocation7 + $0x88] sm:$0xff]  }
 0x90e   : > { %9294 = vmatprep.subr.bf16.mxu0 %v10869_v53 }
 0x90f   : > { %v5091_v16 = vadd.f32 %v5090_v20, %v5060_v11  ;;  %v10873_v11 = vld [vmem:[#allocation7 + $0x60] sm:$0xff]  }
 0x910   : > { %v10875_v20 = vld [vmem:[#allocation7 + $0x20] sm:$0xff]  }
 0x911   : > { %v5092_v32 = vadd.f32 %v5091_v16, %v5061_v1  ;;  %v10880_v1 = vld [vmem:[#allocation7 + $0x90] sm:$0xff]   ;;  %v10876_v16 = vld [vmem:[#allocation7 + $0x68] sm:$0xff]  }
 0x913   : > { %v5093_v24 = vadd.f32 %v5092_v32, %v5062_v57  ;;  %v10878_v57 = vld [vmem:[#allocation7 + $0x28] sm:$0xff]   ;;  %v10883_v32 = vld [vmem:[#allocation7 + $0x98] sm:$0xff]  }
 0x915   : > { %v5094_v4 = vadd.f32 %v5093_v24, %v5063_v13  ;;  %v10879_v13 = vld [vmem:[#allocation7 + $0x70] sm:$0xff]  }
 0x916   : > { %v10881_v24 = vld [vmem:[#allocation7 + $0x30] sm:$0xff]  }
 0x917   : > { %v5095_v9 = vadd.f32 %v5094_v4, %v5064_v8  ;;  %v10885_v8 = vld [vmem:[#allocation7 + $0xa0] sm:$0xff]   ;;  %v10882_v4 = vld [vmem:[#allocation7 + $0x78] sm:$0xff]  }
 0x919   : > { %v5096_v61 = vrot.slane %v5095_v9, 4 }
 0x91b   : > { %v5097_v56 = vadd.f32 %v5096_v61, %v5095_v9  ;;  %v10884_v9 = vld [vmem:[#allocation7 + $0x38] sm:$0xff]   ;;  %v10886_v61 = vld [vmem:[#allocation7 + $0xa8] sm:$0xff]  }
 0x91d   : > { %v5098_v12 = vrot.slane %v5097_v56, 2 }
 0x91f   : > { %v5099_v43 = vadd.f32 %v5098_v12, %v5097_v56  ;;  %v10887_v56 = vld [vmem:[#allocation7 + $0xb0] sm:$0xff]  }
 0x921   : > { %v5100_v54 = vrot.slane %v5099_v43, 1 }
 0x923   : > { %v5101_v30 = vadd.f32 %v5100_v54, %v5099_v43  ;;  %v10888_v43 = vld [vmem:[#allocation7 + $0xb8] sm:$0xff]  }
 0x925   : > { %10019 = vmatmul.mubr.f32.vlgmr.msra.gmra.mrb[102].mxu1 %v5101_v30  ;;  %v10889_v30 = vld [vmem:[#allocation7 + $0x100] sm:$0xff]  }
 0x926   : > { %10022 = vmatpush3.msk.msra.mxu1 %vm1259_vm1, %v13982_v51  ;;  %10023 = vmatprep.mubr.msk.f32.mxu1 %vm11418_vm0, %v15725_v33  ;;  %v10870_v51 = vld [vmem:[#allocation7 + $0x10] sm:$0xff]   ;;  %v10871_v33 = vld [vmem:[#allocation7 + $0x58] sm:$0xff]  }
 0x927   : > { %9295 = vmatpush3.bf16.msra.mxu0 %v10870_v51  ;;  %10026 = vmatprep.subr.bf16.mxu1 %v10874_v19 }
 0x928   : > { %9296 = vmatprep.subr.bf16.mxu0 %v10871_v33 }
 0x92b   : > { %9297 = vmatpush3.bf16.msra.mxu0 %v10872_v48 }
 0x92c   : > { %9298 = vmatprep.subr.bf16.mxu0 %v10873_v11 }
 0x92f   : > { %9299 = vmatpush3.bf16.msra.mxu0 %v10875_v20 }
 0x930   : > { %9300 = vmatprep.subr.bf16.mxu0 %v10876_v16 }
 0x933   : > { %9301 = vmatpush3.bf16.msra.mxu0 %v10878_v57 }
 0x934   : > { %9302 = vmatprep.subr.bf16.mxu0 %v10879_v13 }
 0x937   : > { %9303 = vmatpush3.bf16.msra.mxu0 %v10881_v24 }
 0x938   : > { %9304 = vmatprep.subr.bf16.mxu0 %v10882_v4 }
 0x93b   : > { %9305 = vmatpush3.bf16.msra.mxu0 %v10884_v9 }
 0x93e   : > { %6296 = vmatmul.mubr.bf16.vlgmr.msra.gmra.mrb[136].mxu0 %v13627_v5 }
 0x9f8   : > { %v5168_v25 = vpop.f32.mrb[102].mxu1 }
 0x9f9   : > { %v5172_v44 = vmul.f32 0.0009765625, %v5168_v25  ;;  %v10020_v26 = vpop.f32.mrb[103].mxu1 }
 0x9fb   : > { %10024 = vmatmul.mubr.msk.f32.vlgmr.msra.gmra.mrb[104].mxu1 %vm1255_vm2, %v5172_v44 }
 0x9fc   : > { %10042 = vmatprep.mubr.bf16.mxu1 %v13627_v5  ;;  %10027 = vmatpush3.bf16.msra.mxu1 %v10874_v19 }
 0x9fd   : > { %10028 = vmatprep.subr.bf16.mxu1 %v10877_v60 }
 0xa00   : > { %10029 = vmatpush3.bf16.msra.mxu1 %v10877_v60 }
 0xa01   : > { %10030 = vmatprep.subr.bf16.mxu1 %v10880_v1 }
 0xa04   : > { %10031 = vmatpush3.bf16.msra.mxu1 %v10880_v1 }
 0xa05   : > { %10032 = vmatprep.subr.bf16.mxu1 %v10883_v32 }
 0xa08   : > { %10033 = vmatpush3.bf16.msra.mxu1 %v10883_v32 }
 0xa09   : > { %10034 = vmatprep.subr.bf16.mxu1 %v10885_v8 }
 0xa0c   : > { %10035 = vmatpush3.bf16.msra.mxu1 %v10885_v8 }
 0xa0d   : > { %10036 = vmatprep.subr.bf16.mxu1 %v10886_v61 }
 0xa10   : > { %10037 = vmatpush3.bf16.msra.mxu1 %v10886_v61 }
 0xa11   : > { %10038 = vmatprep.subr.bf16.mxu1 %v10887_v56 }
 0xa14   : > { %10039 = vmatpush3.bf16.msra.mxu1 %v10887_v56 }
 0xa15   : > { %10040 = vmatprep.subr.bf16.mxu1 %v10888_v43 }
 0xa18   : > { %10041 = vmatpush3.bf16.msra.mxu1 %v10888_v43 }
 0xa19   : > { %9426 = vmatprep.subr.bf16.mxu1 %v10889_v30 }
 0xace   : > { %v5242_v12 = vpop.f32.mrb[104].mxu1 }
 0xacf   : > { %v10025_v54 = vpop.f32.mrb[105].mxu1  ;;  %v5243_v25 = vadd.f32 1e-05, %v5242_v12 }
 0xad1   : > { %11107 = vrsqrt.f32 %v5243_v25 }
 0xadb   : > { %v11108_v44 = vpop.eup %11107 }
 0xadc   : > { %v5250_v26 = vrot.slane %v11108_v44, %v15728_v50 }
 0xade   : > { %v5251_v15 = vmul.f32 %v5250_v26, %v14013_v41  ;;  %v5252_v62 = vmul.f32 %v5250_v26, %v14017_v31  ;;  %v5253_v5 = vmul.f32 %v5250_v26, %v14021_v59  ;;  %v5254_v27 = vmul.f32 %v5250_v26, %v14029_v63 }
 0xadf   : > { %v5255_v47 = vmul.f32 %v5250_v26, %v14033_v46  ;;  %v5256_v53 = vmul.f32 %v5250_v26, %v14039_v21  ;;  %v5257_v51 = vmul.f32 %v5250_v26, %v14045_v29  ;;  %v5258_v19 = vmul.f32 %v5250_v26, %v14051_v58 }
 0xae0   : > { %v5259_v33 = vmul.f32 %v5250_v26, %v14057_v34  ;;  %v5260_v50 = vmul.f32 %v5250_v26, %v14063_v35  ;;  %v5261_v41 = vmul.f32 %v5250_v26, %v14069_v18  ;;  %v5262_v31 = vmul.f32 %v5250_v26, %v14075_v7  ;;  %v14234_v18 = vld [vmem:[%s15426_s10] ss:$0 sm:$0xff] }
 0xae1   : > { %v5263_v59 = vmul.f32 %v5250_v26, %v14081_v52  ;;  %v5264_v63 = vmul.f32 %v5250_v26, %v14087_v38  ;;  %v5265_v46 = vmul.f32 %v5250_v26, %v14093_v39  ;;  %v5266_v21 = vmul.f32 %v5250_v26, %v14099_v10 }
 0xae2   : > { %v5267_v29 = vmul.f32 %v5250_v26, %v14105_v45  ;;  %v5268_v58 = vmul.f32 %v5250_v26, %v14111_v14  ;;  %v5269_v34 = vmul.f32 %v5250_v26, %v14117_v42  ;;  %v5270_v35 = vmul.f32 %v5250_v26, %v14123_v28 }
 0xae3   : > { %v5271_v7 = vmul.f32 %v5250_v26, %v14129_v40  ;;  %v5272_v52 = vmul.f32 %v5250_v26, %v14135_v49  ;;  %v5273_v38 = vmul.f32 %v5250_v26, %v14141_v17  ;;  %v5274_v39 = vmul.f32 %v5250_v26, %v14147_v3 }
 0xae4   : > { %v5275_v10 = vmul.f32 %v5250_v26, %v14153_v2  ;;  %v5276_v45 = vmul.f32 %v5250_v26, %v14159_v6  ;;  %v5277_v14 = vmul.f32 %v5250_v26, %v14165_v36  ;;  %v5278_v42 = vmul.f32 %v5250_v26, %v14171_v22  ;;  %v14255_v36 = vld [vmem:[%s15427_s11] ss:$0 sm:$0xff] }
 0xae5   : > { %v5279_v28 = vmul.f32 %v5250_v26, %v14177_v23  ;;  %v5280_v48 = vmul.f32 %v5250_v26, %v14183_v37  ;;  %v5281_v40 = vmul.f32 %v5250_v26, %v14189_v0  ;;  %v5282_v49 = vmul.f32 %v5250_v26, %v14195_v55 }
 0xae6   : > { %v5289_v17 = vmul.f32 %v14234_v18, %v5251_v15  ;;  %v5290_v3 = vmul.f32 %v14234_v18, %v5252_v62  ;;  %v5291_v2 = vmul.f32 %v14234_v18, %v5253_v5  ;;  %v5292_v6 = vmul.f32 %v14234_v18, %v5254_v27 }
 0xae7   : > { %v5293_v22 = vmul.f32 %v14234_v18, %v5255_v47  ;;  %v5294_v23 = vmul.f32 %v14234_v18, %v5256_v53  ;;  %v5295_v37 = vmul.f32 %v14234_v18, %v5257_v51  ;;  %v5296_v0 = vmul.f32 %v14234_v18, %v5258_v19 }
 0xae8   : > { %v5297_v55 = vmul.f32 %v14234_v18, %v5259_v33  ;;  %v5298_v60 = vmul.f32 %v14234_v18, %v5260_v50  ;;  %v5299_v11 = vmul.f32 %v14234_v18, %v5261_v41  ;;  %v5300_v20 = vmul.f32 %v14234_v18, %v5262_v31 }
 0xae9   : > { %v5301_v1 = vmul.f32 %v14234_v18, %v5263_v59  ;;  %v5302_v16 = vmul.f32 %v14234_v18, %v5264_v63  ;;  %v5303_v57 = vmul.f32 %v14234_v18, %v5265_v46  ;;  %v5304_v32 = vmul.f32 %v14234_v18, %v5266_v21 }
 0xaea   : > { %v5305_v13 = vmul.f32 %v14234_v18, %v5267_v29  ;;  %v14271_v24 = vadd.f32 %v14255_v36, %v5289_v17  ;;  %v14274_v8 = vadd.f32 %v14255_v36, %v5290_v3  ;;  %v14277_v4 = vadd.f32 %v14255_v36, %v5291_v2 }
 0xaeb   : > { %v5306_v9 = vmul.f32 %v14234_v18, %v5268_v58  ;;  %v5307_v61 = vmul.f32 %v14234_v18, %v5269_v34  ;;  %v5308_v56 = vmul.f32 %v14234_v18, %v5270_v35  ;;  %v14283_v12 = vadd.f32 %v14255_v36, %v5292_v6 }
 0xaec   : > { %v14286_v43 = vmul.f32 %v14234_v18, %v5271_v7  ;;  %v14289_v54 = vmul.f32 %v14234_v18, %v5272_v52  ;;  %v14292_v30 = vmul.f32 %v14234_v18, %v5273_v38  ;;  %v14295_v25 = vadd.f32 %v14255_v36, %v5293_v22 }
 0xaed   : > { %v14298_v44 = vmul.f32 %v14234_v18, %v5274_v39  ;;  %v14301_v26 = vmul.f32 %v14234_v18, %v5275_v10  ;;  %v14304_v15 = vadd.f32 %v14255_v36, %v5294_v23  ;;  %v14307_v62 = vadd.f32 %v14255_v36, %v5295_v37 }
 0xaee   : > { %v14310_v5 = vmul.f32 %v14234_v18, %v5276_v45  ;;  %v5359_v27 = vsub.f32 0.0, %v14271_v24  ;;  %v5360_v47 = vsub.f32 0.0, %v14274_v8  ;;  %v5361_v53 = vsub.f32 0.0, %v14277_v4 }
 0xaef   : > { %v14316_v51 = vmul.f32 %v14234_v18, %v5277_v14  ;;  %v14319_v19 = vmul.f32 %v14234_v18, %v5278_v42  ;;  %v14322_v33 = vadd.f32 %v14255_v36, %v5296_v0  ;;  %v5362_v50 = vsub.f32 0.0, %v14283_v12 }
 0xaf0   : > { %v14326_v41 = vmul.f32 %v14234_v18, %v5279_v28  ;;  %v14329_v31 = vmul.f32 %v14234_v18, %v5280_v48  ;;  %v14332_v59 = vadd.f32 %v14255_v36, %v5297_v55  ;;  %v5363_v63 = vsub.f32 0.0, %v14295_v25 }
 0xaf1   : > { %v14336_v46 = vmul.f32 %v14234_v18, %v5281_v40  ;;  %v14339_v21 = vadd.f32 %v14255_v36, %v5298_v60  ;;  %v5364_v29 = vsub.f32 0.0, %v14304_v15  ;;  %v5365_v58 = vsub.f32 0.0, %v14307_v62 }
 0xaf2   : > { %v14344_v34 = vadd.f32 %v14255_v36, %v5299_v11  ;;  %v5391_v35 = vmul.f32 1.442695, %v5359_v27  ;;  %v5393_v7 = vmul.f32 1.442695, %v5360_v47  ;;  %v5395_v52 = vmul.f32 1.442695, %v5361_v53 }
 0xaf3   : > { %v14347_v38 = vmul.f32 %v14234_v18, %v5282_v49  ;;  %v14350_v39 = vadd.f32 %v14255_v36, %v5300_v20  ;;  %v5366_v10 = vsub.f32 0.0, %v14322_v33  ;;  %v5397_v45 = vmul.f32 1.442695, %v5362_v50 }
 0xaf4   : > { %v14354_v14 = vadd.f32 %v14255_v36, %v5301_v1  ;;  %v5367_v42 = vsub.f32 0.0, %v14332_v59  ;;  %11109 = vpow2.f32 %v5391_v35  ;;  %v5399_v28 = vmul.f32 1.442695, %v5363_v63 }
 0xaf5   : > { %v14358_v48 = vadd.f32 %v14255_v36, %v5302_v16  ;;  %v5368_v40 = vsub.f32 0.0, %v14339_v21  ;;  %11111 = vpow2.f32 %v5393_v7  ;;  %v5401_v18 = vmul.f32 1.442695, %v5364_v29 }
 0xaf6   : > { %v14362_v49 = vadd.f32 %v14255_v36, %v5303_v57  ;;  %v5369_v17 = vsub.f32 0.0, %v14344_v34  ;;  %11113 = vpow2.f32 %v5395_v52  ;;  %v5403_v3 = vmul.f32 1.442695, %v5365_v58 }
 0xaf7   : > { %v14366_v2 = vadd.f32 %v14255_v36, %v5304_v32  ;;  %v5370_v6 = vsub.f32 0.0, %v14350_v39  ;;  %11115 = vpow2.f32 %v5397_v45  ;;  %v5405_v22 = vmul.f32 1.442695, %v5366_v10 }
 0xaf8   : > { %v14370_v23 = vadd.f32 %v14255_v36, %v5305_v13  ;;  %v5371_v37 = vsub.f32 0.0, %v14354_v14  ;;  %11117 = vpow2.f32 %v5399_v28  ;;  %v5407_v0 = vmul.f32 1.442695, %v5367_v42 }
 0xaf9   : > { %v14374_v55 = vadd.f32 %v14255_v36, %v5306_v9  ;;  %v5372_v60 = vsub.f32 0.0, %v14358_v48  ;;  %11119 = vpow2.f32 %v5401_v18  ;;  %v5409_v11 = vmul.f32 1.442695, %v5368_v40 }
 0xafa   : > { %v14378_v20 = vadd.f32 %v14255_v36, %v5307_v61  ;;  %v5373_v1 = vsub.f32 0.0, %v14362_v49  ;;  %11121 = vpow2.f32 %v5403_v3  ;;  %v5411_v16 = vmul.f32 1.442695, %v5369_v17 }
 0xafb   : > { %v14382_v57 = vadd.f32 %v14255_v36, %v5308_v56  ;;  %v5374_v32 = vsub.f32 0.0, %v14366_v2  ;;  %11123 = vpow2.f32 %v5405_v22  ;;  %v5413_v13 = vmul.f32 1.442695, %v5370_v6 }
 0xafc   : > { %v14387_v9 = vadd.f32 %v14255_v36, %v14286_v43  ;;  %v5375_v27 = vsub.f32 0.0, %v14370_v23  ;;  %11125 = vpow2.f32 %v5407_v0  ;;  %v5415_v61 = vmul.f32 1.442695, %v5371_v37 }
 0xafd   : > { %v14392_v47 = vadd.f32 %v14255_v36, %v14289_v54  ;;  %v5376_v53 = vsub.f32 0.0, %v14374_v55  ;;  %11127 = vpow2.f32 %v5409_v11  ;;  %v5417_v56 = vmul.f32 1.442695, %v5372_v60 }
 0xafe   : > { %v14395_v50 = vpop.eup %11109  ;;  %v14399_v63 = vadd.f32 %v14255_v36, %v14292_v30  ;;  %v5377_v43 = vsub.f32 0.0, %v14378_v20  ;;  %11129 = vpow2.f32 %v5411_v16  ;;  %v5419_v29 = vmul.f32 1.442695, %v5373_v1 }
 0xaff   : > { %v14402_v58 = vpop.eup %11111  ;;  %v14406_v54 = vadd.f32 %v14255_v36, %v14298_v44  ;;  %v5378_v35 = vsub.f32 0.0, %v14382_v57  ;;  %11131 = vpow2.f32 %v5413_v13  ;;  %v5421_v7 = vmul.f32 1.442695, %v5374_v32 }
 0xb00   : > { %v14409_v52 = vpop.eup %11113  ;;  %v14413_v30 = vadd.f32 %v14255_v36, %v14301_v26  ;;  %v5379_v10 = vsub.f32 0.0, %v14387_v9  ;;  %11133 = vpow2.f32 %v5415_v61  ;;  %v5423_v45 = vmul.f32 1.442695, %v5375_v27 }
 0xb01   : > { %v14416_v42 = vpop.eup %11115  ;;  %v14420_v44 = vadd.f32 %v14255_v36, %v14310_v5  ;;  %v5380_v28 = vsub.f32 0.0, %v14392_v47  ;;  %11135 = vpow2.f32 %v5417_v56  ;;  %v5425_v40 = vmul.f32 1.442695, %v5376_v53 }
 0xb02   : > { %v14423_v18 = vpop.eup %11117  ;;  %v14427_v26 = vadd.f32 %v14255_v36, %v14316_v51  ;;  %v5381_v17 = vsub.f32 0.0, %v14399_v63  ;;  %11137 = vpow2.f32 %v5419_v29  ;;  %v5427_v3 = vmul.f32 1.442695, %v5377_v43 }
 0xb03   : > { %v14430_v6 = vpop.eup %11119  ;;  %v14434_v5 = vadd.f32 %v14255_v36, %v14319_v19  ;;  %v5382_v22 = vsub.f32 0.0, %v14406_v54  ;;  %11139 = vpow2.f32 %v5421_v7  ;;  %v5429_v37 = vmul.f32 1.442695, %v5378_v35 }
 0xb04   : > { %15729 = vst [vmem:[#allocation59_spill] sm:$0xff] %v14427_v26  ;;  %v14437_v0 = vpop.eup %11121  ;;  %v14441_v51 = vadd.f32 %v14255_v36, %v14326_v41  ;;  %v5383_v60 = vsub.f32 0.0, %v14413_v30  ;;  %11141 = vpow2.f32 %v5423_v45  ;;  %v5431_v11 = vmul.f32 1.442695, %v5379_v10 }
 0xb05   : > { %15730 = vst [vmem:[#allocation60_spill] sm:$0xff] %v14434_v5  ;;  %v14444_v1 = vpop.eup %11123  ;;  %v14448_v19 = vadd.f32 %v14255_v36, %v14329_v31  ;;  %v5384_v16 = vsub.f32 0.0, %v14420_v44  ;;  %11143 = vpow2.f32 %v5425_v40  ;;  %v5433_v32 = vmul.f32 1.442695, %v5380_v28  ;;  %v10907_v40 = vld [vmem:[#allocation7 + $0x1c0] sm:$0xff]  }
 0xb06   : > { %15731 = vst [vmem:[#allocation61_spill] sm:$0xff] %v14441_v51  ;;  %v14451_v13 = vpop.eup %11125  ;;  %v14455_v41 = vadd.f32 %v14255_v36, %v14336_v46  ;;  %v5385_v27 = vsub.f32 0.0, %v14427_v26  ;;  %11145 = vpow2.f32 %v5427_v3  ;;  %v5435_v61 = vmul.f32 1.442695, %v5381_v17  ;;  %9562 = vmatprep.subr.bf16.mxu0 %v10907_v40  ;;  %v5835_v40 = vld [vmem:[#allocation3 + $0x1a0] sm:$0x1] }
 0xb07   : > { %15732 = vst [vmem:[#allocation22_spill] sm:$0xff] %v14448_v19  ;;  %v14458_v53 = vpop.eup %11127  ;;  %v14462_v31 = vadd.f32 %v14255_v36, %v14347_v38  ;;  %v5386_v56 = vsub.f32 0.0, %v14434_v5  ;;  %11147 = vpow2.f32 %v5429_v37  ;;  %v5437_v43 = vmul.f32 1.442695, %v5382_v22  ;;  %v10908_v37 = vld [vmem:[#allocation7 + $0x180] sm:$0xff]  }
 0xb08   : > { %15733 = vst [vmem:[#allocation32_spill] sm:$0xff] %v14455_v41  ;;  %v14465_v29 = vpop.eup %11129  ;;  %v5387_v35 = vsub.f32 0.0, %v14441_v51  ;;  %11149 = vpow2.f32 %v5431_v11  ;;  %v5439_v46 = vmul.f32 1.442695, %v5383_v60  ;;  %v5388_v10 = vsub.f32 0.0, %v14448_v19  ;;  %v10909_v60 = vld [vmem:[#allocation7 + $0x1c8] sm:$0xff]   ;;  %9563 = vmatpush3.bf16.msra.mxu0 %v10908_v37 }
 0xb09   : > { %15734 = vst [vmem:[#allocation43_spill] sm:$0xff] %v14462_v31  ;;  %v14468_v7 = vpop.eup %11131  ;;  %11151 = vpow2.f32 %v5433_v32  ;;  %v5441_v45 = vmul.f32 1.442695, %v5384_v16  ;;  %v5389_v36 = vsub.f32 0.0, %v14455_v41  ;;  %v5443_v38 = vmul.f32 1.442695, %v5385_v27  ;;  %9564 = vmatprep.subr.bf16.mxu0 %v10909_v60 }
 0xb0a   : > { %v14471_v28 = vpop.eup %11133  ;;  %11153 = vpow2.f32 %v5435_v61  ;;  %v5390_v3 = vsub.f32 0.0, %v14462_v31  ;;  %v5445_v22 = vmul.f32 1.442695, %v5386_v56  ;;  %v5447_v32 = vmul.f32 1.442695, %v5387_v35  ;;  %v10910_v27 = vld [vmem:[#allocation7 + $0x188] sm:$0xff]  }
 0xb0b   : > { %v14474_v17 = vpop.eup %11135  ;;  %11155 = vpow2.f32 %v5437_v43  ;;  %v5449_v41 = vmul.f32 1.442695, %v5388_v10  ;;  %v5451_v19 = vmul.f32 1.442695, %v5389_v36  ;;  %v5455_v35 = vadd.f32 1.0, %v14395_v50  ;;  %v10913_v50 = vld [vmem:[#allocation7 + $0x190] sm:$0xff]  }
 0xb0c   : > { %v14477_v11 = vpop.eup %11137  ;;  %11157 = vpow2.f32 %v5439_v46  ;;  %v5453_v56 = vmul.f32 1.442695, %v5390_v3  ;;  %v5621_v46 = vld [vmem:[#allocation3 + $0x8] sm:$0x80]  ;;  %v5456_v10 = vadd.f32 1.0, %v14402_v58  ;;  %9565 = vmatpush3.bf16.msra.mxu0 %v10910_v27  ;;  %v5457_v36 = vadd.f32 1.0, %v14409_v52 }
 0xb0d   : > { %v14479_v16 = vpop.eup %11139  ;;  %11159 = vpow2.f32 %v5441_v45  ;;  %v5458_v3 = vadd.f32 1.0, %v14416_v42  ;;  %v10914_v51 = vld [vmem:[#allocation7 + $0x1d8] sm:$0xff]   ;;  %v5459_v58 = vadd.f32 1.0, %v14423_v18  ;;  %v5460_v52 = vadd.f32 1.0, %v14430_v6 }
 0xb0e   : > { %v14481_v61 = vpop.eup %11141  ;;  %11161 = vpow2.f32 %v5443_v38  ;;  %v10912_v38 = vld [vmem:[#allocation7 + $0x1d0] sm:$0xff]   ;;  %v10915_v27 = vld [vmem:[#allocation7 + $0x198] sm:$0xff]   ;;  %v5464_v6 = vadd.f32 1.0, %v14458_v53  ;;  %v10917_v53 = vld [vmem:[#allocation7 + $0x1a0] sm:$0xff]  }
 0xb0f   : > { %v14483_v43 = vpop.eup %11143  ;;  %11163 = vpow2.f32 %v5445_v22  ;;  %9566 = vmatprep.subr.bf16.mxu0 %v10912_v38 }
 0xb10   : > { %v14485_v31 = vpop.eup %11145  ;;  %11165 = vpow2.f32 %v5447_v32  ;;  %v5638_v32 = vsel %vm2278_vm13, %v5621_v46, 0  ;;  %9567 = vmatpush3.bf16.msra.mxu0 %v10913_v50  ;;  %v5468_v50 = vadd.f32 1.0, %v14474_v17  ;;  %v10919_v17 = vld [vmem:[#allocation7 + $0x1a8] sm:$0xff]  }
 0xb11   : > { %v11148_v45 = vpop.eup %11147  ;;  %11167 = vpow2.f32 %v5449_v41  ;;  %v5852_v41 = vsel %vm2813_vm6, %v5835_v40, 0  ;;  %v5656_v46 = vshrl.u32 %v5638_v32, 16  ;;  %9568 = vmatprep.subr.bf16.mxu0 %v10914_v51  ;;  %v5462_v40 = vadd.f32 1.0, %v14444_v1  ;;  %v10916_v51 = vld [vmem:[#allocation7 + $0x1e0] sm:$0xff]  }
 0xb12   : > { %v11150_v37 = vpop.eup %11149  ;;  %11169 = vpow2.f32 %v5451_v19  ;;  %v5981_v22 = vshll.u32 %v5852_v41, 16  ;;  %v10918_v41 = vld [vmem:[#allocation7 + $0x1e8] sm:$0xff]  }
 0xb13   : > { %v11152_v60 = vpop.eup %11151  ;;  %11171 = vpow2.f32 %v5453_v56  ;;  %v5461_v56 = vadd.f32 1.0, %v14437_v0  ;;  %v5465_v0 = vadd.f32 1.0, %v14465_v29  ;;  %v5470_v29 = vadd.f32 1.0, %v14479_v16 }
 0xb14   : > { %v11154_v26 = vpop.eup %11153  ;;  %11173 = vrcp.f32 %v5455_v35  ;;  %v5463_v35 = vadd.f32 1.0, %v14451_v13  ;;  %9569 = vmatpush3.bf16.msra.mxu0 %v10915_v27  ;;  %v14504_v32 = vrot.slane %v5981_v22, 1  ;;  %v5467_v13 = vadd.f32 1.0, %v14471_v28 }
 0xb15   : > { %v11156_v19 = vpop.eup %11155  ;;  %11175 = vrcp.f32 %v5456_v10  ;;  %v5471_v27 = vadd.f32 1.0, %v14481_v61  ;;  %9570 = vmatprep.subr.bf16.mxu0 %v10916_v51  ;;  %v5474_v28 = vadd.f32 1.0, %v11148_v45 }
 0xb16   : > { %v11158_v42 = vpop.eup %11157  ;;  %11177 = vrcp.f32 %v5457_v36  ;;  %v14502_v36 = vrot.slane %v5656_v46, 7  ;;  %15737 = vst [vmem:[#allocation46_spill] sm:$0xff] %v14504_v32  ;;  %v5472_v46 = vadd.f32 1.0, %v14483_v43  ;;  %v14514_v32 = vadd.f32 1.0, %v11152_v60 }
 0xb17   : > { %v11160_v5 = vpop.eup %11159  ;;  %11179 = vrcp.f32 %v5458_v3  ;;  %v5466_v3 = vadd.f32 1.0, %v14468_v7  ;;  %v5473_v7 = vadd.f32 1.0, %v14485_v31  ;;  %v14518_v61 = vadd.f32 1.0, %v11156_v19 }
 0xb18   : > { %v11162_v18 = vpop.eup %11161  ;;  %11181 = vrcp.f32 %v5459_v58  ;;  %9571 = vmatpush3.bf16.msra.mxu0 %v10917_v53  ;;  %v14523_v45 = vadd.f32 1.0, %v11160_v5 }
 0xb19   : > { %v11164_v38 = vpop.eup %11163  ;;  %11183 = vrcp.f32 %v5460_v52  ;;  %v5469_v52 = vadd.f32 1.0, %v14477_v11  ;;  %v14516_v11 = vadd.f32 1.0, %v11154_v26  ;;  %9572 = vmatprep.subr.bf16.mxu0 %v10918_v41 }
 0xb1a   : > { %v11166_v10 = vpop.eup %11165  ;;  %11185 = vrcp.f32 %v5461_v56  ;;  %v14528_v60 = vadd.f32 1.0, %v11164_v38 }
 0xb1b   : > { %v11168_v1 = vpop.eup %11167  ;;  %11187 = vrcp.f32 %v5462_v40  ;;  %v5475_v40 = vadd.f32 1.0, %v11150_v37 }
 0xb1c   : > { %v11170_v58 = vpop.eup %11169  ;;  %11189 = vrcp.f32 %v5463_v35  ;;  %v14520_v35 = vadd.f32 1.0, %v11158_v42  ;;  %9573 = vmatpush3.bf16.msra.mxu0 %v10919_v17  ;;  %v14533_v51 = vadd.f32 1.0, %v11168_v1 }
 0xb1d   : > { %v11172_v56 = vpop.eup %11171  ;;  %11191 = vrcp.f32 %v5464_v6  ;;  %v14525_v6 = vadd.f32 1.0, %v11162_v18  ;;  %v10921_v18 = vld [vmem:[#allocation7 + $0x1f0] sm:$0xff]  }
 0xb1e   : > { %v11174_v22 = vpop.eup %11173  ;;  %11193 = vrcp.f32 %v5465_v0  ;;  %v14530_v0 = vadd.f32 1.0, %v11166_v10  ;;  %v14540_v38 = vadd.f32 1.0, %v11172_v56  ;;  %9574 = vmatprep.subr.bf16.mxu0 %v10921_v18  ;;  %v10924_v56 = vld [vmem:[#allocation7 + $0x1b8] sm:$0xff]  }
 0xb1f   : > { %v11176_v16 = vpop.eup %11175  ;;  %11195 = vrcp.f32 %v5466_v3  ;;  %v5551_v31 = vmul.f32 %v11174_v22, %v14271_v24 }
 0xb20   : > { %v11178_v43 = vpop.eup %11177  ;;  %11197 = vrcp.f32 %v5467_v13  ;;  %v5552_v37 = vmul.f32 %v11176_v16, %v14274_v8  ;;  %v14538_v8 = vadd.f32 1.0, %v11170_v58  ;;  %v10922_v13 = vld [vmem:[#allocation7 + $0x1b0] sm:$0xff]  }
 0xb21   : > { %v11180_v26 = vpop.eup %11179  ;;  %11199 = vrcp.f32 %v5468_v50  ;;  %v5553_v19 = vmul.f32 %v11178_v43, %v14277_v4  ;;  %v10923_v4 = vld [vmem:[#allocation7 + $0x1f8] sm:$0xff]   ;;  %9575 = vmatpush3.bf16.msra.mxu0 %v10922_v13 }
 0xb22   : > { %v11182_v42 = vpop.eup %11181  ;;  %11201 = vrcp.f32 %v5469_v52  ;;  %v5554_v24 = vmul.f32 %v11180_v26, %v14283_v12  ;;  %v14536_v5 = vpack.c.bf16 %v5552_v37, %v5551_v31  ;;  %9576 = vmatprep.subr.bf16.mxu0 %v10923_v4 }
 0xb23   : > { %v11184_v3 = vpop.eup %11183  ;;  %11203 = vrcp.f32 %v5470_v29  ;;  %v5555_v10 = vmul.f32 %v11182_v42, %v14295_v25 }
 0xb24   : > { %v11186_v50 = vpop.eup %11185  ;;  %11205 = vrcp.f32 %v5471_v27  ;;  %v5556_v1 = vmul.f32 %v11184_v3, %v14304_v15  ;;  %v14544_v53 = vpack.c.bf16 %v5554_v24, %v5553_v19  ;;  %6303 = vmatprep.mubr.bf16.mxu0 %v14536_v5  ;;  %v5639_v41 = vsel %vm2279_vm11, %v14536_v5, 0 }
 0xb25   : > { %v11188_v58 = vpop.eup %11187  ;;  %11207 = vrcp.f32 %v5472_v46  ;;  %v5557_v52 = vmul.f32 %v11186_v50, %v14307_v62  ;;  %v5660_v25 = vshrl.u32 %v5639_v41, 16  ;;  %v5663_v29 = vshll.u32 %v5639_v41, 16  ;;  %9577 = vmatpush3.bf16.msra.mxu0 %v10924_v56 }
 0xb26   : > { %v11190_v27 = vpop.eup %11189  ;;  %11209 = vrcp.f32 %v5473_v7  ;;  %v5558_v15 = vmul.f32 %v11188_v58, %v14322_v33  ;;  %v14552_v17 = vpack.c.bf16 %v5556_v1, %v5555_v10  ;;  %5606 = vst [vmem:[#allocation3 + $0x38] sm:$0xff] %v14544_v53  ;;  %v5836_v16 = vsel %vm2797_vm12, %v14536_v5, 0  ;;  %v10890_v1 = vld [vmem:[#allocation7 + $0xc0] sm:$0xff]  }
 0xb27   : > { %v11192_v46 = vpop.eup %11191  ;;  %11211 = vrcp.f32 %v5474_v28  ;;  %v5559_v62 = vmul.f32 %v11190_v27, %v14332_v59  ;;  %v14559_v31 = vrot.slane %v5660_v25, 7  ;;  %v5837_v7 = vsel %vm2798_vm15, %v14544_v53, 0 }
 0xb28   : > { %v11194_v33 = vpop.eup %11193  ;;  %11213 = vrcp.f32 %v5475_v40  ;;  %v5560_v37 = vmul.f32 %v11192_v46, %v14339_v21  ;;  %v14565_v26 = vpack.c.bf16 %v5558_v15, %v5557_v52  ;;  %5607 = vst [vmem:[#allocation3 + $0x50] sm:$0xff] %v14552_v17  ;;  %v5854_v19 = vshrl.u32 %v5836_v16, 16  ;;  %v10892_v46 = vld [vmem:[#allocation7 + $0xc8] sm:$0xff]  }
 0xb29   : > { %v11196_v42 = vpop.eup %11195  ;;  %11215 = vrcp.f32 %v14514_v32  ;;  %v5561_v59 = vmul.f32 %v11194_v33, %v14344_v34  ;;  %v5665_v28 = vor.u32 %v5663_v29, %v14559_v31  ;;  %v5856_v24 = vshll.u32 %v5836_v16, 16  ;;  %v15743_v16 = vld [vmem:[#allocation38_spill] sm:$0xff] }
 0xb2a   : > { %v11198_v18 = vpop.eup %11197  ;;  %11217 = vrcp.f32 %v14516_v11  ;;  %v5562_v40 = vmul.f32 %v11196_v42, %v14350_v39  ;;  %v14573_v21 = vpack.c.bf16 %v5560_v37, %v5559_v62  ;;  %5608 = vst [vmem:[#allocation3 + $0x68] sm:$0xff] %v14565_v26  ;;  %v5861_v3 = vshll.u32 %v5837_v7, 16 }
 0xb2b   : > { %v11200_v10 = vpop.eup %11199  ;;  %11219 = vrcp.f32 %v14518_v61  ;;  %v5563_v32 = vmul.f32 %v11198_v18, %v14354_v14  ;;  %v14580_v34 = vsel %vm2312_vm7, %v14502_v36, %v5665_v28  ;;  %v5858_v13 = vrot.slane %v5856_v24, 1  ;;  %v15745_v28 = vld [vmem:[#allocation57_spill] sm:$0xff] }
 0xb2c   : > { %v11202_v4 = vpop.eup %11201  ;;  %11221 = vrcp.f32 %v14520_v35  ;;  %v5564_v39 = vmul.f32 %v11200_v10, %v14358_v48  ;;  %v14584_v11 = vpack.c.bf16 %v5562_v40, %v5561_v59  ;;  %5609 = vst [vmem:[#allocation3 + $0x80] sm:$0xff] %v14573_v21  ;;  %6304 = vmatmul.mubr.bf16.gmra.mrb[140].mxu0 %v14580_v34  ;;  %v5863_v50 = vrot.slane %v5861_v3, 1  ;;  %v15741_v35 = vld [vmem:[#allocation51_spill] sm:$0xff]  ;;  %v10894_v10 = vld [vmem:[#allocation7 + $0xd0] sm:$0xff]  }
 0xb2d   : > { %v11204_v61 = vpop.eup %11203  ;;  %11223 = vrcp.f32 %v14523_v45  ;;  %v5565_v14 = vmul.f32 %v11202_v4, %v14362_v49  ;;  %v5859_v36 = vor.u32 %v5858_v13, %v5854_v19  ;;  %6311 = vmatprep.mubr.bf16.mxu0 %v14544_v53  ;;  %vm15742_vm0 = vcmp.ne.s16.totalorder %v15741_v35, 0  ;;  %v10891_v49 = vld [vmem:[#allocation7 + $0x108] sm:$0xff]   ;;  %v10895_v35 = vld [vmem:[#allocation7 + $0x118] sm:$0xff]  }
 0xb2e   : > { %v14594_v48 = vsel %vm15742_vm0, %v14552_v17, 0  ;;  %v11206_v12 = vpop.eup %11205  ;;  %11225 = vrcp.f32 %v14525_v6  ;;  %v5566_v41 = vmul.f32 %v11204_v61, %v14366_v2  ;;  %v14598_v58 = vpack.c.bf16 %v5564_v39, %v5563_v32  ;;  %5610 = vst [vmem:[#allocation3 + $0x98] sm:$0xff] %v14584_v11 }
 0xb2f   : > { %v5865_v45 = vshrl.u32 %v5837_v7, 16  ;;  %v11208_v52 = vpop.eup %11207  ;;  %11227 = vrcp.f32 %v14528_v60  ;;  %v5567_v25 = vmul.f32 %v11206_v12, %v14370_v23  ;;  %v5864_v29 = vsel %vm2150_vm10, %v5859_v36, %v5863_v50  ;;  %v10893_v7 = vld [vmem:[#allocation7 + $0x110] sm:$0xff]  }
 0xb30   : > { %v5869_v56 = vshll.u32 %v14594_v48, 16  ;;  %v11210_v27 = vpop.eup %11209  ;;  %11229 = vrcp.f32 %v14530_v0  ;;  %v5568_v2 = vmul.f32 %v11208_v52, %v14374_v55  ;;  %v14607_v6 = vpack.c.bf16 %v5566_v41, %v5565_v14  ;;  %5611 = vst [vmem:[#allocation3 + $0xb0] sm:$0xff] %v14598_v58  ;;  %6001 = vst [vmem:[#allocation3 + $0x28] sm:$0xff] %v5864_v29  ;;  %10043 = vmatmul.mubr.bf16.vlgmr.msra.gmra.mrb[108].mxu1 %v5864_v29  ;;  %v15751_v52 = vld [vmem:[#allocation59_spill] sm:$0xff] }
 0xb31   : > { %v5867_v15 = vor.u32 %v5865_v45, %v5863_v50  ;;  %v11212_v22 = vpop.eup %11211  ;;  %11231 = vrcp.f32 %v14533_v51  ;;  %v5569_v23 = vmul.f32 %v11210_v27, %v14378_v20  ;;  %9427 = vmatpush3.bf16.msra.mxu1 %v10890_v1  ;;  %vm15744_vm1 = vcmp.ne.s16.totalorder %v15743_v16, 0  ;;  %v15749_v45 = vld [vmem:[#allocation40_spill] sm:$0xff]  ;;  %v10896_v27 = vld [vmem:[#allocation7 + $0xd8] sm:$0xff]   ;;  %v10897_v16 = vld [vmem:[#allocation7 + $0x120] sm:$0xff]  }
 0xb32   : > { %v5871_v60 = vrot.slane %v5869_v56, 1  ;;  %v5640_v0 = vsel %vm15744_vm1, %v14544_v53, 0  ;;  %v11214_v55 = vpop.eup %11213  ;;  %11233 = vrcp.f32 %v14538_v8  ;;  %v5570_v62 = vmul.f32 %v11212_v22, %v14382_v57  ;;  %5612 = vst [vmem:[#allocation3 + $0xc8] sm:$0xff] %v14607_v6  ;;  %9428 = vmatprep.subr.bf16.mxu1 %v10891_v49 }
 0xb33   : > { %v14617_v43 = vpack.c.bf16 %v5568_v2, %v5567_v25  ;;  %v5668_v51 = vshrl.u32 %v5640_v0, 16  ;;  %v11216_v20 = vpop.eup %11215  ;;  %11235 = vrcp.f32 %v14540_v38  ;;  %v5571_v33 = vmul.f32 %v11214_v55, %v14387_v9 }
 0xb34   : > { %v5872_v37 = vsel %vm2150_vm10, %v5867_v15, %v5871_v60  ;;  %v5671_v19 = vshll.u32 %v5640_v0, 16  ;;  %v11218_v42 = vpop.eup %11217  ;;  %v5572_v8 = vmul.f32 %v11216_v20, %v14392_v47  ;;  %v14624_v59 = vpack.c.bf16 %v5570_v62, %v5569_v23  ;;  %v15747_v47 = vld [vmem:[#allocation24_spill] sm:$0xff] }
 0xb35   : > { %5613 = vst [vmem:[#allocation3 + $0xe0] sm:$0xff] %v14617_v43  ;;  %6002 = vst [vmem:[#allocation3 + $0x40] sm:$0xff] %v5872_v37  ;;  %10046 = vmatprep.mubr.bf16.mxu1 %v5872_v37  ;;  %v14627_v57 = vrot.slane %v5668_v51, 7  ;;  %vm15746_vm2 = vcmp.ne.s16.totalorder %v15745_v28, 0  ;;  %v11220_v24 = vpop.eup %11219  ;;  %v5573_v9 = vmul.f32 %v11218_v42, %v14399_v63  ;;  %v5873_v18 = vshrl.u32 %v14594_v48, 16  ;;  %9429 = vmatpush3.bf16.msra.mxu1 %v10892_v46  ;;  %v15752_v15 = vld [vmem:[#allocation60_spill] sm:$0xff] }
 0xb36   : > { %v5839_v38 = vsel %vm15746_vm2, %v14565_v26, 0  ;;  %vm15748_vm13 = vcmp.ne.s16.totalorder %v15747_v47, 0  ;;  %v11222_v32 = vpop.eup %11221  ;;  %v5574_v13 = vmul.f32 %v11220_v24, %v14406_v54  ;;  %v14638_v4 = vpack.c.bf16 %v5572_v8, %v5571_v33  ;;  %5614 = vst [vmem:[#allocation3 + $0xf8] sm:$0xff] %v14624_v59  ;;  %9430 = vmatprep.subr.bf16.mxu1 %v10893_v7  ;;  %v15753_v46 = vld [vmem:[#allocation61_spill] sm:$0xff]  ;;  %v15755_v37 = vld [vmem:[#allocation22_spill] sm:$0xff]  ;;  %v15756_v24 = vld [vmem:[#allocation32_spill] sm:$0xff] }
 0xb37   : > { %v5877_v40 = vshll.u32 %v5839_v38, 16  ;;  %v5840_v3 = vsel %vm15748_vm13, %v14573_v21, 0  ;;  %v5673_v39 = vor.u32 %v5671_v19, %v14627_v57  ;;  %v5881_v50 = vshrl.u32 %v5839_v38, 16  ;;  %v11224_v63 = vpop.eup %11223 }
 0xb38   : > { %v5575_v61 = vmul.f32 %v11222_v32, %v14413_v30  ;;  %v5875_v14 = vor.u32 %v5873_v18, %v5871_v60  ;;  %v5885_v1 = vshll.u32 %v5840_v3, 16  ;;  %v11226_v48 = vpop.eup %11225  ;;  %v5576_v12 = vmul.f32 %v11224_v63, %v14420_v44  ;;  %5615 = vst [vmem:[#allocation3 + $0x110] sm:$0xff] %v14638_v4  ;;  %v15759_v32 = vld [vmem:[#allocation43_spill] sm:$0xff] }
 0xb39   : > { %v5879_v36 = vrot.slane %v5877_v40, 1  ;;  %v14644_v41 = vpack.c.bf16 %v5574_v13, %v5573_v9  ;;  %v14649_v54 = vsel %vm2312_vm7, %v14559_v31, %v5673_v39  ;;  %vm15750_vm11 = vcmp.ne.s16.totalorder %v15749_v45, 0  ;;  %v11228_v30 = vpop.eup %11227  ;;  %9431 = vmatpush3.bf16.msra.mxu1 %v10894_v10  ;;  %v15757_v40 = vld [vmem:[#allocation26_spill] sm:$0xff] }
 0xb3a   : > { %v5641_v49 = vsel %vm15750_vm11, %v14552_v17, 0  ;;  %v5577_v25 = vmul.f32 %v11226_v48, %v15751_v52  ;;  %6312 = vmatmul.mubr.bf16.gmra.mrb[144].mxu0 %v14649_v54  ;;  %v5887_v56 = vrot.slane %v5885_v1, 1  ;;  %v11230_v2 = vpop.eup %11229  ;;  %v5578_v22 = vmul.f32 %v11228_v30, %v15752_v15  ;;  %9432 = vmatprep.subr.bf16.mxu1 %v10895_v35  ;;  %v10898_v10 = vld [vmem:[#allocation7 + $0xe0] sm:$0xff]   ;;  %v15762_v1 = vld [vmem:[#allocation27_spill] sm:$0xff] }
 0xb3b   : > { %v5880_v29 = vsel %vm2150_vm10, %v5875_v14, %v5879_v36  ;;  %v5883_v44 = vor.u32 %v5881_v50, %v5879_v36  ;;  %v14658_v31 = vpack.c.bf16 %v5576_v12, %v5575_v61  ;;  %5616 = vst [vmem:[#allocation3 + $0x128] sm:$0xff] %v14644_v41  ;;  %6319 = vmatprep.mubr.bf16.mxu0 %v14552_v17  ;;  %v5676_v23 = vshrl.u32 %v5641_v49, 16  ;;  %v11232_v0 = vpop.eup %11231  ;;  %v15760_v14 = vld [vmem:[#allocation42_spill] sm:$0xff]  ;;  %v10899_v12 = vld [vmem:[#allocation7 + $0x128] sm:$0xff]  }
 0xb3c   : > { %6003 = vst [vmem:[#allocation3 + $0x58] sm:$0xff] %v5880_v29  ;;  %10047 = vmatmul.mubr.bf16.gmra.mrb[112].mxu1 %v5880_v29  ;;  %v5679_v60 = vshll.u32 %v5641_v49, 16  ;;  %v5579_v55 = vmul.f32 %v11230_v2, %v15753_v46  ;;  %v5841_v7 = vsel %vm2802_vm9, %v14584_v11, 0  ;;  %v5889_v20 = vshrl.u32 %v5840_v3, 16  ;;  %v11234_v33 = vpop.eup %11233 }
 0xb3d   : > { %v5888_v62 = vsel %vm2150_vm10, %v5883_v44, %v5887_v56  ;;  %v5580_v19 = vmul.f32 %v11232_v0, %v15755_v37  ;;  %v14668_v42 = vpack.c.bf16 %v5578_v22, %v5577_v25  ;;  %5617 = vst [vmem:[#allocation3 + $0x140] sm:$0xff] %v14658_v31  ;;  %v14671_v8 = vrot.slane %v5676_v23, 7  ;;  %v11236_v38 = vpop.eup %11235  ;;  %9433 = vmatpush3.bf16.msra.mxu1 %v10896_v27  ;;  %v10900_v27 = vld [vmem:[#allocation7 + $0xe8] sm:$0xff]   ;;  %v10901_v0 = vld [vmem:[#allocation7 + $0x130] sm:$0xff]  }
 0xb3e   : > { %6004 = vst [vmem:[#allocation3 + $0x70] sm:$0xff] %v5888_v62  ;;  %10050 = vmatprep.mubr.bf16.mxu1 %v5888_v62  ;;  %v5893_v28 = vshll.u32 %v5841_v7, 16  ;;  %v5581_v9 = vmul.f32 %v11234_v33, %v15756_v24  ;;  %v5891_v18 = vor.u32 %v5889_v20, %v5887_v56  ;;  %vm15758_vm9 = vcmp.ne.s16.totalorder %v15757_v40, 0  ;;  %9434 = vmatprep.subr.bf16.mxu1 %v10897_v16  ;;  %v15766_v22 = vld [vmem:[#allocation47_spill] sm:$0xff] }
 0xb3f   : > { %v5842_v47 = vsel %vm15758_vm9, %v14598_v58, 0  ;;  %v5897_v3 = vshrl.u32 %v5841_v7, 16  ;;  %v5582_v13 = vmul.f32 %v11236_v38, %v15759_v32  ;;  %v14678_v39 = vpack.c.bf16 %v5580_v19, %v5579_v55  ;;  %5618 = vst [vmem:[#allocation3 + $0x158] sm:$0xff] %v14668_v42 }
 0xb40   : > { %v5681_v50 = vor.u32 %v5679_v60, %v14671_v8  ;;  %v5895_v63 = vrot.slane %v5893_v28, 1  ;;  %v5901_v61 = vshll.u32 %v5842_v47, 16  ;;  %vm15761_vm12 = vcmp.ne.s16.totalorder %v15760_v14, 0  ;;  %v15768_v60 = vld [vmem:[#allocation29_spill] sm:$0xff] }
 0xb41   : > { %v5642_v36 = vsel %vm15761_vm12, %v14565_v26, 0  ;;  %vm15763_vm15 = vcmp.ne.s16.totalorder %v15762_v1, 0  ;;  %v5905_v48 = vshrl.u32 %v5842_v47, 16  ;;  %v14688_v45 = vpack.c.bf16 %v5582_v13, %v5581_v9  ;;  %5619 = vst [vmem:[#allocation3 + $0x170] sm:$0xff] %v14678_v39  ;;  %9435 = vmatpush3.bf16.msra.mxu1 %v10898_v10  ;;  %v10902_v9 = vld [vmem:[#allocation7 + $0xf0] sm:$0xff]   ;;  %v10903_v14 = vld [vmem:[#allocation7 + $0x138] sm:$0xff]  }
 0xb42   : > { %v5843_v35 = vsel %vm15763_vm15, %v14607_v6, 0  ;;  %v14693_v49 = vsel %vm2312_vm7, %v14627_v57, %v5681_v50  ;;  %v5896_v30 = vsel %vm2150_vm10, %v5891_v18, %v5895_v63  ;;  %v5899_v52 = vor.u32 %v5897_v3, %v5895_v63  ;;  %v15764_v57 = vld [vmem:[#allocation28_spill] sm:$0xff]  ;;  %9436 = vmatprep.subr.bf16.mxu1 %v10899_v12  ;;  %v15771_v63 = vld [vmem:[#allocation49_spill] sm:$0xff] }
 0xb43   : > { %6320 = vmatmul.mubr.bf16.gmra.mrb[148].mxu0 %v14693_v49  ;;  %6005 = vst [vmem:[#allocation3 + $0x88] sm:$0xff] %v5896_v30  ;;  %v5903_v25 = vrot.slane %v5901_v61, 1  ;;  %v5684_v29 = vshrl.u32 %v5642_v36, 16  ;;  %v5687_v44 = vshll.u32 %v5642_v36, 16  ;;  %v5909_v56 = vshll.u32 %v5843_v35, 16  ;;  %5620 = vst [vmem:[#allocation3 + $0x188] sm:$0xff] %v14688_v45 }
 0xb44   : > { %10051 = vmatmul.mubr.bf16.gmra.mrb[116].mxu1 %v5896_v30  ;;  %6327 = vmatprep.mubr.bf16.mxu0 %v14565_v26  ;;  %vm15765_vm6 = vcmp.ne.s16.totalorder %v15764_v57, 0  ;;  %v5913_v15 = vshrl.u32 %v5843_v35, 16  ;;  %vm15767_vm0 = vcmp.ne.s16.totalorder %v15766_v22, 0  ;;  %vm15769_vm1 = vcmp.ne.s16.totalorder %v15768_v60, 0 }
 0xb45   : > { %v5844_v2 = vsel %vm15765_vm6, %v14617_v43, 0  ;;  %v5643_v23 = vsel %vm15767_vm0, %v14573_v21, 0  ;;  %v5845_v16 = vsel %vm15769_vm1, %v14624_v59, 0  ;;  %v5904_v46 = vsel %vm2150_vm10, %v5899_v52, %v5903_v25  ;;  %9437 = vmatpush3.bf16.msra.mxu1 %v10900_v27 }
 0xb46   : > { %v5686_v55 = vrot.slane %v5684_v29, 7  ;;  %v5907_v62 = vor.u32 %v5905_v48, %v5903_v25  ;;  %v5911_v51 = vrot.slane %v5909_v56, 1  ;;  %6006 = vst [vmem:[#allocation3 + $0xa0] sm:$0xff] %v5904_v46  ;;  %10054 = vmatprep.mubr.bf16.mxu1 %v5904_v46  ;;  %v5917_v7 = vshll.u32 %v5844_v2, 16  ;;  %9438 = vmatprep.subr.bf16.mxu1 %v10901_v0  ;;  %v10904_v29 = vld [vmem:[#allocation7 + $0xf8] sm:$0xff]  }
 0xb47   : > { %v5692_v20 = vshrl.u32 %v5643_v23, 16  ;;  %v5695_v33 = vshll.u32 %v5643_v23, 16  ;;  %v5921_v37 = vshrl.u32 %v5844_v2, 16  ;;  %v5925_v24 = vshll.u32 %v5845_v16, 16  ;;  %v14739_v2 = vld [vmem:[#allocation7 + $0x140] sm:$0xff]  }
 0xb48   : > { %v5689_v19 = vor.u32 %v5687_v44, %v5686_v55  ;;  %v14710_v28 = vsel %vm2150_vm10, %v5907_v62, %v5911_v51  ;;  %v5915_v38 = vor.u32 %v5913_v15, %v5911_v51  ;;  %v5919_v18 = vrot.slane %v5917_v7, 1 }
 0xb49   : > { %6007 = vst [vmem:[#allocation3 + $0xb8] sm:$0xff] %v14710_v28  ;;  %v5694_v40 = vrot.slane %v5692_v20, 7  ;;  %v5846_v3 = vsel %vm2807_vm8, %v14638_v4, 0  ;;  %v5929_v10 = vshrl.u32 %v5845_v16, 16  ;;  %v5927_v13 = vrot.slane %v5925_v24, 1  ;;  %9439 = vmatpush3.bf16.msra.mxu1 %v10902_v9 }
 0xb4a   : > { %v14718_v32 = vsel %vm2312_vm7, %v14671_v8, %v5689_v19  ;;  %v5933_v50 = vshll.u32 %v5846_v3, 16  ;;  %vm15772_vm2 = vcmp.ne.s16.totalorder %v15771_v63, 0  ;;  %v14724_v36 = vsel %vm2150_vm10, %v5915_v38, %v5919_v18  ;;  %9440 = vmatprep.subr.bf16.mxu1 %v10903_v14 }
 0xb4b   : > { %v5644_v61 = vsel %vm15772_vm2, %v14584_v11, 0  ;;  %v5697_v1 = vor.u32 %v5695_v33, %v5694_v40  ;;  %v5923_v35 = vor.u32 %v5921_v37, %v5919_v18  ;;  %6328 = vmatmul.mubr.bf16.gmra.mrb[152].mxu0 %v14718_v32  ;;  %6008 = vst [vmem:[#allocation3 + $0xd0] sm:$0xff] %v14724_v36  ;;  %v5931_v12 = vor.u32 %v5929_v10, %v5927_v13  ;;  %v15778_v10 = vld [vmem:[#allocation56_spill] sm:$0xff]  ;;  %v15787_v33 = vld [vmem:[#allocation45_spill] sm:$0xff] }
 0xb4c   : > { %v5700_v48 = vshrl.u32 %v5644_v61, 16  ;;  %v5935_v8 = vrot.slane %v5933_v50, 1  ;;  %v5703_v30 = vshll.u32 %v5644_v61, 16  ;;  %v5847_v25 = vsel %vm2808_vm14, %v14644_v41, 0  ;;  %10055 = vmatmul.mubr.bf16.gmra.mrb[120].mxu1 %v14710_v28  ;;  %6335 = vmatprep.mubr.bf16.mxu0 %v14573_v21  ;;  %v15783_v21 = vld [vmem:[#allocation39_spill] sm:$0xff] }
 0xb4d   : > { %v14734_v44 = vsel %vm2312_vm7, %v5686_v55, %v5697_v1  ;;  %v14737_v56 = vsel %vm2150_vm10, %v5923_v35, %v5927_v13  ;;  %v5937_v57 = vshrl.u32 %v5846_v3, 16  ;;  %10058 = vmatprep.mubr.bf16.mxu1 %v14724_v36  ;;  %v5941_v22 = vshll.u32 %v5847_v25, 16  ;;  %v15775_v55 = vld [vmem:[#allocation35_spill] sm:$0xff]  ;;  %9441 = vmatpush3.bf16.msra.mxu1 %v10904_v29  ;;  %v15780_v1 = vld [vmem:[#allocation36_spill] sm:$0xff] }
 0xb4e   : > { %v5702_v27 = vrot.slane %v5700_v48, 7  ;;  %6009 = vst [vmem:[#allocation3 + $0xe8] sm:$0xff] %v14737_v56  ;;  %v14744_v15 = vsel %vm2150_vm10, %v5931_v12, %v5935_v8  ;;  %v5848_v23 = vsel %vm2809_vm5, %v14658_v31, 0  ;;  %v5945_v60 = vshrl.u32 %v5847_v25, 16  ;;  %10074 = vmatprep.subr.bf16.mxu1 %v14739_v2 }
 0xb4f   : > { %6010 = vst [vmem:[#allocation3 + $0x100] sm:$0xff] %v14744_v15  ;;  %v5939_v0 = vor.u32 %v5937_v57, %v5935_v8  ;;  %v5949_v46 = vshll.u32 %v5848_v23, 16  ;;  %vm15776_vm8 = vcmp.ne.s16.totalorder %v15775_v55, 0  ;;  %v5943_v51 = vrot.slane %v5941_v22, 1 }
 0xb50   : > { %v5705_v16 = vor.u32 %v5703_v30, %v5702_v27  ;;  %v5645_v62 = vsel %vm15776_vm8, %v14598_v58, 0  ;;  %v5849_v37 = vsel %vm2810_vm3, %v14668_v42, 0  ;;  %v5953_v24 = vshrl.u32 %v5848_v23, 16 }
 0xb51   : > { %v5708_v7 = vshrl.u32 %v5645_v62, 16  ;;  %v5711_v20 = vshll.u32 %v5645_v62, 16  ;;  %v5951_v38 = vrot.slane %v5949_v46, 1  ;;  %v5957_v9 = vshll.u32 %v5849_v37, 16  ;;  %v14801_v62 = vld [vmem:[#allocation3 + $0x140] sm:$0xff] }
 0xb52   : > { %v14757_v19 = vsel %vm2312_vm7, %v5694_v40, %v5705_v16  ;;  %v14761_v18 = vsel %vm2150_vm10, %v5939_v0, %v5943_v51  ;;  %v5947_v47 = vor.u32 %v5945_v60, %v5943_v51  ;;  %vm15779_vm14 = vcmp.ne.s16.totalorder %v15778_v10, 0  ;;  %v15785_v60 = vld [vmem:[#allocation41_spill] sm:$0xff]  ;;  %v14809_v10 = vld [vmem:[#allocation3 + $0x158] sm:$0xff] }
 0xb53   : > { %v5710_v3 = vrot.slane %v5708_v7, 7  ;;  %v5850_v13 = vsel %vm15779_vm14, %v14678_v39, 0  ;;  %6011 = vst [vmem:[#allocation3 + $0x118] sm:$0xff] %v14761_v18  ;;  %v5955_v42 = vor.u32 %v5953_v24, %v5951_v38  ;;  %v5959_v50 = vrot.slane %v5957_v9, 1  ;;  %6336 = vmatmul.mubr.bf16.gmra.mrb[156].mxu0 %v14734_v44 }
 0xb54   : > { %v5961_v40 = vshrl.u32 %v5849_v37, 16  ;;  %v5965_v63 = vshll.u32 %v5850_v13, 16  ;;  %v14769_v61 = vsel %vm2150_vm10, %v5947_v47, %v5951_v38  ;;  %vm15781_vm5 = vcmp.ne.s16.totalorder %v15780_v1, 0  ;;  %10059 = vmatmul.mubr.bf16.gmra.mrb[124].mxu1 %v14737_v56  ;;  %6343 = vmatprep.mubr.bf16.mxu0 %v14584_v11 }
 0xb55   : > { %v5713_v14 = vor.u32 %v5711_v20, %v5710_v3  ;;  %v5646_v35 = vsel %vm15781_vm5, %v14607_v6, 0  ;;  %v14777_v39 = vsel %vm2812_vm4, %v14688_v45, 0  ;;  %6012 = vst [vmem:[#allocation3 + $0x130] sm:$0xff] %v14769_v61  ;;  %v14783_v12 = vsel %vm2150_vm10, %v5955_v42, %v5959_v50  ;;  %10062 = vmatprep.mubr.bf16.mxu1 %v14744_v15 }
 0xb56   : > { %v5963_v8 = vor.u32 %v5961_v40, %v5959_v50  ;;  %v5967_v30 = vrot.slane %v5965_v63, 1  ;;  %v5716_v52 = vshrl.u32 %v5646_v35, 16  ;;  %6013 = vst [vmem:[#allocation3 + $0x148] sm:$0xff] %v14783_v12  ;;  %v5719_v45 = vshll.u32 %v5646_v35, 16  ;;  %v15789_v50 = vld [vmem:[#allocation48_spill] sm:$0xff]  ;;  %v15791_v63 = vld [vmem:[#allocation50_spill] sm:$0xff] }
 0xb57   : > { %v14787_v25 = vsel %vm2312_vm7, %v5702_v27, %v5713_v14  ;;  %v5969_v29 = vshrl.u32 %v5850_v13, 16  ;;  %v5973_v57 = vshll.u32 %v14777_v39, 16  ;;  %vm15784_vm3 = vcmp.ne.s16.totalorder %v15783_v21, 0 }
 0xb58   : > { %v14792_v11 = vsel %vm2150_vm10, %v5963_v8, %v5967_v30  ;;  %v5718_v22 = vrot.slane %v5716_v52, 7  ;;  %v5647_v23 = vsel %vm15784_vm3, %v14617_v43, 0  ;;  %vm15786_vm4 = vcmp.ne.s16.totalorder %v15785_v60, 0 }
 0xb59   : > { %v5648_v16 = vsel %vm15786_vm4, %v14624_v59, 0  ;;  %6014 = vst [vmem:[#allocation3 + $0x160] sm:$0xff] %v14792_v11  ;;  %v5971_v27 = vor.u32 %v5969_v29, %v5967_v30  ;;  %v5975_v0 = vrot.slane %v5973_v57, 1  ;;  %v5724_v46 = vshrl.u32 %v5647_v23, 16  ;;  %v14822_v30 = vld [vmem:[#allocation3 + $0x170] sm:$0xff]  ;;  %v15793_v29 = vld [vmem:[#allocation52_spill] sm:$0xff] }
 0xb5a   : > { %v5727_v55 = vshll.u32 %v5647_v23, 16  ;;  %v5721_v51 = vor.u32 %v5719_v45, %v5718_v22  ;;  %v5732_v7 = vshrl.u32 %v5648_v16, 16  ;;  %v5735_v20 = vshll.u32 %v5648_v16, 16 }
 0xb5b   : > { %vm15788_vm13 = vcmp.ne.s16.totalorder %v15787_v33, 0  ;;  %v14807_v38 = vsel %vm2150_vm10, %v5971_v27, %v5975_v0  ;;  %v5726_v24 = vrot.slane %v5724_v46, 7  ;;  %vm15790_vm11 = vcmp.ne.s16.totalorder %v15789_v50, 0  ;;  %6344 = vmatmul.mubr.bf16.gmra.mrb[160].mxu0 %v14757_v19  ;;  %v14833_v27 = vld [vmem:[#allocation3 + $0x188] sm:$0xff]  ;;  %v15797_v50 = vld [vmem:[#allocation44_spill] sm:$0xff] }
 0xb5c   : > { %v5649_v37 = vsel %vm15788_vm13, %v14638_v4, 0  ;;  %v14812_v13 = vsel %vm2312_vm7, %v5710_v3, %v5721_v51  ;;  %6015 = vst [vmem:[#allocation3 + $0x178] sm:$0xff] %v14807_v38  ;;  %v5734_v42 = vrot.slane %v5732_v7, 7  ;;  %v5650_v40 = vsel %vm15790_vm11, %v14644_v41, 0  ;;  %10063 = vmatmul.mubr.bf16.gmra.mrb[128].mxu1 %v14761_v18  ;;  %6351 = vmatprep.mubr.bf16.mxu0 %v14598_v58  ;;  %v15795_v51 = vld [vmem:[#allocation53_spill] sm:$0xff] }
 0xb5d   : > { %v5740_v9 = vshrl.u32 %v5649_v37, 16  ;;  %v5743_v47 = vshll.u32 %v5649_v37, 16  ;;  %vm15792_vm9 = vcmp.ne.s16.totalorder %v15791_v63, 0  ;;  %v5729_v1 = vor.u32 %v5727_v55, %v5726_v24  ;;  %10066 = vmatprep.mubr.bf16.mxu1 %v14769_v61 }
 0xb5e   : > { %v5651_v14 = vsel %vm15792_vm9, %v14801_v62, 0  ;;  %v5748_v48 = vshrl.u32 %v5650_v40, 16  ;;  %v5751_v8 = vshll.u32 %v5650_v40, 16  ;;  %v5737_v3 = vor.u32 %v5735_v20, %v5734_v42 }
 0xb5f   : > { %v5742_v35 = vrot.slane %v5740_v9, 7  ;;  %v5756_v52 = vshrl.u32 %v5651_v14, 16  ;;  %v5759_v45 = vshll.u32 %v5651_v14, 16  ;;  %vm15794_vm12 = vcmp.ne.s16.totalorder %v15793_v29, 0 }
 0xb60   : > { %v5652_v57 = vsel %vm15794_vm12, %v14809_v10, 0  ;;  %v14831_v21 = vsel %vm2312_vm7, %v5718_v22, %v5729_v1  ;;  %v5750_v60 = vrot.slane %v5748_v48, 7  ;;  %v14836_v46 = vsel %vm2312_vm7, %v5726_v24, %v5737_v3 }
 0xb61   : > { %v5745_v23 = vor.u32 %v5743_v47, %v5742_v35  ;;  %v5764_v16 = vshrl.u32 %v5652_v57, 16  ;;  %v5758_v58 = vrot.slane %v5756_v52, 7  ;;  %v5767_v55 = vshll.u32 %v5652_v57, 16 }
 0xb62   : > { %vm15796_vm15 = vcmp.ne.s16.totalorder %v15795_v51, 0  ;;  %v5753_v33 = vor.u32 %v5751_v8, %v5750_v60  ;;  %vm15798_vm6 = vcmp.ne.s16.totalorder %v15797_v50, 0  ;;  %v5977_v24 = vshrl.u32 %v14777_v39, 16  ;;  %v15799_v39 = vld [vmem:[#allocation46_spill] sm:$0xff] }
 0xb63   : > { %v5653_v7 = vsel %vm15796_vm15, %v14822_v30, 0  ;;  %v14842_v20 = vsel %vm2312_vm7, %v5734_v42, %v5745_v23  ;;  %v5766_v22 = vrot.slane %v5764_v16, 7  ;;  %v5761_v9 = vor.u32 %v5759_v45, %v5758_v58  ;;  %6352 = vmatmul.mubr.bf16.gmra.mrb[164].mxu0 %v14787_v25  ;;  %v10920_v16 = vld [vmem:[#allocation7 + $0x158] sm:$0xff]   ;;  %v6604_v51 = vld [vmem:[#allocation3 + $0xb0] sm:$0xff] }
 0xb64   : > { %v5772_v37 = vshrl.u32 %v5653_v7, 16  ;;  %v5775_v47 = vshll.u32 %v5653_v7, 16  ;;  %v5654_v40 = vsel %vm15798_vm6, %v14833_v27, 0  ;;  %v14849_v63 = vsel %vm2312_vm7, %v5742_v35, %v5753_v33  ;;  %10067 = vmatmul.mubr.bf16.gmra.mrb[132].mxu1 %v14783_v12  ;;  %6359 = vmatprep.mubr.bf16.mxu0 %v14607_v6  ;;  %v10906_v6 = vld [vmem:[#allocation7 + $0x148] sm:$0xff]   ;;  %v6607_v33 = vld [vmem:[#allocation3 + $0xc8] sm:$0xff]  ;;  %v6616_v50 = vld [vmem:[#allocation3 + $0x110] sm:$0xff] }
 0xb65   : > { %v5769_v14 = vor.u32 %v5767_v55, %v5766_v22  ;;  %v5780_v48 = vshrl.u32 %v5654_v40, 16  ;;  %v14852_v42 = vsel %vm2312_vm7, %v5750_v60, %v5761_v9  ;;  %v5979_v8 = vor.u32 %v5977_v24, %v5975_v0  ;;  %10070 = vmatprep.mubr.bf16.mxu1 %v14792_v11  ;;  %v10911_v60 = vld [vmem:[#allocation7 + $0x150] sm:$0xff]   ;;  %v7181_v7 = vld [vmem:[#allocation3 + $0x38] sm:$0xff]  ;;  %v7187_v9 = vld [vmem:[#allocation3 + $0x68] sm:$0xff] }
 0xb66   : > { %v5774_v1 = vrot.slane %v5772_v37, 7  ;;  %v5783_v29 = vshll.u32 %v5654_v40, 16  ;;  %v6610_v37 = vld [vmem:[#allocation3 + $0xe0] sm:$0xff] }
 0xb67   : > { %v14856_v3 = vsel %vm2312_vm7, %v5758_v58, %v5769_v14  ;;  %v5782_v45 = vrot.slane %v5780_v48, 7  ;;  %v14862_v35 = vsel %vm2150_vm10, %v5979_v8, %v15799_v39  ;;  %v10934_v14 = vld [vmem:[#allocation7 + $0x228] sm:$0xff]  }
 0xb68   : > { %v5777_v52 = vor.u32 %v5775_v47, %v5774_v1  ;;  %v6613_v47 = vld [vmem:[#allocation3 + $0xf8] sm:$0xff] }
 0xb69   : > { %v5785_v57 = vor.u32 %v5783_v29, %v5782_v45  ;;  %v10936_v45 = vld [vmem:[#allocation7 + $0x238] sm:$0xff]  }
 0xb6a   : > { %v14866_v0 = vsel %vm2312_vm7, %v5766_v22, %v5777_v52  ;;  %v7184_v22 = vld [vmem:[#allocation3 + $0x50] sm:$0xff]  ;;  %v10935_v52 = vld [vmem:[#allocation7 + $0x230] sm:$0xff]  }
 0xb6b   : > { %v14869_v23 = vsel %vm2312_vm7, %v5774_v1, %v5785_v57  ;;  %6360 = vmatmul.mubr.bf16.gmra.mrb[168].mxu0 %v14812_v13  ;;  %v14944_v1 = vld [vmem:[#allocation3 + $0xa0] sm:$0xff] }
 0xb6c   : > { %10071 = vmatmul.mubr.bf16.gmra.mrb[136].mxu1 %v14807_v38  ;;  %6367 = vmatprep.mubr.bf16.mxu0 %v14617_v43  ;;  %v6598_v43 = vld [vmem:[#allocation3 + $0x80] sm:$0xff] }
 0xb6d   : > { %6858 = vmatprep.mubr.bf16.mxu1 %v14536_v5  ;;  %v10925_v5 = vld [vmem:[#allocation7 + $0x160] sm:$0xff]  }
 0xb73   : > { %6368 = vmatmul.mubr.bf16.gmra.mrb[172].mxu0 %v14831_v21 }
 0xb74   : > { %6859 = vmatmul.mubr.bf16.vlgmr.msra.gmra.mrb[140].mxu1 %v14580_v34  ;;  %6375 = vmatprep.mubr.bf16.mxu0 %v14624_v59  ;;  %v10926_v34 = vld [vmem:[#allocation7 + $0x168] sm:$0xff]   ;;  %v14891_v59 = vld [vmem:[#allocation7 + $0x200] sm:$0xff]  }
 0xb75   : > { %10075 = vmatpush3.bf16.msra.mxu1 %v14739_v2  ;;  %6866 = vmatprep.mubr.bf16.mxu1 %v14544_v53  ;;  %v10927_v53 = vld [vmem:[#allocation7 + $0x170] sm:$0xff]  }
 0xb76   : > { %10076 = vmatprep.subr.bf16.mxu1 %v10906_v6 }
 0xb79   : > { %10077 = vmatpush3.bf16.msra.mxu1 %v10906_v6 }
 0xb7a   : > { %10078 = vmatprep.subr.bf16.mxu1 %v10911_v60 }
 0xb7b   : > { %6376 = vmatmul.mubr.bf16.gmra.mrb[176].mxu0 %v14836_v46 }
 0xb7c   : > { %6867 = vmatmul.mubr.bf16.gmra.mrb[144].mxu1 %v14649_v54  ;;  %6383 = vmatprep.mubr.bf16.mxu0 %v14638_v4  ;;  %v9306_v4 = vpop.f32.mrb[136].mxu0 }
 0xb7d   : > { %6874 = vmatprep.mubr.bf16.mxu1 %v14552_v17  ;;  %10079 = vmatpush3.bf16.msra.mxu1 %v10911_v60  ;;  %v10928_v17 = vld [vmem:[#allocation7 + $0x178] sm:$0xff]  }
 0xb7e   : > { %10080 = vmatprep.subr.bf16.mxu1 %v10920_v16 }
 0xb81   : > { %10081 = vmatpush3.bf16.msra.mxu1 %v10920_v16 }
 0xb82   : > { %10082 = vmatprep.subr.bf16.mxu1 %v10925_v5 }
 0xb83   : > { %6384 = vmatmul.mubr.bf16.gmra.mrb[180].mxu0 %v14842_v20 }
 0xb84   : > { %6875 = vmatmul.mubr.bf16.gmra.mrb[148].mxu1 %v14693_v49  ;;  %6391 = vmatprep.mubr.bf16.mxu0 %v14644_v41  ;;  %v9307_v41 = vpop.f32.mrb[137].mxu0 }
 0xb85   : > { %6882 = vmatprep.mubr.bf16.mxu1 %v14565_v26  ;;  %10083 = vmatpush3.bf16.msra.mxu1 %v10925_v5  ;;  %v6601_v26 = vld [vmem:[#allocation3 + $0x98] sm:$0xff]  ;;  %v9309_v2 = vpop.f32.mrb[138].mxu0 }
 0xb86   : > { %10084 = vmatprep.subr.bf16.mxu1 %v10926_v34  ;;  %v9310_v58 = vpop.f32.mrb[139].mxu0  ;;  %v14972_v5 = vld [vmem:[#allocation2 + $0x8] sm:$0xff] }
 0xb87   : > { %v14899_v55 = vadd.f32 %v9310_v58, %v9309_v2 }
 0xb89   : > { %10085 = vmatpush3.bf16.msra.mxu1 %v10926_v34 }
 0xb8a   : > { %10086 = vmatprep.subr.bf16.mxu1 %v10927_v53 }
 0xb8b   : > { %6392 = vmatmul.mubr.bf16.gmra.mrb[184].mxu0 %v14849_v63 }
 0xb8c   : > { %6883 = vmatmul.mubr.bf16.gmra.mrb[152].mxu1 %v14718_v32  ;;  %6399 = vmatprep.mubr.bf16.mxu0 %v14658_v31  ;;  %v14897_v31 = vadd.f32 %v9307_v41, %v9306_v4 }
 0xb8d   : > { %6890 = vmatprep.mubr.bf16.mxu1 %v6598_v43  ;;  %10087 = vmatpush3.bf16.msra.mxu1 %v10927_v53 }
 0xb8e   : > { %10088 = vmatprep.subr.bf16.mxu1 %v10928_v17 }
 0xb91   : > { %10089 = vmatpush3.bf16.msra.mxu1 %v10928_v17 }
 0xb92   : > { %10122 = vmatprep.subr.bf16.mxu1 %v14891_v59 }
 0xb93   : > { %6400 = vmatmul.mubr.bf16.gmra.mrb[188].mxu0 %v14852_v42 }
 0xb94   : > { %6891 = vmatmul.mubr.bf16.gmra.mrb[156].mxu1 %v14734_v44  ;;  %6407 = vmatprep.mubr.bf16.mxu0 %v14809_v10 }
 0xb95   : > { %6898 = vmatprep.mubr.bf16.mxu1 %v6601_v26 }
 0xb9b   : > { %6408 = vmatmul.mubr.bf16.gmra.mrb[192].mxu0 %v14856_v3 }
 0xb9c   : > { %6899 = vmatmul.mubr.bf16.gmra.mrb[160].mxu1 %v14757_v19  ;;  %6415 = vmatprep.mubr.bf16.mxu0 %v14822_v30 }
 0xb9d   : > { %6906 = vmatprep.mubr.bf16.mxu1 %v6604_v51 }
 0xba3   : > { %6416 = vmatmul.mubr.bf16.gmra.mrb[196].mxu0 %v14866_v0 }
 0xba4   : > { %6907 = vmatmul.mubr.bf16.gmra.mrb[164].mxu1 %v14787_v25  ;;  %7453 = vmatprep.mubr.bf16.mxu0 %v7181_v7  ;;  %v10939_v7 = vld [vmem:[#allocation9 + $0x10] sm:$0xff]  }
 0xba5   : > { %6914 = vmatprep.mubr.bf16.mxu1 %v6607_v33 }
 0xbab   : > { %7454 = vmatmul.mubr.bf16.vlgmr.msra.gmra.mrb[200].mxu0 %v14649_v54  ;;  %v6619_v54 = vld [vmem:[#allocation3 + $0x128] sm:$0xff] }
 0xbac   : > { %6915 = vmatmul.mubr.bf16.gmra.mrb[168].mxu1 %v14812_v13  ;;  %7461 = vmatprep.mubr.bf16.mxu0 %v7184_v22 }
 0xbad   : > { %6922 = vmatprep.mubr.bf16.mxu1 %v6610_v37 }
 0xbb3   : > { %7462 = vmatmul.mubr.bf16.gmra.mrb[204].mxu0 %v14693_v49  ;;  %v6587_v49 = vld [vmem:[#allocation3 + $0x28] sm:$0xff] }
 0xbb4   : > { %6923 = vmatmul.mubr.bf16.gmra.mrb[172].mxu1 %v14831_v21  ;;  %7469 = vmatprep.mubr.bf16.mxu0 %v7187_v9 }
 0xbb5   : > { %6930 = vmatprep.mubr.bf16.mxu1 %v6613_v47 }
 0xbbb   : > { %7470 = vmatmul.mubr.bf16.gmra.mrb[208].mxu0 %v14718_v32  ;;  %v10930_v32 = vld [vmem:[#allocation7 + $0x208] sm:$0xff]  }
 0xbbc   : > { %6931 = vmatmul.mubr.bf16.gmra.mrb[176].mxu1 %v14836_v46  ;;  %7477 = vmatprep.mubr.bf16.mxu0 %v6598_v43 }
 0xbbd   : > { %6938 = vmatprep.mubr.bf16.mxu1 %v6616_v50 }
 0xbc3   : > { %7478 = vmatmul.mubr.bf16.gmra.mrb[212].mxu0 %v14734_v44  ;;  %v14928_v44 = vld [vmem:[#allocation3 + $0x40] sm:$0xff] }
 0xbc4   : > { %6939 = vmatmul.mubr.bf16.gmra.mrb[180].mxu1 %v14842_v20  ;;  %7485 = vmatprep.mubr.bf16.mxu0 %v6601_v26 }
 0xbc5   : > { %6946 = vmatprep.mubr.bf16.mxu1 %v6619_v54 }
 0xbcb   : > { %7486 = vmatmul.mubr.bf16.gmra.mrb[216].mxu0 %v14757_v19  ;;  %v14932_v19 = vld [vmem:[#allocation3 + $0x58] sm:$0xff] }
 0xbcc   : > { %6947 = vmatmul.mubr.bf16.gmra.mrb[184].mxu1 %v14849_v63  ;;  %7493 = vmatprep.mubr.bf16.mxu0 %v6604_v51 }
 0xbcd   : > { %6954 = vmatprep.mubr.bf16.mxu1 %v14801_v62 }
 0xbd3   : > { %7494 = vmatmul.mubr.bf16.gmra.mrb[220].mxu0 %v14787_v25  ;;  %v10931_v25 = vld [vmem:[#allocation7 + $0x210] sm:$0xff]  }
 0xbd4   : > { %6955 = vmatmul.mubr.bf16.gmra.mrb[188].mxu1 %v14852_v42  ;;  %7501 = vmatprep.mubr.bf16.mxu0 %v6607_v33 }
 0xbd5   : > { %6962 = vmatprep.mubr.bf16.mxu1 %v14809_v10 }
 0xbdb   : > { %7502 = vmatmul.mubr.bf16.gmra.mrb[224].mxu0 %v14812_v13  ;;  %v10932_v13 = vld [vmem:[#allocation7 + $0x218] sm:$0xff]  }
 0xbdc   : > { %6963 = vmatmul.mubr.bf16.gmra.mrb[192].mxu1 %v14856_v3  ;;  %7509 = vmatprep.mubr.bf16.mxu0 %v6610_v37 }
 0xbdd   : > { %6970 = vmatprep.mubr.bf16.mxu1 %v14822_v30 }
 0xbe3   : > { %7510 = vmatmul.mubr.bf16.gmra.mrb[228].mxu0 %v14831_v21  ;;  %v14936_v21 = vld [vmem:[#allocation3 + $0x70] sm:$0xff] }
 0xbe4   : > { %6971 = vmatmul.mubr.bf16.gmra.mrb[196].mxu1 %v14866_v0  ;;  %7517 = vmatprep.mubr.bf16.mxu0 %v6613_v47 }
 0xbe5   : > { %6978 = vmatprep.mubr.bf16.mxu1 %v14833_v27 }
 0xbeb   : > { %7518 = vmatmul.mubr.bf16.gmra.mrb[232].mxu0 %v14836_v46  ;;  %v14940_v46 = vld [vmem:[#allocation3 + $0x88] sm:$0xff] }
 0xbec   : > { %6979 = vmatmul.mubr.bf16.gmra.mrb[200].mxu1 %v14869_v23  ;;  %7525 = vmatprep.mubr.bf16.mxu0 %v6616_v50  ;;  %v10940_v50 = vld [vmem:[#allocation9 + $0x18] sm:$0xff]  }
 0xbed   : > { %10090 = vmatprep.mubr.bf16.mxu1 %v6587_v49  ;;  %v10941_v49 = vld [vmem:[#allocation9 + $0x20] sm:$0xff]  }
 0xbf3   : > { %7526 = vmatmul.mubr.bf16.gmra.mrb[236].mxu0 %v14842_v20  ;;  %v10933_v20 = vld [vmem:[#allocation7 + $0x220] sm:$0xff]  }
 0xbf4   : > { %10091 = vmatmul.mubr.bf16.vlgmr.msra.gmra.mrb[108].mxu1 %v14928_v44  ;;  %7533 = vmatprep.mubr.bf16.mxu0 %v6619_v54 }
 0xbf5   : > { %10123 = vmatpush3.bf16.msra.mxu1 %v14891_v59  ;;  %10094 = vmatprep.mubr.bf16.mxu1 %v14932_v19 }
 0xbf6   : > { %10124 = vmatprep.subr.bf16.mxu1 %v10930_v32 }
 0xbf9   : > { %10125 = vmatpush3.bf16.msra.mxu1 %v10930_v32 }
 0xbfa   : > { %10126 = vmatprep.subr.bf16.mxu1 %v10931_v25 }
 0xbfb   : > { %7534 = vmatmul.mubr.bf16.gmra.mrb[240].mxu0 %v14849_v63 }
 0xbfc   : > { %10095 = vmatmul.mubr.bf16.gmra.mrb[112].mxu1 %v14936_v21  ;;  %7541 = vmatprep.mubr.bf16.mxu0 %v14801_v62 }
 0xbfd   : > { %10098 = vmatprep.mubr.bf16.mxu1 %v14940_v46  ;;  %10127 = vmatpush3.bf16.msra.mxu1 %v10931_v25 }
 0xbfe   : > { %10128 = vmatprep.subr.bf16.mxu1 %v10932_v13 }
 0xbff   : > { %v9312_v40 = vpop.f32.mrb[140].mxu0 }
 0xc00   : > { %v9313_v24 = vpop.f32.mrb[141].mxu0 }
 0xc01   : > { %10129 = vmatpush3.bf16.msra.mxu1 %v10932_v13  ;;  %v14947_v63 = vadd.f32 %v9313_v24, %v9312_v40  ;;  %v9315_v48 = vpop.f32.mrb[142].mxu0  ;;  %v7200_v40 = vld [vmem:[#allocation3 + $0xd0] sm:$0xff] }
 0xc02   : > { %10130 = vmatprep.subr.bf16.mxu1 %v10933_v20  ;;  %v9316_v62 = vpop.f32.mrb[143].mxu0 }
 0xc03   : > { %7542 = vmatmul.mubr.bf16.gmra.mrb[244].mxu0 %v14852_v42  ;;  %v14952_v8 = vadd.f32 %v9316_v62, %v9315_v48 }
 0xc04   : > { %10099 = vmatmul.mubr.bf16.gmra.mrb[116].mxu1 %v14944_v1  ;;  %7549 = vmatprep.mubr.bf16.mxu0 %v14809_v10 }
 0xc05   : > { %10102 = vmatprep.mubr.bf16.mxu1 %v14710_v28  ;;  %10131 = vmatpush3.bf16.msra.mxu1 %v10933_v20  ;;  %v10937_v28 = vld [vmem:[#allocation9] sm:$0xff]   ;;  %v7197_v20 = vld [vmem:[#allocation3 + $0xb8] sm:$0xff] }
 0xc06   : > { %10132 = vmatprep.subr.bf16.mxu1 %v10934_v14 }
 0xc09   : > { %10133 = vmatpush3.bf16.msra.mxu1 %v10934_v14  ;;  %v10943_v14 = vld [vmem:[#allocation9 + $0x30] sm:$0xff]  }
 0xc0a   : > { %10134 = vmatprep.subr.bf16.mxu1 %v10935_v52 }
 0xc0b   : > { %7550 = vmatmul.mubr.bf16.gmra.mrb[248].mxu0 %v14856_v3 }
 0xc0c   : > { %10103 = vmatmul.mubr.bf16.gmra.mrb[120].mxu1 %v14724_v36  ;;  %7557 = vmatprep.mubr.bf16.mxu0 %v14822_v30 }
 0xc0d   : > { %10106 = vmatprep.mubr.bf16.mxu1 %v14737_v56  ;;  %10135 = vmatpush3.bf16.msra.mxu1 %v10935_v52  ;;  %v9318_v10 = vpop.f32.mrb[144].mxu0 }
 0xc0e   : > { %10136 = vmatprep.subr.bf16.mxu1 %v10936_v45  ;;  %v9319_v42 = vpop.f32.mrb[145].mxu0 }
 0xc0f   : > { %v14958_v29 = vadd.f32 %v9319_v42, %v9318_v10  ;;  %v9321_v39 = vpop.f32.mrb[146].mxu0 }
 0xc10   : > { %v9322_v57 = vpop.f32.mrb[147].mxu0 }
 0xc11   : > { %10137 = vmatpush3.bf16.msra.mxu1 %v10936_v45  ;;  %v14960_v6 = vadd.f32 %v9322_v57, %v9321_v39 }
 0xc12   : > { %10170 = vmatprep.subr.bf16.mxu1 %v10937_v28 }
 0xc13   : > { %7558 = vmatmul.mubr.bf16.gmra.mrb[252].mxu0 %v14866_v0 }
 0xc14   : > { %10107 = vmatmul.mubr.bf16.gmra.mrb[124].mxu1 %v14744_v15  ;;  %7565 = vmatprep.mubr.bf16.mxu0 %v14833_v27 }
 0xc15   : > { %10110 = vmatprep.mubr.bf16.mxu1 %v14761_v18 }
 0xc16   : > { %v9324_v36 = vpop.f32.mrb[148].mxu0 }
 0xc17   : > { %v9325_v56 = vpop.f32.mrb[149].mxu0 }
 0xc18   : > { %v14966_v30 = vadd.f32 %v9325_v56, %v9324_v36  ;;  %v9327_v3 = vpop.f32.mrb[150].mxu0 }
 0xc19   : > { %v9328_v60 = vpop.f32.mrb[151].mxu0 }
 0xc1a   : > { %v14968_v16 = vadd.f32 %v9328_v60, %v9327_v3  ;;  %v10944_v3 = vld [vmem:[#allocation9 + $0x38] sm:$0xff]  }
 0xc1b   : > { %7566 = vmatmul.mubr.bf16.gmra.mrb[0].mxu0 %v14869_v23 }
 0xc1c   : > { %10111 = vmatmul.mubr.bf16.gmra.mrb[128].mxu1 %v14769_v61  ;;  %7573 = vmatprep.mubr.bf16.mxu0 %v14972_v5 }
 0xc1d   : > { %10114 = vmatprep.mubr.bf16.mxu1 %v14783_v12 }
 0xc1e   : > { %v9330_v15 = vpop.f32.mrb[152].mxu0 }
 0xc1f   : > { %v9331_v18 = vpop.f32.mrb[153].mxu0 }
 0xc20   : > { %v14976_v27 = vadd.f32 %v9331_v18, %v9330_v15  ;;  %v9333_v0 = vpop.f32.mrb[154].mxu0  ;;  %v7203_v15 = vld [vmem:[#allocation3 + $0xe8] sm:$0xff]  ;;  %v7206_v18 = vld [vmem:[#allocation3 + $0x100] sm:$0xff] }
 0xc21   : > { %v9334_v34 = vpop.f32.mrb[155].mxu0 }
 0xc22   : > { %v14978_v53 = vadd.f32 %v9334_v34, %v9333_v0 }
 0xc23   : > { %7574 = vmatmul.mubr.bf16.gmra.mrb[4].mxu0 %v14972_v5 }
 0xc24   : > { %10115 = vmatmul.mubr.bf16.gmra.mrb[132].mxu1 %v14792_v11 }
 0xc25   : > { %10118 = vmatprep.mubr.bf16.mxu1 %v14807_v38  ;;  %v10938_v38 = vld [vmem:[#allocation9 + $0x8] sm:$0xff]  }
 0xc26   : > { %v9336_v61 = vpop.f32.mrb[156].mxu0 }
 0xc27   : > { %v9337_v23 = vpop.f32.mrb[157].mxu0 }
 0xc28   : > { %v14983_v17 = vadd.f32 %v9337_v23, %v9336_v61  ;;  %v9339_v43 = vpop.f32.mrb[158].mxu0 }
 0xc29   : > { %v9340_v12 = vpop.f32.mrb[159].mxu0 }
 0xc2a   : > { %v14985_v59 = vadd.f32 %v9340_v12, %v9339_v43 }
 0xc2c   : > { %10119 = vmatmul.mubr.bf16.gmra.mrb[136].mxu1 %v14862_v35 }
 0xc2d   : > { %10138 = vmatprep.mubr.bf16.mxu1 %v14928_v44 }
 0xc2e   : > { %v9342_v26 = vpop.f32.mrb[160].mxu0 }
 0xc2f   : > { %v9343_v4 = vpop.f32.mrb[161].mxu0 }
 0xc30   : > { %v14989_v41 = vadd.f32 %v9343_v4, %v9342_v26  ;;  %v9345_v2 = vpop.f32.mrb[162].mxu0 }
 0xc31   : > { %v9346_v11 = vpop.f32.mrb[163].mxu0 }
 0xc32   : > { %v14991_v58 = vadd.f32 %v9346_v11, %v9345_v2 }
 0xc34   : > { %10139 = vmatmul.mubr.bf16.vlgmr.msra.gmra.mrb[108].mxu1 %v14932_v19 }
 0xc35   : > { %10171 = vmatpush3.bf16.msra.mxu1 %v10937_v28  ;;  %10142 = vmatprep.mubr.bf16.mxu1 %v14936_v21  ;;  %v10942_v21 = vld [vmem:[#allocation9 + $0x28] sm:$0xff]  }
 0xc36   : > { %v9348_v51 = vpop.f32.mrb[164].mxu0  ;;  %10172 = vmatprep.subr.bf16.mxu1 %v10938_v38 }
 0xc37   : > { %v9349_v33 = vpop.f32.mrb[165].mxu0 }
 0xc38   : > { %v14995_v22 = vadd.f32 %v9349_v33, %v9348_v51  ;;  %v9351_v37 = vpop.f32.mrb[166].mxu0 }
 0xc39   : > { %v9352_v9 = vpop.f32.mrb[167].mxu0  ;;  %10173 = vmatpush3.bf16.msra.mxu1 %v10938_v38 }
 0xc3a   : > { %v14997_v47 = vadd.f32 %v9352_v9, %v9351_v37  ;;  %10174 = vmatprep.subr.bf16.mxu1 %v10939_v7  ;;  %v7209_v9 = vld [vmem:[#allocation3 + $0x118] sm:$0xff] }
 0xc3c   : > { %10143 = vmatmul.mubr.bf16.gmra.mrb[112].mxu1 %v14940_v46  ;;  %v15008_v46 = vld [vmem:[%s15800_s30] ss:$0 sm:$0xff]  ;;  %s11344_s30 = sshll.u32 %s11422_s28, 4  ;;  %s11345_s30 = int_to_ptr.vmem [resolvable:$false] %s11344_s30 }
 0xc3d   : > { %10146 = vmatprep.mubr.bf16.mxu1 %v14944_v1  ;;  %10175 = vmatpush3.bf16.msra.mxu1 %v10939_v7  ;;  %v6298_v1 = vadd.f32 %v14897_v31, %v15008_v46  ;;  %v6301_v28 = vadd.f32 %v14899_v55, %v15008_v46  ;;  %v6306_v26 = vadd.f32 %v14947_v63, %v15008_v46  ;;  %s11346_s20 = scalar_lea.vmem %s11345_s30, 4096 }
 0xc3e   : > { %v9354_v54 = vpop.f32.mrb[168].mxu0  ;;  %10176 = vmatprep.subr.bf16.mxu1 %v10940_v50  ;;  %v6309_v7 = vadd.f32 %v14952_v8, %v15008_v46 }
 0xc3f   : > { %v9355_v32 = vpop.f32.mrb[169].mxu0 }
 0xc40   : > { %v15001_v44 = vadd.f32 %v9355_v32, %v9354_v54  ;;  %v9357_v19 = vpop.f32.mrb[170].mxu0 }
 0xc41   : > { %v9358_v25 = vpop.f32.mrb[171].mxu0  ;;  %10177 = vmatpush3.bf16.msra.mxu1 %v10940_v50  ;;  %v7212_v50 = vld [vmem:[#allocation3 + $0x130] sm:$0xff] }
 0xc42   : > { %v15003_v13 = vadd.f32 %v9358_v25, %v9357_v19  ;;  %10178 = vmatprep.subr.bf16.mxu1 %v10941_v49 }
 0xc44   : > { %10147 = vmatmul.mubr.bf16.gmra.mrb[116].mxu1 %v7197_v20  ;;  %v6314_v20 = vadd.f32 %v14958_v29, %v15008_v46 }
 0xc45   : > { %10150 = vmatprep.mubr.bf16.mxu1 %v7200_v40  ;;  %10179 = vmatpush3.bf16.msra.mxu1 %v10941_v49 }
 0xc46   : > { %v9360_v24 = vpop.f32.mrb[172].mxu0  ;;  %10180 = vmatprep.subr.bf16.mxu1 %v10942_v21 }
 0xc47   : > { %v9442_v48 = vpop.f32.mrb[140].mxu1  ;;  %v9361_v62 = vpop.f32.mrb[173].mxu0 }
 0xc48   : > { %v15012_v52 = vadd.f32 %v9361_v62, %v9360_v24  ;;  %v9443_v45 = vpop.f32.mrb[141].mxu1  ;;  %v9363_v10 = vpop.f32.mrb[174].mxu0 }
 0xc49   : > { %v9444_v42 = vadd.f32 %v9443_v45, %v9442_v48  ;;  %v9445_v39 = vpop.f32.mrb[142].mxu1  ;;  %v9364_v57 = vpop.f32.mrb[175].mxu0  ;;  %10181 = vmatpush3.bf16.msra.mxu1 %v10942_v21  ;;  %v6317_v48 = vadd.f32 %v14960_v6, %v15008_v46 }
 0xc4a   : > { %v15016_v36 = vadd.f32 %v9364_v57, %v9363_v10  ;;  %v9446_v56 = vpop.f32.mrb[143].mxu1  ;;  %10182 = vmatprep.subr.bf16.mxu1 %v10943_v14  ;;  %v7215_v10 = vld [vmem:[#allocation3 + $0x148] sm:$0xff] }
 0xc4b   : > { %v15018_v60 = vadd.f32 %v9444_v42, %v6298_v1  ;;  %v9447_v31 = vadd.f32 %v9446_v56, %v9445_v39 }
 0xc4c   : > { %10151 = vmatmul.mubr.bf16.gmra.mrb[120].mxu1 %v7203_v15  ;;  %v6322_v15 = vadd.f32 %v14966_v30, %v15008_v46 }
 0xc4d   : > { %v15020_v0 = vadd.f32 %v9447_v31, %v6301_v28  ;;  %10154 = vmatprep.mubr.bf16.mxu1 %v7206_v18  ;;  %10183 = vmatpush3.bf16.msra.mxu1 %v10943_v14  ;;  %v7218_v28 = vld [vmem:[#allocation3 + $0x160] sm:$0xff] }
 0xc4e   : > { %v9366_v55 = vpop.f32.mrb[176].mxu0  ;;  %10184 = vmatprep.subr.bf16.mxu1 %v10944_v3 }
 0xc4f   : > { %v9448_v34 = vpop.f32.mrb[144].mxu1  ;;  %v9367_v61 = vpop.f32.mrb[177].mxu0 }
 0xc50   : > { %v15022_v23 = vadd.f32 %v9367_v61, %v9366_v55  ;;  %v9449_v43 = vpop.f32.mrb[145].mxu1  ;;  %v9369_v12 = vpop.f32.mrb[178].mxu0 }
 0xc51   : > { %v9450_v4 = vadd.f32 %v9449_v43, %v9448_v34  ;;  %v9451_v2 = vpop.f32.mrb[146].mxu1  ;;  %v9370_v11 = vpop.f32.mrb[179].mxu0  ;;  %10185 = vmatpush3.bf16.msra.mxu1 %v10944_v3  ;;  %v6325_v43 = vadd.f32 %v14968_v16, %v15008_v46  ;;  %v6330_v16 = vadd.f32 %v14976_v27, %v15008_v46 }
 0xc52   : > { %v15026_v38 = vadd.f32 %v9370_v11, %v9369_v12  ;;  %v9452_v51 = vpop.f32.mrb[147].mxu1 }
 0xc53   : > { %v15030_v33 = vadd.f32 %v9450_v4, %v6306_v26  ;;  %v9453_v37 = vadd.f32 %v9452_v51, %v9451_v2  ;;  %v7221_v4 = vld [vmem:[#allocation3 + $0x178] sm:$0xff] }
 0xc54   : > { %10155 = vmatmul.mubr.bf16.gmra.mrb[124].mxu1 %v7209_v9 }
 0xc55   : > { %v15032_v54 = vadd.f32 %v9453_v37, %v6309_v7  ;;  %10158 = vmatprep.mubr.bf16.mxu1 %v7212_v50 }
 0xc56   : > { %v9372_v63 = vpop.f32.mrb[180].mxu0 }
 0xc57   : > { %v9454_v49 = vpop.f32.mrb[148].mxu1  ;;  %v9373_v32 = vpop.f32.mrb[181].mxu0 }
 0xc58   : > { %v15034_v19 = vadd.f32 %v9373_v32, %v9372_v63  ;;  %v9455_v25 = vpop.f32.mrb[149].mxu1  ;;  %v9375_v21 = vpop.f32.mrb[182].mxu0  ;;  %v11240_v32 = vld [vmem:[%s11700_s23] sm:$0xff]  }
 0xc59   : > { %v9456_v8 = vadd.f32 %v9455_v25, %v9454_v49  ;;  %v9457_v40 = vpop.f32.mrb[150].mxu1  ;;  %v9376_v24 = vpop.f32.mrb[183].mxu0 }
 0xc5a   : > { %v15038_v14 = vadd.f32 %v9376_v24, %v9375_v21  ;;  %v9458_v1 = vpop.f32.mrb[151].mxu1 }
 0xc5b   : > { %v15042_v62 = vadd.f32 %v9456_v8, %v6314_v20  ;;  %v9459_v45 = vadd.f32 %v9458_v1, %v9457_v40 }
 0xc5c   : > { %10159 = vmatmul.mubr.bf16.gmra.mrb[128].mxu1 %v7215_v10 }
 0xc5d   : > { %v15044_v42 = vadd.f32 %v9459_v45, %v6317_v48  ;;  %10162 = vmatprep.mubr.bf16.mxu1 %v7218_v28  ;;  %v11241_v28 = vld [vmem:[%s11700_s23 + $0x8] sm:$0xff]  }
 0xc5e   : > { %v9378_v39 = vpop.f32.mrb[184].mxu0 }
 0xc5f   : > { %v9460_v29 = vpop.f32.mrb[152].mxu1  ;;  %v9379_v57 = vpop.f32.mrb[185].mxu0 }
 0xc60   : > { %v15046_v56 = vadd.f32 %v9379_v57, %v9378_v39  ;;  %v9461_v3 = vpop.f32.mrb[153].mxu1  ;;  %v9381_v31 = vpop.f32.mrb[186].mxu0 }
 0xc61   : > { %v9462_v6 = vadd.f32 %v9461_v3, %v9460_v29  ;;  %v9463_v18 = vpop.f32.mrb[154].mxu1  ;;  %v9382_v55 = vpop.f32.mrb[187].mxu0  ;;  %v11242_v3 = vld [vmem:[%s11700_s23 + $0x10] sm:$0xff]  }
 0xc62   : > { %v15050_v34 = vadd.f32 %v9382_v55, %v9381_v31  ;;  %v9464_v61 = vpop.f32.mrb[155].mxu1 }
 0xc63   : > { %v15054_v12 = vadd.f32 %v9462_v6, %v6322_v15  ;;  %v9465_v26 = vadd.f32 %v9464_v61, %v9463_v18  ;;  %v6341_v15 = vadd.f32 %v14985_v59, %v15008_v46 }
 0xc64   : > { %10163 = vmatmul.mubr.bf16.gmra.mrb[132].mxu1 %v7221_v4 }
 0xc65   : > { %v15056_v2 = vadd.f32 %v9465_v26, %v6325_v43  ;;  %10166 = vmatprep.mubr.bf16.mxu1 %v14862_v35  ;;  %v6333_v35 = vadd.f32 %v14978_v53, %v15008_v46  ;;  %v6338_v53 = vadd.f32 %v14983_v17, %v15008_v46 }
 0xc66   : > { %v9384_v30 = vpop.f32.mrb[188].mxu0 }
 0xc67   : > { %v9466_v11 = vpop.f32.mrb[156].mxu1  ;;  %v9385_v51 = vpop.f32.mrb[189].mxu0 }
 0xc68   : > { %v15059_v7 = vadd.f32 %v9385_v51, %v9384_v30  ;;  %v9467_v37 = vpop.f32.mrb[157].mxu1  ;;  %v9387_v9 = vpop.f32.mrb[190].mxu0  ;;  %v6346_v51 = vadd.f32 %v14989_v41, %v15008_v46 }
 0xc69   : > { %v9468_v50 = vadd.f32 %v9467_v37, %v9466_v11  ;;  %v9469_v63 = vpop.f32.mrb[158].mxu1  ;;  %v9388_v49 = vpop.f32.mrb[191].mxu0  ;;  %v11243_v11 = vld [vmem:[%s11700_s23 + $0x18] sm:$0xff]  }
 0xc6a   : > { %v15064_v25 = vadd.f32 %v9388_v49, %v9387_v9  ;;  %v9470_v21 = vpop.f32.mrb[159].mxu1  ;;  %v6349_v49 = vadd.f32 %v14991_v58, %v15008_v46 }
 0xc6b   : > { %v15068_v20 = vadd.f32 %v9468_v50, %v6330_v16  ;;  %v9471_v8 = vadd.f32 %v9470_v21, %v9469_v63  ;;  %v11244_v16 = vld [vmem:[%s11700_s23 + $0x20] sm:$0xff]  }
 0xc6c   : > { %10167 = vmatmul.mubr.bf16.gmra.mrb[136].mxu1 %v14972_v5 }
 0xc6d   : > { %v15071_v40 = vadd.f32 %v9471_v8, %v6333_v35  ;;  %10186 = vmatprep.mubr.bf16.mxu1 %v11240_v32 }
 0xc6e   : > { %v9390_v27 = vpop.f32.mrb[192].mxu0 }
 0xc6f   : > { %v9472_v24 = vpop.f32.mrb[160].mxu1  ;;  %v9391_v1 = vpop.f32.mrb[193].mxu0 }
 0xc70   : > { %v15073_v48 = vadd.f32 %v9391_v1, %v9390_v27  ;;  %v9473_v45 = vpop.f32.mrb[161].mxu1  ;;  %v9393_v10 = vpop.f32.mrb[194].mxu0 }
 0xc71   : > { %v9474_v39 = vadd.f32 %v9473_v45, %v9472_v24  ;;  %v9475_v29 = vpop.f32.mrb[162].mxu1  ;;  %v9394_v57 = vpop.f32.mrb[195].mxu0 }
 0xc72   : > { %v15079_v5 = vadd.f32 %v9394_v57, %v9393_v10  ;;  %v9476_v31 = vpop.f32.mrb[163].mxu1  ;;  %v11245_v10 = vld [vmem:[%s11700_s23 + $0x28] sm:$0xff]  }
 0xc73   : > { %v15083_v6 = vadd.f32 %v9474_v39, %v6338_v53  ;;  %v9477_v18 = vadd.f32 %v9476_v31, %v9475_v29  ;;  %v11246_v29 = vld [vmem:[%s11700_s23 + $0x30] sm:$0xff]  }
 0xc74   : > { %10187 = vmatmul.mubr.bf16.vlgmr.msra.gmra.mrb[108].mxu1 %v11241_v28  ;;  %v6354_v28 = vadd.f32 %v14995_v22, %v15008_v46 }
 0xc75   : > { %v15085_v55 = vadd.f32 %v9477_v18, %v6341_v15  ;;  %10190 = vmatprep.mubr.bf16.mxu1 %v11242_v3  ;;  %v6357_v15 = vadd.f32 %v14997_v47, %v15008_v46  ;;  %v6362_v47 = vadd.f32 %v15001_v44, %v15008_v46 }
 0xc76   : > { %v9396_v17 = vpop.f32.mrb[196].mxu0 }
 0xc77   : > { %v9478_v61 = vpop.f32.mrb[164].mxu1  ;;  %v9397_v43 = vpop.f32.mrb[197].mxu0 }
 0xc78   : > { %v15087_v26 = vadd.f32 %v9397_v43, %v9396_v17  ;;  %v9479_v4 = vpop.f32.mrb[165].mxu1  ;;  %v9399_v30 = vpop.f32.mrb[198].mxu0 }
 0xc79   : > { %v9480_v59 = vadd.f32 %v9479_v4, %v9478_v61  ;;  %v9481_v37 = vpop.f32.mrb[166].mxu1  ;;  %v9400_v9 = vpop.f32.mrb[199].mxu0 }
 0xc7a   : > { %v15093_v50 = vadd.f32 %v9400_v9, %v9399_v30  ;;  %v9482_v63 = vpop.f32.mrb[167].mxu1 }
 0xc7b   : > { %v15097_v32 = vadd.f32 %v9480_v59, %v6346_v51  ;;  %v9483_v21 = vadd.f32 %v9482_v63, %v9481_v37  ;;  %v11247_v59 = vld [vmem:[%s11700_s23 + $0x38] sm:$0xff]   ;;  %v11248_v63 = vld [vmem:[%s11700_s23 + $0x40] sm:$0xff]  }
 0xc7c   : > { %10191 = vmatmul.mubr.bf16.gmra.mrb[112].mxu1 %v11243_v11 }
 0xc7d   : > { %v15099_v35 = vadd.f32 %v9483_v21, %v6349_v49  ;;  %10194 = vmatprep.mubr.bf16.mxu1 %v11244_v16 }
 0xc7e   : > { %v9578_v41 = vpop.f32.mrb[200].mxu0 }
 0xc7f   : > { %v9484_v8 = vpop.f32.mrb[168].mxu1  ;;  %v9579_v27 = vpop.f32.mrb[201].mxu0 }
 0xc80   : > { %v9485_v24 = vpop.f32.mrb[169].mxu1  ;;  %v9580_v1 = vadd.f32 %v9579_v27, %v9578_v41  ;;  %v9581_v45 = vpop.f32.mrb[202].mxu0  ;;  %v6365_v41 = vadd.f32 %v15003_v13, %v15008_v46  ;;  %v6370_v13 = vadd.f32 %v15012_v52, %v15008_v46 }
 0xc81   : > { %v9486_v53 = vadd.f32 %v9485_v24, %v9484_v8  ;;  %v9487_v58 = vpop.f32.mrb[170].mxu1  ;;  %v9582_v39 = vpop.f32.mrb[203].mxu0 }
 0xc82   : > { %v9488_v57 = vpop.f32.mrb[171].mxu1  ;;  %v9583_v3 = vadd.f32 %v9582_v39, %v9581_v45  ;;  %v15106_v31 = vadd.f32 %v15018_v60, %v9580_v1 }
 0xc83   : > { %v15110_v18 = vadd.f32 %v9486_v53, %v6354_v28  ;;  %v9489_v17 = vadd.f32 %v9488_v57, %v9487_v58  ;;  %v11249_v58 = vld [vmem:[%s11700_s23 + $0x48] sm:$0xff]  }
 0xc84   : > { %v15113_v61 = vadd.f32 %v15020_v0, %v9583_v3  ;;  %10195 = vmatmul.mubr.bf16.gmra.mrb[116].mxu1 %v11245_v10  ;;  %v11250_v3 = vld [vmem:[%s11700_s23 + $0x50] sm:$0xff]  }
 0xc85   : > { %v15115_v22 = vadd.f32 %v9489_v17, %v6357_v15  ;;  %10198 = vmatprep.mubr.bf16.mxu1 %v11246_v29 }
 0xc86   : > { %v9584_v43 = vpop.f32.mrb[204].mxu0 }
 0xc87   : > { %v9490_v4 = vpop.f32.mrb[172].mxu1  ;;  %v9585_v30 = vpop.f32.mrb[205].mxu0 }
 0xc88   : > { %v9491_v11 = vpop.f32.mrb[173].mxu1  ;;  %v9586_v60 = vadd.f32 %v9585_v30, %v9584_v43  ;;  %v9587_v51 = vpop.f32.mrb[206].mxu0  ;;  %v6373_v43 = vadd.f32 %v15016_v36, %v15008_v46  ;;  %v6378_v36 = vadd.f32 %v15022_v23, %v15008_v46 }
 0xc89   : > { %v9492_v37 = vadd.f32 %v9491_v11, %v9490_v4  ;;  %v9493_v9 = vpop.f32.mrb[174].mxu1  ;;  %v9588_v16 = vpop.f32.mrb[207].mxu0 }
 0xc8a   : > { %v9494_v0 = vpop.f32.mrb[175].mxu1  ;;  %v9589_v49 = vadd.f32 %v9588_v16, %v9587_v51  ;;  %v15122_v21 = vadd.f32 %v15030_v33, %v9586_v60 }
 0xc8b   : > { %v15126_v8 = vadd.f32 %v9492_v37, %v6362_v47  ;;  %v9495_v27 = vadd.f32 %v9494_v0, %v9493_v9  ;;  %v11251_v9 = vld [vmem:[%s11700_s23 + $0x58] sm:$0xff]  }
 0xc8c   : > { %v15129_v24 = vadd.f32 %v15032_v54, %v9589_v49  ;;  %10199 = vmatmul.mubr.bf16.gmra.mrb[120].mxu1 %v11247_v59  ;;  %v11252_v49 = vld [vmem:[%s11700_s23 + $0x60] sm:$0xff]  }
 0xc8d   : > { %v15131_v44 = vadd.f32 %v9495_v27, %v6365_v41  ;;  %10202 = vmatprep.mubr.bf16.mxu1 %v11248_v63 }
 0xc8e   : > { %v9590_v1 = vpop.f32.mrb[208].mxu0 }
 0xc8f   : > { %v9496_v45 = vpop.f32.mrb[176].mxu1  ;;  %v9591_v10 = vpop.f32.mrb[209].mxu0 }
 0xc90   : > { %v9497_v28 = vpop.f32.mrb[177].mxu1  ;;  %v9592_v33 = vadd.f32 %v9591_v10, %v9590_v1  ;;  %v9593_v53 = vpop.f32.mrb[210].mxu0  ;;  %v6381_v1 = vadd.f32 %v15026_v38, %v15008_v46  ;;  %v6386_v38 = vadd.f32 %v15034_v19, %v15008_v46 }
 0xc91   : > { %v9498_v39 = vadd.f32 %v9497_v28, %v9496_v45  ;;  %v9499_v29 = vpop.f32.mrb[178].mxu1  ;;  %v9594_v57 = vpop.f32.mrb[211].mxu0 }
 0xc92   : > { %v15138_v54 = vadd.f32 %v15042_v62, %v9592_v33  ;;  %v9500_v15 = vpop.f32.mrb[179].mxu1  ;;  %v9595_v17 = vadd.f32 %v9594_v57, %v9593_v53 }
 0xc93   : > { %v15142_v4 = vadd.f32 %v9498_v39, %v6370_v13  ;;  %v9501_v30 = vadd.f32 %v9500_v15, %v9499_v29  ;;  %v11253_v29 = vld [vmem:[%s11700_s23 + $0x68] sm:$0xff]  }
 0xc94   : > { %v15145_v11 = vadd.f32 %v15044_v42, %v9595_v17  ;;  %10203 = vmatmul.mubr.bf16.gmra.mrb[124].mxu1 %v11249_v58  ;;  %v11254_v17 = vld [vmem:[%s11700_s23 + $0x70] sm:$0xff]  }
 0xc95   : > { %v15147_v52 = vadd.f32 %v9501_v30, %v6373_v43  ;;  %10206 = vmatprep.mubr.bf16.mxu1 %v11250_v3 }
 0xc96   : > { %v9596_v60 = vpop.f32.mrb[212].mxu0 }
 0xc97   : > { %v9502_v62 = vpop.f32.mrb[180].mxu1  ;;  %v9597_v51 = vpop.f32.mrb[213].mxu0 }
 0xc98   : > { %v9503_v59 = vpop.f32.mrb[181].mxu1  ;;  %v9598_v47 = vadd.f32 %v9597_v51, %v9596_v60  ;;  %v9599_v37 = vpop.f32.mrb[214].mxu0  ;;  %v6389_v60 = vadd.f32 %v15038_v14, %v15008_v46  ;;  %v6394_v14 = vadd.f32 %v15046_v56, %v15008_v46 }
 0xc99   : > { %v9504_v16 = vadd.f32 %v9503_v59, %v9502_v62  ;;  %v9505_v63 = vpop.f32.mrb[182].mxu1  ;;  %v9600_v0 = vpop.f32.mrb[215].mxu0 }
 0xc9a   : > { %v15154_v42 = vadd.f32 %v15054_v12, %v9598_v47  ;;  %v9506_v41 = vpop.f32.mrb[183].mxu1  ;;  %v9601_v27 = vadd.f32 %v9600_v0, %v9599_v37 }
 0xc9b   : > { %v15158_v45 = vadd.f32 %v9504_v16, %v6378_v36  ;;  %v9507_v10 = vadd.f32 %v9506_v41, %v9505_v63  ;;  %v11255_v63 = vld [vmem:[%s11700_s23 + $0x78] sm:$0xff]   ;;  %s15801_s23 = sld [smem:[#allocation15_spill]] }
 0xc9c   : > { %v15161_v28 = vadd.f32 %v15056_v2, %v9601_v27  ;;  %10207 = vmatmul.mubr.bf16.gmra.mrb[128].mxu1 %v11251_v9 }
 0xc9d   : > { %v15163_v23 = vadd.f32 %v9507_v10, %v6381_v1  ;;  %10210 = vmatprep.mubr.bf16.mxu1 %v11252_v49  ;;  %v6397_v10 = vadd.f32 %v15050_v34, %v15008_v46 }
 0xc9e   : > { %v9602_v33 = vpop.f32.mrb[216].mxu0 }
 0xc9f   : > { %v9508_v12 = vpop.f32.mrb[184].mxu1  ;;  %v9603_v53 = vpop.f32.mrb[217].mxu0 }
 0xca0   : > { %v9509_v58 = vpop.f32.mrb[185].mxu1  ;;  %v9604_v13 = vadd.f32 %v9603_v53, %v9602_v33  ;;  %v9605_v39 = vpop.f32.mrb[218].mxu0 }
 0xca1   : > { %v9510_v57 = vadd.f32 %v9509_v58, %v9508_v12  ;;  %v9511_v3 = vpop.f32.mrb[186].mxu1  ;;  %v9606_v15 = vpop.f32.mrb[219].mxu0  ;;  %s567_s24 = sand.u32 1, %s15801_s23  }
 0xca2   : > { %v15170_v2 = vadd.f32 %v15068_v20, %v9604_v13  ;;  %v9512_v43 = vpop.f32.mrb[187].mxu1  ;;  %v9607_v30 = vadd.f32 %v9606_v15, %v9605_v39  ;;  %s8421_s18 = sshll.u32 %s567_s24, 7  ;;  %s15375_s25 = scalar_lea.sflag [#allocation6], %s567_s24 }
 0xca3   : > { %v15174_v62 = vadd.f32 %v9510_v57, %v6386_v38  ;;  %v9513_v51 = vadd.f32 %v9512_v43, %v9511_v3  ;;  %v6402_v57 = vadd.f32 %v15059_v7, %v15008_v46  ;;  %s15290_s26 = scalar_lea.vmem [#allocation10], %s8421_s18 }
 0xca4   : > { %v15177_v59 = vadd.f32 %v15071_v40, %v9607_v30  ;;  %10211 = vmatmul.mubr.bf16.gmra.mrb[132].mxu1 %v11253_v29  ;;  %v6405_v30 = vadd.f32 %v15064_v25, %v15008_v46  ;;  %s8309_s21 = sshll.u32 %s15290_s26, 4  ;;  %s15369_s21 = int_to_ptr.vmem [resolvable:$true] %s8309_s21 }
 0xca5   : > { %v15179_v19 = vadd.f32 %v9513_v51, %v6389_v60  ;;  %10214 = vmatprep.mubr.bf16.mxu1 %v11254_v17  ;;  %s11340_s19 = scalar_lea.vmem %s15369_s21, 2048  ;;  %p11347_p13 = scmp.lt.s32.totalorder %s15369_s21, %s11345_s30 }
 0xca6   : > { %v9608_v47 = vpop.f32.mrb[220].mxu0  ;;  %p11341_p12 = scmp.ne.s32.totalorder %s15369_s21, %s11340_s19  ;;  %p11348_p1 = scmp.lt.s32.totalorder %s11346_s20, %s11340_s19 }
 0xca7   : > { %v9514_v37 = vpop.f32.mrb[188].mxu1  ;;  %v9609_v20 = vpop.f32.mrb[221].mxu0 }
 0xca8   : > { %v9515_v9 = vpop.f32.mrb[189].mxu1  ;;  %v9610_v36 = vadd.f32 %v9609_v20, %v9608_v47  ;;  %v9611_v16 = vpop.f32.mrb[222].mxu0  ;;  %p11342_p8 = pnand %p11341_p12, %p15805_p7  ;;  %p11349_p6 = por %p11348_p1, %p11347_p13 }
 0xca9   : > { %v9516_v0 = vadd.f32 %v9515_v9, %v9514_v37  ;;  %v9517_v49 = vpop.f32.mrb[190].mxu1  ;;  %v9612_v41 = vpop.f32.mrb[223].mxu0 }
 0xcaa   : > { %v15185_v40 = vadd.f32 %v15083_v6, %v9610_v36  ;;  %v9518_v27 = vpop.f32.mrb[191].mxu1  ;;  %v9613_v1 = vadd.f32 %v9612_v41, %v9611_v16  ;;  %p11343_p11 = pneg %p11342_p8 }
 0xcab   : > { %v15189_v33 = vadd.f32 %v9516_v0, %v6394_v14  ;;  %v9519_v12 = vadd.f32 %v9518_v27, %v9517_v49  ;;  %v6413_v27 = vadd.f32 %v15079_v5, %v15008_v46 }
 0xcac   : > { %v15192_v53 = vadd.f32 %v15085_v55, %v9613_v1  ;;  %10215 = vmatmul.mubr.bf16.gmra.mrb[136].mxu1 %v11255_v63  ;;  %v6410_v63 = vadd.f32 %v15073_v48, %v15008_v46  ;;  %p11350_p9 = pnand %p11349_p6, %p11343_p11 }
 0xcad   : > { %v15194_v58 = vadd.f32 %v9519_v12, %v6397_v10 }
 0xcae   : > { %v9614_v56 = vpop.f32.mrb[224].mxu0 }
 0xcaf   : > { %v9520_v13 = vpop.f32.mrb[192].mxu1  ;;  %v9615_v39 = vpop.f32.mrb[225].mxu0 }
 0xcb0   : > { %v9521_v29 = vpop.f32.mrb[193].mxu1  ;;  %v9616_v6 = vadd.f32 %v9615_v39, %v9614_v56  ;;  %v9617_v38 = vpop.f32.mrb[226].mxu0 }
 0xcb1   : > { %v9522_v3 = vadd.f32 %v9521_v29, %v9520_v13  ;;  %v9523_v34 = vpop.f32.mrb[194].mxu1  ;;  %v9618_v15 = vpop.f32.mrb[227].mxu0 }
 0xcb2   : > { %v15199_v17 = vadd.f32 %v15097_v32, %v9616_v6  ;;  %v9524_v55 = vpop.f32.mrb[195].mxu1  ;;  %v9619_v43 = vadd.f32 %v9618_v15, %v9617_v38  ;;  %v6418_v38 = vadd.f32 %v15087_v26, %v15008_v46 }
 0xcb3   : > { %v15203_v60 = vadd.f32 %v9522_v3, %v6402_v57  ;;  %v9525_v51 = vadd.f32 %v9524_v55, %v9523_v34  ;;  %v6421_v55 = vadd.f32 %v15093_v50, %v15008_v46 }
 0xcb4   : > { %v15206_v47 = vadd.f32 %v15099_v35, %v9619_v43 }
 0xcb5   : > { %v15208_v37 = vadd.f32 %v9525_v51, %v6405_v30 }
 0xcb6   : > { %v9620_v7 = vpop.f32.mrb[228].mxu0 }
 0xcb7   : > { %v9526_v20 = vpop.f32.mrb[196].mxu1  ;;  %v9621_v9 = vpop.f32.mrb[229].mxu0 }
 0xcb8   : > { %v9527_v36 = vpop.f32.mrb[197].mxu1  ;;  %v9622_v16 = vadd.f32 %v9621_v9, %v9620_v7  ;;  %v9623_v32 = vpop.f32.mrb[230].mxu0 }
 0xcb9   : > { %v9528_v14 = vadd.f32 %v9527_v36, %v9526_v20  ;;  %v9529_v0 = vpop.f32.mrb[198].mxu1  ;;  %v9624_v25 = vpop.f32.mrb[231].mxu0 }
 0xcba   : > { %v15213_v49 = vadd.f32 %v15110_v18, %v9622_v16  ;;  %v9530_v41 = vpop.f32.mrb[199].mxu1  ;;  %v9625_v35 = vadd.f32 %v9624_v25, %v9623_v32 }
 0xcbb   : > { %v15217_v1 = vadd.f32 %v9528_v14, %v6410_v63  ;;  %v9531_v10 = vadd.f32 %v9530_v41, %v9529_v0 }
 0xcbc   : > { %v15220_v12 = vadd.f32 %v15115_v22, %v9625_v35 }
 0xcbd   : > { %v15222_v56 = vadd.f32 %v9531_v10, %v6413_v27 }
 0xcbe   : > { %v9626_v48 = vpop.f32.mrb[232].mxu0 }
 0xcbf   : > { %v9532_v13 = vpop.f32.mrb[200].mxu1  ;;  %v9627_v39 = vpop.f32.mrb[233].mxu0 }
 0xcc0   : > { %v9533_v29 = vpop.f32.mrb[201].mxu1  ;;  %v9628_v6 = vadd.f32 %v9627_v39, %v9626_v48  ;;  %v9629_v18 = vpop.f32.mrb[234].mxu0 }
 0xcc1   : > { %v9534_v57 = vadd.f32 %v9533_v29, %v9532_v13  ;;  %v9535_v3 = vpop.f32.mrb[202].mxu1  ;;  %v9630_v5 = vpop.f32.mrb[235].mxu0 }
 0xcc2   : > { %v15227_v34 = vadd.f32 %v15126_v8, %v9628_v6  ;;  %v9536_v15 = vpop.f32.mrb[203].mxu1  ;;  %v9631_v22 = vadd.f32 %v9630_v5, %v9629_v18 }
 0xcc3   : > { %v10538_v43 = vadd.f32 %v9534_v57, %v6418_v38  ;;  %v9537_v30 = vadd.f32 %v9536_v15, %v9535_v3 }
 0xcc4   : > { %v15232_v51 = vadd.f32 %v15131_v44, %v9631_v22 }
 0xcc5   : > { %v10546_v7 = vadd.f32 %v9537_v30, %v6421_v55 }
 0xcc6   : > { %v9632_v20 = vpop.f32.mrb[236].mxu0 }
 0xcc7   : > { %v9633_v9 = vpop.f32.mrb[237].mxu0 }
 0xcc8   : > { %v9634_v26 = vadd.f32 %v9633_v9, %v9632_v20  ;;  %v9635_v36 = vpop.f32.mrb[238].mxu0 }
 0xcc9   : > { %v9636_v16 = vpop.f32.mrb[239].mxu0 }
 0xcca   : > { %v15235_v32 = vadd.f32 %v15142_v4, %v9634_v26  ;;  %v9637_v8 = vadd.f32 %v9636_v16, %v9635_v36 }
 0xccc   : > { %v15238_v63 = vadd.f32 %v15147_v52, %v9637_v8 }
 0xcce   : > { %v9638_v14 = vpop.f32.mrb[240].mxu0 }
 0xccf   : > { %v9639_v46 = vpop.f32.mrb[241].mxu0 }
 0xcd0   : > { %v9640_v50 = vadd.f32 %v9639_v46, %v9638_v14  ;;  %v9641_v0 = vpop.f32.mrb[242].mxu0 }
 0xcd1   : > { %v9642_v25 = vpop.f32.mrb[243].mxu0 }
 0xcd2   : > { %v15241_v44 = vadd.f32 %v15158_v45, %v9640_v50  ;;  %v9643_v41 = vadd.f32 %v9642_v25, %v9641_v0 }
 0xcd4   : > { %v15244_v35 = vadd.f32 %v15163_v23, %v9643_v41 }
 0xcd6   : > { %v9644_v27 = vpop.f32.mrb[244].mxu0 }
 0xcd7   : > { %v9645_v10 = vpop.f32.mrb[245].mxu0 }
 0xcd8   : > { %v9646_v4 = vadd.f32 %v9645_v10, %v9644_v27  ;;  %v9647_v48 = vpop.f32.mrb[246].mxu0 }
 0xcd9   : > { %v9648_v13 = vpop.f32.mrb[247].mxu0 }
 0xcda   : > { %v15247_v52 = vadd.f32 %v15174_v62, %v9646_v4  ;;  %v9649_v39 = vadd.f32 %v9648_v13, %v9647_v48 }
 0xcdc   : > { %v15250_v29 = vadd.f32 %v15179_v19, %v9649_v39 }
 0xcde   : > { %v9650_v6 = vpop.f32.mrb[248].mxu0 }
 0xcdf   : > { %v9651_v18 = vpop.f32.mrb[249].mxu0 }
 0xce0   : > { %v9652_v45 = vadd.f32 %v9651_v18, %v9650_v6  ;;  %v9653_v38 = vpop.f32.mrb[250].mxu0 }
 0xce1   : > { %v9654_v57 = vpop.f32.mrb[251].mxu0 }
 0xce2   : > { %v15253_v23 = vadd.f32 %v15189_v33, %v9652_v45  ;;  %v9655_v3 = vadd.f32 %v9654_v57, %v9653_v38 }
 0xce4   : > { %v15256_v5 = vadd.f32 %v15194_v58, %v9655_v3 }
 0xce6   : > { %v9656_v15 = vpop.f32.mrb[252].mxu0 }
 0xce7   : > { %v9657_v22 = vpop.f32.mrb[253].mxu0 }
 0xce8   : > { %v9658_v62 = vadd.f32 %v9657_v22, %v9656_v15  ;;  %v9659_v55 = vpop.f32.mrb[254].mxu0 }
 0xce9   : > { %v9660_v30 = vpop.f32.mrb[255].mxu0 }
 0xcea   : > { %v15259_v19 = vadd.f32 %v15203_v60, %v9658_v62  ;;  %v9661_v20 = vadd.f32 %v9660_v30, %v9659_v55 }
 0xcec   : > { %v15262_v9 = vadd.f32 %v15208_v37, %v9661_v20 }
 0xcee   : > { %v9662_v26 = vpop.f32.mrb[0].mxu0 }
 0xcef   : > { %v9663_v33 = vpop.f32.mrb[1].mxu0 }
 0xcf0   : > { %v9664_v36 = vadd.f32 %v9663_v33, %v9662_v26  ;;  %v9665_v16 = vpop.f32.mrb[2].mxu0 }
 0xcf1   : > { %v9666_v8 = vpop.f32.mrb[3].mxu0 }
 0xcf2   : > { %v15265_v58 = vadd.f32 %v15217_v1, %v9664_v36  ;;  %v9667_v14 = vadd.f32 %v9666_v8, %v9665_v16  ;;  %v15278_v1 = vld [vmem:[%s15802_s13] ss:$0 sm:$0xff] }
 0xcf3   : > { %v10436_v13 = vadd.f32 %v15129_v24, %v15278_v1  ;;  %v10448_v24 = vadd.f32 %v15138_v54, %v15278_v1  ;;  %v10452_v62 = vadd.f32 %v15161_v28, %v15278_v1  ;;  %v10456_v20 = vadd.f32 %v15145_v11, %v15278_v1 }
 0xcf4   : > { %v15268_v46 = vadd.f32 %v15222_v56, %v9667_v14  ;;  %v10460_v54 = vadd.f32 %v15185_v40, %v15278_v1  ;;  %v10464_v28 = vadd.f32 %v15170_v2, %v15278_v1  ;;  %v10468_v11 = vadd.f32 %v15192_v53, %v15278_v1 }
 0xcf5   : > { %v10476_v2 = vadd.f32 %v15213_v49, %v15278_v1  ;;  %v10480_v53 = vadd.f32 %v15199_v17, %v15278_v1  ;;  %v10492_v17 = vadd.f32 %v15235_v32, %v15278_v1 }
 0xcf6   : > { %v9668_v60 = vpop.f32.mrb[4].mxu0 }
 0xcf7   : > { %v9669_v50 = vpop.f32.mrb[5].mxu0 }
 0xcf8   : > { %v9670_v0 = vadd.f32 %v9669_v50, %v9668_v60  ;;  %v9671_v25 = vpop.f32.mrb[6].mxu0 }
 0xcf9   : > { %v9672_v37 = vpop.f32.mrb[7].mxu0 }
 0xcfa   : > { %v15270_v41 = vadd.f32 %v10538_v43, %v9670_v0  ;;  %v9673_v27 = vadd.f32 %v9672_v37, %v9671_v25  ;;  %v10472_v25 = vadd.f32 %v15177_v59, %v15278_v1  ;;  %v10484_v59 = vadd.f32 %v15220_v12, %v15278_v1 }
 0xcfb   : > { %v10496_v12 = vadd.f32 %v15227_v34, %v15278_v1  ;;  %v10508_v34 = vadd.f32 %v15247_v52, %v15278_v1 }
 0xcfc   : > { %v15272_v10 = vadd.f32 %v10546_v7, %v9673_v27  ;;  %v10440_v7 = vadd.f32 %v15113_v61, %v15278_v1 }
 0xd47   : > { %v10188_v4 = vpop.f32.mrb[108].mxu1 }
 0xd48   : > { %v10428_v56 = vadd.f32 %v15122_v21, %v10188_v4  ;;  %v7976_v48 = vpop.f32.mrb[109].mxu1 }
 0xd49   : > { %v10432_v43 = vadd.f32 %v15106_v31, %v7976_v48  ;;  %v10189_v39 = vpop.f32.mrb[110].mxu1  ;;  %v10444_v31 = vadd.f32 %v15154_v42, %v15278_v1 }
 0xd4a   : > { %v10429_v6 = vadd.f32 %v10428_v56, %v15278_v1  ;;  %v10437_v18 = vadd.f32 %v10436_v13, %v10189_v39  ;;  %v7979_v45 = vpop.f32.mrb[111].mxu1 }
 0xd4b   : > { %v10433_v38 = vadd.f32 %v10432_v43, %v15278_v1  ;;  %v10441_v57 = vadd.f32 %v10440_v7, %v7979_v45 }
 0xd4c   : > { %v8719_v21 = vpack.c.bf16 %v10437_v18, %v10429_v6  ;;  %v10488_v6 = vadd.f32 %v15206_v47, %v15278_v1  ;;  %v10500_v47 = vadd.f32 %v15238_v63, %v15278_v1  ;;  %v10512_v63 = vadd.f32 %v15241_v44, %v15278_v1 }
 0xd4d   : > { %v8714_v3 = vpack.c.bf16 %v10441_v57, %v10433_v38  ;;  %v10524_v44 = vadd.f32 %v15259_v19, %v15278_v1 }
 0xd4e   : > { %8791 = vst [vmem:[%s15290_s26 + $0x8] sm:$0xff] %v8719_v21  }
 0xd4f   : > { %8715 = vst [vmem:[%s15290_s26] sm:$0xff] %v8714_v3   ;;  %v10192_v61 = vpop.f32.mrb[112].mxu1 }
 0xd50   : > { %v10445_v15 = vadd.f32 %v10444_v31, %v10192_v61  ;;  %v7992_v22 = vpop.f32.mrb[113].mxu1 }
 0xd51   : > { %v10449_v55 = vadd.f32 %v10448_v24, %v7992_v22  ;;  %v10193_v30 = vpop.f32.mrb[114].mxu1 }
 0xd52   : > { %v10453_v26 = vadd.f32 %v10452_v62, %v10193_v30  ;;  %v7995_v33 = vpop.f32.mrb[115].mxu1 }
 0xd53   : > { %v10457_v36 = vadd.f32 %v10456_v20, %v7995_v33 }
 0xd54   : > { %v8729_v42 = vpack.c.bf16 %v10453_v26, %v10445_v15  ;;  %v10504_v15 = vadd.f32 %v15232_v51, %v15278_v1  ;;  %v10516_v51 = vadd.f32 %v15250_v29, %v15278_v1  ;;  %v10528_v29 = vadd.f32 %v15253_v23, %v15278_v1 }
 0xd55   : > { %v8724_v16 = vpack.c.bf16 %v10457_v36, %v10449_v55  ;;  %v10540_v23 = vadd.f32 %v15270_v41, %v15278_v1 }
 0xd56   : > { %8793 = vst [vmem:[%s15290_s26 + $0x18] sm:$0xff] %v8729_v42  }
 0xd57   : > { %8792 = vst [vmem:[%s15290_s26 + $0x10] sm:$0xff] %v8724_v16   ;;  %v10196_v8 = vpop.f32.mrb[116].mxu1  ;;  %v10520_v16 = vadd.f32 %v15244_v35, %v15278_v1  ;;  %v10532_v35 = vadd.f32 %v15262_v9, %v15278_v1  ;;  %v10544_v9 = vadd.f32 %v15265_v58, %v15278_v1 }
 0xd58   : > { %v10461_v14 = vadd.f32 %v10460_v54, %v10196_v8  ;;  %v8008_v60 = vpop.f32.mrb[117].mxu1 }
 0xd59   : > { %v10465_v50 = vadd.f32 %v10464_v28, %v8008_v60  ;;  %v10197_v0 = vpop.f32.mrb[118].mxu1 }
 0xd5a   : > { %v10469_v37 = vadd.f32 %v10468_v11, %v10197_v0  ;;  %v8011_v27 = vpop.f32.mrb[119].mxu1 }
 0xd5b   : > { %v10473_v4 = vadd.f32 %v10472_v25, %v8011_v27 }
 0xd5c   : > { %v8739_v40 = vpack.c.bf16 %v10469_v37, %v10461_v14  ;;  %v10536_v37 = vadd.f32 %v15256_v5, %v15278_v1 }
 0xd5d   : > { %v8734_v56 = vpack.c.bf16 %v10473_v4, %v10465_v50 }
 0xd5e   : > { %8795 = vst [vmem:[%s15290_s26 + $0x28] sm:$0xff] %v8739_v40  }
 0xd5f   : > { %8794 = vst [vmem:[%s15290_s26 + $0x20] sm:$0xff] %v8734_v56   ;;  %v10200_v48 = vpop.f32.mrb[120].mxu1 }
 0xd60   : > { %v10477_v13 = vadd.f32 %v10476_v2, %v10200_v48  ;;  %v8024_v43 = vpop.f32.mrb[121].mxu1 }
 0xd61   : > { %v10481_v39 = vadd.f32 %v10480_v53, %v8024_v43  ;;  %v10201_v7 = vpop.f32.mrb[122].mxu1  ;;  %v10548_v53 = vadd.f32 %v15272_v10, %v15278_v1 }
 0xd62   : > { %v10485_v18 = vadd.f32 %v10484_v59, %v10201_v7  ;;  %v8027_v45 = vpop.f32.mrb[123].mxu1  ;;  %v10552_v59 = vadd.f32 %v15268_v46, %v15278_v1 }
 0xd63   : > { %v10489_v38 = vadd.f32 %v10488_v6, %v8027_v45 }
 0xd64   : > { %v8749_v49 = vpack.c.bf16 %v10485_v18, %v10477_v13 }
 0xd65   : > { %v8744_v57 = vpack.c.bf16 %v10489_v38, %v10481_v39 }
 0xd66   : > { %8797 = vst [vmem:[%s15290_s26 + $0x38] sm:$0xff] %v8749_v49  }
 0xd67   : > { %8796 = vst [vmem:[%s15290_s26 + $0x30] sm:$0xff] %v8744_v57   ;;  %v10204_v21 = vpop.f32.mrb[124].mxu1 }
 0xd68   : > { %v10493_v3 = vadd.f32 %v10492_v17, %v10204_v21  ;;  %v8040_v31 = vpop.f32.mrb[125].mxu1 }
 0xd69   : > { %v10497_v61 = vadd.f32 %v10496_v12, %v8040_v31  ;;  %v10205_v24 = vpop.f32.mrb[126].mxu1 }
 0xd6a   : > { %v10501_v22 = vadd.f32 %v10500_v47, %v10205_v24  ;;  %v8043_v62 = vpop.f32.mrb[127].mxu1 }
 0xd6b   : > { %v10505_v55 = vadd.f32 %v10504_v15, %v8043_v62 }
 0xd6c   : > { %v8759_v32 = vpack.c.bf16 %v10501_v22, %v10493_v3 }
 0xd6d   : > { %v8754_v30 = vpack.c.bf16 %v10505_v55, %v10497_v61 }
 0xd6e   : > { %8799 = vst [vmem:[%s15290_s26 + $0x48] sm:$0xff] %v8759_v32  }
 0xd6f   : > { %8798 = vst [vmem:[%s15290_s26 + $0x40] sm:$0xff] %v8754_v30   ;;  %v10208_v20 = vpop.f32.mrb[128].mxu1 }
 0xd70   : > { %v10509_v26 = vadd.f32 %v10508_v34, %v10208_v20  ;;  %v8056_v33 = vpop.f32.mrb[129].mxu1 }
 0xd71   : > { %v10513_v36 = vadd.f32 %v10512_v63, %v8056_v33  ;;  %v10209_v42 = vpop.f32.mrb[130].mxu1 }
 0xd72   : > { %v10517_v54 = vadd.f32 %v10516_v51, %v10209_v42  ;;  %v8059_v8 = vpop.f32.mrb[131].mxu1 }
 0xd73   : > { %v10521_v28 = vadd.f32 %v10520_v16, %v8059_v8 }
 0xd74   : > { %v8769_v52 = vpack.c.bf16 %v10517_v54, %v10509_v26 }
 0xd75   : > { %v8764_v14 = vpack.c.bf16 %v10521_v28, %v10513_v36 }
 0xd76   : > { %8801 = vst [vmem:[%s15290_s26 + $0x58] sm:$0xff] %v8769_v52  }
 0xd77   : > { %8800 = vst [vmem:[%s15290_s26 + $0x50] sm:$0xff] %v8764_v14   ;;  %v10212_v60 = vpop.f32.mrb[132].mxu1 }
 0xd78   : > { %v10525_v11 = vadd.f32 %v10524_v44, %v10212_v60  ;;  %v8072_v50 = vpop.f32.mrb[133].mxu1 }
 0xd79   : > { %v10529_v0 = vadd.f32 %v10528_v29, %v8072_v50  ;;  %v10213_v25 = vpop.f32.mrb[134].mxu1 }
 0xd7a   : > { %v10533_v27 = vadd.f32 %v10532_v35, %v10213_v25  ;;  %v8075_v4 = vpop.f32.mrb[135].mxu1 }
 0xd7b   : > { %v10537_v19 = vadd.f32 %v10536_v37, %v8075_v4 }
 0xd7c   : > { %v8779_v40 = vpack.c.bf16 %v10533_v27, %v10525_v11 }
 0xd7d   : > { %v8774_v56 = vpack.c.bf16 %v10537_v19, %v10529_v0 }
 0xd7e   : > { %8803 = vst [vmem:[%s15290_s26 + $0x68] sm:$0xff] %v8779_v40  }
 0xd7f   : > { %8802 = vst [vmem:[%s15290_s26 + $0x60] sm:$0xff] %v8774_v56   ;;  %v10216_v2 = vpop.f32.mrb[136].mxu1 }
 0xd80   : > { %v10541_v48 = vadd.f32 %v10540_v23, %v10216_v2  ;;  %v8088_v5 = vpop.f32.mrb[137].mxu1 }
 0xd81   : > { %v10545_v13 = vadd.f32 %v10544_v9, %v8088_v5  ;;  %v10217_v43 = vpop.f32.mrb[138].mxu1 }
 0xd82   : > { %v10549_v41 = vadd.f32 %v10548_v53, %v10217_v43  ;;  %v8091_v39 = vpop.f32.mrb[139].mxu1 }
 0xd83   : > { %v10553_v7 = vadd.f32 %v10552_v59, %v8091_v39 }
 0xd84   : > { %v8789_v58 = vpack.c.bf16 %v10549_v41, %v10541_v48 }
 0xd85   : > { %v8784_v10 = vpack.c.bf16 %v10553_v7, %v10545_v13 }
 0xd86   : > { %8805 = vst [vmem:[%s15290_s26 + $0x78] sm:$0xff] %v8789_v58  }
 0xd87   : > { %8804 = vst [vmem:[%s15290_s26 + $0x70] sm:$0xff] %v8784_v10  }
 0xd88   : > { %11353 = shalt.err (!%p11350_p9)
}
 0xd89   : > { %s11354_s23 = scalar_lea.hbm %s15367_s17, 2048  ;;  %s11358_s13 = scalar_lea.hbm %s15804_s0, 4096 }
 0xd8a   : > { %p11355_p2 = scmp.ne.s32.totalorder %s15367_s17, %s11354_s23  ;;  %p11359_p5 = scmp.lt.u32.totalorder %s15367_s17, %s15804_s0 }
 0xd8b   : > { %p11360_p10 = scmp.lt.u32.totalorder %s11358_s13, %s11354_s23  ;;  %p11362_p12 = scmp.lt.u32.totalorder %s11354_s23, %s15367_s17 }
 0xd8c   : > { %p11356_p0 = pnand %p11355_p2, %p15805_p7 }
 0xd8d   : > { %p11361_p4 = por %p11360_p10, %p11359_p5 }
 0xd8e   : > { %p11357_p3 = pneg %p11356_p0 }
 0xd8f   : > { %p11363_p8 = por %p11362_p12, %p11361_p4 }
 0xd91   : > { %p11364_p11 = pnand %p11363_p8, %p11357_p3 }
 0xd93   : > { %11367 = shalt.err (!%p11364_p11)
}
 0xd94   : > { %s11423_s16 = smov 64   ;;  %s11424_s15 = smov 4  }
 0xd95   : > { %10726 = dma.vmem_to_hbm [thread:$0]  (%p15805_p7), %s15369_s21, 2048, %s15367_s17, %s15375_s25, %s11423_s16, %s11423_s16, %s11424_s15  }
 0xd96 PF: > { %s15806_s22 = sld [smem:[#allocation17_spill]]  ;;  %s15807_s19 = sld [smem:[#allocation14_spill]] }
 0xd97   : > { %s15808_s28 = sld [smem:[#allocation21_spill]] }
 0xd9c   : > { %p10748_p13 = scmp.ge.s32.totalorder %s15806_s22, 2  ;;  %s8324_s30 = sand.u32 1, %s15807_s19  }
 0xd9d   : > { %p15809_p1 = scmp.ne.s32.totalorder %s15808_s28, 0  ;;  %s8325_s20 = scalar_lea.sflag [#allocation6], %s8324_s30 }
 0xd9f   : > { %p10739_p6 = pnand %p10748_p13, %p15809_p1 }
 0xda1   : > { %11393 = dma.done.wait (!%p10739_p6), %s8325_s20, 2048  }
 0xda2   : > { %11395 = vsyncadd (!%p10739_p6), %s8325_s20, 4294965248  ;;  %s15810_s24 = sld [smem:[#allocation18_spill]]  ;;  %s15811_s21 = sld [smem:[#allocation15_spill]] }
 0xda3   : > { %s15812_s22 = sld [smem:[#allocation16_spill]]  ;;  %s15813_s23 = sld [smem:[#allocation19_spill]] }
 0xda8   : > { %p28_p9 = scmp.ge.s32.totalorder %s15810_s24, 4  }
 0xdaa   :  { %30 = sbr.rel (!%p28_p9) target bundleno = 10 (0xa), region = 139 }
 0xdb1   :  { %8330 = vsyncpa [#allocation5], 1 }
 0xdb2   :  { %8332 = vsyncpa [#allocation5 + $0x1], 1 }
 0xdb3   :  { %8333 = vsyncpa [#allocation8], 1 }
 0xdb4   :  { %8334 = vsyncpa [#allocation6], 1 }
 0xdb5   :  { %8336 = vsyncpa [#allocation6 + $0x1], 1 }

</bundles_post_ra>
